<compile_context>
chip_gen: v6e
topology: v6e:2x2x1
jax: 0.10.0
libtpu: 0.0.40
codegen_flags: <defaults>
</compile_context>

<pallas_src>
import jax
import jax.numpy as jnp
from jax import lax
from jax.experimental import pallas as pl
from jax.experimental.pallas import tpu as pltpu

SAMPLING_RATE = 250
INCEPTION_WINDOWS = [0.5, 0.25, 0.125, 0.0625]
KS = [int(INCEPTION_WINDOWS[0] * SAMPLING_RATE),
      int(INCEPTION_WINDOWS[1] * SAMPLING_RATE - 1),
      int(INCEPTION_WINDOWS[2] * SAMPLING_RATE),
      int(INCEPTION_WINDOWS[3] * SAMPLING_RATE)]          # [125, 61, 31, 15]
PS = [int(INCEPTION_WINDOWS[0] * SAMPLING_RATE / 2),
      int(INCEPTION_WINDOWS[1] * SAMPLING_RATE / 2 - 1),
      int(INCEPTION_WINDOWS[2] * SAMPLING_RATE / 2),
      int(INCEPTION_WINDOWS[3] * SAMPLING_RATE / 2)]      # [62, 30, 15, 7]
STRIDE_FACTOR = 4
N_BANDS = 9                 # input channels of the Tception branches
N_MID = 36                  # channels after concatenating the 4 branches
N_SPAT = 288                # output channels of the SCB grouped conv
DIL = N_SPAT // N_MID       # 8 spatial filters per group
FEAT = N_SPAT * STRIDE_FACTOR
BN_EPS = 1e-5

CP = 16                     # temporal conv in-channels padded 9 -> 16 (sublane aligned)
G = 8                       # taps packed per matmul -> contraction depth CP*G = 128
NG = 16                     # tap groups; NG*G = 128 >= 125 (union of the 4 branch windows)
KTOT = NG * G


# ---------------------------------------------------------------------------
# Fused Pallas kernel: one grid step = one (batch b, EEG channel h) pair
# ---------------------------------------------------------------------------
def fbmsnet_fused_kernel(x_ref, wt_ref, ws_ref, sshift_ref, wfc_ref, bfc_ref,
                         c_ref, f_ref, z_acc):
    """
    x_ref     : (1, 1, CP, TPAD)  bf16  zero-padded input row, time on lanes
    wt_ref    : (NG, 36, CP*G)    bf16  fused temporal weights (BN scale folded)
    ws_ref    : (1, DIL, 36, 1)   f32   SCB weights for this h (BN scale folded)
    sshift_ref: (DIL, 36, 1)      f32   fused SCB bias + BN shift (incl. temporal shift term)
    wfc_ref   : (4, DIL, 36, nC)  f32   classifier weights rearranged to [s, j, g, n]
    bfc_ref   : (1, nC)           f32
    c_ref     : (1, 1, nC)        f32   log-probabilities (written at the last h step)
    f_ref     : (1, DIL, 36, 4)   f32   log-variance features (written at the last h step)
    z_acc     : (DIL, 36, T)      f32   SCB accumulator over the h (reduction) grid axis
    """
    T = z_acc.shape[-1]
    T4 = T // STRIDE_FACTOR
    h = pl.program_id(1)

    @pl.when(h == 0)
    def _init():
        z_acc[...] = jnp.zeros_like(z_acc)

    # Fused temporal inception conv for this (b, h) row: NG matmuls with a 128-deep
    # contraction (G taps x CP channels) on the MXU, time on the lane dim.
    xh = x_ref[0, 0]                                          # (CP, TPAD) bf16
    mid = jnp.zeros((N_MID, T), jnp.float32)
    for g in range(NG):                                       # static unroll
        base = g * G
        xg = jnp.concatenate(
            [xh[:, base + kk: base + kk + T] for kk in range(G)], axis=0)  # (CP*G, T)
        mid = mid + jnp.dot(wt_ref[g], xg, preferred_element_type=jnp.float32)

    # SCB grouped conv (groups=36, 1 input channel per group) == per-h rank-1 update.
    wsh = ws_ref[0]                                           # (DIL, 36, 1)
    for j in range(DIL):                                      # static unroll
        z_acc[j] += wsh[j] * mid                              # (36,1) * (36,T)

    @pl.when(h == pl.num_programs(1) - 1)
    def _finalize():
        z = z_acc[...] + sshift_ref[...]                      # SCB bias + folded BN shift
        z = z * jax.nn.sigmoid(z)                             # swish
        denom = 1.0 / float(max(T4 - 1, 1))                   # torch.var default: unbiased
        logits = bfc_ref[0]                                   # (nC,)
        pieces = []
        for s in range(STRIDE_FACTOR):
            seg = z[:, :, s * T4:(s + 1) * T4]                # (DIL, 36, T4)
            mu = jnp.mean(seg, axis=-1, keepdims=True)
            var = jnp.sum((seg - mu) ** 2, axis=-1, keepdims=True) * denom
            lv = jnp.log(jnp.clip(var, 1e-6, 1e6))            # (DIL, 36, 1)
            pieces.append(lv)
            logits = logits + jnp.sum(jnp.sum(lv * wfc_ref[s], axis=0), axis=0)
        f_ref[0] = jnp.concatenate(pieces, axis=-1)           # (DIL, 36, 4)
        m = jnp.max(logits)
        lse = jnp.log(jnp.sum(jnp.exp(logits - m))) + m
        c_ref[0, 0] = logits - lse                            # log-softmax


# ---------------------------------------------------------------------------
# Parameter construction (raw, PyTorch-like) and folding for the kernel
# ---------------------------------------------------------------------------
def _renorm(w, maxnorm):
    """torch.renorm(w, p=2, dim=0, maxnorm) equivalent."""
    flat = w.reshape(w.shape[0], -1)
    n = jnp.sqrt(jnp.sum(flat ** 2, axis=1, keepdims=True))
    factor = jnp.where(n > maxnorm, maxnorm / n, 1.0)
    return (flat * factor).reshape(w.shape)


def init_raw_params(key, nChan, nClass):
    ks = iter(jax.random.split(key, 64))
    nrm = lambda shape, sc=0.1: sc * jax.random.normal(next(ks), shape, jnp.float32)
    p = {}
    for i, K in enumerate(KS):
        p[f"t{i}_w"] = (jax.random.normal(next(ks), (N_BANDS, N_BANDS, 1, K), jnp.float32)
                        / jnp.sqrt(float(N_BANDS * K)))
        p[f"t{i}_b"] = nrm((N_BANDS,))
        p[f"t{i}_gamma"] = 1.0 + nrm((N_BANDS,))
        p[f"t{i}_beta"] = nrm((N_BANDS,))
        p[f"t{i}_rmean"] = nrm((N_BANDS,))
        p[f"t{i}_rvar"] = 1.0 + 0.1 * jnp.abs(jax.random.normal(next(ks), (N_BANDS,), jnp.float32))
    p["scb_w"] = jax.random.normal(next(ks), (N_SPAT, 1, nChan, 1), jnp.float32) / jnp.sqrt(float(nChan))
    p["scb_b"] = nrm((N_SPAT,))
    p["scb_gamma"] = 1.0 + nrm((N_SPAT,))
    p["scb_beta"] = nrm((N_SPAT,))
    p["scb_rmean"] = nrm((N_SPAT,))
    p["scb_rvar"] = 1.0 + 0.1 * jnp.abs(jax.random.normal(next(ks), (N_SPAT,), jnp.float32))
    p["fc_w"] = jax.random.normal(next(ks), (nClass, FEAT), jnp.float32) / jnp.sqrt(float(FEAT))
    p["fc_b"] = nrm((nClass,))
    return p


def prepare_params(raw):
    """Fold eval-mode BN + conv biases + weight renorm, and lay weights out for the kernel."""
    # --- fused temporal weight bank: 4 branches share one 128-tap window ----
    w_all = jnp.zeros((KTOT, CP, N_MID), jnp.float32)         # [tap, cin(padded), cout]
    tshift = jnp.zeros((N_MID,), jnp.float32)
    for i in range(4):
        K, P = KS[i], PS[i]
        s = raw[f"t{i}_gamma"] / jnp.sqrt(raw[f"t{i}_rvar"] + BN_EPS)           # (9,)
        w_eff = jnp.transpose(raw[f"t{i}_w"][:, :, 0, :], (2, 1, 0)) * s[None, None, :]  # (K,9,9)
        off = PS[0] - P                                        # align all branches to pad=62
        w_all = w_all.at[off:off + K, :N_BANDS, 9 * i:9 * i + 9].set(w_eff)
        tshift = tshift.at[9 * i:9 * i + 9].set(
            (raw[f"t{i}_b"] - raw[f"t{i}_rmean"]) * s + raw[f"t{i}_beta"])
    # [g, o, kk*CP + c] ordering matches the concat of G shifted (CP, T) slabs in-kernel.
    wt = (w_all.reshape(NG, G, CP, N_MID).transpose(0, 3, 1, 2)
          .reshape(NG, N_MID, G * CP)).astype(jnp.bfloat16)

    # --- SCB grouped conv + BN fold --------------------------------------
    w_scb = _renorm(raw["scb_w"], 2.0)                         # (288,1,H,1)
    H = w_scb.shape[2]
    ws_raw = w_scb[:, 0, :, 0].reshape(N_MID, DIL, H)          # [g, j, h]
    s_s = raw["scb_gamma"] / jnp.sqrt(raw["scb_rvar"] + BN_EPS)    # (288,)
    s_s2d = s_s.reshape(N_MID, DIL)
    ws_eff = ws_raw * s_s2d[:, :, None]                        # BN scale folded
    ws_k = jnp.transpose(ws_eff, (2, 1, 0))[..., None]         # (H, DIL, 36, 1) [h, j, g]

    shift_total = ((raw["scb_b"] - raw["scb_rmean"]) * s_s + raw["scb_beta"]).reshape(N_MID, DIL)
    # contribution of the temporal bias/BN-shift through the (linear) SCB conv
    shift_total = shift_total + s_s2d * jnp.sum(ws_raw, axis=2) * tshift[:, None]
    sshift_k = jnp.transpose(shift_total, (1, 0))[..., None]   # (DIL, 36, 1) [j, g]

    # --- classifier (renorm 0.5) rearranged to [s, j, g, n] ----------------
    wf = _renorm(raw["fc_w"], 0.5)                             # (nClass, 1152)
    nClass = wf.shape[0]
    wfc_k = (jnp.transpose(wf).reshape(N_MID, DIL, STRIDE_FACTOR, nClass)
             .transpose(2, 1, 0, 3))                           # (4, DIL, 36, nClass)
    bfc_k = raw["fc_b"].reshape(1, nClass)

    return {"wt": wt, "ws": ws_k.astype(jnp.float32), "sshift": sshift_k.astype(jnp.float32),
            "wfc": wfc_k.astype(jnp.float32), "bfc": bfc_k.astype(jnp.float32)}


# ---------------------------------------------------------------------------
# Forward pass (layout prep + one fused pallas_call)
# ---------------------------------------------------------------------------
def fbmsnet_forward(x, p):
    """x: (B, 9, nChan, nTime) float32 (NCHW, as in PyTorch). Returns (log_probs, features)."""
    B, Cin, H, T = x.shape
    assert Cin == N_BANDS and T % STRIDE_FACTOR == 0 and T >= 2 * STRIDE_FACTOR
    nClass = p["bfc"].shape[-1]

    LPAD = PS[0]                                              # 62
    TPAD = ((T + KTOT - 1 + 127) // 128) * 128                # >= T + 127, lane aligned
    xr = jnp.transpose(x, (0, 2, 1, 3))                       # (B, H, 9, T)
    xr = jnp.pad(xr, ((0, 0), (0, 0), (0, CP - N_BANDS), (LPAD, TPAD - LPAD - T)))
    xr = xr.astype(jnp.bfloat16)                              # (B, H, CP, TPAD)

    c3, f4 = pl.pallas_call(
        fbmsnet_fused_kernel,
        grid=(B, H),
        in_specs=[
            pl.BlockSpec((1, 1, CP, TPAD), lambda b, h: (b, h, 0, 0)),
            pl.BlockSpec((NG, N_MID, G * CP), lambda b, h: (0, 0, 0)),
            pl.BlockSpec((1, DIL, N_MID, 1), lambda b, h: (h, 0, 0, 0)),
            pl.BlockSpec((DIL, N_MID, 1), lambda b, h: (0, 0, 0)),
            pl.BlockSpec((STRIDE_FACTOR, DIL, N_MID, nClass), lambda b, h: (0, 0, 0, 0)),
            pl.BlockSpec((1, nClass), lambda b, h: (0, 0)),
        ],
        out_specs=(
            pl.BlockSpec((1, 1, nClass), lambda b, h: (b, 0, 0)),
            pl.BlockSpec((1, DIL, N_MID, STRIDE_FACTOR), lambda b, h: (b, 0, 0, 0)),
        ),
        out_shape=(
            jax.ShapeDtypeStruct((B, 1, nClass), jnp.float32),
            jax.ShapeDtypeStruct((B, DIL, N_MID, STRIDE_FACTOR), jnp.float32),
        ),
        scratch_shapes=[pltpu.VMEM((DIL, N_MID, T), jnp.float32)],
        compiler_params=pltpu.CompilerParams(
            dimension_semantics=("parallel", "arbitrary")),
    )(xr, p["wt"], p["ws"], p["sshift"], p["wfc"], p["bfc"])

    c = c3[:, 0, :]                                           # (B, nClass)
    # f4[b, j, g, s] -> flatten order (g*8 + j)*4 + s == torch.flatten(out, 1)
    f = jnp.transpose(f4, (0, 2, 1, 3)).reshape(B, FEAT)
    return c, f


# ---------------------------------------------------------------------------
# Pure-JAX (XLA, f32) reference mirroring the PyTorch module in eval mode
# ---------------------------------------------------------------------------
def reference_forward(x, raw):
    def bn(y, pre):
        s = raw[f"{pre}_gamma"] / jnp.sqrt(raw[f"{pre}_rvar"] + BN_EPS)
        return ((y - raw[f"{pre}_rmean"].reshape(1, -1, 1, 1)) * s.reshape(1, -1, 1, 1)
                + raw[f"{pre}_beta"].reshape(1, -1, 1, 1))

    outs = []
    for i in range(4):
        y = lax.conv_general_dilated(
            x, raw[f"t{i}_w"], (1, 1), [(0, 0), (PS[i], PS[i])],
            dimension_numbers=("NCHW", "OIHW", "NCHW"),
            precision=lax.Precision.HIGHEST) + raw[f"t{i}_b"].reshape(1, -1, 1, 1)
        outs.append(bn(y, f"t{i}"))
    mid = jnp.concatenate(outs, axis=1)                       # (B, 36, H, T)

    z = lax.conv_general_dilated(
        mid, _renorm(raw["scb_w"], 2.0), (1, 1), [(0, 0), (0, 0)],
        dimension_numbers=("NCHW", "OIHW", "NCHW"),
        feature_group_count=N_MID,
        precision=lax.Precision.HIGHEST) + raw["scb_b"].reshape(1, -1, 1, 1)
    z = bn(z, "scb")
    z = z * jax.nn.sigmoid(z)                                 # (B, 288, 1, T)

    B, T = z.shape[0], z.shape[-1]
    z = z.reshape(B, N_SPAT, STRIDE_FACTOR, T // STRIDE_FACTOR)
    v = jnp.var(z, axis=3, keepdims=True, ddof=1)
    f = jnp.log(jnp.clip(v, 1e-6, 1e6)).reshape(B, -1)        # (B, 1152)

    wf = _renorm(raw["fc_w"], 0.5)
    logits = jnp.dot(f, wf.T, precision=lax.Precision.HIGHEST) + raw["fc_b"].reshape(1, -1)
    m = jnp.max(logits, axis=1, keepdims=True)
    lse = jnp.log(jnp.sum(jnp.exp(logits - m), axis=1, keepdims=True)) + m
    return logits - lse, f


if __name__ == "__main__":
    B, nChan, nTime, nClass = 2, 4, 32, 4
    key = jax.random.PRNGKey(0)
    kx, kp = jax.random.split(key)
    x = jax.random.normal(kx, (B, N_BANDS, nChan, nTime), jnp.float32)
    # round x to bf16 once so kernel (bf16 inputs) and f32 reference see the same data
    x = x.astype(jnp.bfloat16).astype(jnp.float32)

    raw = init_raw_params(kp, nChan, nClass)
    params = prepare_params(raw)

    fwd = jax.jit(fbmsnet_forward)
    c, f = fwd(x, params)
    jax.block_until_ready((c, f))

    assert c.shape == (B, nClass), c.shape
    assert f.shape == (B, FEAT), f.shape
    assert bool(jnp.all(jnp.isfinite(c))) and bool(jnp.all(jnp.isfinite(f)))
    # log_softmax rows must exponentiate to probability distributions
    assert bool(jnp.allclose(jnp.sum(jnp.exp(c), axis=1), 1.0, atol=1e-4))

    # numerical check against the f32 XLA reference (kernel uses bf16 weights -> loose tol)
    c_ref, f_ref = jax.jit(reference_forward)(x, raw)
    err_f = float(jnp.max(jnp.abs(f - f_ref)))
    err_c = float(jnp.max(jnp.abs(c - c_ref)))
    assert err_f < 0.35 and err_c < 0.2, (err_f, err_c)

    print("KERNEL_OK")
</pallas_src>

<mosaic_0001>
module attributes {stable_mosaic.version = 11 : i64} {
  func.func @fbmsnet_fused_kernel(%arg0: i32, %arg1: i32, %arg2: memref<1x1x16x256xbf16, #tpu.memory_space<vmem>>, %arg3: memref<16x36x128xbf16, #tpu.memory_space<vmem>>, %arg4: memref<1x8x36x1xf32, #tpu.memory_space<vmem>>, %arg5: memref<8x36x1xf32, #tpu.memory_space<vmem>>, %arg6: memref<4x8x36x4xf32, #tpu.memory_space<vmem>>, %arg7: memref<1x4xf32, #tpu.memory_space<vmem>>, %arg8: memref<1x1x4xf32, #tpu.memory_space<vmem>>, %arg9: memref<1x8x36x4xf32, #tpu.memory_space<vmem>>, %arg10: memref<8x36x32xf32, #tpu.memory_space<vmem>>) attributes {dimension_semantics = [#tpu.dimension_semantics<parallel>, #tpu.dimension_semantics<arbitrary>], iteration_bounds = array<i64: 2, 4>, scalar_prefetch = 0 : i64, scratch_operands = 1 : i64, tpu.core_type = #tpu.core_type<tc>, window_params = [{transform_indices = @transform_0, window_bounds = array<i64: 1, 1, 16, 256>}, {pipeline_mode = #tpu.pipeline_mode<synchronous>, transform_indices = @transform_1, window_bounds = array<i64: 16, 36, 128>}, {transform_indices = @transform_2, window_bounds = array<i64: 1, 8, 36, 1>}, {pipeline_mode = #tpu.pipeline_mode<synchronous>, transform_indices = @transform_3, window_bounds = array<i64: 8, 36, 1>}, {pipeline_mode = #tpu.pipeline_mode<synchronous>, transform_indices = @transform_4, window_bounds = array<i64: 4, 8, 36, 4>}, {pipeline_mode = #tpu.pipeline_mode<synchronous>, transform_indices = @transform_5, window_bounds = array<i64: 1, 4>}, {transform_indices = @transform_6, window_bounds = array<i64: 1, 1, 4>}, {transform_indices = @transform_7, window_bounds = array<i64: 1, 8, 36, 4>}]} {
    %c0_i32 = arith.constant 0 : i32
    %0 = arith.cmpi eq, %arg1, %c0_i32 : i32
    %1 = arith.extui %0 : i1 to i32
    %c0_i32_0 = arith.constant 0 : i32
    %2 = arith.cmpi ne, %1, %c0_i32_0 : i32
    scf.if %2 {
      %cst_106 = arith.constant 0.000000e+00 : f32
      %299 = vector.broadcast %cst_106 : f32 to vector<8x36x32xf32>
      %c0_107 = arith.constant 0 : index
      %c0_108 = arith.constant 0 : index
      %c0_109 = arith.constant 0 : index
      %300 = vector.load %arg10[%c0_107, %c0_108, %c0_109] : memref<8x36x32xf32, #tpu.memory_space<vmem>>, vector<8x36x32xf32>
      tpu.vector_store %arg10[%c0_107, %c0_108, %c0_109], %299 {strides = array<i32>} : memref<8x36x32xf32, #tpu.memory_space<vmem>>, vector<8x36x32xf32>,
    } else {
    }
    %c0 = arith.constant 0 : index
    %c0_1 = arith.constant 0 : index
    %c0_2 = arith.constant 0 : index
    %c0_3 = arith.constant 0 : index
    %3 = vector.load %arg2[%c0, %c0_1, %c0_2, %c0_3] : memref<1x1x16x256xbf16, #tpu.memory_space<vmem>>, vector<1x1x16x256xbf16>
    %4 = vector.shape_cast %3 : vector<1x1x16x256xbf16> to vector<16x256xbf16>
    %cst = arith.constant 0.000000e+00 : f32
    %5 = vector.broadcast %cst : f32 to vector<36x32xf32>
    %6 = vector.extract_strided_slice %4 {offsets = [0, 0], sizes = [16, 32], strides = [1, 1]} : vector<16x256xbf16> to vector<16x32xbf16>
    %7 = vector.extract_strided_slice %4 {offsets = [0, 1], sizes = [16, 32], strides = [1, 1]} : vector<16x256xbf16> to vector<16x32xbf16>
    %8 = vector.extract_strided_slice %4 {offsets = [0, 2], sizes = [16, 32], strides = [1, 1]} : vector<16x256xbf16> to vector<16x32xbf16>
    %9 = vector.extract_strided_slice %4 {offsets = [0, 3], sizes = [16, 32], strides = [1, 1]} : vector<16x256xbf16> to vector<16x32xbf16>
    %10 = vector.extract_strided_slice %4 {offsets = [0, 4], sizes = [16, 32], strides = [1, 1]} : vector<16x256xbf16> to vector<16x32xbf16>
    %11 = vector.extract_strided_slice %4 {offsets = [0, 5], sizes = [16, 32], strides = [1, 1]} : vector<16x256xbf16> to vector<16x32xbf16>
    %12 = vector.extract_strided_slice %4 {offsets = [0, 6], sizes = [16, 32], strides = [1, 1]} : vector<16x256xbf16> to vector<16x32xbf16>
    %13 = vector.extract_strided_slice %4 {offsets = [0, 7], sizes = [16, 32], strides = [1, 1]} : vector<16x256xbf16> to vector<16x32xbf16>
    %14 = tpu.concatenate %6, %7, %8, %9, %10, %11, %12, %13 in 0 : vector<16x32xbf16>, vector<16x32xbf16>, vector<16x32xbf16>, vector<16x32xbf16>, vector<16x32xbf16>, vector<16x32xbf16>, vector<16x32xbf16>, vector<16x32xbf16> -> vector<128x32xbf16>
    %c0_4 = arith.constant 0 : index
    %c0_5 = arith.constant 0 : index
    %c0_6 = arith.constant 0 : index
    %15 = vector.load %arg3[%c0_4, %c0_5, %c0_6] : memref<16x36x128xbf16, #tpu.memory_space<vmem>>, vector<1x36x128xbf16>
    %16 = vector.shape_cast %15 : vector<1x36x128xbf16> to vector<36x128xbf16>
    %cst_7 = arith.constant dense<0.000000e+00> : vector<36x32xf32>
    %17 = tpu.matmul %16, %14, %cst_7 {dimension_numbers = #tpu.dot_dimension_numbers<[1], [0], [0], [1], [0, 0, 1, 1], [], []>} : vector<36x128xbf16>, vector<128x32xbf16>, vector<36x32xf32> -> vector<36x32xf32>
    %18 = arith.addf %5, %17 : vector<36x32xf32>
    %19 = vector.extract_strided_slice %4 {offsets = [0, 8], sizes = [16, 32], strides = [1, 1]} : vector<16x256xbf16> to vector<16x32xbf16>
    %20 = vector.extract_strided_slice %4 {offsets = [0, 9], sizes = [16, 32], strides = [1, 1]} : vector<16x256xbf16> to vector<16x32xbf16>
    %21 = vector.extract_strided_slice %4 {offsets = [0, 10], sizes = [16, 32], strides = [1, 1]} : vector<16x256xbf16> to vector<16x32xbf16>
    %22 = vector.extract_strided_slice %4 {offsets = [0, 11], sizes = [16, 32], strides = [1, 1]} : vector<16x256xbf16> to vector<16x32xbf16>
    %23 = vector.extract_strided_slice %4 {offsets = [0, 12], sizes = [16, 32], strides = [1, 1]} : vector<16x256xbf16> to vector<16x32xbf16>
    %24 = vector.extract_strided_slice %4 {offsets = [0, 13], sizes = [16, 32], strides = [1, 1]} : vector<16x256xbf16> to vector<16x32xbf16>
    %25 = vector.extract_strided_slice %4 {offsets = [0, 14], sizes = [16, 32], strides = [1, 1]} : vector<16x256xbf16> to vector<16x32xbf16>
    %26 = vector.extract_strided_slice %4 {offsets = [0, 15], sizes = [16, 32], strides = [1, 1]} : vector<16x256xbf16> to vector<16x32xbf16>
    %27 = tpu.concatenate %19, %20, %21, %22, %23, %24, %25, %26 in 0 : vector<16x32xbf16>, vector<16x32xbf16>, vector<16x32xbf16>, vector<16x32xbf16>, vector<16x32xbf16>, vector<16x32xbf16>, vector<16x32xbf16>, vector<16x32xbf16> -> vector<128x32xbf16>
    %c1 = arith.constant 1 : index
    %c0_8 = arith.constant 0 : index
    %c0_9 = arith.constant 0 : index
    %28 = vector.load %arg3[%c1, %c0_8, %c0_9] : memref<16x36x128xbf16, #tpu.memory_space<vmem>>, vector<1x36x128xbf16>
    %29 = vector.shape_cast %28 : vector<1x36x128xbf16> to vector<36x128xbf16>
    %cst_10 = arith.constant dense<0.000000e+00> : vector<36x32xf32>
    %30 = tpu.matmul %29, %27, %cst_10 {dimension_numbers = #tpu.dot_dimension_numbers<[1], [0], [0], [1], [0, 0, 1, 1], [], []>} : vector<36x128xbf16>, vector<128x32xbf16>, vector<36x32xf32> -> vector<36x32xf32>
    %31 = arith.addf %18, %30 : vector<36x32xf32>
    %32 = vector.extract_strided_slice %4 {offsets = [0, 16], sizes = [16, 32], strides = [1, 1]} : vector<16x256xbf16> to vector<16x32xbf16>
    %33 = vector.extract_strided_slice %4 {offsets = [0, 17], sizes = [16, 32], strides = [1, 1]} : vector<16x256xbf16> to vector<16x32xbf16>
    %34 = vector.extract_strided_slice %4 {offsets = [0, 18], sizes = [16, 32], strides = [1, 1]} : vector<16x256xbf16> to vector<16x32xbf16>
    %35 = vector.extract_strided_slice %4 {offsets = [0, 19], sizes = [16, 32], strides = [1, 1]} : vector<16x256xbf16> to vector<16x32xbf16>
    %36 = vector.extract_strided_slice %4 {offsets = [0, 20], sizes = [16, 32], strides = [1, 1]} : vector<16x256xbf16> to vector<16x32xbf16>
    %37 = vector.extract_strided_slice %4 {offsets = [0, 21], sizes = [16, 32], strides = [1, 1]} : vector<16x256xbf16> to vector<16x32xbf16>
    %38 = vector.extract_strided_slice %4 {offsets = [0, 22], sizes = [16, 32], strides = [1, 1]} : vector<16x256xbf16> to vector<16x32xbf16>
    %39 = vector.extract_strided_slice %4 {offsets = [0, 23], sizes = [16, 32], strides = [1, 1]} : vector<16x256xbf16> to vector<16x32xbf16>
    %40 = tpu.concatenate %32, %33, %34, %35, %36, %37, %38, %39 in 0 : vector<16x32xbf16>, vector<16x32xbf16>, vector<16x32xbf16>, vector<16x32xbf16>, vector<16x32xbf16>, vector<16x32xbf16>, vector<16x32xbf16>, vector<16x32xbf16> -> vector<128x32xbf16>
    %c2 = arith.constant 2 : index
    %c0_11 = arith.constant 0 : index
    %c0_12 = arith.constant 0 : index
    %41 = vector.load %arg3[%c2, %c0_11, %c0_12] : memref<16x36x128xbf16, #tpu.memory_space<vmem>>, vector<1x36x128xbf16>
    %42 = vector.shape_cast %41 : vector<1x36x128xbf16> to vector<36x128xbf16>
    %cst_13 = arith.constant dense<0.000000e+00> : vector<36x32xf32>
    %43 = tpu.matmul %42, %40, %cst_13 {dimension_numbers = #tpu.dot_dimension_numbers<[1], [0], [0], [1], [0, 0, 1, 1], [], []>} : vector<36x128xbf16>, vector<128x32xbf16>, vector<36x32xf32> -> vector<36x32xf32>
    %44 = arith.addf %31, %43 : vector<36x32xf32>
    %45 = vector.extract_strided_slice %4 {offsets = [0, 24], sizes = [16, 32], strides = [1, 1]} : vector<16x256xbf16> to vector<16x32xbf16>
    %46 = vector.extract_strided_slice %4 {offsets = [0, 25], sizes = [16, 32], strides = [1, 1]} : vector<16x256xbf16> to vector<16x32xbf16>
    %47 = vector.extract_strided_slice %4 {offsets = [0, 26], sizes = [16, 32], strides = [1, 1]} : vector<16x256xbf16> to vector<16x32xbf16>
    %48 = vector.extract_strided_slice %4 {offsets = [0, 27], sizes = [16, 32], strides = [1, 1]} : vector<16x256xbf16> to vector<16x32xbf16>
    %49 = vector.extract_strided_slice %4 {offsets = [0, 28], sizes = [16, 32], strides = [1, 1]} : vector<16x256xbf16> to vector<16x32xbf16>
    %50 = vector.extract_strided_slice %4 {offsets = [0, 29], sizes = [16, 32], strides = [1, 1]} : vector<16x256xbf16> to vector<16x32xbf16>
    %51 = vector.extract_strided_slice %4 {offsets = [0, 30], sizes = [16, 32], strides = [1, 1]} : vector<16x256xbf16> to vector<16x32xbf16>
    %52 = vector.extract_strided_slice %4 {offsets = [0, 31], sizes = [16, 32], strides = [1, 1]} : vector<16x256xbf16> to vector<16x32xbf16>
    %53 = tpu.concatenate %45, %46, %47, %48, %49, %50, %51, %52 in 0 : vector<16x32xbf16>, vector<16x32xbf16>, vector<16x32xbf16>, vector<16x32xbf16>, vector<16x32xbf16>, vector<16x32xbf16>, vector<16x32xbf16>, vector<16x32xbf16> -> vector<128x32xbf16>
    %c3 = arith.constant 3 : index
    %c0_14 = arith.constant 0 : index
    %c0_15 = arith.constant 0 : index
    %54 = vector.load %arg3[%c3, %c0_14, %c0_15] : memref<16x36x128xbf16, #tpu.memory_space<vmem>>, vector<1x36x128xbf16>
    %55 = vector.shape_cast %54 : vector<1x36x128xbf16> to vector<36x128xbf16>
    %cst_16 = arith.constant dense<0.000000e+00> : vector<36x32xf32>
    %56 = tpu.matmul %55, %53, %cst_16 {dimension_numbers = #tpu.dot_dimension_numbers<[1], [0], [0], [1], [0, 0, 1, 1], [], []>} : vector<36x128xbf16>, vector<128x32xbf16>, vector<36x32xf32> -> vector<36x32xf32>
    %57 = arith.addf %44, %56 : vector<36x32xf32>
    %58 = vector.extract_strided_slice %4 {offsets = [0, 32], sizes = [16, 32], strides = [1, 1]} : vector<16x256xbf16> to vector<16x32xbf16>
    %59 = vector.extract_strided_slice %4 {offsets = [0, 33], sizes = [16, 32], strides = [1, 1]} : vector<16x256xbf16> to vector<16x32xbf16>
    %60 = vector.extract_strided_slice %4 {offsets = [0, 34], sizes = [16, 32], strides = [1, 1]} : vector<16x256xbf16> to vector<16x32xbf16>
    %61 = vector.extract_strided_slice %4 {offsets = [0, 35], sizes = [16, 32], strides = [1, 1]} : vector<16x256xbf16> to vector<16x32xbf16>
    %62 = vector.extract_strided_slice %4 {offsets = [0, 36], sizes = [16, 32], strides = [1, 1]} : vector<16x256xbf16> to vector<16x32xbf16>
    %63 = vector.extract_strided_slice %4 {offsets = [0, 37], sizes = [16, 32], strides = [1, 1]} : vector<16x256xbf16> to vector<16x32xbf16>
    %64 = vector.extract_strided_slice %4 {offsets = [0, 38], sizes = [16, 32], strides = [1, 1]} : vector<16x256xbf16> to vector<16x32xbf16>
    %65 = vector.extract_strided_slice %4 {offsets = [0, 39], sizes = [16, 32], strides = [1, 1]} : vector<16x256xbf16> to vector<16x32xbf16>
    %66 = tpu.concatenate %58, %59, %60, %61, %62, %63, %64, %65 in 0 : vector<16x32xbf16>, vector<16x32xbf16>, vector<16x32xbf16>, vector<16x32xbf16>, vector<16x32xbf16>, vector<16x32xbf16>, vector<16x32xbf16>, vector<16x32xbf16> -> vector<128x32xbf16>
    %c4 = arith.constant 4 : index
    %c0_17 = arith.constant 0 : index
    %c0_18 = arith.constant 0 : index
    %67 = vector.load %arg3[%c4, %c0_17, %c0_18] : memref<16x36x128xbf16, #tpu.memory_space<vmem>>, vector<1x36x128xbf16>
    %68 = vector.shape_cast %67 : vector<1x36x128xbf16> to vector<36x128xbf16>
    %cst_19 = arith.constant dense<0.000000e+00> : vector<36x32xf32>
    %69 = tpu.matmul %68, %66, %cst_19 {dimension_numbers = #tpu.dot_dimension_numbers<[1], [0], [0], [1], [0, 0, 1, 1], [], []>} : vector<36x128xbf16>, vector<128x32xbf16>, vector<36x32xf32> -> vector<36x32xf32>
    %70 = arith.addf %57, %69 : vector<36x32xf32>
    %71 = vector.extract_strided_slice %4 {offsets = [0, 40], sizes = [16, 32], strides = [1, 1]} : vector<16x256xbf16> to vector<16x32xbf16>
    %72 = vector.extract_strided_slice %4 {offsets = [0, 41], sizes = [16, 32], strides = [1, 1]} : vector<16x256xbf16> to vector<16x32xbf16>
    %73 = vector.extract_strided_slice %4 {offsets = [0, 42], sizes = [16, 32], strides = [1, 1]} : vector<16x256xbf16> to vector<16x32xbf16>
    %74 = vector.extract_strided_slice %4 {offsets = [0, 43], sizes = [16, 32], strides = [1, 1]} : vector<16x256xbf16> to vector<16x32xbf16>
    %75 = vector.extract_strided_slice %4 {offsets = [0, 44], sizes = [16, 32], strides = [1, 1]} : vector<16x256xbf16> to vector<16x32xbf16>
    %76 = vector.extract_strided_slice %4 {offsets = [0, 45], sizes = [16, 32], strides = [1, 1]} : vector<16x256xbf16> to vector<16x32xbf16>
    %77 = vector.extract_strided_slice %4 {offsets = [0, 46], sizes = [16, 32], strides = [1, 1]} : vector<16x256xbf16> to vector<16x32xbf16>
    %78 = vector.extract_strided_slice %4 {offsets = [0, 47], sizes = [16, 32], strides = [1, 1]} : vector<16x256xbf16> to vector<16x32xbf16>
    %79 = tpu.concatenate %71, %72, %73, %74, %75, %76, %77, %78 in 0 : vector<16x32xbf16>, vector<16x32xbf16>, vector<16x32xbf16>, vector<16x32xbf16>, vector<16x32xbf16>, vector<16x32xbf16>, vector<16x32xbf16>, vector<16x32xbf16> -> vector<128x32xbf16>
    %c5 = arith.constant 5 : index
    %c0_20 = arith.constant 0 : index
    %c0_21 = arith.constant 0 : index
    %80 = vector.load %arg3[%c5, %c0_20, %c0_21] : memref<16x36x128xbf16, #tpu.memory_space<vmem>>, vector<1x36x128xbf16>
    %81 = vector.shape_cast %80 : vector<1x36x128xbf16> to vector<36x128xbf16>
    %cst_22 = arith.constant dense<0.000000e+00> : vector<36x32xf32>
    %82 = tpu.matmul %81, %79, %cst_22 {dimension_numbers = #tpu.dot_dimension_numbers<[1], [0], [0], [1], [0, 0, 1, 1], [], []>} : vector<36x128xbf16>, vector<128x32xbf16>, vector<36x32xf32> -> vector<36x32xf32>
    %83 = arith.addf %70, %82 : vector<36x32xf32>
    %84 = vector.extract_strided_slice %4 {offsets = [0, 48], sizes = [16, 32], strides = [1, 1]} : vector<16x256xbf16> to vector<16x32xbf16>
    %85 = vector.extract_strided_slice %4 {offsets = [0, 49], sizes = [16, 32], strides = [1, 1]} : vector<16x256xbf16> to vector<16x32xbf16>
    %86 = vector.extract_strided_slice %4 {offsets = [0, 50], sizes = [16, 32], strides = [1, 1]} : vector<16x256xbf16> to vector<16x32xbf16>
    %87 = vector.extract_strided_slice %4 {offsets = [0, 51], sizes = [16, 32], strides = [1, 1]} : vector<16x256xbf16> to vector<16x32xbf16>
    %88 = vector.extract_strided_slice %4 {offsets = [0, 52], sizes = [16, 32], strides = [1, 1]} : vector<16x256xbf16> to vector<16x32xbf16>
    %89 = vector.extract_strided_slice %4 {offsets = [0, 53], sizes = [16, 32], strides = [1, 1]} : vector<16x256xbf16> to vector<16x32xbf16>
    %90 = vector.extract_strided_slice %4 {offsets = [0, 54], sizes = [16, 32], strides = [1, 1]} : vector<16x256xbf16> to vector<16x32xbf16>
    %91 = vector.extract_strided_slice %4 {offsets = [0, 55], sizes = [16, 32], strides = [1, 1]} : vector<16x256xbf16> to vector<16x32xbf16>
    %92 = tpu.concatenate %84, %85, %86, %87, %88, %89, %90, %91 in 0 : vector<16x32xbf16>, vector<16x32xbf16>, vector<16x32xbf16>, vector<16x32xbf16>, vector<16x32xbf16>, vector<16x32xbf16>, vector<16x32xbf16>, vector<16x32xbf16> -> vector<128x32xbf16>
    %c6 = arith.constant 6 : index
    %c0_23 = arith.constant 0 : index
    %c0_24 = arith.constant 0 : index
    %93 = vector.load %arg3[%c6, %c0_23, %c0_24] : memref<16x36x128xbf16, #tpu.memory_space<vmem>>, vector<1x36x128xbf16>
    %94 = vector.shape_cast %93 : vector<1x36x128xbf16> to vector<36x128xbf16>
    %cst_25 = arith.constant dense<0.000000e+00> : vector<36x32xf32>
    %95 = tpu.matmul %94, %92, %cst_25 {dimension_numbers = #tpu.dot_dimension_numbers<[1], [0], [0], [1], [0, 0, 1, 1], [], []>} : vector<36x128xbf16>, vector<128x32xbf16>, vector<36x32xf32> -> vector<36x32xf32>
    %96 = arith.addf %83, %95 : vector<36x32xf32>
    %97 = vector.extract_strided_slice %4 {offsets = [0, 56], sizes = [16, 32], strides = [1, 1]} : vector<16x256xbf16> to vector<16x32xbf16>
    %98 = vector.extract_strided_slice %4 {offsets = [0, 57], sizes = [16, 32], strides = [1, 1]} : vector<16x256xbf16> to vector<16x32xbf16>
    %99 = vector.extract_strided_slice %4 {offsets = [0, 58], sizes = [16, 32], strides = [1, 1]} : vector<16x256xbf16> to vector<16x32xbf16>
    %100 = vector.extract_strided_slice %4 {offsets = [0, 59], sizes = [16, 32], strides = [1, 1]} : vector<16x256xbf16> to vector<16x32xbf16>
    %101 = vector.extract_strided_slice %4 {offsets = [0, 60], sizes = [16, 32], strides = [1, 1]} : vector<16x256xbf16> to vector<16x32xbf16>
    %102 = vector.extract_strided_slice %4 {offsets = [0, 61], sizes = [16, 32], strides = [1, 1]} : vector<16x256xbf16> to vector<16x32xbf16>
    %103 = vector.extract_strided_slice %4 {offsets = [0, 62], sizes = [16, 32], strides = [1, 1]} : vector<16x256xbf16> to vector<16x32xbf16>
    %104 = vector.extract_strided_slice %4 {offsets = [0, 63], sizes = [16, 32], strides = [1, 1]} : vector<16x256xbf16> to vector<16x32xbf16>
    %105 = tpu.concatenate %97, %98, %99, %100, %101, %102, %103, %104 in 0 : vector<16x32xbf16>, vector<16x32xbf16>, vector<16x32xbf16>, vector<16x32xbf16>, vector<16x32xbf16>, vector<16x32xbf16>, vector<16x32xbf16>, vector<16x32xbf16> -> vector<128x32xbf16>
    %c7 = arith.constant 7 : index
    %c0_26 = arith.constant 0 : index
    %c0_27 = arith.constant 0 : index
    %106 = vector.load %arg3[%c7, %c0_26, %c0_27] : memref<16x36x128xbf16, #tpu.memory_space<vmem>>, vector<1x36x128xbf16>
    %107 = vector.shape_cast %106 : vector<1x36x128xbf16> to vector<36x128xbf16>
    %cst_28 = arith.constant dense<0.000000e+00> : vector<36x32xf32>
    %108 = tpu.matmul %107, %105, %cst_28 {dimension_numbers = #tpu.dot_dimension_numbers<[1], [0], [0], [1], [0, 0, 1, 1], [], []>} : vector<36x128xbf16>, vector<128x32xbf16>, vector<36x32xf32> -> vector<36x32xf32>
    %109 = arith.addf %96, %108 : vector<36x32xf32>
    %110 = vector.extract_strided_slice %4 {offsets = [0, 64], sizes = [16, 32], strides = [1, 1]} : vector<16x256xbf16> to vector<16x32xbf16>
    %111 = vector.extract_strided_slice %4 {offsets = [0, 65], sizes = [16, 32], strides = [1, 1]} : vector<16x256xbf16> to vector<16x32xbf16>
    %112 = vector.extract_strided_slice %4 {offsets = [0, 66], sizes = [16, 32], strides = [1, 1]} : vector<16x256xbf16> to vector<16x32xbf16>
    %113 = vector.extract_strided_slice %4 {offsets = [0, 67], sizes = [16, 32], strides = [1, 1]} : vector<16x256xbf16> to vector<16x32xbf16>
    %114 = vector.extract_strided_slice %4 {offsets = [0, 68], sizes = [16, 32], strides = [1, 1]} : vector<16x256xbf16> to vector<16x32xbf16>
    %115 = vector.extract_strided_slice %4 {offsets = [0, 69], sizes = [16, 32], strides = [1, 1]} : vector<16x256xbf16> to vector<16x32xbf16>
    %116 = vector.extract_strided_slice %4 {offsets = [0, 70], sizes = [16, 32], strides = [1, 1]} : vector<16x256xbf16> to vector<16x32xbf16>
    %117 = vector.extract_strided_slice %4 {offsets = [0, 71], sizes = [16, 32], strides = [1, 1]} : vector<16x256xbf16> to vector<16x32xbf16>
    %118 = tpu.concatenate %110, %111, %112, %113, %114, %115, %116, %117 in 0 : vector<16x32xbf16>, vector<16x32xbf16>, vector<16x32xbf16>, vector<16x32xbf16>, vector<16x32xbf16>, vector<16x32xbf16>, vector<16x32xbf16>, vector<16x32xbf16> -> vector<128x32xbf16>
    %c8 = arith.constant 8 : index
    %c0_29 = arith.constant 0 : index
    %c0_30 = arith.constant 0 : index
    %119 = vector.load %arg3[%c8, %c0_29, %c0_30] : memref<16x36x128xbf16, #tpu.memory_space<vmem>>, vector<1x36x128xbf16>
    %120 = vector.shape_cast %119 : vector<1x36x128xbf16> to vector<36x128xbf16>
    %cst_31 = arith.constant dense<0.000000e+00> : vector<36x32xf32>
    %121 = tpu.matmul %120, %118, %cst_31 {dimension_numbers = #tpu.dot_dimension_numbers<[1], [0], [0], [1], [0, 0, 1, 1], [], []>} : vector<36x128xbf16>, vector<128x32xbf16>, vector<36x32xf32> -> vector<36x32xf32>
    %122 = arith.addf %109, %121 : vector<36x32xf32>
    %123 = vector.extract_strided_slice %4 {offsets = [0, 72], sizes = [16, 32], strides = [1, 1]} : vector<16x256xbf16> to vector<16x32xbf16>
    %124 = vector.extract_strided_slice %4 {offsets = [0, 73], sizes = [16, 32], strides = [1, 1]} : vector<16x256xbf16> to vector<16x32xbf16>
    %125 = vector.extract_strided_slice %4 {offsets = [0, 74], sizes = [16, 32], strides = [1, 1]} : vector<16x256xbf16> to vector<16x32xbf16>
    %126 = vector.extract_strided_slice %4 {offsets = [0, 75], sizes = [16, 32], strides = [1, 1]} : vector<16x256xbf16> to vector<16x32xbf16>
    %127 = vector.extract_strided_slice %4 {offsets = [0, 76], sizes = [16, 32], strides = [1, 1]} : vector<16x256xbf16> to vector<16x32xbf16>
    %128 = vector.extract_strided_slice %4 {offsets = [0, 77], sizes = [16, 32], strides = [1, 1]} : vector<16x256xbf16> to vector<16x32xbf16>
    %129 = vector.extract_strided_slice %4 {offsets = [0, 78], sizes = [16, 32], strides = [1, 1]} : vector<16x256xbf16> to vector<16x32xbf16>
    %130 = vector.extract_strided_slice %4 {offsets = [0, 79], sizes = [16, 32], strides = [1, 1]} : vector<16x256xbf16> to vector<16x32xbf16>
    %131 = tpu.concatenate %123, %124, %125, %126, %127, %128, %129, %130 in 0 : vector<16x32xbf16>, vector<16x32xbf16>, vector<16x32xbf16>, vector<16x32xbf16>, vector<16x32xbf16>, vector<16x32xbf16>, vector<16x32xbf16>, vector<16x32xbf16> -> vector<128x32xbf16>
    %c9 = arith.constant 9 : index
    %c0_32 = arith.constant 0 : index
    %c0_33 = arith.constant 0 : index
    %132 = vector.load %arg3[%c9, %c0_32, %c0_33] : memref<16x36x128xbf16, #tpu.memory_space<vmem>>, vector<1x36x128xbf16>
    %133 = vector.shape_cast %132 : vector<1x36x128xbf16> to vector<36x128xbf16>
    %cst_34 = arith.constant dense<0.000000e+00> : vector<36x32xf32>
    %134 = tpu.matmul %133, %131, %cst_34 {dimension_numbers = #tpu.dot_dimension_numbers<[1], [0], [0], [1], [0, 0, 1, 1], [], []>} : vector<36x128xbf16>, vector<128x32xbf16>, vector<36x32xf32> -> vector<36x32xf32>
    %135 = arith.addf %122, %134 : vector<36x32xf32>
    %136 = vector.extract_strided_slice %4 {offsets = [0, 80], sizes = [16, 32], strides = [1, 1]} : vector<16x256xbf16> to vector<16x32xbf16>
    %137 = vector.extract_strided_slice %4 {offsets = [0, 81], sizes = [16, 32], strides = [1, 1]} : vector<16x256xbf16> to vector<16x32xbf16>
    %138 = vector.extract_strided_slice %4 {offsets = [0, 82], sizes = [16, 32], strides = [1, 1]} : vector<16x256xbf16> to vector<16x32xbf16>
    %139 = vector.extract_strided_slice %4 {offsets = [0, 83], sizes = [16, 32], strides = [1, 1]} : vector<16x256xbf16> to vector<16x32xbf16>
    %140 = vector.extract_strided_slice %4 {offsets = [0, 84], sizes = [16, 32], strides = [1, 1]} : vector<16x256xbf16> to vector<16x32xbf16>
    %141 = vector.extract_strided_slice %4 {offsets = [0, 85], sizes = [16, 32], strides = [1, 1]} : vector<16x256xbf16> to vector<16x32xbf16>
    %142 = vector.extract_strided_slice %4 {offsets = [0, 86], sizes = [16, 32], strides = [1, 1]} : vector<16x256xbf16> to vector<16x32xbf16>
    %143 = vector.extract_strided_slice %4 {offsets = [0, 87], sizes = [16, 32], strides = [1, 1]} : vector<16x256xbf16> to vector<16x32xbf16>
    %144 = tpu.concatenate %136, %137, %138, %139, %140, %141, %142, %143 in 0 : vector<16x32xbf16>, vector<16x32xbf16>, vector<16x32xbf16>, vector<16x32xbf16>, vector<16x32xbf16>, vector<16x32xbf16>, vector<16x32xbf16>, vector<16x32xbf16> -> vector<128x32xbf16>
    %c10 = arith.constant 10 : index
    %c0_35 = arith.constant 0 : index
    %c0_36 = arith.constant 0 : index
    %145 = vector.load %arg3[%c10, %c0_35, %c0_36] : memref<16x36x128xbf16, #tpu.memory_space<vmem>>, vector<1x36x128xbf16>
    %146 = vector.shape_cast %145 : vector<1x36x128xbf16> to vector<36x128xbf16>
    %cst_37 = arith.constant dense<0.000000e+00> : vector<36x32xf32>
    %147 = tpu.matmul %146, %144, %cst_37 {dimension_numbers = #tpu.dot_dimension_numbers<[1], [0], [0], [1], [0, 0, 1, 1], [], []>} : vector<36x128xbf16>, vector<128x32xbf16>, vector<36x32xf32> -> vector<36x32xf32>
    %148 = arith.addf %135, %147 : vector<36x32xf32>
    %149 = vector.extract_strided_slice %4 {offsets = [0, 88], sizes = [16, 32], strides = [1, 1]} : vector<16x256xbf16> to vector<16x32xbf16>
    %150 = vector.extract_strided_slice %4 {offsets = [0, 89], sizes = [16, 32], strides = [1, 1]} : vector<16x256xbf16> to vector<16x32xbf16>
    %151 = vector.extract_strided_slice %4 {offsets = [0, 90], sizes = [16, 32], strides = [1, 1]} : vector<16x256xbf16> to vector<16x32xbf16>
    %152 = vector.extract_strided_slice %4 {offsets = [0, 91], sizes = [16, 32], strides = [1, 1]} : vector<16x256xbf16> to vector<16x32xbf16>
    %153 = vector.extract_strided_slice %4 {offsets = [0, 92], sizes = [16, 32], strides = [1, 1]} : vector<16x256xbf16> to vector<16x32xbf16>
    %154 = vector.extract_strided_slice %4 {offsets = [0, 93], sizes = [16, 32], strides = [1, 1]} : vector<16x256xbf16> to vector<16x32xbf16>
    %155 = vector.extract_strided_slice %4 {offsets = [0, 94], sizes = [16, 32], strides = [1, 1]} : vector<16x256xbf16> to vector<16x32xbf16>
    %156 = vector.extract_strided_slice %4 {offsets = [0, 95], sizes = [16, 32], strides = [1, 1]} : vector<16x256xbf16> to vector<16x32xbf16>
    %157 = tpu.concatenate %149, %150, %151, %152, %153, %154, %155, %156 in 0 : vector<16x32xbf16>, vector<16x32xbf16>, vector<16x32xbf16>, vector<16x32xbf16>, vector<16x32xbf16>, vector<16x32xbf16>, vector<16x32xbf16>, vector<16x32xbf16> -> vector<128x32xbf16>
    %c11 = arith.constant 11 : index
    %c0_38 = arith.constant 0 : index
    %c0_39 = arith.constant 0 : index
    %158 = vector.load %arg3[%c11, %c0_38, %c0_39] : memref<16x36x128xbf16, #tpu.memory_space<vmem>>, vector<1x36x128xbf16>
    %159 = vector.shape_cast %158 : vector<1x36x128xbf16> to vector<36x128xbf16>
    %cst_40 = arith.constant dense<0.000000e+00> : vector<36x32xf32>
    %160 = tpu.matmul %159, %157, %cst_40 {dimension_numbers = #tpu.dot_dimension_numbers<[1], [0], [0], [1], [0, 0, 1, 1], [], []>} : vector<36x128xbf16>, vector<128x32xbf16>, vector<36x32xf32> -> vector<36x32xf32>
    %161 = arith.addf %148, %160 : vector<36x32xf32>
    %162 = vector.extract_strided_slice %4 {offsets = [0, 96], sizes = [16, 32], strides = [1, 1]} : vector<16x256xbf16> to vector<16x32xbf16>
    %163 = vector.extract_strided_slice %4 {offsets = [0, 97], sizes = [16, 32], strides = [1, 1]} : vector<16x256xbf16> to vector<16x32xbf16>
    %164 = vector.extract_strided_slice %4 {offsets = [0, 98], sizes = [16, 32], strides = [1, 1]} : vector<16x256xbf16> to vector<16x32xbf16>
    %165 = vector.extract_strided_slice %4 {offsets = [0, 99], sizes = [16, 32], strides = [1, 1]} : vector<16x256xbf16> to vector<16x32xbf16>
    %166 = vector.extract_strided_slice %4 {offsets = [0, 100], sizes = [16, 32], strides = [1, 1]} : vector<16x256xbf16> to vector<16x32xbf16>
    %167 = vector.extract_strided_slice %4 {offsets = [0, 101], sizes = [16, 32], strides = [1, 1]} : vector<16x256xbf16> to vector<16x32xbf16>
    %168 = vector.extract_strided_slice %4 {offsets = [0, 102], sizes = [16, 32], strides = [1, 1]} : vector<16x256xbf16> to vector<16x32xbf16>
    %169 = vector.extract_strided_slice %4 {offsets = [0, 103], sizes = [16, 32], strides = [1, 1]} : vector<16x256xbf16> to vector<16x32xbf16>
    %170 = tpu.concatenate %162, %163, %164, %165, %166, %167, %168, %169 in 0 : vector<16x32xbf16>, vector<16x32xbf16>, vector<16x32xbf16>, vector<16x32xbf16>, vector<16x32xbf16>, vector<16x32xbf16>, vector<16x32xbf16>, vector<16x32xbf16> -> vector<128x32xbf16>
    %c12 = arith.constant 12 : index
    %c0_41 = arith.constant 0 : index
    %c0_42 = arith.constant 0 : index
    %171 = vector.load %arg3[%c12, %c0_41, %c0_42] : memref<16x36x128xbf16, #tpu.memory_space<vmem>>, vector<1x36x128xbf16>
    %172 = vector.shape_cast %171 : vector<1x36x128xbf16> to vector<36x128xbf16>
    %cst_43 = arith.constant dense<0.000000e+00> : vector<36x32xf32>
    %173 = tpu.matmul %172, %170, %cst_43 {dimension_numbers = #tpu.dot_dimension_numbers<[1], [0], [0], [1], [0, 0, 1, 1], [], []>} : vector<36x128xbf16>, vector<128x32xbf16>, vector<36x32xf32> -> vector<36x32xf32>
    %174 = arith.addf %161, %173 : vector<36x32xf32>
    %175 = vector.extract_strided_slice %4 {offsets = [0, 104], sizes = [16, 32], strides = [1, 1]} : vector<16x256xbf16> to vector<16x32xbf16>
    %176 = vector.extract_strided_slice %4 {offsets = [0, 105], sizes = [16, 32], strides = [1, 1]} : vector<16x256xbf16> to vector<16x32xbf16>
    %177 = vector.extract_strided_slice %4 {offsets = [0, 106], sizes = [16, 32], strides = [1, 1]} : vector<16x256xbf16> to vector<16x32xbf16>
    %178 = vector.extract_strided_slice %4 {offsets = [0, 107], sizes = [16, 32], strides = [1, 1]} : vector<16x256xbf16> to vector<16x32xbf16>
    %179 = vector.extract_strided_slice %4 {offsets = [0, 108], sizes = [16, 32], strides = [1, 1]} : vector<16x256xbf16> to vector<16x32xbf16>
    %180 = vector.extract_strided_slice %4 {offsets = [0, 109], sizes = [16, 32], strides = [1, 1]} : vector<16x256xbf16> to vector<16x32xbf16>
    %181 = vector.extract_strided_slice %4 {offsets = [0, 110], sizes = [16, 32], strides = [1, 1]} : vector<16x256xbf16> to vector<16x32xbf16>
    %182 = vector.extract_strided_slice %4 {offsets = [0, 111], sizes = [16, 32], strides = [1, 1]} : vector<16x256xbf16> to vector<16x32xbf16>
    %183 = tpu.concatenate %175, %176, %177, %178, %179, %180, %181, %182 in 0 : vector<16x32xbf16>, vector<16x32xbf16>, vector<16x32xbf16>, vector<16x32xbf16>, vector<16x32xbf16>, vector<16x32xbf16>, vector<16x32xbf16>, vector<16x32xbf16> -> vector<128x32xbf16>
    %c13 = arith.constant 13 : index
    %c0_44 = arith.constant 0 : index
    %c0_45 = arith.constant 0 : index
    %184 = vector.load %arg3[%c13, %c0_44, %c0_45] : memref<16x36x128xbf16, #tpu.memory_space<vmem>>, vector<1x36x128xbf16>
    %185 = vector.shape_cast %184 : vector<1x36x128xbf16> to vector<36x128xbf16>
    %cst_46 = arith.constant dense<0.000000e+00> : vector<36x32xf32>
    %186 = tpu.matmul %185, %183, %cst_46 {dimension_numbers = #tpu.dot_dimension_numbers<[1], [0], [0], [1], [0, 0, 1, 1], [], []>} : vector<36x128xbf16>, vector<128x32xbf16>, vector<36x32xf32> -> vector<36x32xf32>
    %187 = arith.addf %174, %186 : vector<36x32xf32>
    %188 = vector.extract_strided_slice %4 {offsets = [0, 112], sizes = [16, 32], strides = [1, 1]} : vector<16x256xbf16> to vector<16x32xbf16>
    %189 = vector.extract_strided_slice %4 {offsets = [0, 113], sizes = [16, 32], strides = [1, 1]} : vector<16x256xbf16> to vector<16x32xbf16>
    %190 = vector.extract_strided_slice %4 {offsets = [0, 114], sizes = [16, 32], strides = [1, 1]} : vector<16x256xbf16> to vector<16x32xbf16>
    %191 = vector.extract_strided_slice %4 {offsets = [0, 115], sizes = [16, 32], strides = [1, 1]} : vector<16x256xbf16> to vector<16x32xbf16>
    %192 = vector.extract_strided_slice %4 {offsets = [0, 116], sizes = [16, 32], strides = [1, 1]} : vector<16x256xbf16> to vector<16x32xbf16>
    %193 = vector.extract_strided_slice %4 {offsets = [0, 117], sizes = [16, 32], strides = [1, 1]} : vector<16x256xbf16> to vector<16x32xbf16>
    %194 = vector.extract_strided_slice %4 {offsets = [0, 118], sizes = [16, 32], strides = [1, 1]} : vector<16x256xbf16> to vector<16x32xbf16>
    %195 = vector.extract_strided_slice %4 {offsets = [0, 119], sizes = [16, 32], strides = [1, 1]} : vector<16x256xbf16> to vector<16x32xbf16>
    %196 = tpu.concatenate %188, %189, %190, %191, %192, %193, %194, %195 in 0 : vector<16x32xbf16>, vector<16x32xbf16>, vector<16x32xbf16>, vector<16x32xbf16>, vector<16x32xbf16>, vector<16x32xbf16>, vector<16x32xbf16>, vector<16x32xbf16> -> vector<128x32xbf16>
    %c14 = arith.constant 14 : index
    %c0_47 = arith.constant 0 : index
    %c0_48 = arith.constant 0 : index
    %197 = vector.load %arg3[%c14, %c0_47, %c0_48] : memref<16x36x128xbf16, #tpu.memory_space<vmem>>, vector<1x36x128xbf16>
    %198 = vector.shape_cast %197 : vector<1x36x128xbf16> to vector<36x128xbf16>
    %cst_49 = arith.constant dense<0.000000e+00> : vector<36x32xf32>
    %199 = tpu.matmul %198, %196, %cst_49 {dimension_numbers = #tpu.dot_dimension_numbers<[1], [0], [0], [1], [0, 0, 1, 1], [], []>} : vector<36x128xbf16>, vector<128x32xbf16>, vector<36x32xf32> -> vector<36x32xf32>
    %200 = arith.addf %187, %199 : vector<36x32xf32>
    %201 = vector.extract_strided_slice %4 {offsets = [0, 120], sizes = [16, 32], strides = [1, 1]} : vector<16x256xbf16> to vector<16x32xbf16>
    %202 = vector.extract_strided_slice %4 {offsets = [0, 121], sizes = [16, 32], strides = [1, 1]} : vector<16x256xbf16> to vector<16x32xbf16>
    %203 = vector.extract_strided_slice %4 {offsets = [0, 122], sizes = [16, 32], strides = [1, 1]} : vector<16x256xbf16> to vector<16x32xbf16>
    %204 = vector.extract_strided_slice %4 {offsets = [0, 123], sizes = [16, 32], strides = [1, 1]} : vector<16x256xbf16> to vector<16x32xbf16>
    %205 = vector.extract_strided_slice %4 {offsets = [0, 124], sizes = [16, 32], strides = [1, 1]} : vector<16x256xbf16> to vector<16x32xbf16>
    %206 = vector.extract_strided_slice %4 {offsets = [0, 125], sizes = [16, 32], strides = [1, 1]} : vector<16x256xbf16> to vector<16x32xbf16>
    %207 = vector.extract_strided_slice %4 {offsets = [0, 126], sizes = [16, 32], strides = [1, 1]} : vector<16x256xbf16> to vector<16x32xbf16>
    %208 = vector.extract_strided_slice %4 {offsets = [0, 127], sizes = [16, 32], strides = [1, 1]} : vector<16x256xbf16> to vector<16x32xbf16>
    %209 = tpu.concatenate %201, %202, %203, %204, %205, %206, %207, %208 in 0 : vector<16x32xbf16>, vector<16x32xbf16>, vector<16x32xbf16>, vector<16x32xbf16>, vector<16x32xbf16>, vector<16x32xbf16>, vector<16x32xbf16>, vector<16x32xbf16> -> vector<128x32xbf16>
    %c15 = arith.constant 15 : index
    %c0_50 = arith.constant 0 : index
    %c0_51 = arith.constant 0 : index
    %210 = vector.load %arg3[%c15, %c0_50, %c0_51] : memref<16x36x128xbf16, #tpu.memory_space<vmem>>, vector<1x36x128xbf16>
    %211 = vector.shape_cast %210 : vector<1x36x128xbf16> to vector<36x128xbf16>
    %cst_52 = arith.constant dense<0.000000e+00> : vector<36x32xf32>
    %212 = tpu.matmul %211, %209, %cst_52 {dimension_numbers = #tpu.dot_dimension_numbers<[1], [0], [0], [1], [0, 0, 1, 1], [], []>} : vector<36x128xbf16>, vector<128x32xbf16>, vector<36x32xf32> -> vector<36x32xf32>
    %213 = arith.addf %200, %212 : vector<36x32xf32>
    %c0_53 = arith.constant 0 : index
    %c0_54 = arith.constant 0 : index
    %c0_55 = arith.constant 0 : index
    %c0_56 = arith.constant 0 : index
    %214 = vector.load %arg4[%c0_53, %c0_54, %c0_55, %c0_56] : memref<1x8x36x1xf32, #tpu.memory_space<vmem>>, vector<1x8x36x1xf32>
    %215 = vector.shape_cast %214 : vector<1x8x36x1xf32> to vector<8x36x1xf32>
    %c0_57 = arith.constant 0 : index
    %c0_58 = arith.constant 0 : index
    %c0_59 = arith.constant 0 : index
    %216 = vector.load %arg10[%c0_57, %c0_58, %c0_59] : memref<8x36x32xf32, #tpu.memory_space<vmem>>, vector<1x36x32xf32>
    %217 = vector.shape_cast %216 : vector<1x36x32xf32> to vector<36x32xf32>
    %218 = vector.extract_strided_slice %215 {offsets = [0, 0, 0], sizes = [1, 36, 1], strides = [1, 1, 1]} : vector<8x36x1xf32> to vector<1x36x1xf32>
    %219 = vector.shape_cast %218 : vector<1x36x1xf32> to vector<36x1xf32>
    %220 = vector.broadcast %219 : vector<36x1xf32> to vector<36x32xf32>
    %221 = arith.mulf %220, %213 : vector<36x32xf32>
    %222 = arith.addf %217, %221 : vector<36x32xf32>
    %c0_60 = arith.constant 0 : index
    %c0_61 = arith.constant 0 : index
    %c0_62 = arith.constant 0 : index
    %223 = vector.load %arg10[%c0_60, %c0_61, %c0_62] : memref<8x36x32xf32, #tpu.memory_space<vmem>>, vector<1x36x32xf32>
    %224 = vector.shape_cast %223 : vector<1x36x32xf32> to vector<36x32xf32>
    %225 = vector.shape_cast %222 : vector<36x32xf32> to vector<1x36x32xf32>
    tpu.vector_store %arg10[%c0_60, %c0_61, %c0_62], %225 {strides = array<i32>} : memref<8x36x32xf32, #tpu.memory_space<vmem>>, vector<1x36x32xf32>,
    %c1_63 = arith.constant 1 : index
    %c0_64 = arith.constant 0 : index
    %c0_65 = arith.constant 0 : index
    %226 = vector.load %arg10[%c1_63, %c0_64, %c0_65] : memref<8x36x32xf32, #tpu.memory_space<vmem>>, vector<1x36x32xf32>
    %227 = vector.shape_cast %226 : vector<1x36x32xf32> to vector<36x32xf32>
    %228 = vector.extract_strided_slice %215 {offsets = [1, 0, 0], sizes = [1, 36, 1], strides = [1, 1, 1]} : vector<8x36x1xf32> to vector<1x36x1xf32>
    %229 = vector.shape_cast %228 : vector<1x36x1xf32> to vector<36x1xf32>
    %230 = vector.broadcast %229 : vector<36x1xf32> to vector<36x32xf32>
    %231 = arith.mulf %230, %213 : vector<36x32xf32>
    %232 = arith.addf %227, %231 : vector<36x32xf32>
    %c1_66 = arith.constant 1 : index
    %c0_67 = arith.constant 0 : index
    %c0_68 = arith.constant 0 : index
    %233 = vector.load %arg10[%c1_66, %c0_67, %c0_68] : memref<8x36x32xf32, #tpu.memory_space<vmem>>, vector<1x36x32xf32>
    %234 = vector.shape_cast %233 : vector<1x36x32xf32> to vector<36x32xf32>
    %235 = vector.shape_cast %232 : vector<36x32xf32> to vector<1x36x32xf32>
    tpu.vector_store %arg10[%c1_66, %c0_67, %c0_68], %235 {strides = array<i32>} : memref<8x36x32xf32, #tpu.memory_space<vmem>>, vector<1x36x32xf32>,
    %c2_69 = arith.constant 2 : index
    %c0_70 = arith.constant 0 : index
    %c0_71 = arith.constant 0 : index
    %236 = vector.load %arg10[%c2_69, %c0_70, %c0_71] : memref<8x36x32xf32, #tpu.memory_space<vmem>>, vector<1x36x32xf32>
    %237 = vector.shape_cast %236 : vector<1x36x32xf32> to vector<36x32xf32>
    %238 = vector.extract_strided_slice %215 {offsets = [2, 0, 0], sizes = [1, 36, 1], strides = [1, 1, 1]} : vector<8x36x1xf32> to vector<1x36x1xf32>
    %239 = vector.shape_cast %238 : vector<1x36x1xf32> to vector<36x1xf32>
    %240 = vector.broadcast %239 : vector<36x1xf32> to vector<36x32xf32>
    %241 = arith.mulf %240, %213 : vector<36x32xf32>
    %242 = arith.addf %237, %241 : vector<36x32xf32>
    %c2_72 = arith.constant 2 : index
    %c0_73 = arith.constant 0 : index
    %c0_74 = arith.constant 0 : index
    %243 = vector.load %arg10[%c2_72, %c0_73, %c0_74] : memref<8x36x32xf32, #tpu.memory_space<vmem>>, vector<1x36x32xf32>
    %244 = vector.shape_cast %243 : vector<1x36x32xf32> to vector<36x32xf32>
    %245 = vector.shape_cast %242 : vector<36x32xf32> to vector<1x36x32xf32>
    tpu.vector_store %arg10[%c2_72, %c0_73, %c0_74], %245 {strides = array<i32>} : memref<8x36x32xf32, #tpu.memory_space<vmem>>, vector<1x36x32xf32>,
    %c3_75 = arith.constant 3 : index
    %c0_76 = arith.constant 0 : index
    %c0_77 = arith.constant 0 : index
    %246 = vector.load %arg10[%c3_75, %c0_76, %c0_77] : memref<8x36x32xf32, #tpu.memory_space<vmem>>, vector<1x36x32xf32>
    %247 = vector.shape_cast %246 : vector<1x36x32xf32> to vector<36x32xf32>
    %248 = vector.extract_strided_slice %215 {offsets = [3, 0, 0], sizes = [1, 36, 1], strides = [1, 1, 1]} : vector<8x36x1xf32> to vector<1x36x1xf32>
    %249 = vector.shape_cast %248 : vector<1x36x1xf32> to vector<36x1xf32>
    %250 = vector.broadcast %249 : vector<36x1xf32> to vector<36x32xf32>
    %251 = arith.mulf %250, %213 : vector<36x32xf32>
    %252 = arith.addf %247, %251 : vector<36x32xf32>
    %c3_78 = arith.constant 3 : index
    %c0_79 = arith.constant 0 : index
    %c0_80 = arith.constant 0 : index
    %253 = vector.load %arg10[%c3_78, %c0_79, %c0_80] : memref<8x36x32xf32, #tpu.memory_space<vmem>>, vector<1x36x32xf32>
    %254 = vector.shape_cast %253 : vector<1x36x32xf32> to vector<36x32xf32>
    %255 = vector.shape_cast %252 : vector<36x32xf32> to vector<1x36x32xf32>
    tpu.vector_store %arg10[%c3_78, %c0_79, %c0_80], %255 {strides = array<i32>} : memref<8x36x32xf32, #tpu.memory_space<vmem>>, vector<1x36x32xf32>,
    %c4_81 = arith.constant 4 : index
    %c0_82 = arith.constant 0 : index
    %c0_83 = arith.constant 0 : index
    %256 = vector.load %arg10[%c4_81, %c0_82, %c0_83] : memref<8x36x32xf32, #tpu.memory_space<vmem>>, vector<1x36x32xf32>
    %257 = vector.shape_cast %256 : vector<1x36x32xf32> to vector<36x32xf32>
    %258 = vector.extract_strided_slice %215 {offsets = [4, 0, 0], sizes = [1, 36, 1], strides = [1, 1, 1]} : vector<8x36x1xf32> to vector<1x36x1xf32>
    %259 = vector.shape_cast %258 : vector<1x36x1xf32> to vector<36x1xf32>
    %260 = vector.broadcast %259 : vector<36x1xf32> to vector<36x32xf32>
    %261 = arith.mulf %260, %213 : vector<36x32xf32>
    %262 = arith.addf %257, %261 : vector<36x32xf32>
    %c4_84 = arith.constant 4 : index
    %c0_85 = arith.constant 0 : index
    %c0_86 = arith.constant 0 : index
    %263 = vector.load %arg10[%c4_84, %c0_85, %c0_86] : memref<8x36x32xf32, #tpu.memory_space<vmem>>, vector<1x36x32xf32>
    %264 = vector.shape_cast %263 : vector<1x36x32xf32> to vector<36x32xf32>
    %265 = vector.shape_cast %262 : vector<36x32xf32> to vector<1x36x32xf32>
    tpu.vector_store %arg10[%c4_84, %c0_85, %c0_86], %265 {strides = array<i32>} : memref<8x36x32xf32, #tpu.memory_space<vmem>>, vector<1x36x32xf32>,
    %c5_87 = arith.constant 5 : index
    %c0_88 = arith.constant 0 : index
    %c0_89 = arith.constant 0 : index
    %266 = vector.load %arg10[%c5_87, %c0_88, %c0_89] : memref<8x36x32xf32, #tpu.memory_space<vmem>>, vector<1x36x32xf32>
    %267 = vector.shape_cast %266 : vector<1x36x32xf32> to vector<36x32xf32>
    %268 = vector.extract_strided_slice %215 {offsets = [5, 0, 0], sizes = [1, 36, 1], strides = [1, 1, 1]} : vector<8x36x1xf32> to vector<1x36x1xf32>
    %269 = vector.shape_cast %268 : vector<1x36x1xf32> to vector<36x1xf32>
    %270 = vector.broadcast %269 : vector<36x1xf32> to vector<36x32xf32>
    %271 = arith.mulf %270, %213 : vector<36x32xf32>
    %272 = arith.addf %267, %271 : vector<36x32xf32>
    %c5_90 = arith.constant 5 : index
    %c0_91 = arith.constant 0 : index
    %c0_92 = arith.constant 0 : index
    %273 = vector.load %arg10[%c5_90, %c0_91, %c0_92] : memref<8x36x32xf32, #tpu.memory_space<vmem>>, vector<1x36x32xf32>
    %274 = vector.shape_cast %273 : vector<1x36x32xf32> to vector<36x32xf32>
    %275 = vector.shape_cast %272 : vector<36x32xf32> to vector<1x36x32xf32>
    tpu.vector_store %arg10[%c5_90, %c0_91, %c0_92], %275 {strides = array<i32>} : memref<8x36x32xf32, #tpu.memory_space<vmem>>, vector<1x36x32xf32>,
    %c6_93 = arith.constant 6 : index
    %c0_94 = arith.constant 0 : index
    %c0_95 = arith.constant 0 : index
    %276 = vector.load %arg10[%c6_93, %c0_94, %c0_95] : memref<8x36x32xf32, #tpu.memory_space<vmem>>, vector<1x36x32xf32>
    %277 = vector.shape_cast %276 : vector<1x36x32xf32> to vector<36x32xf32>
    %278 = vector.extract_strided_slice %215 {offsets = [6, 0, 0], sizes = [1, 36, 1], strides = [1, 1, 1]} : vector<8x36x1xf32> to vector<1x36x1xf32>
    %279 = vector.shape_cast %278 : vector<1x36x1xf32> to vector<36x1xf32>
    %280 = vector.broadcast %279 : vector<36x1xf32> to vector<36x32xf32>
    %281 = arith.mulf %280, %213 : vector<36x32xf32>
    %282 = arith.addf %277, %281 : vector<36x32xf32>
    %c6_96 = arith.constant 6 : index
    %c0_97 = arith.constant 0 : index
    %c0_98 = arith.constant 0 : index
    %283 = vector.load %arg10[%c6_96, %c0_97, %c0_98] : memref<8x36x32xf32, #tpu.memory_space<vmem>>, vector<1x36x32xf32>
    %284 = vector.shape_cast %283 : vector<1x36x32xf32> to vector<36x32xf32>
    %285 = vector.shape_cast %282 : vector<36x32xf32> to vector<1x36x32xf32>
    tpu.vector_store %arg10[%c6_96, %c0_97, %c0_98], %285 {strides = array<i32>} : memref<8x36x32xf32, #tpu.memory_space<vmem>>, vector<1x36x32xf32>,
    %c7_99 = arith.constant 7 : index
    %c0_100 = arith.constant 0 : index
    %c0_101 = arith.constant 0 : index
    %286 = vector.load %arg10[%c7_99, %c0_100, %c0_101] : memref<8x36x32xf32, #tpu.memory_space<vmem>>, vector<1x36x32xf32>
    %287 = vector.shape_cast %286 : vector<1x36x32xf32> to vector<36x32xf32>
    %288 = vector.extract_strided_slice %215 {offsets = [7, 0, 0], sizes = [1, 36, 1], strides = [1, 1, 1]} : vector<8x36x1xf32> to vector<1x36x1xf32>
    %289 = vector.shape_cast %288 : vector<1x36x1xf32> to vector<36x1xf32>
    %290 = vector.broadcast %289 : vector<36x1xf32> to vector<36x32xf32>
    %291 = arith.mulf %290, %213 : vector<36x32xf32>
    %292 = arith.addf %287, %291 : vector<36x32xf32>
    %c7_102 = arith.constant 7 : index
    %c0_103 = arith.constant 0 : index
    %c0_104 = arith.constant 0 : index
    %293 = vector.load %arg10[%c7_102, %c0_103, %c0_104] : memref<8x36x32xf32, #tpu.memory_space<vmem>>, vector<1x36x32xf32>
    %294 = vector.shape_cast %293 : vector<1x36x32xf32> to vector<36x32xf32>
    %295 = vector.shape_cast %292 : vector<36x32xf32> to vector<1x36x32xf32>
    tpu.vector_store %arg10[%c7_102, %c0_103, %c0_104], %295 {strides = array<i32>} : memref<8x36x32xf32, #tpu.memory_space<vmem>>, vector<1x36x32xf32>,
    %c3_i32 = arith.constant 3 : i32
    %296 = arith.cmpi eq, %arg1, %c3_i32 : i32
    %297 = arith.extui %296 : i1 to i32
    %c0_i32_105 = arith.constant 0 : i32
    %298 = arith.cmpi ne, %297, %c0_i32_105 : i32
    scf.if %298 {
      %c0_106 = arith.constant 0 : index
      %c0_107 = arith.constant 0 : index
      %c0_108 = arith.constant 0 : index
      %299 = vector.load %arg10[%c0_106, %c0_107, %c0_108] : memref<8x36x32xf32, #tpu.memory_space<vmem>>, vector<8x36x32xf32>
      %c0_109 = arith.constant 0 : index
      %c0_110 = arith.constant 0 : index
      %c0_111 = arith.constant 0 : index
      %300 = vector.load %arg5[%c0_109, %c0_110, %c0_111] : memref<8x36x1xf32, #tpu.memory_space<vmem>>, vector<8x36x1xf32>
      %301 = vector.broadcast %300 : vector<8x36x1xf32> to vector<8x36x32xf32>
      %302 = arith.addf %299, %301 : vector<8x36x32xf32>
      %303 = arith.negf %302 : vector<8x36x32xf32>
      %304 = math.exp %303 : vector<8x36x32xf32>
      %cst_112 = arith.constant 1.000000e+00 : f32
      %305 = vector.broadcast %cst_112 : f32 to vector<8x36x32xf32>
      %306 = arith.addf %305, %304 : vector<8x36x32xf32>
      %307 = arith.divf %305, %306 : vector<8x36x32xf32>
      %308 = arith.mulf %302, %307 : vector<8x36x32xf32>
      %c0_113 = arith.constant 0 : index
      %c0_114 = arith.constant 0 : index
      %309 = vector.load %arg7[%c0_113, %c0_114] : memref<1x4xf32, #tpu.memory_space<vmem>>, vector<1x4xf32>
      %310 = vector.shape_cast %309 : vector<1x4xf32> to vector<4xf32>
      %311 = vector.extract_strided_slice %308 {offsets = [0, 0, 0], sizes = [8, 36, 8], strides = [1, 1, 1]} : vector<8x36x32xf32> to vector<8x36x8xf32>
      %cst_115 = arith.constant dense<0.000000e+00> : vector<8x36xf32>
      %312 = vector.multi_reduction <add>, %311, %cst_115 [2] : vector<8x36x8xf32> to vector<8x36xf32>
      %313 = vector.shape_cast %312 : vector<8x36xf32> to vector<8x36x1xf32>
      %cst_116 = arith.constant 8.000000e+00 : f32
      %314 = vector.broadcast %cst_116 : f32 to vector<8x36x1xf32>
      %315 = arith.divf %313, %314 : vector<8x36x1xf32>
      %316 = vector.broadcast %315 : vector<8x36x1xf32> to vector<8x36x8xf32>
      %317 = arith.subf %311, %316 : vector<8x36x8xf32>
      %318 = arith.mulf %317, %317 : vector<8x36x8xf32>
      %cst_117 = arith.constant dense<0.000000e+00> : vector<8x36xf32>
      %319 = vector.multi_reduction <add>, %318, %cst_117 [2] : vector<8x36x8xf32> to vector<8x36xf32>
      %320 = vector.shape_cast %319 : vector<8x36xf32> to vector<8x36x1xf32>
      %cst_118 = arith.constant 0.142857149 : f32
      %321 = vector.broadcast %cst_118 : f32 to vector<8x36x1xf32>
      %322 = arith.mulf %320, %321 : vector<8x36x1xf32>
      %cst_119 = arith.constant 9.99999997E-7 : f32
      %cst_120 = arith.constant 1.000000e+06 : f32
      %323 = vector.broadcast %cst_119 : f32 to vector<8x36x1xf32>
      %324 = arith.maximumf %323, %322 : vector<8x36x1xf32>
      %325 = vector.broadcast %cst_120 : f32 to vector<8x36x1xf32>
      %326 = arith.minimumf %325, %324 : vector<8x36x1xf32>
      %327 = math.log %326 : vector<8x36x1xf32>
      %c0_121 = arith.constant 0 : index
      %c0_122 = arith.constant 0 : index
      %c0_123 = arith.constant 0 : index
      %c0_124 = arith.constant 0 : index
      %328 = vector.load %arg6[%c0_121, %c0_122, %c0_123, %c0_124] : memref<4x8x36x4xf32, #tpu.memory_space<vmem>>, vector<1x8x36x4xf32>
      %329 = vector.shape_cast %328 : vector<1x8x36x4xf32> to vector<8x36x4xf32>
      %330 = vector.broadcast %327 : vector<8x36x1xf32> to vector<8x36x4xf32>
      %331 = arith.mulf %330, %329 : vector<8x36x4xf32>
      %cst_125 = arith.constant dense<0.000000e+00> : vector<36x4xf32>
      %332 = vector.multi_reduction <add>, %331, %cst_125 [0] : vector<8x36x4xf32> to vector<36x4xf32>
      %cst_126 = arith.constant dense<0.000000e+00> : vector<4xf32>
      %333 = vector.multi_reduction <add>, %332, %cst_126 [0] : vector<36x4xf32> to vector<4xf32>
      %334 = arith.addf %310, %333 : vector<4xf32>
      %335 = vector.extract_strided_slice %308 {offsets = [0, 0, 8], sizes = [8, 36, 8], strides = [1, 1, 1]} : vector<8x36x32xf32> to vector<8x36x8xf32>
      %cst_127 = arith.constant dense<0.000000e+00> : vector<8x36xf32>
      %336 = vector.multi_reduction <add>, %335, %cst_127 [2] : vector<8x36x8xf32> to vector<8x36xf32>
      %337 = vector.shape_cast %336 : vector<8x36xf32> to vector<8x36x1xf32>
      %cst_128 = arith.constant 8.000000e+00 : f32
      %338 = vector.broadcast %cst_128 : f32 to vector<8x36x1xf32>
      %339 = arith.divf %337, %338 : vector<8x36x1xf32>
      %340 = vector.broadcast %339 : vector<8x36x1xf32> to vector<8x36x8xf32>
      %341 = arith.subf %335, %340 : vector<8x36x8xf32>
      %342 = arith.mulf %341, %341 : vector<8x36x8xf32>
      %cst_129 = arith.constant dense<0.000000e+00> : vector<8x36xf32>
      %343 = vector.multi_reduction <add>, %342, %cst_129 [2] : vector<8x36x8xf32> to vector<8x36xf32>
      %344 = vector.shape_cast %343 : vector<8x36xf32> to vector<8x36x1xf32>
      %cst_130 = arith.constant 0.142857149 : f32
      %345 = vector.broadcast %cst_130 : f32 to vector<8x36x1xf32>
      %346 = arith.mulf %344, %345 : vector<8x36x1xf32>
      %cst_131 = arith.constant 9.99999997E-7 : f32
      %cst_132 = arith.constant 1.000000e+06 : f32
      %347 = vector.broadcast %cst_131 : f32 to vector<8x36x1xf32>
      %348 = arith.maximumf %347, %346 : vector<8x36x1xf32>
      %349 = vector.broadcast %cst_132 : f32 to vector<8x36x1xf32>
      %350 = arith.minimumf %349, %348 : vector<8x36x1xf32>
      %351 = math.log %350 : vector<8x36x1xf32>
      %c1_133 = arith.constant 1 : index
      %c0_134 = arith.constant 0 : index
      %c0_135 = arith.constant 0 : index
      %c0_136 = arith.constant 0 : index
      %352 = vector.load %arg6[%c1_133, %c0_134, %c0_135, %c0_136] : memref<4x8x36x4xf32, #tpu.memory_space<vmem>>, vector<1x8x36x4xf32>
      %353 = vector.shape_cast %352 : vector<1x8x36x4xf32> to vector<8x36x4xf32>
      %354 = vector.broadcast %351 : vector<8x36x1xf32> to vector<8x36x4xf32>
      %355 = arith.mulf %354, %353 : vector<8x36x4xf32>
      %cst_137 = arith.constant dense<0.000000e+00> : vector<36x4xf32>
      %356 = vector.multi_reduction <add>, %355, %cst_137 [0] : vector<8x36x4xf32> to vector<36x4xf32>
      %cst_138 = arith.constant dense<0.000000e+00> : vector<4xf32>
      %357 = vector.multi_reduction <add>, %356, %cst_138 [0] : vector<36x4xf32> to vector<4xf32>
      %358 = arith.addf %334, %357 : vector<4xf32>
      %359 = vector.extract_strided_slice %308 {offsets = [0, 0, 16], sizes = [8, 36, 8], strides = [1, 1, 1]} : vector<8x36x32xf32> to vector<8x36x8xf32>
      %cst_139 = arith.constant dense<0.000000e+00> : vector<8x36xf32>
      %360 = vector.multi_reduction <add>, %359, %cst_139 [2] : vector<8x36x8xf32> to vector<8x36xf32>
      %361 = vector.shape_cast %360 : vector<8x36xf32> to vector<8x36x1xf32>
      %cst_140 = arith.constant 8.000000e+00 : f32
      %362 = vector.broadcast %cst_140 : f32 to vector<8x36x1xf32>
      %363 = arith.divf %361, %362 : vector<8x36x1xf32>
      %364 = vector.broadcast %363 : vector<8x36x1xf32> to vector<8x36x8xf32>
      %365 = arith.subf %359, %364 : vector<8x36x8xf32>
      %366 = arith.mulf %365, %365 : vector<8x36x8xf32>
      %cst_141 = arith.constant dense<0.000000e+00> : vector<8x36xf32>
      %367 = vector.multi_reduction <add>, %366, %cst_141 [2] : vector<8x36x8xf32> to vector<8x36xf32>
      %368 = vector.shape_cast %367 : vector<8x36xf32> to vector<8x36x1xf32>
      %cst_142 = arith.constant 0.142857149 : f32
      %369 = vector.broadcast %cst_142 : f32 to vector<8x36x1xf32>
      %370 = arith.mulf %368, %369 : vector<8x36x1xf32>
      %cst_143 = arith.constant 9.99999997E-7 : f32
      %cst_144 = arith.constant 1.000000e+06 : f32
      %371 = vector.broadcast %cst_143 : f32 to vector<8x36x1xf32>
      %372 = arith.maximumf %371, %370 : vector<8x36x1xf32>
      %373 = vector.broadcast %cst_144 : f32 to vector<8x36x1xf32>
      %374 = arith.minimumf %373, %372 : vector<8x36x1xf32>
      %375 = math.log %374 : vector<8x36x1xf32>
      %c2_145 = arith.constant 2 : index
      %c0_146 = arith.constant 0 : index
      %c0_147 = arith.constant 0 : index
      %c0_148 = arith.constant 0 : index
      %376 = vector.load %arg6[%c2_145, %c0_146, %c0_147, %c0_148] : memref<4x8x36x4xf32, #tpu.memory_space<vmem>>, vector<1x8x36x4xf32>
      %377 = vector.shape_cast %376 : vector<1x8x36x4xf32> to vector<8x36x4xf32>
      %378 = vector.broadcast %375 : vector<8x36x1xf32> to vector<8x36x4xf32>
      %379 = arith.mulf %378, %377 : vector<8x36x4xf32>
      %cst_149 = arith.constant dense<0.000000e+00> : vector<36x4xf32>
      %380 = vector.multi_reduction <add>, %379, %cst_149 [0] : vector<8x36x4xf32> to vector<36x4xf32>
      %cst_150 = arith.constant dense<0.000000e+00> : vector<4xf32>
      %381 = vector.multi_reduction <add>, %380, %cst_150 [0] : vector<36x4xf32> to vector<4xf32>
      %382 = arith.addf %358, %381 : vector<4xf32>
      %383 = vector.extract_strided_slice %308 {offsets = [0, 0, 24], sizes = [8, 36, 8], strides = [1, 1, 1]} : vector<8x36x32xf32> to vector<8x36x8xf32>
      %cst_151 = arith.constant dense<0.000000e+00> : vector<8x36xf32>
      %384 = vector.multi_reduction <add>, %383, %cst_151 [2] : vector<8x36x8xf32> to vector<8x36xf32>
      %385 = vector.shape_cast %384 : vector<8x36xf32> to vector<8x36x1xf32>
      %cst_152 = arith.constant 8.000000e+00 : f32
      %386 = vector.broadcast %cst_152 : f32 to vector<8x36x1xf32>
      %387 = arith.divf %385, %386 : vector<8x36x1xf32>
      %388 = vector.broadcast %387 : vector<8x36x1xf32> to vector<8x36x8xf32>
      %389 = arith.subf %383, %388 : vector<8x36x8xf32>
      %390 = arith.mulf %389, %389 : vector<8x36x8xf32>
      %cst_153 = arith.constant dense<0.000000e+00> : vector<8x36xf32>
      %391 = vector.multi_reduction <add>, %390, %cst_153 [2] : vector<8x36x8xf32> to vector<8x36xf32>
      %392 = vector.shape_cast %391 : vector<8x36xf32> to vector<8x36x1xf32>
      %cst_154 = arith.constant 0.142857149 : f32
      %393 = vector.broadcast %cst_154 : f32 to vector<8x36x1xf32>
      %394 = arith.mulf %392, %393 : vector<8x36x1xf32>
      %cst_155 = arith.constant 9.99999997E-7 : f32
      %cst_156 = arith.constant 1.000000e+06 : f32
      %395 = vector.broadcast %cst_155 : f32 to vector<8x36x1xf32>
      %396 = arith.maximumf %395, %394 : vector<8x36x1xf32>
      %397 = vector.broadcast %cst_156 : f32 to vector<8x36x1xf32>
      %398 = arith.minimumf %397, %396 : vector<8x36x1xf32>
      %399 = math.log %398 : vector<8x36x1xf32>
      %c3_157 = arith.constant 3 : index
      %c0_158 = arith.constant 0 : index
      %c0_159 = arith.constant 0 : index
      %c0_160 = arith.constant 0 : index
      %400 = vector.load %arg6[%c3_157, %c0_158, %c0_159, %c0_160] : memref<4x8x36x4xf32, #tpu.memory_space<vmem>>, vector<1x8x36x4xf32>
      %401 = vector.shape_cast %400 : vector<1x8x36x4xf32> to vector<8x36x4xf32>
      %402 = vector.broadcast %399 : vector<8x36x1xf32> to vector<8x36x4xf32>
      %403 = arith.mulf %402, %401 : vector<8x36x4xf32>
      %cst_161 = arith.constant dense<0.000000e+00> : vector<36x4xf32>
      %404 = vector.multi_reduction <add>, %403, %cst_161 [0] : vector<8x36x4xf32> to vector<36x4xf32>
      %cst_162 = arith.constant dense<0.000000e+00> : vector<4xf32>
      %405 = vector.multi_reduction <add>, %404, %cst_162 [0] : vector<36x4xf32> to vector<4xf32>
      %406 = arith.addf %382, %405 : vector<4xf32>
      %407 = tpu.concatenate %327, %351, %375, %399 in 2 : vector<8x36x1xf32>, vector<8x36x1xf32>, vector<8x36x1xf32>, vector<8x36x1xf32> -> vector<8x36x4xf32>
      %c0_163 = arith.constant 0 : index
      %c0_164 = arith.constant 0 : index
      %c0_165 = arith.constant 0 : index
      %c0_166 = arith.constant 0 : index
      %408 = vector.load %arg9[%c0_163, %c0_164, %c0_165, %c0_166] : memref<1x8x36x4xf32, #tpu.memory_space<vmem>>, vector<1x8x36x4xf32>
      %409 = vector.shape_cast %408 : vector<1x8x36x4xf32> to vector<8x36x4xf32>
      %410 = vector.shape_cast %407 : vector<8x36x4xf32> to vector<1x8x36x4xf32>
      tpu.vector_store %arg9[%c0_163, %c0_164, %c0_165, %c0_166], %410 {strides = array<i32>} : memref<1x8x36x4xf32, #tpu.memory_space<vmem>>, vector<1x8x36x4xf32>,
      %411 = vector.shape_cast %406 : vector<4xf32> to vector<1x4xf32>
      %cst_167 = arith.constant dense<0xFF800000> : vector<1xf32>
      %412 = vector.multi_reduction <maximumf>, %411, %cst_167 [1] : vector<1x4xf32> to vector<1xf32>
      %413 = vector.shape_cast %412 : vector<1xf32> to vector<1x1xf32>
      %414 = vector.extract %413[0, 0] : f32 from vector<1x1xf32>
      %415 = vector.broadcast %414 : f32 to vector<4xf32>
      %416 = arith.subf %406, %415 : vector<4xf32>
      %417 = math.exp %416 : vector<4xf32>
      %418 = vector.shape_cast %417 : vector<4xf32> to vector<1x4xf32>
      %cst_168 = arith.constant dense<0.000000e+00> : vector<1xf32>
      %419 = vector.multi_reduction <add>, %418, %cst_168 [1] : vector<1x4xf32> to vector<1xf32>
      %420 = vector.shape_cast %419 : vector<1xf32> to vector<1x1xf32>
      %421 = vector.extract %420[0, 0] : f32 from vector<1x1xf32>
      %422 = math.log %421 : f32
      %423 = arith.addf %422, %414 : f32
      %424 = vector.broadcast %423 : f32 to vector<4xf32>
      %425 = arith.subf %406, %424 : vector<4xf32>
      %c0_169 = arith.constant 0 : index
      %c0_170 = arith.constant 0 : index
      %c0_171 = arith.constant 0 : index
      %426 = vector.load %arg8[%c0_169, %c0_170, %c0_171] : memref<1x1x4xf32, #tpu.memory_space<vmem>>, vector<1x1x4xf32>
      %427 = vector.shape_cast %426 : vector<1x1x4xf32> to vector<4xf32>
      %428 = vector.shape_cast %425 : vector<4xf32> to vector<1x1x4xf32>
      tpu.vector_store %arg8[%c0_169, %c0_170, %c0_171], %428 {strides = array<i32>} : memref<1x1x4xf32, #tpu.memory_space<vmem>>, vector<1x1x4xf32>,
    } else {
    }
    return
  }
  func.func @transform_0(%arg0: i32, %arg1: i32) -> (i32, i32, i32, i32) {
    %c0_i32 = arith.constant 0 : i32
    %c0_i32_0 = arith.constant 0 : i32
    %c0_i32_1 = arith.constant 0 : i32
    return %arg0, %arg1, %c0_i32, %c0_i32_0 : i32, i32, i32, i32
  }
  func.func @transform_1(%arg0: i32, %arg1: i32) -> (i32, i32, i32) {
    %c0_i32 = arith.constant 0 : i32
    %c0_i32_0 = arith.constant 0 : i32
    %c0_i32_1 = arith.constant 0 : i32
    %c0_i32_2 = arith.constant 0 : i32
    return %c0_i32, %c0_i32_0, %c0_i32_1 : i32, i32, i32
  }
  func.func @transform_2(%arg0: i32, %arg1: i32) -> (i32, i32, i32, i32) {
    %c0_i32 = arith.constant 0 : i32
    %c0_i32_0 = arith.constant 0 : i32
    %c0_i32_1 = arith.constant 0 : i32
    %c0_i32_2 = arith.constant 0 : i32
    return %arg1, %c0_i32, %c0_i32_0, %c0_i32_1 : i32, i32, i32, i32
  }
  func.func @transform_3(%arg0: i32, %arg1: i32) -> (i32, i32, i32) {
    %c0_i32 = arith.constant 0 : i32
    %c0_i32_0 = arith.constant 0 : i32
    %c0_i32_1 = arith.constant 0 : i32
    %c0_i32_2 = arith.constant 0 : i32
    return %c0_i32, %c0_i32_0, %c0_i32_1 : i32, i32, i32
  }
  func.func @transform_4(%arg0: i32, %arg1: i32) -> (i32, i32, i32, i32) {
    %c0_i32 = arith.constant 0 : i32
    %c0_i32_0 = arith.constant 0 : i32
    %c0_i32_1 = arith.constant 0 : i32
    %c0_i32_2 = arith.constant 0 : i32
    %c0_i32_3 = arith.constant 0 : i32
    return %c0_i32, %c0_i32_0, %c0_i32_1, %c0_i32_2 : i32, i32, i32, i32
  }
  func.func @transform_5(%arg0: i32, %arg1: i32) -> (i32, i32) {
    %c0_i32 = arith.constant 0 : i32
    %c0_i32_0 = arith.constant 0 : i32
    %c0_i32_1 = arith.constant 0 : i32
    return %c0_i32, %c0_i32_0 : i32, i32
  }
  func.func @transform_6(%arg0: i32, %arg1: i32) -> (i32, i32, i32) {
    %c0_i32 = arith.constant 0 : i32
    %c0_i32_0 = arith.constant 0 : i32
    %c0_i32_1 = arith.constant 0 : i32
    return %arg0, %c0_i32, %c0_i32_0 : i32, i32, i32
  }
  func.func @transform_7(%arg0: i32, %arg1: i32) -> (i32, i32, i32, i32) {
    %c0_i32 = arith.constant 0 : i32
    %c0_i32_0 = arith.constant 0 : i32
    %c0_i32_1 = arith.constant 0 : i32
    %c0_i32_2 = arith.constant 0 : i32
    return %arg0, %c0_i32, %c0_i32_0, %c0_i32_1 : i32, i32, i32, i32
  }
}

</mosaic_0001>

<bundles_post_ra>
// kernel: fbmsnet_forward.1
= control target key start
LH: loop header
LB: loop body
LE: loop exit
PB: predicated region body
PF: predicated region fallthrough
CT: control target
= control target key end

     0   :  { %13 = vsyncpa [#allocation4], 0  ;;  %s14029_s0 = inlined_call_operand.vmem [shape: bf16[2,4,16,256], index: 0, kind: input, shape index: {}]   ;;  %s14030_s1 = inlined_call_operand.vmem [shape: bf16[16,36,128], index: 1, kind: input, shape index: {}]   ;;  %s14031_s2 = inlined_call_operand.vmem [shape: f32[4,8,36,1], index: 2, kind: input, shape index: {}]   ;;  %s14032_s3 = inlined_call_operand.vmem [shape: f32[8,36,1], index: 3, kind: input, shape index: {}]   ;;  %s14033_s4 = inlined_call_operand.vmem [shape: f32[4,8,36,4], index: 4, kind: input, shape index: {}]   ;;  %s14034_s5 = inlined_call_operand.vmem [shape: f32[1,4], index: 5, kind: input, shape index: {}]   ;;  %s14035_s6 = inlined_call_operand.hbm [shape: f32[2,1,4], index: 6, kind: output, shape index: {0}]   ;;  %s14036_s7 = inlined_call_operand.vmem [shape: f32[2,8,36,4], index: 7, kind: output, shape index: {1}]  }
   0x1   :  { %15 = vsyncpa [#allocation4 + $0x1], 0  ;;  %s9075_s24 = smov 0   ;;  %s9077_s25 = smov 0  }
   0x2   :  { %s9079_s26 = smov 0   ;;  %s9081_s27 = smov 0  }
   0x3   :  { %s9083_s28 = smov 0   ;;  %s9085_s29 = smov 0  }
   0x4   :  { %s9087_s30 = smov 0   ;;  %s9089_s8 = smov 0  }
   0x5 LB: > { %14142 = sst [smem:[#allocation6_spill]] %s8974_s24  ;;  %s7337_s9 = sadd.s32 4294967295, %s9002_s8   ;;  %s9002_s8 = sphi %s9089_s8, %s21_s8   ;;  %s8998_s30 = sphi %s9087_s30, %s14407_s30   ;;  %s8994_s29 = sphi %s9085_s29, %s14403_s29   ;;  %s8990_s28 = sphi %s9083_s28, %s14402_s28   ;;  %s8986_s27 = sphi %s9081_s27, %s14401_s27   ;;  %s8982_s26 = sphi %s9079_s26, %s14400_s26   ;;  %s8978_s25 = sphi %s9077_s25, %s14406_s25   ;;  %s8974_s24 = sphi %s9075_s24, %s14405_s24  }
   0x6   : > { %14143 = sst [smem:[#allocation7_spill]] %s8982_s26  ;;  %s7338_s10 = sadd.s32 4294967294, %s9002_s8  }
   0x7   : > { %14144 = sst [smem:[#allocation8_spill]] %s8994_s29  ;;  %s30_s11 = sadd.s32 1, %s8994_s29 }
   0x8   : > { %14145 = sst [smem:[#allocation9_spill]] %s8998_s30  ;;  %p31_p0 = scmp.ge.s32.totalorder %s30_s11, 4 }
   0x9   : > { %s33_s12 = sadd.s32 1, %s8998_s30  ;;  %p188_p1 = scmp.ne.s32.totalorder %s8982_s26, %s8978_s25 }
   0xa   : > { %p189_p2 = scmp.eq.s32.totalorder %s7337_s9, 7  ;;  %s14409_s11 = smov (%p31_p0, %s30_s11), 0 }
   0xb   : > { %14146 = sst [smem:[#allocation10_spill]] %s14409_s11  ;;  %s14411_s12 = smov (!%p31_p0, %s33_s12), %s8998_s30 }
   0xc   : > { %p9124_p3 = por %p189_p2, %p188_p1  ;;  %p194_p4 = scmp.ne.s32.totalorder %s8978_s25, %s8974_s24 }
   0xd   : > { %p35_p5 = scmp.ge.s32.totalorder %s14411_s12, 2  ;;  %p195_p6 = scmp.eq.s32.totalorder %s7338_s10, 7 }
   0xe   : > { %p7341_p7 = scmp.ge.s32.totalorder %s9002_s8, 1  ;;  %p271_p8 = scmp.lt.s32.totalorder %s9002_s8, 9 }
   0xf   : > { %s14413_s12 = smov (%p35_p5, %s14411_s12), 0  ;;  %p9134_p9 = por %p195_p6, %p194_p4 }
  0x10   : > { %14148 = sst [smem:[#allocation11_spill]] %s14413_s12  ;;  %p272_p10 = pnand %p7341_p7, %p271_p8 }
  0x11   : > { %s14149_s14 = scalar_select %p9134_p9, 1, 0 }
  0x12   : > { %s175_s15 = ssub.s32 %s8998_s30, %s14413_s12  ;;  %s178_s16 = sadd.s32 1, %s8982_s26 }
  0x13   : > { %14150 = sst [smem:[#allocation12_spill]] %s14149_s14  ;;  %p176_p11 = scmp.eq.s32.totalorder %s175_s15, 0 }
  0x14   : > { %275 = sbr.rel (%p272_p10) target bundleno = 3143 (0xc47), region = 44 }
  0x15   : > { %s9142_s17 = scalar_select %p176_p11, %s8982_s26, %s178_s16  }
  0x17   : > { %14151 = sst [smem:[#allocation13_spill]] %s9142_s17 }
  0x19   : > { %p316_p12 = scmp.lt.s32.totalorder %s8990_s28, 1  ;;  %p318_p13 = scmp.lt.s32.totalorder %s8986_s27, 3 }
  0x1a   : > { %p7347_p0 = scmp.ne.s32.totalorder %s8986_s27, 0 }
  0x1b   : > { %s317_s19 = scalar_select %p316_p12, %s8990_s28, 1 }
  0x1c   : > { %s319_s20 = scalar_select %p318_p13, %s8986_s27, 3 }
  0x1d   : > { %s7343_s21 = sshll.u32 %s317_s19, 4  ;;  %s8262_s22 = smul.u32 320, %s317_s19 }
  0x1e   : > { %s7342_s23 = sshll.u32 %s319_s20, 2  ;;  %s8261_s9 = smul.u32 320, %s319_s20 }
  0x1f   : > { %s322_s10 = sadd.s32 %s7343_s21, %s7342_s23  ;;  %s9152_s12 = scalar_lea.vmem %s14036_s7, %s8262_s22 }
  0x20   : > { %s7344_s11 = sshll.u32 %s322_s10, 2  ;;  %s9157_s17 = scalar_lea.vmem %s14031_s2, %s8261_s9 }
  0x21   : > { %s9162_s14 = scalar_lea.vmem %s14029_s0, %s7344_s11  ;;  %s14152_s19 = sand.u32 1, %s8978_s25  }
  0x22   : > { %s9166_s24 = scalar_lea.vmem [#allocation3], %s14152_s19  ;;  %339 = sbr.rel (%p7347_p0) target bundleno = 60 (0x3c), region = 48 }
  0x27   : > { %vm340_vm0 = vcmask 261120   ;;  %vm345_vm1 = vcmask 257024   ;;  %v9004_v0 = vmov 0.0  }
  0x28   : > { %341 = vst.msk [vmem:[#allocation2] sm:$0xff] %vm340_vm0, %v9004_v0  ;;  %342 = vst.msk [vmem:[#allocation2 + $0x8] sm:$0xff] %vm340_vm0, %v9004_v0 }
  0x29   : > { %343 = vst.msk [vmem:[#allocation2 + $0x10] sm:$0xff] %vm340_vm0, %v9004_v0  ;;  %344 = vst.msk [vmem:[#allocation2 + $0x18] sm:$0xff] %vm340_vm0, %v9004_v0 }
  0x2a   : > { %347 = vst.msk [vmem:[#allocation2 + $0x28] sm:$0xff] %vm340_vm0, %v9004_v0  ;;  %348 = vst.msk [vmem:[#allocation2 + $0x30] sm:$0xff] %vm340_vm0, %v9004_v0 }
  0x2b   : > { %349 = vst.msk [vmem:[#allocation2 + $0x38] sm:$0xff] %vm340_vm0, %v9004_v0  ;;  %350 = vst.msk [vmem:[#allocation2 + $0x40] sm:$0xff] %vm340_vm0, %v9004_v0 }
  0x2c   : > { %352 = vst.msk [vmem:[#allocation2 + $0x50] sm:$0xff] %vm340_vm0, %v9004_v0  ;;  %353 = vst.msk [vmem:[#allocation2 + $0x58] sm:$0xff] %vm340_vm0, %v9004_v0 }
  0x2d   : > { %354 = vst.msk [vmem:[#allocation2 + $0x60] sm:$0xff] %vm340_vm0, %v9004_v0  ;;  %355 = vst.msk [vmem:[#allocation2 + $0x68] sm:$0xff] %vm340_vm0, %v9004_v0 }
  0x2e   : > { %357 = vst.msk [vmem:[#allocation2 + $0x78] sm:$0xff] %vm340_vm0, %v9004_v0  ;;  %358 = vst.msk [vmem:[#allocation2 + $0x80] sm:$0xff] %vm340_vm0, %v9004_v0 }
  0x2f   : > { %359 = vst.msk [vmem:[#allocation2 + $0x88] sm:$0xff] %vm340_vm0, %v9004_v0  ;;  %360 = vst.msk [vmem:[#allocation2 + $0x90] sm:$0xff] %vm340_vm0, %v9004_v0 }
  0x30   : > { %362 = vst.msk [vmem:[#allocation2 + $0xa0] sm:$0xff] %vm340_vm0, %v9004_v0  ;;  %363 = vst.msk [vmem:[#allocation2 + $0xa8] sm:$0xff] %vm340_vm0, %v9004_v0 }
  0x31   : > { %364 = vst.msk [vmem:[#allocation2 + $0xb0] sm:$0xff] %vm340_vm0, %v9004_v0  ;;  %365 = vst.msk [vmem:[#allocation2 + $0xb8] sm:$0xff] %vm340_vm0, %v9004_v0 }
  0x32   : > { %367 = vst.msk [vmem:[#allocation2 + $0xc8] sm:$0xff] %vm340_vm0, %v9004_v0  ;;  %368 = vst.msk [vmem:[#allocation2 + $0xd0] sm:$0xff] %vm340_vm0, %v9004_v0 }
  0x33   : > { %369 = vst.msk [vmem:[#allocation2 + $0xd8] sm:$0xff] %vm340_vm0, %v9004_v0  ;;  %370 = vst.msk [vmem:[#allocation2 + $0xe0] sm:$0xff] %vm340_vm0, %v9004_v0 }
  0x34   : > { %372 = vst.msk [vmem:[#allocation2 + $0xf0] sm:$0xff] %vm340_vm0, %v9004_v0  ;;  %373 = vst.msk [vmem:[#allocation2 + $0xf8] sm:$0xff] %vm340_vm0, %v9004_v0 }
  0x35   : > { %374 = vst.msk [vmem:[#allocation2 + $0x100] sm:$0xff] %vm340_vm0, %v9004_v0  ;;  %375 = vst.msk [vmem:[#allocation2 + $0x108] sm:$0xff] %vm340_vm0, %v9004_v0 }
  0x36   : > { %377 = vst.msk [vmem:[#allocation2 + $0x118] sm:$0xff] %vm340_vm0, %v9004_v0  ;;  %378 = vst.msk [vmem:[#allocation2 + $0x120] sm:$0xff] %vm340_vm0, %v9004_v0 }
  0x37   : > { %379 = vst.msk [vmem:[#allocation2 + $0x128] sm:$0xff] %vm340_vm0, %v9004_v0  ;;  %380 = vst.msk [vmem:[#allocation2 + $0x130] sm:$0xff] %vm340_vm0, %v9004_v0 }
  0x38   : > { %346 = vst.msk [vmem:[#allocation2 + $0x20] sm:$0xf] %vm345_vm1, %v9004_v0  ;;  %351 = vst.msk [vmem:[#allocation2 + $0x48] sm:$0xf] %vm345_vm1, %v9004_v0 }
  0x39   : > { %356 = vst.msk [vmem:[#allocation2 + $0x70] sm:$0xf] %vm345_vm1, %v9004_v0  ;;  %361 = vst.msk [vmem:[#allocation2 + $0x98] sm:$0xf] %vm345_vm1, %v9004_v0 }
  0x3a   : > { %366 = vst.msk [vmem:[#allocation2 + $0xc0] sm:$0xf] %vm345_vm1, %v9004_v0  ;;  %371 = vst.msk [vmem:[#allocation2 + $0xe8] sm:$0xf] %vm345_vm1, %v9004_v0 }
  0x3b   : > { %376 = vst.msk [vmem:[#allocation2 + $0x110] sm:$0xf] %vm345_vm1, %v9004_v0  ;;  %381 = vst.msk [vmem:[#allocation2 + $0x138] sm:$0xf] %vm345_vm1, %v9004_v0 }
  0x3c PF: > { %v9210_v1 = vld [vmem:[%s9162_s14] ss:$8 sps:$4 sm:$0xff]   ;;  %s9005_s26 = smov 121   ;;  %s9006_s29 = smov 123   ;;  %v9007_v2 = vmov 0.0   ;;  %vm9018_vm2 = vmmov 0  }
  0x3d   : > { %408 = vrot.lane.b32.xlu0 %v9210_v1, %s9005_s26  ;;  %402 = vrot.lane.b32.xlu1 %v9210_v1, %s9006_s29  ;;  %s9008_s30 = smov 122   ;;  %s9009_s11 = smov 124   ;;  %v8375_v10 = vld [vmem:[%s14030_s1] sm:$0xff]   ;;  %v8377_v11 = vld [vmem:[%s14030_s1 + $0x8] sm:$0xff]   ;;  %vm1689_vm3 = vcmask 990208   ;;  %vm1685_vm4 = vcmask 998400  }
  0x3e   : > { %7841 = vmatprep.subr.bf16.mxu1 %v9007_v2  ;;  %7813 = vmatprep.subr.bf16.mxu0 %v9007_v2  ;;  %s9010_s18 = smov 125   ;;  %s9011_s20 = smov 126   ;;  %v8378_v12 = vld [vmem:[%s14030_s1 + $0x10] ss:$0 sps:$4 sm:$0x33]   ;;  %v8376_v34 = vld [vmem:[%s14030_s1 + $0x14] sm:$0xff]  }
  0x3f   : > { %s14043_s21 = smov 127   ;;  %s9013_s22 = smov 112   ;;  %7857 = vmatprep.mubr.msk.bf16.mxu1 %vm9018_vm2, %v9007_v2  ;;  %7829 = vmatprep.mubr.msk.bf16.mxu0 %vm9018_vm2, %v9007_v2  ;;  %v9382_v15 = vld [vmem:[%s9162_s14 + $0x4] ss:$8 sps:$4 sm:$0xff]   ;;  %v8379_v39 = vld [vmem:[%s14030_s1 + $0x1c] sm:$0xff]   ;;  %v8385_v61 = vld [vmem:[%s14030_s1 + $0x30] sm:$0xff]  }
  0x40   : > { %s9014_s23 = smov 120   ;;  %s9015_s9 = smov 96   ;;  %v8380_v44 = vld [vmem:[%s14030_s1 + $0x3c] sm:$0xff]   ;;  %v8381_v45 = vld [vmem:[%s14030_s1 + $0x24] ss:$0 sps:$4 sm:$0x33]  }
  0x41   : > { %405 = vrot.lane.b32.xlu0 %v9210_v1, %s9008_s30  ;;  %399 = vrot.lane.b32.xlu1 %v9210_v1, %s9009_s11  ;;  %s9016_s10 = smov 104   ;;  %s9017_s15 = smov 88   ;;  %v8383_v50 = vld [vmem:[%s14030_s1 + $0x44] sm:$0xff]   ;;  %v8384_v56 = vld [vmem:[%s14030_s1 + $0x4c] ss:$0 sps:$4 sm:$0x33]  }
  0x42   : > { %v8382_v55 = vld [vmem:[%s14030_s1 + $0x28] sm:$0xff]   ;;  %s9026_s16 = smov 32   ;;  %vm1681_vm5 = vcmask 1006592   ;;  %vm1677_vm6 = vcmask 1014784   ;;  %vm1673_vm7 = vcmask 1022976   ;;  %vm1669_vm8 = vcmask 1031168  }
  0x43   : > { %vm1665_vm9 = vcmask 1039360   ;;  %vm1852_vm10 = vcmask 195584   ;;  %vm1984_vm11 = vcmask 130048   ;;  %vm2116_vm12 = vcmask 64512   ;;  %p7473_p1 = scmp.ne.s32.totalorder %s8986_s27, 3 }
  0x44   : > { %vm2274_vm13 = vcmask 261120   ;;  %vm2279_vm14 = vcmask 257024  }
  0x45   : > { %396 = vrot.lane.b32.xlu0 %v9210_v1, %s9010_s18  ;;  %393 = vrot.lane.b32.xlu1 %v9210_v1, %s9011_s20 }
  0x49   : > { %390 = vrot.lane.b32.xlu0 %v9210_v1, %s14043_s21  ;;  %612 = vrot.lane.b32.xlu1 %v9210_v1, %s9013_s22  ;;  %s9019_s21 = smov 80  }
  0x4d   : > { %438 = vrot.lane.b32.xlu0 %v9210_v1, %s9014_s23  ;;  %826 = vrot.lane.b32.xlu1 %v9210_v1, %s9015_s9 }
  0x51   : > { %719 = vrot.lane.b32.xlu0 %v9210_v1, %s9016_s10 }
  0x55   : > { %933 = vrot.lane.b32.xlu0 %v9210_v1, %s9017_s15 }
  0xaf   : > { %v9238_v3 = vpop.permute.xlu0 %408  ;;  %v9240_v4 = vpop.permute.xlu1 %402 }
  0xb0   : > { %7842 = vmatpush3.bf16.msra.mxu1 %v9238_v3  ;;  %452 = vrot.lane.b32.xlu1 %v9238_v3, %s9014_s23 }
  0xb1   : > { %7843 = vmatprep.subr.bf16.mxu1 %v9007_v2 }
  0xb3   : > { %v9250_v5 = vpop.permute.xlu0 %405  ;;  %v9255_v6 = vpop.permute.xlu1 %399 }
  0xb4   : > { %448 = vrot.lane.b32.xlu1 %v9240_v4, %s9014_s23  ;;  %7844 = vmatpush3.bf16.msra.mxu1 %v9250_v5 }
  0xb5   : > { %450 = vrot.lane.b32.xlu0 %v9250_v5, %s9014_s23  ;;  %7845 = vmatprep.subr.bf16.mxu1 %v9007_v2 }
  0xb7   : > { %v9260_v7 = vpop.permute.xlu0 %396  ;;  %v9268_v8 = vpop.permute.xlu1 %393 }
  0xb8   : > { %7846 = vmatpush3.bf16.msra.mxu1 %v9240_v4  ;;  %444 = vrot.lane.b32.xlu1 %v9260_v7, %s9014_s23 }
  0xb9   : > { %446 = vrot.lane.b32.xlu0 %v9255_v6, %s9014_s23  ;;  %7847 = vmatprep.subr.bf16.mxu1 %v9007_v2 }
  0xbb   : > { %v9270_v9 = vpop.permute.xlu0 %390  ;;  %v9375_v14 = vpop.permute.xlu1 %612 }
  0xbc   : > { %7848 = vmatpush3.bf16.msra.mxu1 %v9255_v6  ;;  %440 = vrot.lane.b32.xlu1 %v9270_v9, %s9014_s23 }
  0xbd   : > { %442 = vrot.lane.b32.xlu0 %v9268_v8, %s9014_s23  ;;  %7849 = vmatprep.subr.bf16.mxu1 %v9007_v2  ;;  %s9025_s23 = smov 24  }
  0xbf   : > { %v9373_v13 = vpop.permute.xlu0 %438  ;;  %v9388_v17 = vpop.permute.xlu1 %826 }
  0xc0   : > { %7850 = vmatpush3.bf16.msra.mxu1 %v9260_v7  ;;  %626 = vrot.lane.b32.xlu1 %v9238_v3, %s9013_s22 }
  0xc1   : > { %733 = vrot.lane.b32.xlu0 %v9238_v3, %s9016_s10  ;;  %7851 = vmatprep.subr.bf16.mxu1 %v9007_v2 }
  0xc3   : > { %v9384_v16 = vpop.permute.xlu0 %719 }
  0xc4   : > { %7852 = vmatpush3.bf16.msra.mxu1 %v9268_v8  ;;  %624 = vrot.lane.b32.xlu1 %v9250_v5, %s9013_s22 }
  0xc5   : > { %731 = vrot.lane.b32.xlu0 %v9250_v5, %s9016_s10  ;;  %7853 = vmatprep.subr.bf16.mxu1 %v9007_v2 }
  0xc7   : > { %v9396_v18 = vpop.permute.xlu0 %933 }
  0xc8   : > { %7854 = vmatpush3.bf16.msra.mxu1 %v9270_v9  ;;  %622 = vrot.lane.b32.xlu1 %v9240_v4, %s9013_s22 }
  0xc9   : > { %729 = vrot.lane.b32.xlu0 %v9240_v4, %s9016_s10  ;;  %7855 = vmatprep.subr.bf16.mxu1 %v9007_v2 }
  0xcc   : > { %620 = vrot.lane.b32.xlu1 %v9255_v6, %s9013_s22  ;;  %7856 = vmatpush3.bf16.msra.mxu1 %v9210_v1 }
  0xcd   : > { %727 = vrot.lane.b32.xlu0 %v9255_v6, %s9016_s10  ;;  %7897 = vmatprep.subr.bf16.mxu1 %v9007_v2 }
  0xcf   : > { %7858 = vmatmul.mubr.bf16.vlgmr.msra.gmra.mxu1 %v8375_v10  ;;  %v8386_v10 = vld [vmem:[%s14030_s1 + $0x64] sm:$0xff]  }
  0xd0   : > { %618 = vrot.lane.b32.xlu1 %v9260_v7, %s9013_s22  ;;  %7861 = vmatprep.mubr.msk.bf16.mxu1 %vm9018_vm2, %v9007_v2 }
  0xd1   : > { %725 = vrot.lane.b32.xlu0 %v9260_v7, %s9016_s10 }
  0xd4   : > { %616 = vrot.lane.b32.xlu1 %v9268_v8, %s9013_s22 }
  0xd5   : > { %723 = vrot.lane.b32.xlu0 %v9268_v8, %s9016_s10 }
  0xd7   : > { %7862 = vmatmul.mubr.bf16.gmra.mxu1 %v8377_v11  ;;  %v8387_v11 = vld [vmem:[%s14030_s1 + $0x38] ss:$0 sps:$4 sm:$0x33]  }
  0xd8   : > { %614 = vrot.lane.b32.xlu1 %v9270_v9, %s9013_s22  ;;  %7865 = vmatprep.mubr.msk.bf16.mxu1 %vm9018_vm2, %v9007_v2  ;;  %s9020_s22 = smov 72  }
  0xd9   : > { %721 = vrot.lane.b32.xlu0 %v9270_v9, %s9016_s10  ;;  %s9022_s10 = smov 56  }
  0xdc   : > { %840 = vrot.lane.b32.xlu1 %v9238_v3, %s9015_s9 }
  0xdd   : > { %947 = vrot.lane.b32.xlu0 %v9238_v3, %s9017_s15 }
  0xdf   : > { %7866 = vmatmul.mubr.bf16.gmra.mxu1 %v8378_v12 }
  0xe0   : > { %838 = vrot.lane.b32.xlu1 %v9250_v5, %s9015_s9  ;;  %7913 = vmatprep.mubr.msk.bf16.mxu1 %vm9018_vm2, %v9007_v2 }
  0xe1   : > { %945 = vrot.lane.b32.xlu0 %v9250_v5, %s9017_s15 }
  0xe4   : > { %836 = vrot.lane.b32.xlu1 %v9240_v4, %s9015_s9 }
  0xe5   : > { %943 = vrot.lane.b32.xlu0 %v9240_v4, %s9017_s15 }
  0xe8   : > { %834 = vrot.lane.b32.xlu1 %v9255_v6, %s9015_s9 }
  0xe9   : > { %941 = vrot.lane.b32.xlu0 %v9255_v6, %s9017_s15 }
  0xec   : > { %832 = vrot.lane.b32.xlu1 %v9260_v7, %s9015_s9 }
  0xed   : > { %939 = vrot.lane.b32.xlu0 %v9260_v7, %s9017_s15 }
  0xf0   : > { %830 = vrot.lane.b32.xlu1 %v9268_v8, %s9015_s9 }
  0xf1   : > { %937 = vrot.lane.b32.xlu0 %v9268_v8, %s9017_s15 }
  0xf4   : > { %828 = vrot.lane.b32.xlu1 %v9270_v9, %s9015_s9  ;;  %s9021_s9 = smov 64  }
  0xf5   : > { %935 = vrot.lane.b32.xlu0 %v9270_v9, %s9017_s15  ;;  %s9024_s15 = smov 40  }
  0xf8   : > { %1054 = vrot.lane.b32.xlu1 %v9238_v3, %s9019_s21 }
  0xf9   : > { %1161 = vrot.lane.b32.xlu0 %v9238_v3, %s9020_s22 }
  0xfc   : > { %1052 = vrot.lane.b32.xlu1 %v9250_v5, %s9019_s21 }
  0xfd   : > { %1159 = vrot.lane.b32.xlu0 %v9250_v5, %s9020_s22 }
 0x100   : > { %1050 = vrot.lane.b32.xlu1 %v9240_v4, %s9019_s21 }
 0x101   : > { %1157 = vrot.lane.b32.xlu0 %v9240_v4, %s9020_s22 }
 0x104   : > { %1048 = vrot.lane.b32.xlu1 %v9255_v6, %s9019_s21 }
 0x105   : > { %1155 = vrot.lane.b32.xlu0 %v9255_v6, %s9020_s22 }
 0x108   : > { %1046 = vrot.lane.b32.xlu1 %v9260_v7, %s9019_s21 }
 0x109   : > { %1153 = vrot.lane.b32.xlu0 %v9260_v7, %s9020_s22 }
 0x10c   : > { %1044 = vrot.lane.b32.xlu1 %v9268_v8, %s9019_s21 }
 0x10d   : > { %1151 = vrot.lane.b32.xlu0 %v9268_v8, %s9020_s22 }
 0x110   : > { %1042 = vrot.lane.b32.xlu1 %v9270_v9, %s9019_s21 }
 0x111   : > { %1149 = vrot.lane.b32.xlu0 %v9270_v9, %s9020_s22 }
 0x114   : > { %1040 = vrot.lane.b32.xlu1 %v9210_v1, %s9019_s21 }
 0x115   : > { %1147 = vrot.lane.b32.xlu0 %v9210_v1, %s9020_s22 }
 0x118   : > { %1268 = vrot.lane.b32.xlu1 %v9238_v3, %s9021_s9 }
 0x119   : > { %1375 = vrot.lane.b32.xlu0 %v9238_v3, %s9022_s10 }
 0x11c   : > { %1266 = vrot.lane.b32.xlu1 %v9250_v5, %s9021_s9 }
 0x11d   : > { %1687 = vrot.lane.b32.xlu0 %v9382_v15, %s9005_s26 }
 0x120   : > { %1373 = vrot.lane.b32.xlu1 %v9250_v5, %s9022_s10 }
 0x121   : > { %1264 = vrot.lane.b32.xlu0 %v9240_v4, %s9021_s9 }
 0x122   : > { %v453_v19 = vpop.permute.xlu1 %452 }
 0x123   : > { %7814 = vmatpush3.bf16.msra.mxu0 %v453_v19 }
 0x124   : > { %1683 = vrot.lane.b32.xlu1 %v9382_v15, %s9008_s30  ;;  %7815 = vmatprep.subr.bf16.mxu0 %v9007_v2  ;;  %s14153_s30 = smov 127  }
 0x125   : > { %1371 = vrot.lane.b32.xlu0 %v9240_v4, %s9022_s10 }
 0x126   : > { %v449_v20 = vpop.permute.xlu1 %448 }
 0x127   : > { %v451_v21 = vpop.permute.xlu0 %450 }
 0x128   : > { %7816 = vmatpush3.bf16.msra.mxu0 %v451_v21  ;;  %1262 = vrot.lane.b32.xlu1 %v9255_v6, %s9021_s9 }
 0x129   : > { %1679 = vrot.lane.b32.xlu0 %v9382_v15, %s9006_s29  ;;  %7817 = vmatprep.subr.bf16.mxu0 %v9007_v2 }
 0x12a   : > { %v445_v22 = vpop.permute.xlu1 %444 }
 0x12b   : > { %v447_v23 = vpop.permute.xlu0 %446 }
 0x12c   : > { %7818 = vmatpush3.bf16.msra.mxu0 %v449_v20  ;;  %1369 = vrot.lane.b32.xlu1 %v9255_v6, %s9022_s10 }
 0x12d   : > { %1260 = vrot.lane.b32.xlu0 %v9260_v7, %s9021_s9  ;;  %7819 = vmatprep.subr.bf16.mxu0 %v9007_v2 }
 0x12e   : > { %v441_v24 = vpop.permute.xlu1 %440 }
 0x12f   : > { %v443_v25 = vpop.permute.xlu0 %442 }
 0x130   : > { %7820 = vmatpush3.bf16.msra.mxu0 %v447_v23  ;;  %1675 = vrot.lane.b32.xlu1 %v9382_v15, %s9009_s11  ;;  %s9023_s11 = smov 48   ;;  %v8388_v23 = vld [vmem:[%s14030_s1 + $0x50] sm:$0xff]  }
 0x131   : > { %1367 = vrot.lane.b32.xlu0 %v9260_v7, %s9022_s10  ;;  %7821 = vmatprep.subr.bf16.mxu0 %v9007_v2 }
 0x132   : > { %v627_v26 = vpop.permute.xlu1 %626 }
 0x133   : > { %v734_v27 = vpop.permute.xlu0 %733 }
 0x134   : > { %7822 = vmatpush3.bf16.msra.mxu0 %v445_v22  ;;  %7898 = vmatpush3.bf16.msra.mxu1 %v734_v27 }
 0x135   : > { %1671 = vrot.lane.b32.xlu0 %v9382_v15, %s9010_s18  ;;  %1258 = vrot.lane.b32.xlu1 %v9268_v8, %s9021_s9 }
 0x136   : > { %v625_v28 = vpop.permute.xlu1 %624  ;;  %7823 = vmatprep.subr.bf16.mxu0 %v9007_v2  ;;  %7899 = vmatprep.subr.bf16.mxu1 %v9007_v2 }
 0x137   : > { %v732_v29 = vpop.permute.xlu0 %731 }
 0x138   : > { %7824 = vmatpush3.bf16.msra.mxu0 %v443_v25  ;;  %7900 = vmatpush3.bf16.msra.mxu1 %v732_v29 }
 0x139   : > { %1256 = vrot.lane.b32.xlu0 %v9270_v9, %s9021_s9  ;;  %1365 = vrot.lane.b32.xlu1 %v9268_v8, %s9022_s10 }
 0x13a   : > { %v623_v30 = vpop.permute.xlu1 %622  ;;  %7825 = vmatprep.subr.bf16.mxu0 %v9007_v2  ;;  %7901 = vmatprep.subr.bf16.mxu1 %v9007_v2 }
 0x13b   : > { %v730_v31 = vpop.permute.xlu0 %729 }
 0x13c   : > { %7826 = vmatpush3.bf16.msra.mxu0 %v441_v24  ;;  %7902 = vmatpush3.bf16.msra.mxu1 %v730_v31  ;;  %v8390_v24 = vld [vmem:[%s14030_s1 + $0x74] ss:$0 sps:$4 sm:$0x33]  }
 0x13d   : > { %1363 = vrot.lane.b32.xlu0 %v9270_v9, %s9022_s10  ;;  %1667 = vrot.lane.b32.xlu1 %v9382_v15, %s9011_s20 }
 0x13e   : > { %v621_v32 = vpop.permute.xlu1 %620  ;;  %7827 = vmatprep.subr.bf16.mxu0 %v9007_v2  ;;  %7903 = vmatprep.subr.bf16.mxu1 %v9007_v2 }
 0x13f   : > { %v728_v33 = vpop.permute.xlu0 %727 }
 0x140   : > { %7828 = vmatpush3.bf16.msra.mxu0 %v9373_v13  ;;  %7904 = vmatpush3.bf16.msra.mxu1 %v728_v33  ;;  %v8392_v33 = vld [vmem:[%s14030_s1 + $0x8c] sm:$0xff]  }
 0x141   : > { %1663 = vrot.lane.b32.xlu0 %v9382_v15, %s14153_s30  ;;  %1254 = vrot.lane.b32.xlu1 %v9210_v1, %s9021_s9  ;;  %s9029_s9 = smov 8  }
 0x142   : > { %v619_v35 = vpop.permute.xlu1 %618  ;;  %7869 = vmatprep.subr.bf16.mxu0 %v9007_v2  ;;  %7905 = vmatprep.subr.bf16.mxu1 %v9007_v2 }
 0x143   : > { %v726_v36 = vpop.permute.xlu0 %725  ;;  %7830 = vmatmul.mubr.bf16.vlgmr.msra.gmra.mxu0 %v8376_v34  ;;  %v8393_v34 = vld [vmem:[%s14030_s1 + $0x60] ss:$0 sps:$4 sm:$0x33]  }
 0x144   : > { %7870 = vmatpush3.bf16.msra.mxu0 %v627_v26  ;;  %7906 = vmatpush3.bf16.msra.mxu1 %v726_v36 }
 0x145   : > { %1482 = vrot.lane.b32.xlu0 %v9238_v3, %s9023_s11  ;;  %1361 = vrot.lane.b32.xlu1 %v9210_v1, %s9022_s10 }
 0x146   : > { %v617_v37 = vpop.permute.xlu1 %616  ;;  %7871 = vmatprep.subr.bf16.mxu0 %v9007_v2  ;;  %7907 = vmatprep.subr.bf16.mxu1 %v9007_v2 }
 0x147   : > { %v724_v38 = vpop.permute.xlu0 %723  ;;  %7833 = vmatprep.mubr.msk.bf16.mxu0 %vm9018_vm2, %v9007_v2 }
 0x148   : > { %7872 = vmatpush3.bf16.msra.mxu0 %v625_v28  ;;  %7908 = vmatpush3.bf16.msra.mxu1 %v724_v38  ;;  %v8391_v28 = vld [vmem:[%s14030_s1 + $0x58] sm:$0xff]  }
 0x149   : > { %1480 = vrot.lane.b32.xlu0 %v9250_v5, %s9023_s11  ;;  %1589 = vrot.lane.b32.xlu1 %v9238_v3, %s9024_s15 }
 0x14a   : > { %v615_v40 = vpop.permute.xlu1 %614  ;;  %7873 = vmatprep.subr.bf16.mxu0 %v9007_v2  ;;  %7909 = vmatprep.subr.bf16.mxu1 %v9007_v2 }
 0x14b   : > { %v722_v41 = vpop.permute.xlu0 %721  ;;  %7834 = vmatmul.mubr.bf16.gmra.mxu0 %v8379_v39 }
 0x14c   : > { %7874 = vmatpush3.bf16.msra.mxu0 %v623_v30  ;;  %7910 = vmatpush3.bf16.msra.mxu1 %v722_v41 }
 0x14d   : > { %1478 = vrot.lane.b32.xlu0 %v9240_v4, %s9023_s11  ;;  %1587 = vrot.lane.b32.xlu1 %v9250_v5, %s9024_s15 }
 0x14e   : > { %v841_v42 = vpop.permute.xlu1 %840  ;;  %7875 = vmatprep.subr.bf16.mxu0 %v9007_v2  ;;  %7911 = vmatprep.subr.bf16.mxu1 %v9007_v2 }
 0x14f   : > { %v948_v43 = vpop.permute.xlu0 %947  ;;  %7837 = vmatprep.mubr.msk.bf16.mxu0 %vm9018_vm2, %v9007_v2 }
 0x150   : > { %7876 = vmatpush3.bf16.msra.mxu0 %v621_v32  ;;  %7912 = vmatpush3.bf16.msra.mxu1 %v9384_v16 }
 0x151   : > { %1476 = vrot.lane.b32.xlu0 %v9255_v6, %s9023_s11  ;;  %1585 = vrot.lane.b32.xlu1 %v9240_v4, %s9024_s15 }
 0x152   : > { %v839_v46 = vpop.permute.xlu1 %838  ;;  %7877 = vmatprep.subr.bf16.mxu0 %v9007_v2  ;;  %7953 = vmatprep.subr.bf16.mxu1 %v9007_v2 }
 0x153   : > { %v946_v47 = vpop.permute.xlu0 %945  ;;  %7914 = vmatmul.mubr.bf16.vlgmr.msra.gmra.mxu1 %v8380_v44  ;;  %7838 = vmatmul.mubr.bf16.gmra.mxu0 %v8381_v45 }
 0x154   : > { %7878 = vmatpush3.bf16.msra.mxu0 %v619_v35  ;;  %7954 = vmatpush3.bf16.msra.mxu1 %v948_v43 }
 0x155   : > { %1474 = vrot.lane.b32.xlu0 %v9260_v7, %s9023_s11  ;;  %1583 = vrot.lane.b32.xlu1 %v9255_v6, %s9024_s15 }
 0x156   : > { %v837_v48 = vpop.permute.xlu1 %836  ;;  %7879 = vmatprep.subr.bf16.mxu0 %v9007_v2  ;;  %7955 = vmatprep.subr.bf16.mxu1 %v9007_v2 }
 0x157   : > { %v944_v49 = vpop.permute.xlu0 %943  ;;  %7885 = vmatprep.mubr.msk.bf16.mxu0 %vm9018_vm2, %v9007_v2  ;;  %7917 = vmatprep.mubr.msk.bf16.mxu1 %vm9018_vm2, %v9007_v2 }
 0x158   : > { %7880 = vmatpush3.bf16.msra.mxu0 %v617_v37  ;;  %7956 = vmatpush3.bf16.msra.mxu1 %v946_v47  ;;  %v8397_v47 = vld [vmem:[%s14030_s1 + $0x9c] ss:$0 sps:$4 sm:$0x33]  }
 0x159   : > { %1472 = vrot.lane.b32.xlu0 %v9268_v8, %s9023_s11  ;;  %1581 = vrot.lane.b32.xlu1 %v9260_v7, %s9024_s15 }
 0x15a   : > { %v835_v51 = vpop.permute.xlu1 %834  ;;  %7881 = vmatprep.subr.bf16.mxu0 %v9007_v2  ;;  %7957 = vmatprep.subr.bf16.mxu1 %v9007_v2 }
 0x15b   : > { %v942_v52 = vpop.permute.xlu0 %941  ;;  %7918 = vmatmul.mubr.bf16.gmra.mxu1 %v8383_v50 }
 0x15c   : > { %7882 = vmatpush3.bf16.msra.mxu0 %v615_v40  ;;  %7958 = vmatpush3.bf16.msra.mxu1 %v944_v49  ;;  %v8395_v40 = vld [vmem:[%s14030_s1 + $0x94] sm:$0xff]  }
 0x15d   : > { %1470 = vrot.lane.b32.xlu0 %v9270_v9, %s9023_s11  ;;  %1579 = vrot.lane.b32.xlu1 %v9268_v8, %s9024_s15 }
 0x15e   : > { %v833_v53 = vpop.permute.xlu1 %832  ;;  %7883 = vmatprep.subr.bf16.mxu0 %v9007_v2  ;;  %7959 = vmatprep.subr.bf16.mxu1 %v9007_v2 }
 0x15f   : > { %v940_v54 = vpop.permute.xlu0 %939  ;;  %7921 = vmatprep.mubr.msk.bf16.mxu1 %vm9018_vm2, %v9007_v2 }
 0x160   : > { %7884 = vmatpush3.bf16.msra.mxu0 %v9375_v14  ;;  %7960 = vmatpush3.bf16.msra.mxu1 %v942_v52 }
 0x161   : > { %1577 = vrot.lane.b32.xlu1 %v9270_v9, %s9024_s15  ;;  %7925 = vmatprep.subr.bf16.mxu0 %v9007_v2 }
 0x162   : > { %v831_v57 = vpop.permute.xlu1 %830  ;;  %7961 = vmatprep.subr.bf16.mxu1 %v9007_v2  ;;  %1468 = vrot.lane.b32.xlu0 %v9210_v1, %s9023_s11 }
 0x163   : > { %v938_v58 = vpop.permute.xlu0 %937  ;;  %7886 = vmatmul.mubr.bf16.vlgmr.msra.gmra.mxu0 %v8382_v55  ;;  %7922 = vmatmul.mubr.bf16.gmra.mxu1 %v8384_v56  ;;  %v8396_v56 = vld [vmem:[%s14030_s1 + $0x80] sm:$0xff]  }
 0x164   : > { %7926 = vmatpush3.bf16.msra.mxu0 %v841_v42  ;;  %7962 = vmatpush3.bf16.msra.mxu1 %v940_v54 }
 0x165   : > { %7927 = vmatprep.subr.bf16.mxu0 %v9007_v2  ;;  %7963 = vmatprep.subr.bf16.mxu1 %v9007_v2 }
 0x166   : > { %v829_v59 = vpop.permute.xlu1 %828  ;;  %1575 = vrot.lane.b32.xlu1 %v9210_v1, %s9024_s15  ;;  %7889 = vmatprep.mubr.msk.bf16.mxu0 %vm9018_vm2, %v9007_v2 }
 0x167   : > { %v936_v60 = vpop.permute.xlu0 %935  ;;  %7969 = vmatprep.mubr.msk.bf16.mxu1 %vm9018_vm2, %v9007_v2 }
 0x168   : > { %7928 = vmatpush3.bf16.msra.mxu0 %v839_v46  ;;  %7964 = vmatpush3.bf16.msra.mxu1 %v938_v58 }
 0x169   : > { %7929 = vmatprep.subr.bf16.mxu0 %v9007_v2  ;;  %7965 = vmatprep.subr.bf16.mxu1 %v9007_v2 }
 0x16a   : > { %v1055_v62 = vpop.permute.xlu1 %1054 }
 0x16b   : > { %v1162_v63 = vpop.permute.xlu0 %1161  ;;  %7890 = vmatmul.mubr.bf16.gmra.mxu0 %v8385_v61 }
 0x16c   : > { %7930 = vmatpush3.bf16.msra.mxu0 %v837_v48  ;;  %7966 = vmatpush3.bf16.msra.mxu1 %v936_v60 }
 0x16d   : > { %7931 = vmatprep.subr.bf16.mxu0 %v9007_v2  ;;  %7967 = vmatprep.subr.bf16.mxu1 %v9007_v2 }
 0x16e   : > { %v1053_v0 = vpop.permute.xlu1 %1052  ;;  %7893 = vmatprep.mubr.msk.bf16.mxu0 %vm9018_vm2, %v9007_v2 }
 0x16f   : > { %v1160_v1 = vpop.permute.xlu0 %1159 }
 0x170   : > { %7932 = vmatpush3.bf16.msra.mxu0 %v835_v51  ;;  %7968 = vmatpush3.bf16.msra.mxu1 %v9396_v18  ;;  %v8389_v18 = vld [vmem:[%s14030_s1 + $0x6c] sm:$0xff]  }
 0x171   : > { %7933 = vmatprep.subr.bf16.mxu0 %v9007_v2  ;;  %8009 = vmatprep.subr.bf16.mxu1 %v9007_v2 }
 0x172   : > { %v1051_v12 = vpop.permute.xlu1 %1050 }
 0x173   : > { %v1158_v13 = vpop.permute.xlu0 %1157  ;;  %7970 = vmatmul.mubr.bf16.vlgmr.msra.gmra.mxu1 %v8386_v10  ;;  %7894 = vmatmul.mubr.bf16.gmra.mxu0 %v8387_v11 }
 0x174   : > { %7934 = vmatpush3.bf16.msra.mxu0 %v833_v53  ;;  %8010 = vmatpush3.bf16.msra.mxu1 %v1162_v63 }
 0x175   : > { %7935 = vmatprep.subr.bf16.mxu0 %v9007_v2  ;;  %8011 = vmatprep.subr.bf16.mxu1 %v9007_v2 }
 0x176   : > { %v1049_v14 = vpop.permute.xlu1 %1048  ;;  %7941 = vmatprep.mubr.msk.bf16.mxu0 %vm9018_vm2, %v9007_v2  ;;  %7973 = vmatprep.mubr.msk.bf16.mxu1 %vm9018_vm2, %v9007_v2 }
 0x177   : > { %v1156_v16 = vpop.permute.xlu0 %1155 }
 0x178   : > { %7936 = vmatpush3.bf16.msra.mxu0 %v831_v57  ;;  %8012 = vmatpush3.bf16.msra.mxu1 %v1160_v1  ;;  %v8398_v1 = vld [vmem:[%s14030_s1 + $0x88] ss:$0 sps:$4 sm:$0x33]  }
 0x179   : > { %7937 = vmatprep.subr.bf16.mxu0 %v9007_v2  ;;  %8013 = vmatprep.subr.bf16.mxu1 %v9007_v2 }
 0x17a   : > { %v1047_v19 = vpop.permute.xlu1 %1046 }
 0x17b   : > { %v1154_v20 = vpop.permute.xlu0 %1153  ;;  %7974 = vmatmul.mubr.bf16.gmra.mxu1 %v8389_v18 }
 0x17c   : > { %7938 = vmatpush3.bf16.msra.mxu0 %v829_v59  ;;  %8014 = vmatpush3.bf16.msra.mxu1 %v1158_v13 }
 0x17d   : > { %7939 = vmatprep.subr.bf16.mxu0 %v9007_v2  ;;  %8015 = vmatprep.subr.bf16.mxu1 %v9007_v2 }
 0x17e   : > { %v9563_v21 = vpop.permute.xlu1 %1044  ;;  %7977 = vmatprep.mubr.msk.bf16.mxu1 %vm9018_vm2, %v9007_v2 }
 0x17f   : > { %v1152_v22 = vpop.permute.xlu0 %1151 }
 0x180   : > { %7940 = vmatpush3.bf16.msra.mxu0 %v9388_v17  ;;  %8016 = vmatpush3.bf16.msra.mxu1 %v1156_v16  ;;  %v9027_v16 = vmov 0  }
 0x181   : > { %7981 = vmatprep.subr.bf16.mxu0 %v9007_v2  ;;  %8017 = vmatprep.subr.bf16.mxu1 %v9007_v2 }
 0x182   : > { %v9576_v25 = vpop.permute.xlu1 %1042  ;;  %8371 = vset.pattern.permute.xlu1 %v9027_v16  ;;  %8370 = vset.pattern.permute.xlu0 %v9027_v16 }
 0x183   : > { %v1150_v26 = vpop.permute.xlu0 %1149  ;;  %7942 = vmatmul.mubr.bf16.vlgmr.msra.gmra.mxu0 %v8388_v23  ;;  %7978 = vmatmul.mubr.bf16.gmra.mxu1 %v8390_v24  ;;  %v8400_v24 = vld [vmem:[%s14030_s1 + $0xa0] sm:$0xff]  }
 0x184   : > { %7982 = vmatpush3.bf16.msra.mxu0 %v1055_v62  ;;  %8018 = vmatpush3.bf16.msra.mxu1 %v1154_v20 }
 0x185   : > { %7983 = vmatprep.subr.bf16.mxu0 %v9007_v2  ;;  %8019 = vmatprep.subr.bf16.mxu1 %v9007_v2 }
 0x186   : > { %v9580_v27 = vpop.permute.xlu1 %1040  ;;  %7945 = vmatprep.mubr.msk.bf16.mxu0 %vm9018_vm2, %v9007_v2  ;;  %8025 = vmatprep.mubr.msk.bf16.mxu1 %vm9018_vm2, %v9007_v2 }
 0x187   : > { %v1148_v17 = vpop.permute.xlu0 %1147 }
 0x188   : > { %7984 = vmatpush3.bf16.msra.mxu0 %v1053_v0  ;;  %8020 = vmatpush3.bf16.msra.mxu1 %v1152_v22  ;;  %v9766_v22 = vld [vmem:[%s9162_s14] ss:$8 sps:$4 sm:$0xff]  }
 0x189   : > { %7985 = vmatprep.subr.bf16.mxu0 %v9007_v2  ;;  %8021 = vmatprep.subr.bf16.mxu1 %v9007_v2 }
 0x18a   : > { %v9591_v29 = vpop.permute.xlu1 %1268 }
 0x18b   : > { %v1376_v30 = vpop.permute.xlu0 %1375  ;;  %7946 = vmatmul.mubr.bf16.gmra.mxu0 %v8391_v28 }
 0x18c   : > { %7986 = vmatpush3.bf16.msra.mxu0 %v1051_v12  ;;  %8022 = vmatpush3.bf16.msra.mxu1 %v1150_v26 }
 0x18d   : > { %7987 = vmatprep.subr.bf16.mxu0 %v9007_v2  ;;  %8023 = vmatprep.subr.bf16.mxu1 %v9007_v2 }
 0x18e   : > { %v9595_v31 = vpop.permute.xlu1 %1266  ;;  %7949 = vmatprep.mubr.msk.bf16.mxu0 %vm9018_vm2, %v9007_v2 }
 0x18f   : > { %v9599_v32 = vpop.permute.xlu0 %1687  ;;  %v9652_v43 = vpop.f32.mrf.mxu1 }
 0x190   : > { %7988 = vmatpush3.bf16.msra.mxu0 %v1049_v14  ;;  %8024 = vmatpush3.bf16.msra.mxu1 %v1148_v17  ;;  %v9609_v35 = vsel %vm1689_vm3, %v9238_v3, %v9599_v32 }
 0x191   : > { %1848 = vrot.lane.b32.xlu1 %v9609_v35, %s9025_s23  ;;  %1727 = vrot.lane.b32.xlu0 %v9609_v35, %s9026_s16  ;;  %v7859_v45 = vpop.f32.mrf.mxu1 }
 0x192   : > { %v1374_v36 = vpop.permute.xlu1 %1373  ;;  %7989 = vmatprep.subr.bf16.mxu0 %v9007_v2  ;;  %8065 = vmatprep.subr.bf16.mxu1 %v9007_v2  ;;  %v2194_v45 = vld [vmem:[%s9157_s17] sm:$0xff] }
 0x193   : > { %v9617_v37 = vpop.permute.xlu0 %1264  ;;  %8026 = vmatmul.mubr.bf16.vlgmr.msra.gmra.mxu1 %v8392_v33  ;;  %7950 = vmatmul.mubr.bf16.gmra.mxu0 %v8393_v34  ;;  %v9671_v48 = vpop.f32.mrf.mxu1  ;;  %v8403_v34 = vld [vmem:[%s14030_s1 + $0xb0] ss:$0 sps:$4 sm:$0x33]  }
 0x194   : > { %7990 = vmatpush3.bf16.msra.mxu0 %v1047_v19  ;;  %8066 = vmatpush3.bf16.msra.mxu1 %v1376_v30  ;;  %v8404_v30 = vld [vmem:[%s14030_s1 + $0xc4] ss:$0 sps:$4 sm:$0x33]  }
 0x195   : > { %1850 = vrot.lane.b32.xlu0 %v9599_v32, %s9025_s23  ;;  %7991 = vmatprep.subr.bf16.mxu0 %v9007_v2  ;;  %v7860_v50 = vpop.f32.mrf.mxu1 }
 0x196   : > { %v9622_v3 = vpop.permute.xlu1 %1683  ;;  %8067 = vmatprep.subr.bf16.mxu1 %v9007_v2  ;;  %7997 = vmatprep.mubr.msk.bf16.mxu0 %vm9018_vm2, %v9007_v2 }
 0x197   : > { %v1372_v38 = vpop.permute.xlu0 %1371  ;;  %v9629_v39 = vsel %vm1685_vm4, %v9250_v5, %v9622_v3  ;;  %8029 = vmatprep.mubr.msk.bf16.mxu1 %vm9018_vm2, %v9007_v2  ;;  %v9686_v53 = vpop.f32.mrf.mxu1 }
 0x198   : > { %7992 = vmatpush3.bf16.msra.mxu0 %v9563_v21  ;;  %8068 = vmatpush3.bf16.msra.mxu1 %v1374_v36 }
 0x199   : > { %1725 = vrot.lane.b32.xlu1 %v9629_v39, %s9026_s16  ;;  %1844 = vrot.lane.b32.xlu0 %v9629_v39, %s9025_s23  ;;  %v7863_v54 = vpop.f32.mrf.mxu1 }
 0x19a   : > { %v9641_v41 = vpop.permute.xlu1 %1262  ;;  %7993 = vmatprep.subr.bf16.mxu0 %v9007_v2  ;;  %8069 = vmatprep.subr.bf16.mxu1 %v9007_v2 }
 0x19b   : > { %v9645_v5 = vpop.permute.xlu0 %1679  ;;  %8030 = vmatmul.mubr.bf16.gmra.mxu1 %v8395_v40  ;;  %v9708_v58 = vpop.f32.mrf.mxu1  ;;  %v8405_v40 = vld [vmem:[%s14030_s1 + $0xc8] sm:$0xff]  }
 0x19c   : > { %7994 = vmatpush3.bf16.msra.mxu0 %v9576_v25  ;;  %8070 = vmatpush3.bf16.msra.mxu1 %v1372_v38  ;;  %v9650_v42 = vsel %vm1681_vm5, %v9240_v4, %v9645_v5  ;;  %v8394_v4 = vld [vmem:[%s14030_s1 + $0x78] sm:$0xff]  }
 0x19d   : > { %1846 = vrot.lane.b32.xlu1 %v9622_v3, %s9025_s23  ;;  %1723 = vrot.lane.b32.xlu0 %v9650_v42, %s9026_s16  ;;  %v7864_v59 = vpop.f32.mrf.mxu1  ;;  %v8402_v25 = vld [vmem:[%s14030_s1 + $0xbc] sm:$0xff]  }
 0x19e   : > { %v1370_v44 = vpop.permute.xlu1 %1369  ;;  %7995 = vmatprep.subr.bf16.mxu0 %v9007_v2  ;;  %8071 = vmatprep.subr.bf16.mxu1 %v9007_v2  ;;  %v8406_v38 = vld [vmem:[%s14030_s1 + $0xdc] sm:$0xff]  }
 0x19f   : > { %v9660_v46 = vpop.permute.xlu0 %1260  ;;  %8033 = vmatprep.mubr.msk.bf16.mxu1 %vm9018_vm2, %v9007_v2  ;;  %v9716_v62 = vpop.f32.mrf.mxu1 }
 0x1a0   : > { %7996 = vmatpush3.bf16.msra.mxu0 %v9580_v27  ;;  %8072 = vmatpush3.bf16.msra.mxu1 %v1370_v44  ;;  %v8409_v44 = vld [vmem:[%s14030_s1 + $0xd8] ss:$0 sps:$4 sm:$0x33]  }
 0x1a1   : > { %1840 = vrot.lane.b32.xlu1 %v9650_v42, %s9025_s23  ;;  %1842 = vrot.lane.b32.xlu0 %v9645_v5, %s9025_s23 }
 0x1a2   : > { %v9677_v49 = vpop.permute.xlu1 %1675  ;;  %8037 = vmatprep.subr.bf16.mxu0 %v9007_v2  ;;  %8073 = vmatprep.subr.bf16.mxu1 %v9007_v2 }
 0x1a3   : > { %7998 = vmatmul.mubr.bf16.vlgmr.msra.gmra.mxu0 %v8394_v4  ;;  %v1368_v51 = vpop.permute.xlu0 %1367  ;;  %v9683_v52 = vsel %vm1677_vm6, %v9255_v6, %v9677_v49  ;;  %8034 = vmatmul.mubr.bf16.gmra.mxu1 %v8397_v47  ;;  %v2197_v47 = vld [vmem:[%s9157_s17 + $0x18] sm:$0xff] }
 0x1a4   : > { %8038 = vmatpush3.bf16.msra.mxu0 %v9591_v29  ;;  %8074 = vmatpush3.bf16.msra.mxu1 %v1368_v51  ;;  %v8401_v29 = vld [vmem:[%s14030_s1 + $0xa8] sm:$0xff]   ;;  %v2196_v51 = vld [vmem:[%s9157_s17 + $0x10] sm:$0xff] }
 0x1a5   : > { %1721 = vrot.lane.b32.xlu1 %v9683_v52, %s9026_s16  ;;  %1836 = vrot.lane.b32.xlu0 %v9683_v52, %s9025_s23 }
 0x1a6   : > { %8039 = vmatprep.subr.bf16.mxu0 %v9007_v2  ;;  %8075 = vmatprep.subr.bf16.mxu1 %v9007_v2 }
 0x1a7   : > { %v1259_v6 = vpop.permute.xlu1 %1258  ;;  %v9694_v55 = vpop.permute.xlu0 %1671  ;;  %8001 = vmatprep.mubr.msk.bf16.mxu0 %vm9018_vm2, %v9007_v2  ;;  %8081 = vmatprep.mubr.msk.bf16.mxu1 %vm9018_vm2, %v9007_v2 }
 0x1a8   : > { %8040 = vmatpush3.bf16.msra.mxu0 %v9595_v31  ;;  %v9706_v57 = vsel %vm1673_vm7, %v9260_v7, %v9694_v55  ;;  %v7867_v7 = vpop.f32.mrf.mxu1 }
 0x1a9   : > { %1838 = vrot.lane.b32.xlu1 %v9677_v49, %s9025_s23  ;;  %1719 = vrot.lane.b32.xlu0 %v9706_v57, %s9026_s16 }
 0x1aa   : > { %8041 = vmatprep.subr.bf16.mxu0 %v9007_v2  ;;  %v587_v11 = vpop.f32.mrf.mxu1 }
 0x1ab   : > { %v1366_v60 = vpop.permute.xlu1 %1365  ;;  %v1257_v61 = vpop.permute.xlu0 %1256  ;;  %8002 = vmatmul.mubr.bf16.gmra.mxu0 %v8396_v56 }
 0x1ac   : > { %8042 = vmatpush3.bf16.msra.mxu0 %v9617_v37  ;;  %8076 = vmatpush3.bf16.msra.mxu1 %v1366_v60  ;;  %v7868_v12 = vpop.f32.mrf.mxu1 }
 0x1ad   : > { %1832 = vrot.lane.b32.xlu1 %v9706_v57, %s9025_s23  ;;  %1834 = vrot.lane.b32.xlu0 %v9694_v55, %s9025_s23 }
 0x1ae   : > { %8043 = vmatprep.subr.bf16.mxu0 %v9007_v2  ;;  %8077 = vmatprep.subr.bf16.mxu1 %v9007_v2 }
 0x1af   : > { %v9724_v63 = vpop.permute.xlu1 %1667  ;;  %v1364_v0 = vpop.permute.xlu0 %1363  ;;  %8005 = vmatprep.mubr.msk.bf16.mxu0 %vm9018_vm2, %v9007_v2 }
 0x1b0   : > { %8044 = vmatpush3.bf16.msra.mxu0 %v9641_v41  ;;  %8078 = vmatpush3.bf16.msra.mxu1 %v1364_v0  ;;  %v9734_v10 = vsel %vm1669_vm8, %v9268_v8, %v9724_v63  ;;  %v8408_v41 = vld [vmem:[%s14030_s1 + $0xe4] sm:$0xff]  }
 0x1b1   : > { %1717 = vrot.lane.b32.xlu1 %v9734_v10, %s9026_s16  ;;  %1828 = vrot.lane.b32.xlu0 %v9734_v10, %s9025_s23 }
 0x1b2   : > { %8045 = vmatprep.subr.bf16.mxu0 %v9007_v2  ;;  %8079 = vmatprep.subr.bf16.mxu1 %v9007_v2 }
 0x1b3   : > { %v1255_v13 = vpop.permute.xlu1 %1254  ;;  %v9742_v14 = vpop.permute.xlu0 %1663  ;;  %8006 = vmatmul.mubr.bf16.gmra.mxu0 %v8398_v1 }
 0x1b4   : > { %8046 = vmatpush3.bf16.msra.mxu0 %v9660_v46  ;;  %v9747_v8 = vsel %vm1665_vm9, %v9270_v9, %v9742_v14  ;;  %8053 = vmatprep.mubr.msk.bf16.mxu0 %vm9018_vm2, %v9007_v2  ;;  %v8399_v9 = vld [vmem:[%s14030_s1 + $0xb4] sm:$0xff]   ;;  %v2195_v46 = vld [vmem:[%s9157_s17 + $0x8] sm:$0xff] }
 0x1b5   : > { %1830 = vrot.lane.b32.xlu1 %v9724_v63, %s9025_s23  ;;  %1715 = vrot.lane.b32.xlu0 %v9747_v8, %s9026_s16 }
 0x1b6   : > { %8047 = vmatprep.subr.bf16.mxu0 %v9007_v2 }
 0x1b7   : > { %v1362_v18 = vpop.permute.xlu1 %1361  ;;  %v1483_v19 = vpop.permute.xlu0 %1482 }
 0x1b8   : > { %8048 = vmatpush3.bf16.msra.mxu0 %v1259_v6  ;;  %8080 = vmatpush3.bf16.msra.mxu1 %v1362_v18  ;;  %v2199_v6 = vld [vmem:[%s9157_s17 + $0x28] sm:$0xff]  ;;  %v2202_v18 = vld [vmem:[%s9157_s17 + $0x40] sm:$0xff] }
 0x1b9   : > { %1824 = vrot.lane.b32.xlu1 %v9747_v8, %s9025_s23  ;;  %1826 = vrot.lane.b32.xlu0 %v9742_v14, %s9025_s23 }
 0x1ba   : > { %8049 = vmatprep.subr.bf16.mxu0 %v9007_v2  ;;  %8121 = vmatprep.subr.bf16.mxu1 %v9007_v2 }
 0x1bb   : > { %v1590_v20 = vpop.permute.xlu1 %1589  ;;  %v1481_v21 = vpop.permute.xlu0 %1480  ;;  %8082 = vmatmul.mubr.bf16.vlgmr.msra.gmra.mxu1 %v8399_v9 }
 0x1bc   : > { %8050 = vmatpush3.bf16.msra.mxu0 %v1257_v61  ;;  %8122 = vmatpush3.bf16.msra.mxu1 %v1590_v20  ;;  %v2201_v61 = vld [vmem:[%s9157_s17 + $0x38] sm:$0xff] }
 0x1bd   : > { %1713 = vrot.lane.b32.xlu1 %v9766_v22, %s9026_s16  ;;  %1820 = vrot.lane.b32.xlu0 %v9766_v22, %s9025_s23  ;;  %s9028_s16 = smov 16  }
 0x1be   : > { %8051 = vmatprep.subr.bf16.mxu0 %v9007_v2  ;;  %8123 = vmatprep.subr.bf16.mxu1 %v9007_v2 }
 0x1bf   : > { %v1588_v23 = vpop.permute.xlu1 %1587  ;;  %8085 = vmatprep.mubr.msk.bf16.mxu1 %vm9018_vm2, %v9007_v2  ;;  %v1479_v26 = vpop.permute.xlu0 %1478 }
 0x1c0   : > { %8052 = vmatpush3.bf16.msra.mxu0 %v1255_v13  ;;  %8124 = vmatpush3.bf16.msra.mxu1 %v1588_v23  ;;  %v2203_v13 = vld [vmem:[%s9157_s17 + $0x48] sm:$0xf] }
 0x1c1   : > { %1822 = vrot.lane.b32.xlu1 %v9382_v15, %s9025_s23  ;;  %1980 = vrot.lane.b32.xlu0 %v9609_v35, %s9028_s16 }
 0x1c2   : > { %8093 = vmatprep.subr.bf16.mxu0 %v9007_v2  ;;  %8125 = vmatprep.subr.bf16.mxu1 %v9007_v2 }
 0x1c3   : > { %v1586_v27 = vpop.permute.xlu1 %1585  ;;  %8054 = vmatmul.mubr.bf16.vlgmr.msra.gmra.mxu0 %v8400_v24  ;;  %8086 = vmatmul.mubr.bf16.gmra.mxu1 %v8402_v25  ;;  %v1477_v17 = vpop.permute.xlu0 %1476 }
 0x1c4   : > { %8094 = vmatpush3.bf16.msra.mxu0 %v1483_v19  ;;  %8126 = vmatpush3.bf16.msra.mxu1 %v1586_v27 }
 0x1c5   : > { %1982 = vrot.lane.b32.xlu1 %v9599_v32, %s9028_s16  ;;  %2112 = vrot.lane.b32.xlu0 %v9609_v35, %s9029_s9 }
 0x1c6   : > { %8095 = vmatprep.subr.bf16.mxu0 %v9007_v2  ;;  %8127 = vmatprep.subr.bf16.mxu1 %v9007_v2 }
 0x1c7   : > { %v1584_v28 = vpop.permute.xlu1 %1583  ;;  %8057 = vmatprep.mubr.msk.bf16.mxu0 %vm9018_vm2, %v9007_v2  ;;  %8089 = vmatprep.mubr.msk.bf16.mxu1 %vm9018_vm2, %v9007_v2  ;;  %v1475_v33 = vpop.permute.xlu0 %1474 }
 0x1c8   : > { %8096 = vmatpush3.bf16.msra.mxu0 %v1481_v21  ;;  %8128 = vmatpush3.bf16.msra.mxu1 %v1584_v28  ;;  %v2205_v21 = vld [vmem:[%s9157_s17 + $0x58] sm:$0xff]  ;;  %v2207_v28 = vld [vmem:[%s9157_s17 + $0x68] sm:$0xff] }
 0x1c9   : > { %2114 = vrot.lane.b32.xlu1 %v9599_v32, %s9029_s9  ;;  %1976 = vrot.lane.b32.xlu0 %v9629_v39, %s9028_s16 }
 0x1ca   : > { %8097 = vmatprep.subr.bf16.mxu0 %v9007_v2  ;;  %8129 = vmatprep.subr.bf16.mxu1 %v9007_v2 }
 0x1cb   : > { %v1582_v31 = vpop.permute.xlu1 %1581  ;;  %8058 = vmatmul.mubr.bf16.gmra.mxu0 %v8401_v29  ;;  %8090 = vmatmul.mubr.bf16.gmra.mxu1 %v8404_v30  ;;  %v1473_v35 = vpop.permute.xlu0 %1472 }
 0x1cc   : > { %8098 = vmatpush3.bf16.msra.mxu0 %v1479_v26  ;;  %8130 = vmatpush3.bf16.msra.mxu1 %v1582_v31  ;;  %v2204_v26 = vld [vmem:[%s9157_s17 + $0x50] sm:$0xff] }
 0x1cd   : > { %1978 = vrot.lane.b32.xlu1 %v9622_v3, %s9028_s16  ;;  %2108 = vrot.lane.b32.xlu0 %v9629_v39, %s9029_s9 }
 0x1ce   : > { %8099 = vmatprep.subr.bf16.mxu0 %v9007_v2  ;;  %8131 = vmatprep.subr.bf16.mxu1 %v9007_v2 }
 0x1cf   : > { %v1580_v32 = vpop.permute.xlu1 %1579  ;;  %8061 = vmatprep.mubr.msk.bf16.mxu0 %vm9018_vm2, %v9007_v2  ;;  %8137 = vmatprep.mubr.msk.bf16.mxu1 %vm9018_vm2, %v9007_v2 }
 0x1d0   : > { %8100 = vmatpush3.bf16.msra.mxu0 %v1477_v17  ;;  %8132 = vmatpush3.bf16.msra.mxu1 %v1580_v32  ;;  %v2206_v32 = vld [vmem:[%s9157_s17 + $0x60] sm:$0xff] }
 0x1d1   : > { %2110 = vrot.lane.b32.xlu1 %v9622_v3, %s9029_s9  ;;  %1972 = vrot.lane.b32.xlu0 %v9650_v42, %s9028_s16  ;;  %v1471_v3 = vpop.permute.xlu0 %1470 }
 0x1d2   : > { %8101 = vmatprep.subr.bf16.mxu0 %v9007_v2  ;;  %8133 = vmatprep.subr.bf16.mxu1 %v9007_v2 }
 0x1d3   : > { %v1578_v36 = vpop.permute.xlu1 %1577  ;;  %8062 = vmatmul.mubr.bf16.gmra.mxu0 %v8403_v34 }
 0x1d4   : > { %8102 = vmatpush3.bf16.msra.mxu0 %v1475_v33  ;;  %8134 = vmatpush3.bf16.msra.mxu1 %v1578_v36  ;;  %v2209_v36 = vld [vmem:[%s9157_s17 + $0x78] sm:$0xff] }
 0x1d5   : > { %1974 = vrot.lane.b32.xlu1 %v9645_v5, %s9028_s16  ;;  %2104 = vrot.lane.b32.xlu0 %v9650_v42, %s9029_s9  ;;  %v1469_v39 = vpop.permute.xlu0 %1468  ;;  %v8410_v42 = vld [vmem:[%s14030_s1 + $0xec] ss:$0 sps:$4 sm:$0x33]  }
 0x1d6   : > { %8103 = vmatprep.subr.bf16.mxu0 %v9007_v2  ;;  %8135 = vmatprep.subr.bf16.mxu1 %v9007_v2 }
 0x1d7   : > { %8109 = vmatprep.mubr.msk.bf16.mxu0 %vm9018_vm2, %v9007_v2 }
 0x1d8   : > { %8104 = vmatpush3.bf16.msra.mxu0 %v1473_v35  ;;  %v1576_v37 = vpop.permute.xlu1 %1575 }
 0x1d9   : > { %2106 = vrot.lane.b32.xlu1 %v9645_v5, %s9029_s9  ;;  %1968 = vrot.lane.b32.xlu0 %v9683_v52, %s9028_s16  ;;  %v8407_v5 = vld [vmem:[%s14030_s1 + $0xd0] sm:$0xff]  }
 0x1da   : > { %8105 = vmatprep.subr.bf16.mxu0 %v9007_v2  ;;  %8136 = vmatpush3.bf16.msra.mxu1 %v1576_v37 }
 0x1db   : > { %8177 = vmatprep.subr.bf16.mxu1 %v9007_v2 }
 0x1dc   : > { %8106 = vmatpush3.bf16.msra.mxu0 %v1471_v3 }
 0x1dd   : > { %1970 = vrot.lane.b32.xlu1 %v9677_v49, %s9028_s16  ;;  %2100 = vrot.lane.b32.xlu0 %v9683_v52, %s9029_s9 }
 0x1de   : > { %8107 = vmatprep.subr.bf16.mxu0 %v9007_v2  ;;  %8138 = vmatmul.mubr.bf16.vlgmr.msra.gmra.mxu1 %v8406_v38 }
 0x1df   : > { %8141 = vmatprep.mubr.msk.bf16.mxu1 %vm9018_vm2, %v9007_v2 }
 0x1e0   : > { %8108 = vmatpush3.bf16.msra.mxu0 %v1469_v39  ;;  %v2208_v39 = vld [vmem:[%s9157_s17 + $0x70] sm:$0xf] }
 0x1e1   : > { %2102 = vrot.lane.b32.xlu1 %v9677_v49, %s9029_s9  ;;  %1964 = vrot.lane.b32.xlu0 %v9706_v57, %s9028_s16 }
 0x1e2   : > { %8149 = vmatprep.subr.bf16.mxu0 %v9007_v2 }
 0x1e3   : > { %8110 = vmatmul.mubr.bf16.vlgmr.msra.gmra.mxu0 %v8405_v40 }
 0x1e4   : > { %8113 = vmatprep.mubr.msk.bf16.mxu0 %vm9018_vm2, %v9007_v2 }
 0x1e5   : > { %1966 = vrot.lane.b32.xlu1 %v9694_v55, %s9028_s16  ;;  %2096 = vrot.lane.b32.xlu0 %v9706_v57, %s9029_s9  ;;  %v2198_v57 = vld [vmem:[%s9157_s17 + $0x20] sm:$0xf] }
 0x1e6   : > { %8142 = vmatmul.mubr.bf16.gmra.mxu1 %v8408_v41 }
 0x1e7   : > { %8145 = vmatprep.mubr.msk.bf16.mxu1 %vm9018_vm2, %v9007_v2 }
 0x1e9   : > { %2098 = vrot.lane.b32.xlu1 %v9694_v55, %s9029_s9  ;;  %1960 = vrot.lane.b32.xlu0 %v9734_v10, %s9028_s16 }
 0x1eb   : > { %8114 = vmatmul.mubr.bf16.gmra.mxu0 %v8407_v5  ;;  %v2211_v5 = vld [vmem:[%s9157_s17 + $0x88] sm:$0xff] }
 0x1ec   : > { %8117 = vmatprep.mubr.msk.bf16.mxu0 %vm9018_vm2, %v9007_v2 }
 0x1ed   : > { %1962 = vrot.lane.b32.xlu1 %v9724_v63, %s9028_s16  ;;  %2092 = vrot.lane.b32.xlu0 %v9734_v10, %s9029_s9  ;;  %v2200_v10 = vld [vmem:[%s9157_s17 + $0x30] sm:$0xff] }
 0x1ee   : > { %8146 = vmatmul.mubr.bf16.gmra.mxu1 %v8410_v42 }
 0x1ef   : > { %8193 = vmatprep.mubr.msk.bf16.mxu1 %vm9018_vm2, %v9007_v2 }
 0x1f1   : > { %2094 = vrot.lane.b32.xlu1 %v9724_v63, %s9029_s9  ;;  %1956 = vrot.lane.b32.xlu0 %v9747_v8, %s9028_s16 }
 0x1f3   : > { %8118 = vmatmul.mubr.bf16.gmra.mxu0 %v8409_v44 }
 0x1f4   : > { %8165 = vmatprep.mubr.msk.bf16.mxu0 %vm9018_vm2, %v9007_v2 }
 0x1f5   : > { %1958 = vrot.lane.b32.xlu1 %v9742_v14, %s9028_s16  ;;  %2088 = vrot.lane.b32.xlu0 %v9747_v8, %s9029_s9 }
 0x1f9   : > { %2090 = vrot.lane.b32.xlu1 %v9742_v14, %s9029_s9  ;;  %1952 = vrot.lane.b32.xlu0 %v9766_v22, %s9028_s16 }
 0x1fd   : > { %1954 = vrot.lane.b32.xlu1 %v9382_v15, %s9028_s16  ;;  %2084 = vrot.lane.b32.xlu0 %v9766_v22, %s9029_s9 }
 0x201   : > { %2086 = vrot.lane.b32.xlu1 %v9382_v15, %s9029_s9  ;;  %2241 = vperm.xlu0 %8370, %v2194_v45  }
 0x203   : > { %v1728_v4 = vpop.permute.xlu0 %1727  ;;  %v9916_v49 = vpop.f32.mrf.mxu0 }
 0x204   : > { %8150 = vmatpush3.bf16.msra.mxu0 %v1728_v4  ;;  %v1849_v52 = vpop.permute.xlu1 %1848  ;;  %v569_v42 = vadd.f32 %v9652_v43, %v9916_v49  ;;  %v2210_v4 = vld [vmem:[%s9157_s17 + $0x80] sm:$0xff] }
 0x205   : > { %8151 = vmatprep.subr.bf16.mxu0 %v9007_v2  ;;  %2246 = vperm.xlu1 %8371, %v2195_v46   ;;  %v7831_v50 = vpop.f32.mrf.mxu0 }
 0x206   : > { %2256 = vperm.xlu0 %8370, %v2197_v47  }
 0x207   : > { %v1851_v54 = vpop.permute.xlu0 %1850  ;;  %v9922_v55 = vpop.f32.mrf.mxu0 }
 0x208   : > { %v1860_v15 = vsel %vm1852_vm10, %v1849_v52, %v1851_v54  ;;  %v572_v52 = vadd.f32 %v9671_v48, %v9922_v55 }
 0x209   : > { %8178 = vmatpush3.bf16.msra.mxu1 %v1860_v15  ;;  %2251 = vperm.xlu1 %8371, %v2196_v51   ;;  %v7832_v56 = vpop.f32.mrf.mxu0  ;;  %v2213_v51 = vld [vmem:[%s9157_s17 + $0x98] sm:$0xf] }
 0x20a   : > { %8179 = vmatprep.subr.bf16.mxu1 %v9007_v2  ;;  %2289 = vperm.xlu0 %8370, %v2199_v6  }
 0x20b   : > { %v1726_v59 = vpop.permute.xlu1 %1725  ;;  %v1845_v60 = vpop.permute.xlu0 %1844 }
 0x20c   : > { %8152 = vmatpush3.bf16.msra.mxu0 %v1726_v59  ;;  %v9927_v7 = vpop.f32.mrf.mxu0 }
 0x20d   : > { %8153 = vmatprep.subr.bf16.mxu0 %v9007_v2  ;;  %2261 = vperm.xlu1 %8371, %v2198_v57   ;;  %v2212_v57 = vld [vmem:[%s9157_s17 + $0x90] sm:$0xff]  ;;  %v577_v48 = vadd.f32 %v9686_v53, %v9927_v7  ;;  %v2217_v7 = vld [vmem:[%s9157_s17 + $0xb8] sm:$0xff] }
 0x20e   : > { %v7835_v63 = vpop.f32.mrf.mxu0  ;;  %2299 = vperm.xlu0 %8370, %v2201_v61  }
 0x20f   : > { %v1847_v0 = vpop.permute.xlu1 %1846  ;;  %v1724_v1 = vpop.permute.xlu0 %1723  ;;  %v2215_v63 = vld [vmem:[%s9157_s17 + $0xa8] sm:$0xff] }
 0x210   : > { %v1859_v11 = vsel %vm1852_vm10, %v1845_v60, %v1847_v0  ;;  %8154 = vmatpush3.bf16.msra.mxu0 %v1724_v1  ;;  %v9932_v12 = vpop.f32.mrf.mxu0 }
 0x211   : > { %8180 = vmatpush3.bf16.msra.mxu1 %v1859_v11  ;;  %8155 = vmatprep.subr.bf16.mxu0 %v9007_v2 }
 0x212   : > { %8181 = vmatprep.subr.bf16.mxu1 %v9007_v2  ;;  %v7836_v14 = vpop.f32.mrf.mxu0  ;;  %2294 = vperm.xlu1 %8371, %v2200_v10  }
 0x213   : > { %v1841_v8 = vpop.permute.xlu1 %1840  ;;  %v1843_v16 = vpop.permute.xlu0 %1842  ;;  %2309 = vperm.xlu0 %8370, %v2203_v13   ;;  %v2214_v14 = vld [vmem:[%s9157_s17 + $0xa0] sm:$0xff] }
 0x214   : > { %v1858_v19 = vsel %vm1852_vm10, %v1841_v8, %v1843_v16  ;;  %v9939_v9 = vpop.f32.mrf.mxu0  ;;  %v777_v20 = vpop.f32.mrf.mxu1  ;;  %v580_v16 = vadd.f32 %v9708_v58, %v9932_v12  ;;  %v2219_v12 = vld [vmem:[%s9157_s17 + $0xc8] sm:$0xff] }
 0x215   : > { %8182 = vmatpush3.bf16.msra.mxu1 %v1858_v19 }
 0x216   : > { %8183 = vmatprep.subr.bf16.mxu1 %v9007_v2  ;;  %v7839_v22 = vpop.f32.mrf.mxu0  ;;  %v7915_v23 = vpop.f32.mrf.mxu1  ;;  %2304 = vperm.xlu1 %8371, %v2202_v18  }
 0x217   : > { %v1722_v24 = vpop.permute.xlu1 %1721  ;;  %v1837_v25 = vpop.permute.xlu0 %1836  ;;  %2340 = vperm.xlu0 %8370, %v2205_v21   ;;  %v8411_v22 = vld [vmem:[%s14030_s1 + $0xf0] sm:$0xff]  }
 0x218   : > { %8156 = vmatpush3.bf16.msra.mxu0 %v1722_v24  ;;  %v515_v27 = vpop.f32.mrf.mxu0  ;;  %v9944_v17 = vpop.f32.mrf.mxu1  ;;  %v2216_v24 = vld [vmem:[%s9157_s17 + $0xb0] sm:$0xff] }
 0x219   : > { %8157 = vmatprep.subr.bf16.mxu0 %v9007_v2 }
 0x21a   : > { %v7840_v29 = vpop.f32.mrf.mxu0  ;;  %v7916_v30 = vpop.f32.mrf.mxu1  ;;  %2335 = vperm.xlu1 %8371, %v2204_v26  }
 0x21b   : > { %v1839_v31 = vpop.permute.xlu1 %1838  ;;  %v1720_v33 = vpop.permute.xlu0 %1719  ;;  %2350 = vperm.xlu0 %8370, %v2207_v28   ;;  %v2218_v30 = vld [vmem:[%s9157_s17 + $0xc0] sm:$0xf] }
 0x21c   : > { %v1857_v34 = vsel %vm1852_vm10, %v1837_v25, %v1839_v31  ;;  %8158 = vmatpush3.bf16.msra.mxu0 %v1720_v33  ;;  %v9950_v35 = vpop.f32.mrf.mxu1  ;;  %v585_v25 = vadd.f32 %v9716_v62, %v9939_v9  ;;  %v8412_v62 = vld [vmem:[%s14030_s1 + $0x104] sm:$0xff]  }
 0x21d   : > { %8184 = vmatpush3.bf16.msra.mxu1 %v1857_v34  ;;  %8159 = vmatprep.subr.bf16.mxu0 %v9007_v2 }
 0x21e   : > { %8185 = vmatprep.subr.bf16.mxu1 %v9007_v2  ;;  %v7919_v37 = vpop.f32.mrf.mxu1  ;;  %2345 = vperm.xlu1 %8371, %v2206_v32   ;;  %v2221_v32 = vld [vmem:[%s9157_s17 + $0xd8] sm:$0xff] }
 0x21f   : > { %v1833_v3 = vpop.permute.xlu1 %1832  ;;  %v1835_v38 = vpop.permute.xlu0 %1834  ;;  %2381 = vperm.xlu0 %8370, %v2209_v36  }
 0x220   : > { %v1856_v40 = vsel %vm1852_vm10, %v1833_v3, %v1835_v38  ;;  %v9957_v41 = vpop.f32.mrf.mxu1  ;;  %v8413_v38 = vld [vmem:[%s14030_s1 + $0xf8] sm:$0xff]  }
 0x221   : > { %8186 = vmatpush3.bf16.msra.mxu1 %v1856_v40  ;;  %v2220_v40 = vld [vmem:[%s9157_s17 + $0xd0] sm:$0xff] }
 0x222   : > { %8187 = vmatprep.subr.bf16.mxu1 %v9007_v2  ;;  %v7920_v44 = vpop.f32.mrf.mxu1  ;;  %2355 = vperm.xlu1 %8371, %v2208_v39  }
 0x223   : > { %v1718_v45 = vpop.permute.xlu1 %1717  ;;  %v1829_v46 = vpop.permute.xlu0 %1828  ;;  %2391 = vperm.xlu0 %8370, %v2211_v5   ;;  %v2223_v44 = vld [vmem:[%s9157_s17 + $0xe8] sm:$0xf] }
 0x224   : > { %8160 = vmatpush3.bf16.msra.mxu0 %v1718_v45  ;;  %v670_v47 = vpop.f32.mrf.mxu0  ;;  %v9964_v50 = vpop.f32.mrf.mxu1 }
 0x225   : > { %8161 = vmatprep.subr.bf16.mxu0 %v9007_v2  ;;  %v692_v43 = vadd.f32 %v670_v47, %v569_v42 }
 0x226   : > { %v7887_v49 = vpop.f32.mrf.mxu0  ;;  %v7923_v54 = vpop.f32.mrf.mxu1  ;;  %2386 = vperm.xlu1 %8371, %v2210_v4  }
 0x227   : > { %v1831_v6 = vpop.permute.xlu1 %1830  ;;  %v1716_v15 = vpop.permute.xlu0 %1715  ;;  %v9970_v56 = vadd.f32 %v777_v20, %v692_v43  ;;  %2401 = vperm.xlu0 %8370, %v2213_v51   ;;  %v2225_v49 = vld [vmem:[%s9157_s17 + $0xf8] sm:$0xff] }
 0x228   : > { %v1855_v59 = vsel %vm1852_vm10, %v1829_v46, %v1831_v6  ;;  %8162 = vmatpush3.bf16.msra.mxu0 %v1716_v15  ;;  %v673_v60 = vpop.f32.mrf.mxu0  ;;  %v796_v61 = vpop.f32.mrf.mxu1 }
 0x229   : > { %8188 = vmatpush3.bf16.msra.mxu1 %v1855_v59  ;;  %8163 = vmatprep.subr.bf16.mxu0 %v9007_v2  ;;  %v693_v55 = vadd.f32 %v673_v60, %v572_v52  ;;  %v8414_v52 = vld [vmem:[%s14030_s1 + $0x10c] sm:$0xff]  }
 0x22a   : > { %8189 = vmatprep.subr.bf16.mxu1 %v9007_v2  ;;  %v7888_v0 = vpop.f32.mrf.mxu0  ;;  %v7924_v1 = vpop.f32.mrf.mxu1  ;;  %2396 = vperm.xlu1 %8371, %v2212_v57   ;;  %v8415_v57 = vld [vmem:[%s14030_s1 + $0x100] ss:$0 sps:$4 sm:$0x33]   ;;  %v2224_v59 = vld [vmem:[%s9157_s17 + $0xf0] sm:$0xff] }
 0x22b   : > { %v1825_v10 = vpop.permute.xlu1 %1824  ;;  %v1827_v11 = vpop.permute.xlu0 %1826  ;;  %v9980_v13 = vadd.f32 %v9944_v17, %v693_v55  ;;  %2432 = vperm.xlu0 %8370, %v2215_v63   ;;  %v2227_v63 = vld [vmem:[%s9157_s17 + $0x108] sm:$0xff]  ;;  %v2226_v1 = vld [vmem:[%s9157_s17 + $0x100] sm:$0xff] }
 0x22c   : > { %v1854_v8 = vsel %vm1852_vm10, %v1825_v10, %v1827_v11  ;;  %v678_v53 = vpop.f32.mrf.mxu0  ;;  %v8416_v11 = vld [vmem:[%s14030_s1 + $0x114] ss:$0 sps:$4 sm:$0x33]  }
 0x22d   : > { %8190 = vmatpush3.bf16.msra.mxu1 %v1854_v8  ;;  %v694_v18 = vadd.f32 %v678_v53, %v577_v48  ;;  %v2229_v53 = vld [vmem:[%s9157_s17 + $0x118] sm:$0xff] }
 0x22e   : > { %8191 = vmatprep.subr.bf16.mxu1 %v9007_v2  ;;  %v7891_v19 = vpop.f32.mrf.mxu0  ;;  %2427 = vperm.xlu1 %8371, %v2214_v14  }
 0x22f   : > { %v1714_v20 = vpop.permute.xlu1 %1713  ;;  %v1821_v21 = vpop.permute.xlu0 %1820  ;;  %v9992_v23 = vadd.f32 %v9950_v35, %v694_v18  ;;  %2442 = vperm.xlu0 %8370, %v2217_v7  }
 0x230   : > { %8164 = vmatpush3.bf16.msra.mxu0 %v1714_v20  ;;  %v681_v58 = vpop.f32.mrf.mxu0 }
 0x231   : > { %8205 = vmatprep.subr.bf16.mxu0 %v9007_v2  ;;  %v695_v26 = vadd.f32 %v681_v58, %v580_v16 }
 0x232   : > { %v7892_v27 = vpop.f32.mrf.mxu0  ;;  %2437 = vperm.xlu1 %8371, %v2216_v24  }
 0x233   : > { %v1823_v17 = vpop.permute.xlu1 %1822  ;;  %8166 = vmatmul.mubr.bf16.vlgmr.msra.gmra.mxu0 %v8411_v22  ;;  %v1981_v28 = vpop.permute.xlu0 %1980  ;;  %v10000_v29 = vadd.f32 %v9957_v41, %v695_v26  ;;  %2473 = vperm.xlu0 %8370, %v2219_v12   ;;  %v2228_v22 = vld [vmem:[%s9157_s17 + $0x110] sm:$0xf] }
 0x234   : > { %v1853_v31 = vsel %vm1852_vm10, %v1821_v21, %v1823_v17  ;;  %8169 = vmatprep.mubr.msk.bf16.mxu0 %vm9018_vm2, %v9007_v2  ;;  %v686_v9 = vpop.f32.mrf.mxu0  ;;  %v10009_v33 = vpop.f32.mrf.mxu1 }
 0x235   : > { %8192 = vmatpush3.bf16.msra.mxu1 %v1853_v31  ;;  %v696_v34 = vadd.f32 %v686_v9, %v585_v25  ;;  %v2230_v31 = vld [vmem:[%s9157_s17 + $0x120] sm:$0xff] }
 0x236   : > { %8233 = vmatprep.subr.bf16.mxu1 %v9007_v2  ;;  %v7895_v35 = vpop.f32.mrf.mxu0  ;;  %v7971_v36 = vpop.f32.mrf.mxu1  ;;  %2447 = vperm.xlu1 %8371, %v2218_v30  }
 0x237   : > { %v1983_v37 = vpop.permute.xlu1 %1982  ;;  %v2113_v3 = vpop.permute.xlu0 %2112  ;;  %v10017_v39 = vadd.f32 %v9964_v50, %v696_v34  ;;  %2483 = vperm.xlu0 %8370, %v2221_v32   ;;  %v2222_v50 = vld [vmem:[%s9157_s17 + $0xe0] sm:$0xff] }
 0x238   : > { %v1992_v41 = vsel %vm1984_vm11, %v1981_v28, %v1983_v37  ;;  %8194 = vmatmul.mubr.bf16.vlgmr.msra.gmra.mxu1 %v8412_v62  ;;  %v689_v5 = vpop.f32.mrf.mxu0  ;;  %v10021_v42 = vpop.f32.mrf.mxu1  ;;  %v2232_v37 = vld [vmem:[%s9157_s17 + $0x130] sm:$0xff] }
 0x239   : > { %8206 = vmatpush3.bf16.msra.mxu0 %v1992_v41  ;;  %8197 = vmatprep.mubr.msk.bf16.mxu1 %vm9018_vm2, %v9007_v2 }
 0x23a   : > { %8207 = vmatprep.subr.bf16.mxu0 %v9007_v2  ;;  %v7896_v45 = vpop.f32.mrf.mxu0  ;;  %v7972_v46 = vpop.f32.mrf.mxu1  ;;  %2478 = vperm.xlu1 %8371, %v2220_v40  }
 0x23b   : > { %v2115_v4 = vpop.permute.xlu1 %2114  ;;  %8170 = vmatmul.mubr.bf16.gmra.mxu0 %v8413_v38  ;;  %v1977_v47 = vpop.permute.xlu0 %1976  ;;  %2493 = vperm.xlu0 %8370, %v2223_v44  }
 0x23c   : > { %v2124_v51 = vsel %vm2116_vm12, %v2113_v3, %v2115_v4  ;;  %8173 = vmatprep.mubr.msk.bf16.mxu0 %vm9018_vm2, %v9007_v2  ;;  %v10034_v43 = vpop.f32.mrf.mxu1 }
 0x23d   : > { %8234 = vmatpush3.bf16.msra.mxu1 %v2124_v51 }
 0x23e   : > { %8235 = vmatprep.subr.bf16.mxu1 %v9007_v2  ;;  %v7975_v54 = vpop.f32.mrf.mxu1  ;;  %2488 = vperm.xlu1 %8371, %v2222_v50  }
 0x23f   : > { %v1979_v6 = vpop.permute.xlu1 %1978  ;;  %v2109_v15 = vpop.permute.xlu0 %2108  ;;  %2524 = vperm.xlu0 %8370, %v2225_v49  }
 0x240   : > { %v1991_v60 = vsel %vm1984_vm11, %v1977_v47, %v1979_v6  ;;  %8198 = vmatmul.mubr.bf16.gmra.mxu1 %v8414_v52  ;;  %v10043_v61 = vpop.f32.mrf.mxu1 }
 0x241   : > { %8208 = vmatpush3.bf16.msra.mxu0 %v1991_v60  ;;  %8201 = vmatprep.mubr.msk.bf16.mxu1 %vm9018_vm2, %v9007_v2 }
 0x242   : > { %8209 = vmatprep.subr.bf16.mxu0 %v9007_v2  ;;  %v7976_v48 = vpop.f32.mrf.mxu1  ;;  %2519 = vperm.xlu1 %8371, %v2224_v59  }
 0x243   : > { %v2111_v55 = vpop.permute.xlu1 %2110  ;;  %8174 = vmatmul.mubr.bf16.gmra.mxu0 %v8415_v57  ;;  %v1973_v0 = vpop.permute.xlu0 %1972  ;;  %2534 = vperm.xlu0 %8370, %v2227_v63  }
 0x244   : > { %v2123_v10 = vsel %vm2116_vm12, %v2109_v15, %v2111_v55  ;;  %v884_v14 = vpop.f32.mrf.mxu0  ;;  %v10054_v8 = vpop.f32.mrf.mxu1  ;;  %8221 = vmatprep.mubr.msk.bf16.mxu0 %vm9018_vm2, %v9007_v2 }
 0x245   : > { %8236 = vmatpush3.bf16.msra.mxu1 %v2123_v10  ;;  %v906_v7 = vadd.f32 %v884_v14, %v9970_v56  ;;  %v2231_v56 = vld [vmem:[%s9157_s17 + $0x128] sm:$0xff] }
 0x246   : > { %8237 = vmatprep.subr.bf16.mxu1 %v9007_v2  ;;  %v7943_v16 = vpop.f32.mrf.mxu0  ;;  %v7979_v18 = vpop.f32.mrf.mxu1  ;;  %2529 = vperm.xlu1 %8371, %v2226_v1  }
 0x247   : > { %v1975_v19 = vpop.permute.xlu1 %1974  ;;  %v2105_v20 = vpop.permute.xlu0 %2104  ;;  %v10062_v21 = vadd.f32 %v10009_v33, %v906_v7  ;;  %2565 = vperm.xlu0 %8370, %v2229_v53  }
 0x248   : > { %v1990_v24 = vsel %vm1984_vm11, %v1973_v0, %v1975_v19  ;;  %8202 = vmatmul.mubr.bf16.gmra.mxu1 %v8416_v11  ;;  %v887_v58 = vpop.f32.mrf.mxu0  ;;  %v1010_v12 = vpop.f32.mrf.mxu1 }
 0x249   : > { %8210 = vmatpush3.bf16.msra.mxu0 %v1990_v24  ;;  %v907_v25 = vadd.f32 %v887_v58, %v9980_v13  ;;  %8249 = vmatprep.mubr.msk.bf16.mxu1 %vm9018_vm2, %v9007_v2  ;;  %v2233_v13 = vld [vmem:[%s9157_s17 + $0x138] sm:$0xf] }
 0x24a   : > { %8211 = vmatprep.subr.bf16.mxu0 %v9007_v2  ;;  %v7944_v26 = vpop.f32.mrf.mxu0  ;;  %v7980_v27 = vpop.f32.mrf.mxu1  ;;  %2539 = vperm.xlu1 %8371, %v2228_v22  }
 0x24b   : > { %v2107_v17 = vpop.permute.xlu1 %2106  ;;  %v1969_v28 = vpop.permute.xlu0 %1968  ;;  %v10072_v30 = vadd.f32 %v10021_v42, %v907_v25  ;;  %2575 = vperm.xlu0 %8370, %v2231_v56  }
 0x24c   : > { %v2122_v62 = vsel %vm2116_vm12, %v2105_v20, %v2107_v17  ;;  %v892_v9 = vpop.f32.mrf.mxu0 }
 0x24d   : > { %8238 = vmatpush3.bf16.msra.mxu1 %v2122_v62  ;;  %v908_v33 = vadd.f32 %v892_v9, %v9992_v23 }
 0x24e   : > { %8239 = vmatprep.subr.bf16.mxu1 %v9007_v2  ;;  %v7947_v32 = vpop.f32.mrf.mxu0  ;;  %2570 = vperm.xlu1 %8371, %v2230_v31  }
 0x24f   : > { %v1971_v34 = vpop.permute.xlu1 %1970  ;;  %v2101_v35 = vpop.permute.xlu0 %2100  ;;  %v10080_v36 = vadd.f32 %v10034_v43, %v908_v33  ;;  %2585 = vperm.xlu0 %8370, %v2233_v13  }
 0x250   : > { %v1989_v3 = vsel %vm1984_vm11, %v1969_v28, %v1971_v34  ;;  %v895_v38 = vpop.f32.mrf.mxu0 }
 0x251   : > { %8212 = vmatpush3.bf16.msra.mxu0 %v1989_v3  ;;  %v909_v40 = vadd.f32 %v895_v38, %v10000_v29 }
 0x252   : > { %8213 = vmatprep.subr.bf16.mxu0 %v9007_v2  ;;  %v7948_v23 = vpop.f32.mrf.mxu0  ;;  %2580 = vperm.xlu1 %8371, %v2232_v37  }
 0x253   : > { %v2103_v41 = vpop.permute.xlu1 %2102  ;;  %v1965_v5 = vpop.permute.xlu0 %1964  ;;  %v10087_v42 = vadd.f32 %v10043_v61, %v909_v40 }
 0x254   : > { %v2121_v44 = vsel %vm2116_vm12, %v2101_v35, %v2103_v41  ;;  %v900_v45 = vpop.f32.mrf.mxu0  ;;  %v1205_v46 = vpop.f32.mrf.mxu1  ;;  %v8417_v35 = vld [vmem:[%s14030_s1 + $0x118] sm:$0xff]   ;;  %v8418_v41 = vld [vmem:[%s14030_s1 + $0x12c] sm:$0xff]  }
 0x255   : > { %8240 = vmatpush3.bf16.msra.mxu1 %v2121_v44  ;;  %v910_v4 = vadd.f32 %v900_v45, %v10017_v39 }
 0x256   : > { %8241 = vmatprep.subr.bf16.mxu1 %v9007_v2  ;;  %v7951_v47 = vpop.f32.mrf.mxu0  ;;  %v8027_v29 = vpop.f32.mrf.mxu1 }
 0x257   : > { %v1967_v50 = vpop.permute.xlu1 %1966  ;;  %v2097_v51 = vpop.permute.xlu0 %2096  ;;  %v10093_v52 = vadd.f32 %v10054_v8, %v910_v4  ;;  %v8420_v29 = vld [vmem:[%s14030_s1 + $0x134] sm:$0xff]  }
 0x258   : > { %v1988_v43 = vsel %vm1984_vm11, %v1965_v5, %v1967_v50  ;;  %v903_v49 = vpop.f32.mrf.mxu0  ;;  %v1208_v54 = vpop.f32.mrf.mxu1 }
 0x259   : > { %8214 = vmatpush3.bf16.msra.mxu0 %v1988_v43 }
 0x25a   : > { %8215 = vmatprep.subr.bf16.mxu0 %v9007_v2  ;;  %v7952_v6 = vpop.f32.mrf.mxu0  ;;  %v8028_v15 = vpop.f32.mrf.mxu1 }
 0x25b   : > { %v2099_v57 = vpop.permute.xlu1 %2098  ;;  %v1961_v39 = vpop.permute.xlu0 %1960  ;;  %v8422_v15 = vld [vmem:[%s14030_s1 + $0x13c] ss:$0 sps:$4 sm:$0x33]  }
 0x25c   : > { %v2120_v59 = vsel %vm2116_vm12, %v2097_v51, %v2099_v57  ;;  %v1213_v60 = vpop.f32.mrf.mxu1 }
 0x25d   : > { %8242 = vmatpush3.bf16.msra.mxu1 %v2120_v59 }
 0x25e   : > { %8243 = vmatprep.subr.bf16.mxu1 %v9007_v2  ;;  %v8031_v61 = vpop.f32.mrf.mxu1 }
 0x25f   : > { %v1963_v63 = vpop.permute.xlu1 %1962  ;;  %v2093_v48 = vpop.permute.xlu0 %2092 }
 0x260   : > { %v1987_v55 = vsel %vm1984_vm11, %v1961_v39, %v1963_v63  ;;  %v1216_v0 = vpop.f32.mrf.mxu1 }
 0x261   : > { %8216 = vmatpush3.bf16.msra.mxu0 %v1987_v55 }
 0x262   : > { %8217 = vmatprep.subr.bf16.mxu0 %v9007_v2  ;;  %v8032_v1 = vpop.f32.mrf.mxu1 }
 0x263   : > { %v1098_v10 = vpop.f32.mrf.mxu0  ;;  %v2095_v11 = vpop.permute.xlu1 %2094 }
 0x264   : > { %v1120_v14 = vadd.f32 %v1098_v10, %v10062_v21  ;;  %v2119_v8 = vsel %vm2116_vm12, %v2093_v48, %v2095_v11  ;;  %v1957_v53 = vpop.permute.xlu0 %1956  ;;  %v1221_v7 = vpop.f32.mrf.mxu1 }
 0x265   : > { %v7999_v16 = vpop.f32.mrf.mxu0  ;;  %8244 = vmatpush3.bf16.msra.mxu1 %v2119_v8 }
 0x266   : > { %v1227_v18 = vadd.f32 %v1205_v46, %v1120_v14  ;;  %8245 = vmatprep.subr.bf16.mxu1 %v9007_v2  ;;  %v8035_v19 = vpop.f32.mrf.mxu1  ;;  %v8419_v46 = vld [vmem:[%s14030_s1 + $0x120] sm:$0xff]  }
 0x267   : > { %v1101_v20 = vpop.f32.mrf.mxu0  ;;  %v1959_v22 = vpop.permute.xlu1 %1958 }
 0x268   : > { %v1121_v24 = vadd.f32 %v1101_v20, %v10072_v30  ;;  %v1986_v58 = vsel %vm1984_vm11, %v1957_v53, %v1959_v22  ;;  %v2089_v12 = vpop.permute.xlu0 %2088  ;;  %v1224_v56 = vpop.f32.mrf.mxu1 }
 0x269   : > { %8218 = vmatpush3.bf16.msra.mxu0 %v1986_v58  ;;  %v8000_v21 = vpop.f32.mrf.mxu0 }
 0x26a   : > { %v1228_v25 = vadd.f32 %v1208_v54, %v1121_v24  ;;  %8219 = vmatprep.subr.bf16.mxu0 %v9007_v2  ;;  %v8036_v26 = vpop.f32.mrf.mxu1 }
 0x26b   : > { %v2091_v27 = vpop.permute.xlu1 %2090  ;;  %v1106_v17 = vpop.f32.mrf.mxu0 }
 0x26c   : > { %v2118_v28 = vsel %vm2116_vm12, %v2089_v12, %v2091_v27  ;;  %v1122_v31 = vadd.f32 %v1106_v17, %v10080_v36  ;;  %v1953_v62 = vpop.permute.xlu0 %1952 }
 0x26d   : > { %8246 = vmatpush3.bf16.msra.mxu1 %v2118_v28  ;;  %v8003_v9 = vpop.f32.mrf.mxu0 }
 0x26e   : > { %v1229_v30 = vadd.f32 %v1213_v60, %v1122_v31  ;;  %8247 = vmatprep.subr.bf16.mxu1 %v9007_v2 }
 0x26f   : > { %v1955_v13 = vpop.permute.xlu1 %1954  ;;  %v1109_v33 = vpop.f32.mrf.mxu0 }
 0x270   : > { %v1985_v32 = vsel %vm1984_vm11, %v1953_v62, %v1955_v13  ;;  %v1123_v34 = vadd.f32 %v1109_v33, %v10087_v42  ;;  %v2085_v37 = vpop.permute.xlu0 %2084 }
 0x271   : > { %8220 = vmatpush3.bf16.msra.mxu0 %v1985_v32  ;;  %v8004_v3 = vpop.f32.mrf.mxu0 }
 0x272   : > { %v1230_v36 = vadd.f32 %v1216_v0, %v1123_v34 }
 0x273   : > { %v2087_v38 = vpop.permute.xlu1 %2086  ;;  %v1114_v40 = vpop.f32.mrf.mxu0 }
 0x274   : > { %v2117_v23 = vsel %vm2116_vm12, %v2085_v37, %v2087_v38  ;;  %8222 = vmatmul.mubr.bf16.vlgmr.msra.gmra.mxu0 %v8417_v35  ;;  %v1124_v5 = vadd.f32 %v1114_v40, %v10093_v52  ;;  %v8421_v52 = vld [vmem:[%s14030_s1 + $0x128] ss:$0 sps:$4 sm:$0x33]  }
 0x275   : > { %8248 = vmatpush3.bf16.msra.mxu1 %v2117_v23  ;;  %8225 = vmatprep.mubr.msk.bf16.mxu0 %vm9018_vm2, %v9007_v2  ;;  %v8007_v42 = vpop.f32.mrf.mxu0 }
 0x276   : > { %v1231_v44 = vadd.f32 %v1221_v7, %v1124_v5 }
 0x277   : > { %v1117_v45 = vpop.f32.mrf.mxu0 }
 0x278   : > { %8250 = vmatmul.mubr.bf16.vlgmr.msra.gmra.mxu1 %v8418_v41 }
 0x279   : > { %8253 = vmatprep.mubr.msk.bf16.mxu1 %vm9018_vm2, %v9007_v2  ;;  %v8008_v4 = vpop.f32.mrf.mxu0 }
 0x27b   : > { %v1419_v47 = vpop.f32.mrf.mxu1 }
 0x27c   : > { %8226 = vmatmul.mubr.bf16.gmra.mxu0 %v8419_v46 }
 0x27d   : > { %8229 = vmatprep.mubr.msk.bf16.mxu0 %vm9018_vm2, %v9007_v2  ;;  %v8083_v50 = vpop.f32.mrf.mxu1 }
 0x27f   : > { %v1422_v51 = vpop.f32.mrf.mxu1 }
 0x280   : > { %8254 = vmatmul.mubr.bf16.gmra.mxu1 %v8420_v29 }
 0x281   : > { %8257 = vmatprep.mubr.msk.bf16.mxu1 %vm9018_vm2, %v9007_v2  ;;  %v8084_v43 = vpop.f32.mrf.mxu1 }
 0x283   : > { %v1312_v49 = vpop.f32.mrf.mxu0  ;;  %v1427_v54 = vpop.f32.mrf.mxu1 }
 0x284   : > { %v1334_v6 = vadd.f32 %v1312_v49, %v1227_v18  ;;  %8230 = vmatmul.mubr.bf16.gmra.mxu0 %v8421_v52 }
 0x285   : > { %v8055_v57 = vpop.f32.mrf.mxu0  ;;  %v8087_v39 = vpop.f32.mrf.mxu1 }
 0x286   : > { %v1441_v59 = vadd.f32 %v1419_v47, %v1334_v6  ;;  %v10144_v6 = vpop.permute.xlu1 %2246 }
 0x287   : > { %v1315_v60 = vpop.f32.mrf.mxu0  ;;  %v1430_v61 = vpop.f32.mrf.mxu1 }
 0x288   : > { %v1335_v63 = vadd.f32 %v1315_v60, %v1228_v25  ;;  %8258 = vmatmul.mubr.bf16.gmra.mxu1 %v8422_v15 }
 0x289   : > { %v8056_v48 = vpop.f32.mrf.mxu0  ;;  %v8088_v55 = vpop.f32.mrf.mxu1 }
 0x28a   : > { %v1442_v0 = vadd.f32 %v1422_v51, %v1335_v63  ;;  %v10148_v57 = vpop.permute.xlu1 %2251 }
 0x28b   : > { %v1320_v2 = vpop.f32.mrf.mxu0  ;;  %v1435_v1 = vpop.f32.mrf.mxu1 }
 0x28c   : > { %v1336_v10 = vadd.f32 %v1320_v2, %v1229_v30 }
 0x28d   : > { %v8059_v11 = vpop.f32.mrf.mxu0  ;;  %v8091_v14 = vpop.f32.mrf.mxu1 }
 0x28e   : > { %v1443_v8 = vadd.f32 %v1427_v54, %v1336_v10  ;;  %v10142_v54 = vpop.permute.xlu0 %2241 }
 0x28f   : > { %v1323_v53 = vpop.f32.mrf.mxu0  ;;  %v1438_v7 = vpop.f32.mrf.mxu1 }
 0x290   : > { %v1337_v16 = vadd.f32 %v1323_v53, %v1230_v36 }
 0x291   : > { %v8060_v18 = vpop.f32.mrf.mxu0  ;;  %v8092_v19 = vpop.f32.mrf.mxu1 }
 0x292   : > { %v1444_v20 = vadd.f32 %v1430_v61, %v1337_v16  ;;  %v10146_v15 = vpop.permute.xlu0 %2256 }
 0x293   : > { %v1328_v22 = vpop.f32.mrf.mxu0 }
 0x294   : > { %v1338_v24 = vadd.f32 %v1328_v22, %v1231_v44 }
 0x295   : > { %v8063_v58 = vpop.f32.mrf.mxu0 }
 0x296   : > { %v1445_v12 = vadd.f32 %v1435_v1, %v1338_v24  ;;  %v10150_v39 = vpop.permute.xlu0 %2289 }
 0x297   : > { %v1331_v56 = vpop.f32.mrf.mxu0 }
 0x299   : > { %v8064_v21 = vpop.f32.mrf.mxu0 }
 0x29a   : > { %v10154_v60 = vpop.permute.xlu0 %2299 }
 0x29e   : > { %v1633_v25 = vpop.f32.mrf.mxu1  ;;  %v10158_v63 = vpop.permute.xlu0 %2309 }
 0x2a0   : > { %v8139_v26 = vpop.f32.mrf.mxu1 }
 0x2a2   : > { %v1636_v27 = vpop.f32.mrf.mxu1  ;;  %v10162_v55 = vpop.permute.xlu0 %2340 }
 0x2a3   : > { %v1526_v17 = vpop.f32.mrf.mxu0 }
 0x2a4   : > { %v1548_v28 = vadd.f32 %v1526_v17, %v1441_v59  ;;  %v8140_v31 = vpop.f32.mrf.mxu1  ;;  %v10152_v59 = vpop.permute.xlu1 %2261 }
 0x2a5   : > { %v8111_v62 = vpop.f32.mrf.mxu0 }
 0x2a6   : > { %v10140_v9 = vadd.f32 %v1633_v25, %v1548_v28  ;;  %v1641_v30 = vpop.f32.mrf.mxu1  ;;  %v10166_v11 = vpop.permute.xlu0 %2350 }
 0x2a7   : > { %v1529_v13 = vpop.f32.mrf.mxu0 }
 0x2a8   : > { %v1549_v33 = vadd.f32 %v1529_v13, %v1442_v0  ;;  %v8143_v32 = vpop.f32.mrf.mxu1  ;;  %v10156_v61 = vpop.permute.xlu1 %2294 }
 0x2a9   : > { %v8112_v34 = vpop.f32.mrf.mxu0 }
 0x2aa   : > { %v1656_v35 = vadd.f32 %v1636_v27, %v1549_v33  ;;  %v1644_v37 = vpop.f32.mrf.mxu1  ;;  %v10170_v24 = vpop.permute.xlu0 %2381 }
 0x2ab   : > { %v1534_v3 = vpop.f32.mrf.mxu0 }
 0x2ac   : > { %v1550_v36 = vadd.f32 %v1534_v3, %v1443_v8  ;;  %v8144_v38 = vpop.f32.mrf.mxu1  ;;  %v10160_v48 = vpop.permute.xlu1 %2304 }
 0x2ad   : > { %v8115_v40 = vpop.f32.mrf.mxu0 }
 0x2ae   : > { %v1657_v23 = vadd.f32 %v1641_v30, %v1550_v36  ;;  %v1649_v41 = vpop.f32.mrf.mxu1  ;;  %v10176_v31 = vpop.permute.xlu0 %2391 }
 0x2af   : > { %v1537_v5 = vpop.f32.mrf.mxu0 }
 0x2b0   : > { %v1551_v42 = vadd.f32 %v1537_v5, %v1444_v20  ;;  %v8147_v44 = vpop.f32.mrf.mxu1  ;;  %v10164_v0 = vpop.permute.xlu1 %2335 }
 0x2b1   : > { %v8116_v45 = vpop.f32.mrf.mxu0 }
 0x2b2   : > { %v1658_v46 = vadd.f32 %v1644_v37, %v1551_v42  ;;  %v1652_v4 = vpop.f32.mrf.mxu1 }
 0x2b3   : > { %v1542_v47 = vpop.f32.mrf.mxu0 }
 0x2b4   : > { %v1552_v29 = vadd.f32 %v1542_v47, %v1445_v12  ;;  %v8148_v50 = vpop.f32.mrf.mxu1  ;;  %v10168_v53 = vpop.permute.xlu1 %2345 }
 0x2b5   : > { %v8119_v51 = vpop.f32.mrf.mxu0 }
 0x2b6   : > { %v1659_v52 = vadd.f32 %v1649_v41, %v1552_v29 }
 0x2b7   : > { %v1545_v43 = vpop.f32.mrf.mxu0 }
 0x2b8   : > { %v10172_v12 = vpop.permute.xlu1 %2355 }
 0x2b9   : > { %v8120_v49 = vpop.f32.mrf.mxu0 }
 0x2bc   : > { %v10178_v13 = vpop.permute.xlu1 %2386 }
 0x2c0   : > { %v10184_v40 = vpop.permute.xlu1 %2396 }
 0x2c4   : > { %v2428_v42 = vpop.permute.xlu1 %2427 }
 0x2c8   : > { %v10190_v45 = vpop.permute.xlu1 %2437 }
 0x2cc   : > { %v10194_v4 = vpop.permute.xlu1 %2447 }
 0x2d0   : > { %v10196_v29 = vpop.permute.xlu1 %2478 }
 0x2d4   : > { %v10200_v51 = vpop.permute.xlu1 %2488 }
 0x2d8   : > { %v2520_v43 = vpop.permute.xlu1 %2519 }
 0x2f3   : > { %v1771_v2 = vpop.f32.mrf.mxu0 }
 0x2f5   : > { %v8167_v1 = vpop.f32.mrf.mxu0 }
 0x2f6   : > { %v1793_v1 = vadd.f32 %v1771_v2, %v10140_v9 }
 0x2f7   : > { %v1774_v10 = vpop.f32.mrf.mxu0 }
 0x2f8   : > { %v1794_v14 = vadd.f32 %v1774_v10, %v1656_v35  ;;  %v1903_v8 = vpop.f32.mrf.mxu1 }
 0x2f9   : > { %v8168_v7 = vpop.f32.mrf.mxu0 }
 0x2fa   : > { %v8195_v16 = vpop.f32.mrf.mxu1  ;;  %v10207_v7 = vpop.permute.xlu1 %2529 }
 0x2fb   : > { %v1779_v18 = vpop.f32.mrf.mxu0 }
 0x2fc   : > { %v1795_v19 = vadd.f32 %v1779_v18, %v1657_v23  ;;  %v1906_v20 = vpop.f32.mrf.mxu1  ;;  %v10186_v23 = vpop.permute.xlu0 %2401  ;;  %v1925_v18 = vadd.f32 %v1903_v8, %v1793_v1 }
 0x2fd   : > { %v8171_v22 = vpop.f32.mrf.mxu0 }
 0x2fe   : > { %v8196_v58 = vpop.f32.mrf.mxu1 }
 0x2ff   : > { %v1782_v56 = vpop.f32.mrf.mxu0  ;;  %v1926_v58 = vadd.f32 %v1906_v20, %v1794_v14 }
 0x300   : > { %v1796_v21 = vadd.f32 %v1782_v56, %v1658_v46  ;;  %v1911_v25 = vpop.f32.mrf.mxu1  ;;  %v10188_v44 = vpop.permute.xlu0 %2432 }
 0x301   : > { %v10174_v26 = vadd.f32 %v1911_v25, %v1795_v19  ;;  %v8172_v27 = vpop.f32.mrf.mxu0 }
 0x302   : > { %v8199_v17 = vpop.f32.mrf.mxu1  ;;  %v2234_v27 = vld [vmem:[#allocation2] sm:$0xff] }
 0x303   : > { %v1787_v28 = vpop.f32.mrf.mxu0  ;;  %v2282_v17 = vld [vmem:[#allocation2 + $0x28] sm:$0xff] }
 0x304   : > { %v1797_v62 = vadd.f32 %v1787_v28, %v1659_v52  ;;  %v1914_v30 = vpop.f32.mrf.mxu1  ;;  %v10192_v46 = vpop.permute.xlu0 %2442 }
 0x305   : > { %v10180_v33 = vadd.f32 %v1914_v30, %v1796_v21  ;;  %v8175_v32 = vpop.f32.mrf.mxu0  ;;  %v2374_v30 = vld [vmem:[#allocation2 + $0x78] sm:$0xff] }
 0x306   : > { %v8200_v34 = vpop.f32.mrf.mxu1  ;;  %v2420_v32 = vld [vmem:[#allocation2 + $0xa0] sm:$0xff] }
 0x307   : > { %v1790_v35 = vpop.f32.mrf.mxu0  ;;  %v10211_v34 = vpop.permute.xlu1 %2539 }
 0x308   : > { %v1919_v37 = vpop.f32.mrf.mxu1  ;;  %v2474_v47 = vpop.permute.xlu0 %2473  ;;  %14155 = vst [vmem:[#allocation15_spill] sm:$0xff] %v10211_v34 }
 0x309   : > { %v10182_v3 = vadd.f32 %v1919_v37, %v1797_v62  ;;  %v8176_v36 = vpop.f32.mrf.mxu0  ;;  %v2328_v62 = vld [vmem:[#allocation2 + $0x50] sm:$0xff] }
 0x30a   : > { %v8203_v38 = vpop.f32.mrf.mxu1  ;;  %v2466_v36 = vld [vmem:[#allocation2 + $0xc8] sm:$0xff] }
 0x30b   : > { %v2512_v38 = vld [vmem:[#allocation2 + $0xf0] sm:$0xff] }
 0x30c   : > { %v1922_v41 = vpop.f32.mrf.mxu1  ;;  %v10198_v50 = vpop.permute.xlu0 %2483 }
 0x30d   : > { %v2558_v41 = vld [vmem:[#allocation2 + $0x118] sm:$0xff] }
 0x30e   : > { %v8204_v5 = vpop.f32.mrf.mxu1 }
 0x310   : > { %v10202_v52 = vpop.permute.xlu0 %2493 }
 0x311   : > { %14154 = vst [vmem:[#allocation14_spill] sm:$0xff] %v10202_v52 }
 0x314   : > { %v10204_v49 = vpop.permute.xlu0 %2524 }
 0x318   : > { %v10209_v16 = vpop.permute.xlu0 %2534 }
 0x31c   : > { %v2566_v35 = vpop.permute.xlu0 %2565 }
 0x334   : > { %v2035_v10 = vpop.f32.mrf.mxu0 }
 0x335   : > { %v2057_v22 = vadd.f32 %v2035_v10, %v1925_v18 }
 0x336   : > { %v8223_v19 = vpop.f32.mrf.mxu0 }
 0x338   : > { %v2038_v56 = vpop.f32.mrf.mxu0  ;;  %v2167_v21 = vpop.f32.mrf.mxu1 }
 0x339   : > { %v2189_v25 = vadd.f32 %v2167_v21, %v2057_v22  ;;  %v2058_v28 = vadd.f32 %v2038_v56, %v1926_v58 }
 0x33a   : > { %v8224_v9 = vpop.f32.mrf.mxu0  ;;  %v8251_v2 = vpop.f32.mrf.mxu1 }
 0x33b   : > { %v2264_v8 = vmul.f32 %v10142_v54, %v2189_v25  ;;  %v2312_v37 = vmul.f32 %v10150_v39, %v2189_v25  ;;  %v2358_v14 = vmul.f32 %v10164_v0, %v2189_v25  ;;  %v2404_v20 = vmul.f32 %v10170_v24, %v2189_v25 }
 0x33c   : > { %v2450_v5 = vmul.f32 %v2428_v42, %v2189_v25  ;;  %v2496_v1 = vmul.f32 %v2474_v47, %v2189_v25  ;;  %v2542_v10 = vmul.f32 %v2520_v43, %v2189_v25  ;;  %v2588_v18 = vmul.f32 %v2566_v35, %v2189_v25  ;;  %v2043_v19 = vpop.f32.mrf.mxu0  ;;  %v2170_v22 = vpop.f32.mrf.mxu1  ;;  %v2235_v42 = vld [vmem:[#allocation2 + $0x8] sm:$0xff]  ;;  %v2283_v47 = vld [vmem:[#allocation2 + $0x30] sm:$0xff]  ;;  %v2329_v43 = vld [vmem:[#allocation2 + $0x58] sm:$0xff] }
 0x33d   : > { %v2269_v58 = vadd.f32 %v2264_v8, %v2234_v27  ;;  %v2317_v56 = vadd.f32 %v2312_v37, %v2282_v17  ;;  %v2363_v21 = vadd.f32 %v2358_v14, %v2328_v62  ;;  %v2409_v9 = vadd.f32 %v2404_v20, %v2374_v30  ;;  %v2375_v25 = vld [vmem:[#allocation2 + $0x80] sm:$0xff]  ;;  %v2421_v27 = vld [vmem:[#allocation2 + $0xa8] sm:$0xff]  ;;  %v2571_v30 = vpop.permute.xlu1 %2570  ;;  %v2467_v37 = vld [vmem:[#allocation2 + $0xd0] sm:$0xff] }
 0x33e   : > { %v2455_v54 = vadd.f32 %v2450_v5, %v2420_v32  ;;  %v2501_v2 = vadd.f32 %v2496_v1, %v2466_v36  ;;  %v2547_v39 = vadd.f32 %v2542_v10, %v2512_v38  ;;  %v2593_v34 = vadd.f32 %v2588_v18, %v2558_v41  ;;  %v8227_v0 = vpop.f32.mrf.mxu0  ;;  %v8252_v52 = vpop.f32.mrf.mxu1  ;;  %v2513_v14 = vld [vmem:[#allocation2 + $0xf8] sm:$0xff]  ;;  %v2559_v20 = vld [vmem:[#allocation2 + $0x120] sm:$0xff] }
 0x33f   : > { %2275 = vst.msk [vmem:[#allocation2] sm:$0xff] %vm2274_vm13, %v2269_v58  ;;  %2322 = vst.msk [vmem:[#allocation2 + $0x28] sm:$0xff] %vm2274_vm13, %v2317_v56  ;;  %v2190_v24 = vadd.f32 %v2170_v22, %v2058_v28  ;;  %v2059_v52 = vadd.f32 %v2043_v19, %v10174_v26 }
 0x340   : > { %2368 = vst.msk [vmem:[#allocation2 + $0x50] sm:$0xff] %vm2274_vm13, %v2363_v21  ;;  %2414 = vst.msk [vmem:[#allocation2 + $0x78] sm:$0xff] %vm2274_vm13, %v2409_v9  ;;  %v2046_v17 = vpop.f32.mrf.mxu0  ;;  %v2175_v62 = vpop.f32.mrf.mxu1  ;;  %v2330_v21 = vld [vmem:[#allocation2 + $0x60] sm:$0xff]  ;;  %v2376_v9 = vld [vmem:[#allocation2 + $0x88] sm:$0xff] }
 0x341   : > { %2460 = vst.msk [vmem:[#allocation2 + $0xa0] sm:$0xff] %vm2274_vm13, %v2455_v54  ;;  %2506 = vst.msk [vmem:[#allocation2 + $0xc8] sm:$0xff] %vm2274_vm13, %v2501_v2  ;;  %v2265_v28 = vmul.f32 %v10144_v6, %v2190_v24  ;;  %v2313_v32 = vmul.f32 %v10156_v61, %v2190_v24  ;;  %v2359_v35 = vmul.f32 %v10162_v55, %v2190_v24  ;;  %v2422_v54 = vld [vmem:[#allocation2 + $0xb0] sm:$0xff] }
 0x342   : > { %2552 = vst.msk [vmem:[#allocation2 + $0xf0] sm:$0xff] %vm2274_vm13, %v2547_v39  ;;  %2598 = vst.msk [vmem:[#allocation2 + $0x118] sm:$0xff] %vm2274_vm13, %v2593_v34  ;;  %v2405_v8 = vmul.f32 %v10178_v13, %v2190_v24  ;;  %v2451_v34 = vmul.f32 %v10188_v44, %v2190_v24  ;;  %v2497_v26 = vmul.f32 %v10196_v29, %v2190_v24  ;;  %v8228_v41 = vpop.f32.mrf.mxu0  ;;  %v8255_v5 = vpop.f32.mrf.mxu1  ;;  %v2236_v29 = vld [vmem:[#allocation2 + $0x10] sm:$0xff] }
 0x343   : > { %v2543_v36 = vmul.f32 %v10204_v49, %v2190_v24  ;;  %v2589_v38 = vmul.f32 %v2571_v30, %v2190_v24  ;;  %v2270_v1 = vadd.f32 %v2265_v28, %v2235_v42  ;;  %v2318_v6 = vadd.f32 %v2313_v32, %v2283_v47  ;;  %v2284_v49 = vld [vmem:[#allocation2 + $0x38] sm:$0xff]  ;;  %v2576_v24 = vpop.permute.xlu0 %2575 }
 0x344   : > { %v2364_v10 = vadd.f32 %v2359_v35, %v2329_v43  ;;  %v2410_v61 = vadd.f32 %v2405_v8, %v2375_v25  ;;  %v2456_v18 = vadd.f32 %v2451_v34, %v2421_v27  ;;  %v2502_v55 = vadd.f32 %v2497_v26, %v2467_v37  ;;  %v2051_v22 = vpop.f32.mrf.mxu0  ;;  %v2178_v58 = vpop.f32.mrf.mxu1  ;;  %v2468_v25 = vld [vmem:[#allocation2 + $0xd8] sm:$0xff]  ;;  %v2514_v27 = vld [vmem:[#allocation2 + $0x100] sm:$0xff]  ;;  %v2331_v26 = vld [vmem:[#allocation2 + $0x68] sm:$0xff] }
 0x345   : > { %v2548_v19 = vadd.f32 %v2543_v36, %v2513_v14  ;;  %v2594_v13 = vadd.f32 %v2589_v38, %v2559_v20  ;;  %2276 = vst.msk [vmem:[#allocation2 + $0x8] sm:$0xff] %vm2274_vm13, %v2270_v1  ;;  %2323 = vst.msk [vmem:[#allocation2 + $0x30] sm:$0xff] %vm2274_vm13, %v2318_v6  ;;  %v2191_v44 = vadd.f32 %v2175_v62, %v2059_v52  ;;  %v2560_v62 = vld [vmem:[#allocation2 + $0x128] sm:$0xff]  ;;  %v2377_v36 = vld [vmem:[#allocation2 + $0x90] sm:$0xff]  ;;  %v2581_v1 = vpop.permute.xlu1 %2580 }
 0x346   : > { %2369 = vst.msk [vmem:[#allocation2 + $0x58] sm:$0xff] %vm2274_vm13, %v2364_v10  ;;  %2415 = vst.msk [vmem:[#allocation2 + $0x80] sm:$0xff] %vm2274_vm13, %v2410_v61  ;;  %v2060_v56 = vadd.f32 %v2046_v17, %v10180_v33  ;;  %v2061_v2 = vadd.f32 %v2051_v22, %v10182_v3  ;;  %v8231_v39 = vpop.f32.mrf.mxu0  ;;  %v8256_v0 = vpop.f32.mrf.mxu1  ;;  %v2423_v38 = vld [vmem:[#allocation2 + $0xb8] sm:$0xff] }
 0x347   : > { %2461 = vst.msk [vmem:[#allocation2 + $0xa8] sm:$0xff] %vm2274_vm13, %v2456_v18  ;;  %2507 = vst.msk [vmem:[#allocation2 + $0xd0] sm:$0xff] %vm2274_vm13, %v2502_v55  ;;  %v2266_v42 = vmul.f32 %v10148_v57, %v2191_v44  ;;  %v2314_v47 = vmul.f32 %v10154_v60, %v2191_v44  ;;  %v2360_v52 = vmul.f32 %v10168_v53, %v2191_v44  ;;  %v2469_v55 = vld [vmem:[#allocation2 + $0xe0] sm:$0xff]  ;;  %v2332_v0 = vld [vmem:[#allocation2 + $0x70] sm:$0xf] }
 0x348   : > { %2553 = vst.msk [vmem:[#allocation2 + $0xf8] sm:$0xff] %vm2274_vm13, %v2548_v19  ;;  %2599 = vst.msk [vmem:[#allocation2 + $0x120] sm:$0xff] %vm2274_vm13, %v2594_v13  ;;  %v2406_v43 = vmul.f32 %v10176_v31, %v2191_v44  ;;  %v2452_v33 = vmul.f32 %v10190_v45, %v2191_v44  ;;  %v2498_v17 = vmul.f32 %v10198_v50, %v2191_v44  ;;  %v2054_v28 = vpop.f32.mrf.mxu0  ;;  %v2183_v32 = vpop.f32.mrf.mxu1  ;;  %v2237_v50 = vld [vmem:[#allocation2 + $0x18] sm:$0xff]  ;;  %v2515_v19 = vld [vmem:[#allocation2 + $0x108] sm:$0xff] }
 0x349   : > { %v2544_v3 = vmul.f32 %v10207_v7, %v2191_v44  ;;  %v2590_v30 = vmul.f32 %v2576_v24, %v2191_v44  ;;  %v2271_v35 = vadd.f32 %v2266_v42, %v2236_v29  ;;  %v2319_v57 = vadd.f32 %v2314_v47, %v2284_v49  ;;  %v2285_v7 = vld [vmem:[#allocation2 + $0x40] sm:$0xff]  ;;  %v2561_v13 = vld [vmem:[#allocation2 + $0x130] sm:$0xff]  ;;  %v2378_v24 = vld [vmem:[#allocation2 + $0x98] sm:$0xf] }
 0x34a   : > { %v2365_v8 = vadd.f32 %v2360_v52, %v2330_v21  ;;  %v2411_v60 = vadd.f32 %v2406_v43, %v2376_v9  ;;  %v2457_v37 = vadd.f32 %v2452_v33, %v2422_v54  ;;  %v2503_v53 = vadd.f32 %v2498_v17, %v2468_v25  ;;  %v8232_v20 = vpop.f32.mrf.mxu0  ;;  %v8259_v34 = vpop.f32.mrf.mxu1  ;;  %v2286_v54 = vld [vmem:[#allocation2 + $0x48] sm:$0xf]  ;;  %v2424_v42 = vld [vmem:[#allocation2 + $0xc0] sm:$0xf]  ;;  %v2516_v25 = vld [vmem:[#allocation2 + $0x110] sm:$0xf] }
 0x34b   : > { %v2549_v14 = vadd.f32 %v2544_v3, %v2514_v27  ;;  %v2595_v31 = vadd.f32 %v2590_v30, %v2560_v62  ;;  %2277 = vst.msk [vmem:[#allocation2 + $0x10] sm:$0xff] %vm2274_vm13, %v2271_v35  ;;  %2324 = vst.msk [vmem:[#allocation2 + $0x38] sm:$0xff] %vm2274_vm13, %v2319_v57  ;;  %v2192_v45 = vadd.f32 %v2178_v58, %v2060_v56  ;;  %v2470_v43 = vld [vmem:[#allocation2 + $0xe8] sm:$0xf]  ;;  %v2562_v27 = vld [vmem:[#allocation2 + $0x138] sm:$0xf] }
 0x34c   : > { %2370 = vst.msk [vmem:[#allocation2 + $0x60] sm:$0xff] %vm2274_vm13, %v2365_v8  ;;  %2416 = vst.msk [vmem:[#allocation2 + $0x88] sm:$0xff] %vm2274_vm13, %v2411_v60  ;;  %v2193_v41 = vadd.f32 %v2183_v32, %v2061_v2  ;;  %v2186_v5 = vpop.f32.mrf.mxu1 }
 0x34d   : > { %2462 = vst.msk [vmem:[#allocation2 + $0xb0] sm:$0xff] %vm2274_vm13, %v2457_v37  ;;  %2508 = vst.msk [vmem:[#allocation2 + $0xd8] sm:$0xff] %vm2274_vm13, %v2503_v53  ;;  %v2267_v6 = vmul.f32 %v10146_v15, %v2192_v45  ;;  %v2315_v10 = vmul.f32 %v10160_v48, %v2192_v45  ;;  %v2361_v61 = vmul.f32 %v10166_v11, %v2192_v45  ;;  %v2238_v48 = vld [vmem:[#allocation2 + $0x20] sm:$0xf] }
 0x34e   : > { %2554 = vst.msk [vmem:[#allocation2 + $0x100] sm:$0xff] %vm2274_vm13, %v2549_v14  ;;  %2600 = vst.msk [vmem:[#allocation2 + $0x128] sm:$0xff] %vm2274_vm13, %v2595_v31  ;;  %v2407_v18 = vmul.f32 %v10184_v40, %v2192_v45  ;;  %v2453_v22 = vmul.f32 %v10192_v46, %v2192_v45  ;;  %v2499_v58 = vmul.f32 %v10200_v51, %v2192_v45  ;;  %v8260_v49 = vpop.f32.mrf.mxu1  ;;  %v2586_v46 = vpop.permute.xlu0 %2585 }
 0x34f   : > { %v2545_v44 = vmul.f32 %v10209_v16, %v2192_v45  ;;  %v2591_v29 = vmul.f32 %v2581_v1, %v2192_v45  ;;  %v2272_v56 = vadd.f32 %v2267_v6, %v2237_v50  ;;  %v2320_v21 = vadd.f32 %v2315_v10, %v2285_v7 }
 0x350   : > { %v2366_v15 = vadd.f32 %v2361_v61, %v2331_v26  ;;  %v2412_v9 = vadd.f32 %v2407_v18, %v2377_v36  ;;  %v2458_v11 = vadd.f32 %v2453_v22, %v2423_v38  ;;  %v2504_v2 = vadd.f32 %v2499_v58, %v2469_v55 }
 0x351   : > { %v2550_v40 = vadd.f32 %v2545_v44, %v2515_v19  ;;  %v2596_v39 = vadd.f32 %v2591_v29, %v2561_v13  ;;  %2278 = vst.msk [vmem:[#allocation2 + $0x18] sm:$0xff] %vm2274_vm13, %v2272_v56  ;;  %2325 = vst.msk [vmem:[#allocation2 + $0x40] sm:$0xff] %vm2274_vm13, %v2320_v21  ;;  %v2268_v51 = vmul.f32 %v10152_v59, %v2193_v41  ;;  %v14156_v59 = vld [vmem:[#allocation14_spill] sm:$0xff] }
 0x352   : > { %2371 = vst.msk [vmem:[#allocation2 + $0x68] sm:$0xff] %vm2274_vm13, %v2366_v15  ;;  %2417 = vst.msk [vmem:[#allocation2 + $0x90] sm:$0xff] %vm2274_vm13, %v2412_v9  ;;  %v2316_v16 = vmul.f32 %v10158_v63, %v2193_v41  ;;  %v2362_v47 = vmul.f32 %v10172_v12, %v2193_v41  ;;  %v2408_v52 = vmul.f32 %v10186_v23, %v2193_v41  ;;  %v14157_v63 = vld [vmem:[#allocation15_spill] sm:$0xff] }
 0x353   : > { %2463 = vst.msk [vmem:[#allocation2 + $0xb8] sm:$0xff] %vm2274_vm13, %v2458_v11  ;;  %2509 = vst.msk [vmem:[#allocation2 + $0xe0] sm:$0xff] %vm2274_vm13, %v2504_v2  ;;  %v2454_v62 = vmul.f32 %v10194_v4, %v2193_v41  ;;  %v2500_v33 = vmul.f32 %v14156_v59, %v2193_v41  ;;  %v2546_v17 = vmul.f32 %v14157_v63, %v2193_v41 }
 0x354   : > { %2555 = vst.msk [vmem:[#allocation2 + $0x108] sm:$0xff] %vm2274_vm13, %v2550_v40  ;;  %2601 = vst.msk [vmem:[#allocation2 + $0x130] sm:$0xff] %vm2274_vm13, %v2596_v39  ;;  %v2592_v12 = vmul.f32 %v2586_v46, %v2193_v41  ;;  %v2273_v3 = vadd.f32 %v2268_v51, %v2238_v48  ;;  %v2321_v23 = vadd.f32 %v2316_v16, %v2286_v54 }
 0x355   : > { %v2367_v30 = vadd.f32 %v2362_v47, %v2332_v0  ;;  %v2413_v28 = vadd.f32 %v2408_v52, %v2378_v24  ;;  %v2459_v32 = vadd.f32 %v2454_v62, %v2424_v42  ;;  %v2505_v35 = vadd.f32 %v2500_v33, %v2470_v43  ;;  %2606 = sbr.rel (%p7473_p1) target bundleno = 3119 (0xc2f), region = 52 }
 0x356   : > { %v2551_v57 = vadd.f32 %v2546_v17, %v2516_v25  ;;  %v2597_v8 = vadd.f32 %v2592_v12, %v2562_v27  ;;  %2280 = vst.msk [vmem:[#allocation2 + $0x20] sm:$0xf] %vm2279_vm14, %v2273_v3  ;;  %2326 = vst.msk [vmem:[#allocation2 + $0x48] sm:$0xf] %vm2279_vm14, %v2321_v23 }
 0x357   : > { %2372 = vst.msk [vmem:[#allocation2 + $0x70] sm:$0xf] %vm2279_vm14, %v2367_v30  ;;  %2418 = vst.msk [vmem:[#allocation2 + $0x98] sm:$0xf] %vm2279_vm14, %v2413_v28 }
 0x358   : > { %2464 = vst.msk [vmem:[#allocation2 + $0xc0] sm:$0xf] %vm2279_vm14, %v2459_v32  ;;  %2510 = vst.msk [vmem:[#allocation2 + $0xe8] sm:$0xf] %vm2279_vm14, %v2505_v35 }
 0x359   : > { %2556 = vst.msk [vmem:[#allocation2 + $0x110] sm:$0xf] %vm2279_vm14, %v2551_v57  ;;  %2602 = vst.msk [vmem:[#allocation2 + $0x138] sm:$0xf] %vm2279_vm14, %v2597_v8 }
 0x35a   : > { %v2649_v4 = vld [vmem:[%s14032_s3 + $0x10] sm:$0xff]  ;;  %v2647_v60 = vld [vmem:[%s14032_s3] sm:$0xff]  ;;  %v9030_v37 = vmov 0   ;;  %v2650_v53 = vld [vmem:[%s14032_s3 + $0x18] sm:$0xff]  ;;  %vm3221_vm15 = vcmask 60416   ;;  %s9031_s18 = smov 120  }
 0x35b   : > { %8425 = vset.pattern.permute.xlu1 %v9030_v37  ;;  %8424 = vset.pattern.permute.xlu0 %v9030_v37  ;;  %v2648_v14 = vld [vmem:[%s14032_s3 + $0x8] sm:$0xff]  ;;  %v2651_v20 = vld [vmem:[%s14032_s3 + $0x20] sm:$0xf]  ;;  %v2654_v34 = vld [vmem:[%s14032_s3 + $0x38] sm:$0xff]  ;;  %s9032_s20 = smov 112   ;;  %vm3851_vm0 = vcmask 31744  }
 0x35c   : > { %2699 = vperm.xlu1 %8425, %v2649_v4   ;;  %2689 = vperm.xlu0 %8424, %v2647_v60   ;;  %v2652_v31 = vld [vmem:[%s14032_s3 + $0x28] sm:$0xff]  ;;  %v2653_v45 = vld [vmem:[%s14032_s3 + $0x30] sm:$0xff]  ;;  %v2655_v7 = vld [vmem:[%s14032_s3 + $0x40] sm:$0xff]  ;;  %s9033_s16 = smov 104   ;;  %vm3912_vm1 = vcmask 27648   ;;  %vm7020_vm2 = vcmask 7168  }
 0x35d   : > { %v2656_v50 = vld [vmem:[%s14032_s3 + $0x48] sm:$0xf]  ;;  %v2658_v26 = vld [vmem:[%s14032_s3 + $0x58] sm:$0xff]  ;;  %v2657_v36 = vld [vmem:[%s14032_s3 + $0x50] sm:$0xff]  ;;  %vm7061_vm3 = vcmask 15360   ;;  %vm7102_vm4 = vcmask 23552  }
 0x35e   : > { %v2660_v38 = vld [vmem:[%s14032_s3 + $0x68] sm:$0xff]  ;;  %v2659_v41 = vld [vmem:[%s14032_s3 + $0x60] sm:$0xff]  ;;  %v2662_v5 = vld [vmem:[%s14032_s3 + $0x78] sm:$0xff]  ;;  %vm7183_vm5 = vcmask 24576  }
 0x35f   : > { %v2661_v1 = vld [vmem:[%s14032_s3 + $0x70] sm:$0xf]  ;;  %v2664_v6 = vld [vmem:[%s14032_s3 + $0x88] sm:$0xff]  ;;  %v2663_v10 = vld [vmem:[%s14032_s3 + $0x80] sm:$0xff] }
 0x360   : > { %2704 = vperm.xlu1 %8425, %v2650_v53   ;;  %2694 = vperm.xlu0 %8424, %v2648_v14   ;;  %v2666_v61 = vld [vmem:[%s14032_s3 + $0x98] sm:$0xf]  ;;  %v2665_v18 = vld [vmem:[%s14032_s3 + $0x90] sm:$0xff]  ;;  %v2668_v55 = vld [vmem:[%s14032_s3 + $0xa8] sm:$0xff] }
 0x361   : > { %v2667_v19 = vld [vmem:[%s14032_s3 + $0xa0] sm:$0xff]  ;;  %v2670_v13 = vld [vmem:[%s14032_s3 + $0xb8] sm:$0xff]  ;;  %v2669_v22 = vld [vmem:[%s14032_s3 + $0xb0] sm:$0xff] }
 0x362   : > { %v2672_v58 = vld [vmem:[%s14032_s3 + $0xc8] sm:$0xff]  ;;  %v2671_v44 = vld [vmem:[%s14032_s3 + $0xc0] sm:$0xf]  ;;  %v2674_v29 = vld [vmem:[%s14032_s3 + $0xd8] sm:$0xff] }
 0x363   : > { %v2673_v49 = vld [vmem:[%s14032_s3 + $0xd0] sm:$0xff]  ;;  %v2676_v56 = vld [vmem:[%s14032_s3 + $0xe8] sm:$0xf]  ;;  %v2675_v21 = vld [vmem:[%s14032_s3 + $0xe0] sm:$0xff] }
 0x364   : > { %2714 = vperm.xlu1 %8425, %v2652_v31   ;;  %2709 = vperm.xlu0 %8424, %v2651_v20   ;;  %v2678_v15 = vld [vmem:[%s14032_s3 + $0xf8] sm:$0xff]  ;;  %v2677_v9 = vld [vmem:[%s14032_s3 + $0xf0] sm:$0xff]  ;;  %v2680_v48 = vld [vmem:[%s14032_s3 + $0x108] sm:$0xff] }
 0x365   : > { %v2679_v54 = vld [vmem:[%s14032_s3 + $0x100] sm:$0xff]  ;;  %v2682_v11 = vld [vmem:[%s14032_s3 + $0x118] sm:$0xff]  ;;  %v2681_v2 = vld [vmem:[%s14032_s3 + $0x110] sm:$0xf] }
 0x366   : > { %v2684_v40 = vld [vmem:[%s14032_s3 + $0x128] sm:$0xff]  ;;  %v2683_v39 = vld [vmem:[%s14032_s3 + $0x120] sm:$0xff]  ;;  %v2686_v0 = vld [vmem:[%s14032_s3 + $0x138] sm:$0xf] }
 0x367   : > { %v2685_v24 = vld [vmem:[%s14032_s3 + $0x130] sm:$0xff]  ;;  %v2607_v46 = vld [vmem:[#allocation2] sm:$0xff]  ;;  %v2610_v43 = vld [vmem:[#allocation2 + $0x18] sm:$0xff] }
 0x368   : > { %2724 = vperm.xlu1 %8425, %v2654_v34   ;;  %2719 = vperm.xlu0 %8424, %v2653_v45   ;;  %v2609_v42 = vld [vmem:[#allocation2 + $0x10] sm:$0xff]  ;;  %v2608_v25 = vld [vmem:[#allocation2 + $0x8] sm:$0xff]  ;;  %v2611_v3 = vld [vmem:[#allocation2 + $0x20] sm:$0xf] }
 0x369   : > { %v2612_v12 = vld [vmem:[#allocation2 + $0x28] sm:$0xff]  ;;  %v2614_v8 = vld [vmem:[#allocation2 + $0x38] sm:$0xff]  ;;  %v2613_v4 = vld [vmem:[#allocation2 + $0x30] sm:$0xff] }
 0x36a   : > { %v2616_v34 = vld [vmem:[#allocation2 + $0x48] sm:$0xf]  ;;  %v2615_v45 = vld [vmem:[#allocation2 + $0x40] sm:$0xff] }
 0x36c   : > { %2734 = vperm.xlu1 %8425, %v2656_v50   ;;  %2729 = vperm.xlu0 %8424, %v2655_v7  }
 0x370   : > { %2744 = vperm.xlu1 %8425, %v2658_v26   ;;  %2739 = vperm.xlu0 %8424, %v2657_v36  }
 0x374   : > { %2754 = vperm.xlu1 %8425, %v2660_v38   ;;  %2749 = vperm.xlu0 %8424, %v2659_v41  }
 0x378   : > { %2764 = vperm.xlu1 %8425, %v2662_v5   ;;  %2759 = vperm.xlu0 %8424, %v2661_v1   ;;  %v2618_v1 = vld [vmem:[#allocation2 + $0x58] sm:$0xff] }
 0x37c   : > { %2774 = vperm.xlu1 %8425, %v2664_v6   ;;  %2769 = vperm.xlu0 %8424, %v2663_v10   ;;  %v2617_v6 = vld [vmem:[#allocation2 + $0x50] sm:$0xff] }
 0x380   : > { %2784 = vperm.xlu1 %8425, %v2666_v61   ;;  %2779 = vperm.xlu0 %8424, %v2665_v18  }
 0x384   : > { %2794 = vperm.xlu1 %8425, %v2668_v55   ;;  %2789 = vperm.xlu0 %8424, %v2667_v19  }
 0x388   : > { %2804 = vperm.xlu1 %8425, %v2670_v13   ;;  %2799 = vperm.xlu0 %8424, %v2669_v22  }
 0x38c   : > { %2814 = vperm.xlu1 %8425, %v2672_v58   ;;  %2809 = vperm.xlu0 %8424, %v2671_v44  }
 0x390   : > { %2824 = vperm.xlu1 %8425, %v2674_v29   ;;  %2819 = vperm.xlu0 %8424, %v2673_v49   ;;  %v2620_v49 = vld [vmem:[#allocation2 + $0x68] sm:$0xff] }
 0x394   : > { %2834 = vperm.xlu1 %8425, %v2676_v56   ;;  %2829 = vperm.xlu0 %8424, %v2675_v21   ;;  %v2619_v56 = vld [vmem:[#allocation2 + $0x60] sm:$0xff] }
 0x398   : > { %2844 = vperm.xlu1 %8425, %v2678_v15   ;;  %2839 = vperm.xlu0 %8424, %v2677_v9  }
 0x39c   : > { %2854 = vperm.xlu1 %8425, %v2680_v48   ;;  %2849 = vperm.xlu0 %8424, %v2679_v54  }
 0x3a0   : > { %2864 = vperm.xlu1 %8425, %v2682_v11   ;;  %2859 = vperm.xlu0 %8424, %v2681_v2  }
 0x3a4   : > { %2874 = vperm.xlu1 %8425, %v2684_v40   ;;  %2869 = vperm.xlu0 %8424, %v2683_v39  }
 0x3a8   : > { %2884 = vperm.xlu1 %8425, %v2686_v0   ;;  %2879 = vperm.xlu0 %8424, %v2685_v24   ;;  %v2622_v24 = vld [vmem:[#allocation2 + $0x78] sm:$0xff] }
 0x3d7   : > { %v2700_v51 = vpop.permute.xlu1 %2699  ;;  %v2690_v16 = vpop.permute.xlu0 %2689 }
 0x3d8   : > { %v10409_v47 = vadd.f32 %v2700_v51, %v2609_v42  ;;  %v10411_v52 = vadd.f32 %v2690_v16, %v2607_v46  ;;  %v2621_v42 = vld [vmem:[#allocation2 + $0x70] sm:$0xf] }
 0x3da   : > { %v7476_v27 = vmul.f32 -1.442695, %v10409_v47  ;;  %v7474_v62 = vmul.f32 -1.442695, %v10411_v52 }
 0x3db   : > { %v2705_v59 = vpop.permute.xlu1 %2704  ;;  %v2695_v33 = vpop.permute.xlu0 %2694 }
 0x3dc   : > { %8426 = vpow2.f32 %v7476_v27  ;;  %v10415_v63 = vadd.f32 %v2705_v59, %v2610_v43  ;;  %v10417_v17 = vadd.f32 %v2695_v33, %v2608_v25 }
 0x3dd   : > { %8428 = vpow2.f32 %v7474_v62 }
 0x3de   : > { %v7477_v23 = vmul.f32 -1.442695, %v10415_v63  ;;  %v7475_v30 = vmul.f32 -1.442695, %v10417_v17 }
 0x3df   : > { %v2715_v28 = vpop.permute.xlu1 %2714  ;;  %v2710_v32 = vpop.permute.xlu0 %2709 }
 0x3e0   : > { %8430 = vpow2.f32 %v7477_v23  ;;  %v10421_v35 = vadd.f32 %v2715_v28, %v2612_v12  ;;  %v10423_v57 = vadd.f32 %v2710_v32, %v2611_v3  ;;  %v2624_v3 = vld [vmem:[#allocation2 + $0x88] sm:$0xff]  ;;  %v2623_v23 = vld [vmem:[#allocation2 + $0x80] sm:$0xff] }
 0x3e1   : > { %8432 = vpow2.f32 %v7475_v30 }
 0x3e2   : > { %v7479_v60 = vmul.f32 -1.442695, %v10421_v35  ;;  %v7478_v37 = vmul.f32 -1.442695, %v10423_v57 }
 0x3e3   : > { %v2725_v53 = vpop.permute.xlu1 %2724  ;;  %v2720_v14 = vpop.permute.xlu0 %2719 }
 0x3e4   : > { %8434 = vpow2.f32 %v7479_v60  ;;  %v10427_v31 = vadd.f32 %v2725_v53, %v2614_v8  ;;  %v10429_v20 = vadd.f32 %v2720_v14, %v2613_v4 }
 0x3e5   : > { %8436 = vpow2.f32 %v7478_v37 }
 0x3e6   : > { %v7481_v50 = vmul.f32 -1.442695, %v10427_v31  ;;  %v7480_v7 = vmul.f32 -1.442695, %v10429_v20 }
 0x3e7   : > { %v2735_v26 = vpop.permute.xlu1 %2734  ;;  %v2730_v36 = vpop.permute.xlu0 %2729 }
 0x3e8   : > { %8438 = vpow2.f32 %v7481_v50  ;;  %v10433_v38 = vadd.f32 %v2735_v26, %v2616_v34  ;;  %v10435_v41 = vadd.f32 %v2730_v36, %v2615_v45  ;;  %v2626_v45 = vld [vmem:[#allocation2 + $0x98] sm:$0xf]  ;;  %v2625_v50 = vld [vmem:[#allocation2 + $0x90] sm:$0xff] }
 0x3e9   : > { %v8427_v5 = vpop.eup %8426  ;;  %8440 = vpow2.f32 %v7480_v7 }
 0x3ea   : > { %v8429_v10 = vpop.eup %8428  ;;  %v3049_v61 = vadd.f32 1.0, %v8427_v5  ;;  %v7483_v18 = vmul.f32 -1.442695, %v10433_v38  ;;  %v7482_v19 = vmul.f32 -1.442695, %v10435_v41 }
 0x3eb   : > { %v3047_v55 = vadd.f32 1.0, %v8429_v10  ;;  %v2745_v13 = vpop.permute.xlu1 %2744  ;;  %v2740_v22 = vpop.permute.xlu0 %2739 }
 0x3ec   : > { %8442 = vrcp.f32 %v3049_v61  ;;  %v10439_v58 = vadd.f32 %v2745_v13, %v2618_v1  ;;  %v10441_v44 = vadd.f32 %v2740_v22, %v2617_v6 }
 0x3ed   : > { %v8431_v29 = vpop.eup %8430  ;;  %8444 = vrcp.f32 %v3047_v55 }
 0x3ee   : > { %v8433_v21 = vpop.eup %8432  ;;  %v3050_v15 = vadd.f32 1.0, %v8431_v29  ;;  %8446 = vpow2.f32 %v7483_v18  ;;  %v7485_v9 = vmul.f32 -1.442695, %v10439_v58  ;;  %v7484_v54 = vmul.f32 -1.442695, %v10441_v44 }
 0x3ef   : > { %v3048_v48 = vadd.f32 1.0, %v8433_v21  ;;  %8448 = vpow2.f32 %v7482_v19  ;;  %v2755_v11 = vpop.permute.xlu1 %2754  ;;  %v2750_v2 = vpop.permute.xlu0 %2749 }
 0x3f0   : > { %8450 = vrcp.f32 %v3050_v15  ;;  %v10445_v40 = vadd.f32 %v2755_v11, %v2620_v49  ;;  %v10447_v39 = vadd.f32 %v2750_v2, %v2619_v56  ;;  %v2628_v49 = vld [vmem:[#allocation2 + $0xa8] sm:$0xff]  ;;  %v2627_v56 = vld [vmem:[#allocation2 + $0xa0] sm:$0xff] }
 0x3f1   : > { %v8435_v0 = vpop.eup %8434  ;;  %8452 = vrcp.f32 %v3048_v48 }
 0x3f2   : > { %v8437_v46 = vpop.eup %8436  ;;  %v3052_v51 = vadd.f32 1.0, %v8435_v0  ;;  %8454 = vpow2.f32 %v7485_v9  ;;  %v7487_v16 = vmul.f32 -1.442695, %v10445_v40  ;;  %v7486_v25 = vmul.f32 -1.442695, %v10447_v39 }
 0x3f3   : > { %v3051_v43 = vadd.f32 1.0, %v8437_v46  ;;  %8456 = vpow2.f32 %v7484_v54  ;;  %v2765_v27 = vpop.permute.xlu1 %2764  ;;  %v2760_v62 = vpop.permute.xlu0 %2759 }
 0x3f4   : > { %8458 = vrcp.f32 %v3052_v51  ;;  %v10451_v59 = vadd.f32 %v2765_v27, %v2622_v24  ;;  %v10453_v33 = vadd.f32 %v2760_v62, %v2621_v42  ;;  %v2629_v27 = vld [vmem:[#allocation2 + $0xb0] sm:$0xff] }
 0x3f5   : > { %v8439_v12 = vpop.eup %8438  ;;  %8460 = vrcp.f32 %v3051_v43 }
 0x3f6   : > { %v8441_v30 = vpop.eup %8440  ;;  %v3054_v28 = vadd.f32 1.0, %v8439_v12  ;;  %8462 = vpow2.f32 %v7487_v16  ;;  %v7489_v32 = vmul.f32 -1.442695, %v10451_v59  ;;  %v7488_v4 = vmul.f32 -1.442695, %v10453_v33 }
 0x3f7   : > { %v3053_v8 = vadd.f32 1.0, %v8441_v30  ;;  %8464 = vpow2.f32 %v7486_v25  ;;  %v2775_v60 = vpop.permute.xlu1 %2774  ;;  %v2770_v37 = vpop.permute.xlu0 %2769  ;;  %v2630_v25 = vld [vmem:[#allocation2 + $0xb8] sm:$0xff] }
 0x3f8   : > { %8466 = vrcp.f32 %v3054_v28  ;;  %v10457_v53 = vadd.f32 %v2775_v60, %v2624_v3  ;;  %v10459_v14 = vadd.f32 %v2770_v37, %v2623_v23 }
 0x3f9   : > { %v8443_v34 = vpop.eup %8442  ;;  %8468 = vrcp.f32 %v3053_v8 }
 0x3fa   : > { %v8445_v7 = vpop.eup %8444  ;;  %8470 = vpow2.f32 %v7489_v32  ;;  %v7491_v26 = vmul.f32 -1.442695, %v10457_v53  ;;  %v7490_v36 = vmul.f32 -1.442695, %v10459_v14  ;;  %v10464_v1 = vmul.f32 %v8443_v34, %v10409_v47 }
 0x3fb   : > { %v8447_v5 = vpop.eup %8446  ;;  %v10467_v6 = vmul.f32 %v8445_v7, %v10411_v52  ;;  %8472 = vpow2.f32 %v7488_v4  ;;  %v2785_v10 = vpop.permute.xlu1 %2784  ;;  %v2631_v7 = vld [vmem:[#allocation2 + $0xc0] sm:$0xf] }
 0x3fc   : > { %v2780_v61 = vpop.permute.xlu0 %2779  ;;  %v8449_v18 = vpop.eup %8448  ;;  %v3056_v55 = vadd.f32 1.0, %v8447_v5  ;;  %8474 = vpow2.f32 %v7491_v26  ;;  %v10469_v19 = vadd.f32 %v2785_v10, %v2626_v45  ;;  %v3215_v2 = vsel %vm2116_vm12, %v10464_v1, 0.0 }
 0x3fd   : > { %v10471_v13 = vadd.f32 %v2780_v61, %v2625_v50  ;;  %v8451_v22 = vpop.eup %8450  ;;  %v3055_v29 = vadd.f32 1.0, %v8449_v18  ;;  %8476 = vpow2.f32 %v7490_v36  ;;  %v3209_v47 = vsel %vm2116_vm12, %v10467_v6, 0.0  ;;  %v2632_v50 = vld [vmem:[#allocation2 + $0xc8] sm:$0xff] }
 0x3fe   : > { %v8453_v52 = vpop.eup %8452  ;;  %8478 = vrcp.f32 %v3056_v55  ;;  %v7493_v21 = vmul.f32 -1.442695, %v10469_v19  ;;  %3210 = vadd.xlane.f32.xlu0 %v3209_v47  ;;  %v10487_v16 = vmul.f32 %v8451_v22, %v10415_v63 }
 0x3ff   : > { %v7492_v15 = vmul.f32 -1.442695, %v10471_v13  ;;  %v8455_v9 = vpop.eup %8454  ;;  %v10478_v48 = vmul.f32 %v8453_v52, %v10417_v17  ;;  %8480 = vrcp.f32 %v3055_v29  ;;  %v2795_v54 = vpop.permute.xlu1 %2794 }
 0x400   : > { %v2790_v11 = vpop.permute.xlu0 %2789  ;;  %v8457_v0 = vpop.eup %8456  ;;  %v3058_v24 = vadd.f32 1.0, %v8455_v9  ;;  %8482 = vpow2.f32 %v7493_v21  ;;  %v10482_v42 = vadd.f32 %v2795_v54, %v2628_v49  ;;  %14159 = vst [vmem:[#allocation17_spill] sm:$0xff] %v10487_v16  ;;  %v2634_v9 = vld [vmem:[#allocation2 + $0xd8] sm:$0xff]  ;;  %v2633_v54 = vld [vmem:[#allocation2 + $0xd0] sm:$0xff] }
 0x401   : > { %14158 = vst [vmem:[#allocation16_spill] sm:$0xff] %v10478_v48  ;;  %v10484_v46 = vadd.f32 %v2790_v11, %v2627_v56  ;;  %v8459_v51 = vpop.eup %8458  ;;  %v3057_v43 = vadd.f32 1.0, %v8457_v0  ;;  %8484 = vpow2.f32 %v7492_v15  ;;  %v3212_v17 = vsel %vm2116_vm12, %v10478_v48, 0.0 }
 0x402   : > { %v8461_v62 = vpop.eup %8460  ;;  %8486 = vrcp.f32 %v3058_v24  ;;  %v7495_v12 = vmul.f32 -1.442695, %v10482_v42  ;;  %3213 = vadd.xlane.f32.xlu1 %v3212_v17  ;;  %3216 = vadd.xlane.f32.xlu0 %v3215_v2  ;;  %v10494_v63 = vmul.f32 %v8459_v51, %v10421_v35 }
 0x403   : > { %v7494_v3 = vmul.f32 -1.442695, %v10484_v46  ;;  %v8463_v23 = vpop.eup %8462  ;;  %v10497_v30 = vmul.f32 %v8461_v62, %v10423_v57  ;;  %8488 = vrcp.f32 %v3057_v43  ;;  %v2805_v28 = vpop.permute.xlu1 %2804  ;;  %v3218_v57 = vsel %vm2116_vm12, %v10487_v16, 0.0 }
 0x404   : > { %v2800_v32 = vpop.permute.xlu0 %2799  ;;  %v8465_v8 = vpop.eup %8464  ;;  %v3060_v4 = vadd.f32 1.0, %v8463_v23  ;;  %8490 = vpow2.f32 %v7495_v12  ;;  %v10499_v60 = vadd.f32 %v2805_v28, %v2630_v25  ;;  %v3225_v22 = vsel %vm2116_vm12, %v10494_v63, 0.0 }
 0x405   : > { %14160 = vst [vmem:[#allocation18_spill] sm:$0xff] %v10497_v30  ;;  %v10501_v37 = vadd.f32 %v2800_v32, %v2629_v27  ;;  %v8467_v34 = vpop.eup %8466  ;;  %v3059_v45 = vadd.f32 1.0, %v8465_v8  ;;  %8492 = vpow2.f32 %v7494_v3  ;;  %v3222_v35 = vsel %vm3221_vm15, %v10497_v30, 0.0  ;;  %v2636_v32 = vld [vmem:[#allocation2 + $0xe8] sm:$0xf]  ;;  %v2635_v8 = vld [vmem:[#allocation2 + $0xe0] sm:$0xff] }
 0x406   : > { %v8469_v26 = vpop.eup %8468  ;;  %8494 = vrcp.f32 %v3060_v4  ;;  %v7497_v36 = vmul.f32 -1.442695, %v10499_v60  ;;  %3223 = vadd.xlane.f32.xlu1 %v3222_v35  ;;  %3219 = vadd.xlane.f32.xlu0 %v3218_v57  ;;  %v10519_v21 = vmul.f32 %v8467_v34, %v10427_v31 }
 0x407   : > { %v7496_v5 = vmul.f32 -1.442695, %v10501_v37  ;;  %v8471_v10 = vpop.eup %8470  ;;  %v10510_v61 = vmul.f32 %v8469_v26, %v10429_v20  ;;  %8496 = vrcp.f32 %v3059_v45  ;;  %v2815_v18 = vpop.permute.xlu1 %2814 }
 0x408   : > { %v2810_v55 = vpop.permute.xlu0 %2809  ;;  %v8473_v29 = vpop.eup %8472  ;;  %v3062_v47 = vadd.f32 1.0, %v8471_v10  ;;  %8498 = vpow2.f32 %v7497_v36  ;;  %v10514_v49 = vadd.f32 %v2815_v18, %v2632_v50  ;;  %v3231_v28 = vsel %vm2116_vm12, %v10519_v21, 0.0 }
 0x409   : > { %14161 = vst [vmem:[#allocation19_spill] sm:$0xff] %v10510_v61  ;;  %v10516_v56 = vadd.f32 %v2810_v55, %v2631_v7  ;;  %v8475_v52 = vpop.eup %8474  ;;  %v3061_v15 = vadd.f32 1.0, %v8473_v29  ;;  %8500 = vpow2.f32 %v7496_v5  ;;  %v3228_v20 = vsel %vm2116_vm12, %v10510_v61, 0.0  ;;  %v2638_v29 = vld [vmem:[#allocation2 + $0xf8] sm:$0xff] }
 0x40a   : > { %v8477_v11 = vpop.eup %8476  ;;  %8502 = vrcp.f32 %v3062_v47  ;;  %v3064_v2 = vadd.f32 1.0, %v8475_v52  ;;  %v7499_v0 = vmul.f32 -1.442695, %v10514_v49  ;;  %3229 = vadd.xlane.f32.xlu1 %v3228_v20  ;;  %3226 = vadd.xlane.f32.xlu0 %v3225_v22  ;;  %v2637_v47 = vld [vmem:[#allocation2 + $0xf0] sm:$0xff] }
 0x40b   : > { %v8479_v24 = vpop.eup %8478  ;;  %8504 = vrcp.f32 %v3061_v15  ;;  %v3063_v51 = vadd.f32 1.0, %v8477_v11  ;;  %v7498_v31 = vmul.f32 -1.442695, %v10516_v56  ;;  %v2825_v43 = vpop.permute.xlu1 %2824 }
 0x40c   : > { %v2820_v17 = vpop.permute.xlu0 %2819  ;;  %v8481_v25 = vpop.eup %8480  ;;  %8506 = vrcp.f32 %v3064_v2  ;;  %v10525_v27 = vadd.f32 %v2825_v43, %v2634_v9  ;;  %v10530_v3 = vmul.f32 %v8479_v24, %v10433_v38 }
 0x40d   : > { %v10527_v62 = vadd.f32 %v2820_v17, %v2633_v54  ;;  %v8483_v12 = vpop.eup %8482  ;;  %v10533_v23 = vmul.f32 %v8481_v25, %v10435_v41  ;;  %8508 = vrcp.f32 %v3063_v51 }
 0x40e   : > { %14162 = vst [vmem:[#allocation20_spill] sm:$0xff] %v10530_v3  ;;  %v8485_v4 = vpop.eup %8484  ;;  %v3066_v34 = vadd.f32 1.0, %v8483_v12  ;;  %8510 = vpow2.f32 %v7499_v0  ;;  %v7501_v45 = vmul.f32 -1.442695, %v10525_v27  ;;  %3232 = vadd.xlane.f32.xlu0 %v3231_v28  ;;  %v3237_v22 = vsel %vm3221_vm15, %v10530_v3, 0.0  ;;  %v2640_v12 = vld [vmem:[#allocation2 + $0x108] sm:$0xff] }
 0x40f   : > { %v8487_v35 = vpop.eup %8486  ;;  %v3065_v57 = vadd.f32 1.0, %v8485_v4  ;;  %8512 = vpow2.f32 %v7498_v31  ;;  %v7500_v38 = vmul.f32 -1.442695, %v10527_v62  ;;  %v3234_v41 = vsel %vm2116_vm12, %v10533_v23, 0.0  ;;  %v2835_v50 = vpop.permute.xlu1 %2834  ;;  %v2639_v28 = vld [vmem:[#allocation2 + $0x100] sm:$0xff] }
 0x410   : > { %v2830_v7 = vpop.permute.xlu0 %2829  ;;  %v8489_v26 = vpop.eup %8488  ;;  %8514 = vrcp.f32 %v3066_v34  ;;  %3235 = vadd.xlane.f32.xlu1 %v3234_v41  ;;  %v10541_v36 = vadd.f32 %v2835_v50, %v2636_v32  ;;  %v10546_v18 = vmul.f32 %v8487_v35, %v10439_v58 }
 0x411   : > { %v10543_v5 = vadd.f32 %v2830_v7, %v2635_v8  ;;  %v8491_v10 = vpop.eup %8490  ;;  %v10549_v55 = vmul.f32 %v8489_v26, %v10441_v44  ;;  %8516 = vrcp.f32 %v3065_v57 }
 0x412   : > { %v8493_v52 = vpop.eup %8492  ;;  %v3068_v15 = vadd.f32 1.0, %v8491_v10  ;;  %8518 = vpow2.f32 %v7501_v45  ;;  %v7503_v20 = vmul.f32 -1.442695, %v10541_v36  ;;  %3238 = vadd.xlane.f32.xlu0 %v3237_v22  ;;  %v3243_v25 = vsel %vm2116_vm12, %v10546_v18, 0.0 }
 0x413   : > { %v8495_v9 = vpop.eup %8494  ;;  %v3067_v54 = vadd.f32 1.0, %v8493_v52  ;;  %8520 = vpow2.f32 %v7500_v38  ;;  %v7502_v58 = vmul.f32 -1.442695, %v10543_v5  ;;  %v3240_v44 = vsel %vm2116_vm12, %v10549_v55, 0.0  ;;  %v2845_v11 = vpop.permute.xlu1 %2844 }
 0x414   : > { %v2840_v2 = vpop.permute.xlu0 %2839  ;;  %v8497_v0 = vpop.eup %8496  ;;  %8522 = vrcp.f32 %v3068_v15  ;;  %3241 = vadd.xlane.f32.xlu1 %v3240_v44  ;;  %v10557_v24 = vadd.f32 %v2845_v11, %v2638_v29  ;;  %v10562_v43 = vmul.f32 %v8495_v9, %v10445_v40  ;;  %v2642_v29 = vld [vmem:[#allocation2 + $0x118] sm:$0xff] }
 0x415   : > { %v10559_v51 = vadd.f32 %v2840_v2, %v2637_v47  ;;  %v8499_v31 = vpop.eup %8498  ;;  %v10565_v17 = vmul.f32 %v8497_v0, %v10447_v39  ;;  %8524 = vrcp.f32 %v3067_v54  ;;  %v2641_v47 = vld [vmem:[#allocation2 + $0x110] sm:$0xf] }
 0x416   : > { %14163 = vst [vmem:[#allocation21_spill] sm:$0xff] %v10562_v43  ;;  %v8501_v32 = vpop.eup %8500  ;;  %v3070_v8 = vadd.f32 1.0, %v8499_v31  ;;  %8526 = vpow2.f32 %v7503_v20  ;;  %v7505_v4 = vmul.f32 -1.442695, %v10557_v24  ;;  %3244 = vadd.xlane.f32.xlu0 %v3243_v25  ;;  %v3249_v22 = vsel %vm2116_vm12, %v10562_v43, 0.0 }
 0x417   : > { %14164 = vst [vmem:[#allocation22_spill] sm:$0xff] %v10565_v17  ;;  %v8503_v34 = vpop.eup %8502  ;;  %v3069_v45 = vadd.f32 1.0, %v8501_v32  ;;  %8528 = vpow2.f32 %v7502_v58  ;;  %v7504_v40 = vmul.f32 -1.442695, %v10559_v51  ;;  %v3246_v39 = vsel %vm2116_vm12, %v10565_v17, 0.0  ;;  %v2855_v35 = vpop.permute.xlu1 %2854  ;;  %v2643_v32 = vld [vmem:[#allocation2 + $0x120] sm:$0xff] }
 0x418   : > { %v2850_v57 = vpop.permute.xlu0 %2849  ;;  %v8505_v38 = vpop.eup %8504  ;;  %8530 = vrcp.f32 %v3070_v8  ;;  %3247 = vadd.xlane.f32.xlu1 %v3246_v39  ;;  %v10573_v41 = vadd.f32 %v2855_v35, %v2640_v12  ;;  %v10578_v26 = vmul.f32 %v8503_v34, %v10451_v59 }
 0x419   : > { %v10575_v50 = vadd.f32 %v2850_v57, %v2639_v28  ;;  %v8507_v7 = vpop.eup %8506  ;;  %v10581_v10 = vmul.f32 %v8505_v38, %v10453_v33  ;;  %8532 = vrcp.f32 %v3069_v45  ;;  %v2644_v28 = vld [vmem:[#allocation2 + $0x128] sm:$0xff] }
 0x41a   : > { %14165 = vst [vmem:[#allocation23_spill] sm:$0xff] %v10578_v26  ;;  %v8509_v52 = vpop.eup %8508  ;;  %8534 = vpow2.f32 %v7505_v4  ;;  %v7507_v15 = vmul.f32 -1.442695, %v10573_v41  ;;  %3250 = vadd.xlane.f32.xlu0 %v3249_v22  ;;  %v10588_v59 = vmul.f32 %v8507_v7, %v10457_v53  ;;  %v3255_v12 = vsel %vm2116_vm12, %v10578_v26, 0.0 }
 0x41b   : > { %v7506_v20 = vmul.f32 -1.442695, %v10575_v50  ;;  %v8511_v9 = vpop.eup %8510  ;;  %v10591_v33 = vmul.f32 %v8509_v52, %v10459_v14  ;;  %8536 = vpow2.f32 %v7504_v40  ;;  %v3252_v54 = vsel %vm3221_vm15, %v10581_v10, 0.0  ;;  %v2865_v58 = vpop.permute.xlu1 %2864 }
 0x41c   : > { %14166 = vst [vmem:[#allocation24_spill] sm:$0xff] %v10588_v59  ;;  %v2860_v44 = vpop.permute.xlu0 %2859  ;;  %v8513_v11 = vpop.eup %8512  ;;  %v3072_v2 = vadd.f32 1.0, %v8511_v9  ;;  %8538 = vpow2.f32 %v7507_v15  ;;  %3253 = vadd.xlane.f32.xlu1 %v3252_v54  ;;  %v10595_v0 = vadd.f32 %v2865_v58, %v2642_v29  ;;  %v3261_v57 = vsel %vm2116_vm12, %v10588_v59, 0.0  ;;  %v2645_v9 = vld [vmem:[#allocation2 + $0x130] sm:$0xff] }
 0x41d   : > { %14167 = vst [vmem:[#allocation25_spill] sm:$0xff] %v10591_v33  ;;  %v10597_v31 = vadd.f32 %v2860_v44, %v2641_v47  ;;  %v8515_v25 = vpop.eup %8514  ;;  %v3071_v53 = vadd.f32 1.0, %v8513_v11  ;;  %8540 = vpow2.f32 %v7506_v20  ;;  %v3258_v14 = vsel %vm2116_vm12, %v10591_v33, 0.0  ;;  %v2646_v20 = vld [vmem:[#allocation2 + $0x138] sm:$0xf] }
 0x41e   : > { %v8517_v8 = vpop.eup %8516  ;;  %8542 = vrcp.f32 %v3072_v2  ;;  %v7509_v4 = vmul.f32 -1.442695, %v10595_v0  ;;  %3256 = vadd.xlane.f32.xlu0 %v3255_v12  ;;  %v10615_v52 = vmul.f32 %v8515_v25, %v10469_v19 }
 0x41f   : > { %v7508_v34 = vmul.f32 -1.442695, %v10597_v31  ;;  %v8519_v45 = vpop.eup %8518  ;;  %v10606_v40 = vmul.f32 %v8517_v8, %v10471_v13  ;;  %8544 = vrcp.f32 %v3071_v53  ;;  %v2875_v39 = vpop.permute.xlu1 %2874 }
 0x420   : > { %v2870_v35 = vpop.permute.xlu0 %2869  ;;  %v8521_v38 = vpop.eup %8520  ;;  %v3074_v7 = vadd.f32 1.0, %v8519_v45  ;;  %8546 = vpow2.f32 %v7509_v4  ;;  %3259 = vadd.xlane.f32.xlu1 %v3258_v14  ;;  %v10610_v22 = vadd.f32 %v2875_v39, %v2644_v28  ;;  %14168 = vst [vmem:[#allocation26_spill] sm:$0xff] %v10615_v52 }
 0x421   : > { %v10612_v29 = vadd.f32 %v2870_v35, %v2643_v32  ;;  %v8523_v47 = vpop.eup %8522  ;;  %v3073_v13 = vadd.f32 1.0, %v8521_v38  ;;  %8548 = vpow2.f32 %v7508_v34  ;;  %v3264_v15 = vsel %vm2116_vm12, %v10606_v40, 0.0 }
 0x422   : > { %v8525_v54 = vpop.eup %8524  ;;  %8550 = vrcp.f32 %v3074_v7  ;;  %v7511_v58 = vmul.f32 -1.442695, %v10610_v22  ;;  %3262 = vadd.xlane.f32.xlu0 %v3261_v57  ;;  %v10622_v2 = vmul.f32 %v8523_v47, %v10482_v42 }
 0x423   : > { %v7510_v44 = vmul.f32 -1.442695, %v10612_v29  ;;  %v8527_v11 = vpop.eup %8526  ;;  %v10625_v19 = vmul.f32 %v8525_v54, %v10484_v46  ;;  %8552 = vrcp.f32 %v3073_v13  ;;  %v2885_v25 = vpop.permute.xlu1 %2884  ;;  %v3267_v46 = vsel %vm3221_vm15, %v10615_v52, 0.0 }
 0x424   : > { %v2880_v53 = vpop.permute.xlu0 %2879  ;;  %v8529_v14 = vpop.eup %8528  ;;  %v3076_v12 = vadd.f32 1.0, %v8527_v11  ;;  %8554 = vpow2.f32 %v7511_v58  ;;  %3265 = vadd.xlane.f32.xlu1 %v3264_v15  ;;  %v10627_v28 = vadd.f32 %v2885_v25, %v2646_v20  ;;  %v3273_v47 = vsel %vm2116_vm12, %v10622_v2, 0.0 }
 0x425   : > { %14169 = vst [vmem:[#allocation27_spill] sm:$0xff] %v10625_v19  ;;  %v10629_v32 = vadd.f32 %v2880_v53, %v2645_v9  ;;  %v8531_v8 = vpop.eup %8530  ;;  %v3075_v4 = vadd.f32 1.0, %v8529_v14  ;;  %8556 = vpow2.f32 %v7510_v44  ;;  %v3270_v42 = vsel %vm2116_vm12, %v10625_v19, 0.0 }
 0x426   : > { %v8533_v34 = vpop.eup %8532  ;;  %8558 = vrcp.f32 %v3076_v12  ;;  %v7513_v45 = vmul.f32 -1.442695, %v10627_v28  ;;  %3268 = vadd.xlane.f32.xlu0 %v3267_v46  ;;  %v10643_v15 = vmul.f32 %v8531_v8, %v10499_v60 }
 0x427   : > { %v7512_v39 = vmul.f32 -1.442695, %v10629_v32  ;;  %v8535_v35 = vpop.eup %8534  ;;  %v10638_v57 = vmul.f32 %v8533_v34, %v10501_v37  ;;  %8560 = vrcp.f32 %v3075_v4 }
 0x428   : > { %v8537_v38 = vpop.eup %8536  ;;  %v3078_v7 = vadd.f32 1.0, %v8535_v35  ;;  %8562 = vpow2.f32 %v7513_v45  ;;  %3271 = vadd.xlane.f32.xlu1 %v3270_v42  ;;  %14170 = vst [vmem:[#allocation28_spill] sm:$0xff] %v10643_v15  ;;  %v3279_v14 = vsel %vm2116_vm12, %v10643_v15, 0.0 }
 0x429   : > { %v8539_v13 = vpop.eup %8538  ;;  %v3077_v20 = vadd.f32 1.0, %v8537_v38  ;;  %8564 = vpow2.f32 %v7512_v39  ;;  %v3276_v9 = vsel %vm2116_vm12, %v10638_v57, 0.0 }
 0x42a   : > { %v8541_v54 = vpop.eup %8540  ;;  %8566 = vrcp.f32 %v3078_v7  ;;  %v3080_v37 = vadd.f32 1.0, %v8539_v13  ;;  %3274 = vadd.xlane.f32.xlu0 %v3273_v47 }
 0x42b   : > { %v8543_v58 = vpop.eup %8542  ;;  %8568 = vrcp.f32 %v3077_v20  ;;  %v3079_v44 = vadd.f32 1.0, %v8541_v54 }
 0x42c   : > { %v8545_v11 = vpop.eup %8544  ;;  %8570 = vrcp.f32 %v3080_v37  ;;  %3277 = vadd.xlane.f32.xlu1 %v3276_v9  ;;  %v10648_v53 = vmul.f32 %v8543_v58, %v10514_v49 }
 0x42d   : > { %v8547_v25 = vpop.eup %8546  ;;  %v10651_v60 = vmul.f32 %v8545_v11, %v10516_v56  ;;  %8572 = vrcp.f32 %v3079_v44 }
 0x42e   : > { %v8549_v12 = vpop.eup %8548  ;;  %v3082_v8 = vadd.f32 1.0, %v8547_v25  ;;  %3280 = vadd.xlane.f32.xlu0 %v3279_v14  ;;  %v3285_v39 = vsel %vm2116_vm12, %v10648_v53, 0.0 }
 0x42f   : > { %14171 = vst [vmem:[#allocation29_spill] sm:$0xff] %v10651_v60  ;;  %v8551_v4 = vpop.eup %8550  ;;  %v3081_v42 = vadd.f32 1.0, %v8549_v12  ;;  %v3282_v46 = vsel %vm3221_vm15, %v10651_v60, 0.0 }
 0x430   : > { %v8553_v34 = vpop.eup %8552  ;;  %8574 = vrcp.f32 %v3082_v8  ;;  %3283 = vadd.xlane.f32.xlu1 %v3282_v46  ;;  %v10658_v45 = vmul.f32 %v8551_v4, %v10525_v27 }
 0x431   : > { %v8555_v49 = vpop.eup %8554  ;;  %v10661_v56 = vmul.f32 %v8553_v34, %v10527_v62  ;;  %8576 = vrcp.f32 %v3081_v42 }
 0x432   : > { %14172 = vst [vmem:[#allocation30_spill] sm:$0xff] %v10658_v45  ;;  %v8557_v35 = vpop.eup %8556  ;;  %v3084_v38 = vadd.f32 1.0, %v8555_v49  ;;  %3286 = vadd.xlane.f32.xlu0 %v3285_v39  ;;  %v3291_v54 = vsel %vm2116_vm12, %v10658_v45, 0.0 }
 0x433   : > { %v8559_v7 = vpop.eup %8558  ;;  %v3083_v47 = vadd.f32 1.0, %v8557_v35  ;;  %v3288_v13 = vsel %vm2116_vm12, %v10661_v56, 0.0 }
 0x434   : > { %v8561_v20 = vpop.eup %8560  ;;  %8578 = vrcp.f32 %v3084_v38  ;;  %3289 = vadd.xlane.f32.xlu1 %v3288_v13  ;;  %v10668_v9 = vmul.f32 %v8559_v7, %v10541_v36 }
 0x435   : > { %v8563_v27 = vpop.eup %8562  ;;  %v10671_v62 = vmul.f32 %v8561_v20, %v10543_v5  ;;  %8580 = vrcp.f32 %v3083_v47 }
 0x436   : > { %v8565_v37 = vpop.eup %8564  ;;  %v3086_v58 = vadd.f32 1.0, %v8563_v27  ;;  %3292 = vadd.xlane.f32.xlu0 %v3291_v54  ;;  %v3297_v8 = vsel %vm3221_vm15, %v10668_v9, 0.0 }
 0x437   : > { %14173 = vst [vmem:[#allocation31_spill] sm:$0xff] %v10671_v62  ;;  %v8567_v44 = vpop.eup %8566  ;;  %v3085_v11 = vadd.f32 1.0, %v8565_v37  ;;  %v3294_v25 = vsel %vm2116_vm12, %v10671_v62, 0.0 }
 0x438   : > { %v8569_v14 = vpop.eup %8568  ;;  %8582 = vrcp.f32 %v3086_v58  ;;  %3295 = vadd.xlane.f32.xlu1 %v3294_v25  ;;  %v10678_v12 = vmul.f32 %v8567_v44, %v10557_v24 }
 0x439   : > { %v8571_v36 = vpop.eup %8570  ;;  %v10681_v5 = vmul.f32 %v8569_v14, %v10559_v51  ;;  %8584 = vrcp.f32 %v3085_v11 }
 0x43a   : > { %14174 = vst [vmem:[#allocation32_spill] sm:$0xff] %v10678_v12  ;;  %v8573_v4 = vpop.eup %8572  ;;  %3298 = vadd.xlane.f32.xlu0 %v3297_v8  ;;  %v10691_v24 = vmul.f32 %v8571_v36, %v10573_v41  ;;  %v3303_v49 = vsel %vm2116_vm12, %v10678_v12, 0.0 }
 0x43b   : > { %14175 = vst [vmem:[#allocation33_spill] sm:$0xff] %v10681_v5  ;;  %v10686_v42 = vmul.f32 %v8573_v4, %v10575_v50  ;;  %v3300_v46 = vsel %vm2116_vm12, %v10681_v5, 0.0 }
 0x43c   : > { %3301 = vadd.xlane.f32.xlu1 %v3300_v46  ;;  %v3309_v7 = vsel %vm2116_vm12, %v10691_v24, 0.0 }
 0x43d   : > { %14176 = vst [vmem:[#allocation34_spill] sm:$0xff] %v10686_v42  ;;  %v8575_v34 = vpop.eup %8574  ;;  %v3306_v51 = vsel %vm2116_vm12, %v10686_v42, 0.0 }
 0x43e   : > { %v8577_v39 = vpop.eup %8576  ;;  %3304 = vadd.xlane.f32.xlu0 %v3303_v49  ;;  %v10701_v38 = vmul.f32 %v8575_v34, %v10595_v0 }
 0x43f   : > { %v10698_v35 = vmul.f32 %v8577_v39, %v10597_v31 }
 0x440   : > { %3307 = vadd.xlane.f32.xlu1 %v3306_v51  ;;  %14177 = vst [vmem:[#allocation35_spill] sm:$0xff] %v10701_v38  ;;  %v3315_v27 = vsel %vm2116_vm12, %v10701_v38, 0.0 }
 0x441   : > { %v8579_v50 = vpop.eup %8578  ;;  %v3312_v41 = vsel %vm3221_vm15, %v10698_v35, 0.0 }
 0x442   : > { %v8581_v47 = vpop.eup %8580  ;;  %3310 = vadd.xlane.f32.xlu0 %v3309_v7  ;;  %v10711_v31 = vmul.f32 %v8579_v50, %v10610_v22 }
 0x443   : > { %v10708_v13 = vmul.f32 %v8581_v47, %v10612_v29 }
 0x444   : > { %3313 = vadd.xlane.f32.xlu1 %v3312_v41  ;;  %v3321_v22 = vsel %vm2116_vm12, %v10711_v31, 0.0 }
 0x445   : > { %v8583_v20 = vpop.eup %8582  ;;  %v3318_v0 = vsel %vm2116_vm12, %v10708_v13, 0.0 }
 0x446   : > { %v8585_v54 = vpop.eup %8584  ;;  %3316 = vadd.xlane.f32.xlu0 %v3315_v27  ;;  %v10721_v29 = vmul.f32 %v8583_v20, %v10627_v28 }
 0x447   : > { %v10718_v37 = vmul.f32 %v8585_v54, %v10629_v32 }
 0x448   : > { %3319 = vadd.xlane.f32.xlu1 %v3318_v0  ;;  %v3327_v44 = vsel %vm3221_vm15, %v10721_v29, 0.0 }
 0x449   : > { %v3324_v58 = vsel %vm2116_vm12, %v10718_v37, 0.0 }
 0x44a   : > { %3322 = vadd.xlane.f32.xlu0 %v3321_v22 }
 0x44c   : > { %3325 = vadd.xlane.f32.xlu1 %v3324_v58 }
 0x44e   : > { %3328 = vadd.xlane.f32.xlu0 %v3327_v44 }
 0x45d   : > { %3984 = vrot.lane.b32.xlu1 %v10467_v6, %s9031_s18 }
 0x461   : > { %3988 = vrot.lane.b32.xlu1 %v10464_v1, %s9031_s18 }
 0x464   : > { %3986 = vrot.lane.b32.xlu0 %v10478_v48, %s9031_s18 }
 0x465   : > { %3990 = vrot.lane.b32.xlu1 %v10487_v16, %s9031_s18 }
 0x468   : > { %3992 = vrot.lane.b32.xlu0 %v10497_v30, %s9031_s18 }
 0x469   : > { %3994 = vrot.lane.b32.xlu1 %v10494_v63, %s9031_s18 }
 0x46c   : > { %3996 = vrot.lane.b32.xlu0 %v10510_v61, %s9031_s18 }
 0x46d   : > { %3998 = vrot.lane.b32.xlu1 %v10519_v21, %s9031_s18 }
 0x470   : > { %4000 = vrot.lane.b32.xlu0 %v10533_v23, %s9031_s18 }
 0x471   : > { %4002 = vrot.lane.b32.xlu1 %v10530_v3, %s9031_s18 }
 0x474   : > { %4004 = vrot.lane.b32.xlu0 %v10549_v55, %s9031_s18 }
 0x475   : > { %4006 = vrot.lane.b32.xlu1 %v10546_v18, %s9031_s18 }
 0x487   : > { %v3211_v28 = vpop.xlane.xlu0 %3210 }
 0x488   : > { %v3331_v32 = vmul.f32 0.125, %v3211_v28 }
 0x48a   : > { %v3371_v34 = vsub.f32 %v10467_v6, %v3331_v32 }
 0x48b   : > { %v3214_v11 = vpop.xlane.xlu1 %3213  ;;  %v3217_v25 = vpop.xlane.xlu0 %3216 }
 0x48c   : > { %v3332_v14 = vmul.f32 0.125, %v3214_v11  ;;  %v3333_v8 = vmul.f32 0.125, %v3217_v25  ;;  %v3411_v47 = vmul.f32 %v3371_v34, %v3371_v34 }
 0x48e   : > { %v3372_v36 = vsub.f32 %v10478_v48, %v3332_v14  ;;  %v3373_v20 = vsub.f32 %v10464_v1, %v3333_v8  ;;  %v3451_v44 = vsel %vm2116_vm12, %v3411_v47, 0.0 }
 0x48f   : > { %v3224_v4 = vpop.xlane.xlu1 %3223  ;;  %v3220_v46 = vpop.xlane.xlu0 %3219 }
 0x490   : > { %v3334_v51 = vmul.f32 0.125, %v3220_v46  ;;  %v3412_v49 = vmul.f32 %v3372_v36, %v3372_v36  ;;  %v3335_v0 = vmul.f32 0.125, %v3224_v4  ;;  %v3413_v32 = vmul.f32 %v3373_v20, %v3373_v20 }
 0x492   : > { %v3454_v39 = vsel %vm2116_vm12, %v3412_v49, 0.0  ;;  %v3374_v50 = vsub.f32 %v10487_v16, %v3334_v51  ;;  %v3375_v36 = vsub.f32 %v10497_v30, %v3335_v0  ;;  %v3457_v51 = vsel %vm2116_vm12, %v3413_v32, 0.0 }
 0x493   : > { %v3230_v41 = vpop.xlane.xlu1 %3229  ;;  %3455 = vadd.xlane.f32.xlu0 %v3454_v39  ;;  %v3227_v7 = vpop.xlane.xlu0 %3226 }
 0x494   : > { %v3336_v27 = vmul.f32 0.125, %v3227_v7  ;;  %v3414_v54 = vmul.f32 %v3374_v50, %v3374_v50  ;;  %v3337_v11 = vmul.f32 0.125, %v3230_v41  ;;  %v3415_v50 = vmul.f32 %v3375_v36, %v3375_v36 }
 0x496   : > { %v3460_v58 = vsel %vm2116_vm12, %v3414_v54, 0.0  ;;  %v3376_v22 = vsub.f32 %v10494_v63, %v3336_v27  ;;  %v3377_v41 = vsub.f32 %v10510_v61, %v3337_v11 }
 0x497   : > { %3461 = vadd.xlane.f32.xlu0 %v3460_v58  ;;  %v3233_v28 = vpop.xlane.xlu0 %3232 }
 0x498   : > { %v3338_v25 = vmul.f32 0.125, %v3233_v28  ;;  %v3416_v14 = vmul.f32 %v3376_v22, %v3376_v22  ;;  %v3463_v22 = vsel %vm3221_vm15, %v3415_v50, 0.0  ;;  %v3417_v28 = vmul.f32 %v3377_v41, %v3377_v41 }
 0x499   : > { %v3236_v46 = vpop.xlane.xlu1 %3235  ;;  %3452 = vadd.xlane.f32.xlu1 %v3451_v44 }
 0x49a   : > { %v3466_v8 = vsel %vm2116_vm12, %v3416_v14, 0.0  ;;  %v3378_v4 = vsub.f32 %v10519_v21, %v3338_v25  ;;  %v3339_v34 = vmul.f32 0.125, %v3236_v46 }
 0x49b   : > { %3467 = vadd.xlane.f32.xlu0 %v3466_v8  ;;  %v3239_v49 = vpop.xlane.xlu0 %3238 }
 0x49c   : > { %v3340_v39 = vmul.f32 0.125, %v3239_v49  ;;  %v3418_v7 = vmul.f32 %v3378_v4, %v3378_v4  ;;  %v3379_v58 = vsub.f32 %v10533_v23, %v3339_v34 }
 0x49d   : > { %v3242_v47 = vpop.xlane.xlu1 %3241  ;;  %3458 = vadd.xlane.f32.xlu1 %v3457_v51  ;;  %v3469_v51 = vsel %vm2116_vm12, %v3417_v28, 0.0 }
 0x49e   : > { %v3380_v20 = vsub.f32 %v10530_v3, %v3340_v39  ;;  %v3472_v0 = vsel %vm2116_vm12, %v3418_v7, 0.0  ;;  %v3341_v27 = vmul.f32 0.125, %v3242_v47  ;;  %v3419_v46 = vmul.f32 %v3379_v58, %v3379_v58 }
 0x49f   : > { %3473 = vadd.xlane.f32.xlu0 %v3472_v0  ;;  %v3245_v54 = vpop.xlane.xlu0 %3244 }
 0x4a0   : > { %v3342_v44 = vmul.f32 0.125, %v3245_v54  ;;  %v3420_v32 = vmul.f32 %v3380_v20, %v3380_v20  ;;  %v3381_v8 = vsub.f32 %v10549_v55, %v3341_v27  ;;  %v3475_v41 = vsel %vm2116_vm12, %v3419_v46, 0.0 }
 0x4a1   : > { %v3248_v25 = vpop.xlane.xlu1 %3247  ;;  %3464 = vadd.xlane.f32.xlu1 %v3463_v22 }
 0x4a2   : > { %v3478_v11 = vsel %vm3221_vm15, %v3420_v32, 0.0  ;;  %v3382_v14 = vsub.f32 %v10546_v18, %v3342_v44  ;;  %v3343_v4 = vmul.f32 0.125, %v3248_v25  ;;  %v3421_v20 = vmul.f32 %v3381_v8, %v3381_v8 }
 0x4a3   : > { %3479 = vadd.xlane.f32.xlu0 %v3478_v11  ;;  %v3251_v36 = vpop.xlane.xlu0 %3250 }
 0x4a4   : > { %v3344_v34 = vmul.f32 0.125, %v3251_v36  ;;  %v3422_v49 = vmul.f32 %v3382_v14, %v3382_v14  ;;  %v3383_v27 = vsub.f32 %v10565_v17, %v3343_v4  ;;  %v3481_v25 = vsel %vm2116_vm12, %v3421_v20, 0.0 }
 0x4a5   : > { %v3254_v39 = vpop.xlane.xlu1 %3253  ;;  %3470 = vadd.xlane.f32.xlu1 %v3469_v51 }
 0x4a6   : > { %v3484_v50 = vsel %vm2116_vm12, %v3422_v49, 0.0  ;;  %v3384_v7 = vsub.f32 %v10562_v43, %v3344_v34  ;;  %v3345_v0 = vmul.f32 0.125, %v3254_v39  ;;  %v3423_v46 = vmul.f32 %v3383_v27, %v3383_v27 }
 0x4a7   : > { %3485 = vadd.xlane.f32.xlu0 %v3484_v50  ;;  %v3257_v47 = vpop.xlane.xlu0 %3256 }
 0x4a8   : > { %v3346_v54 = vmul.f32 0.125, %v3257_v47  ;;  %v3424_v58 = vmul.f32 %v3384_v7, %v3384_v7  ;;  %v3385_v14 = vsub.f32 %v10581_v10, %v3345_v0  ;;  %v3487_v7 = vsel %vm2116_vm12, %v3423_v46, 0.0 }
 0x4a9   : > { %v3260_v22 = vpop.xlane.xlu1 %3259  ;;  %3476 = vadd.xlane.f32.xlu1 %v3475_v41 }
 0x4aa   : > { %v3490_v44 = vsel %vm2116_vm12, %v3424_v58, 0.0  ;;  %v3386_v28 = vsub.f32 %v10578_v26, %v3346_v54  ;;  %v3347_v32 = vmul.f32 0.125, %v3260_v22  ;;  %v3425_v47 = vmul.f32 %v3385_v14, %v3385_v14 }
 0x4ab   : > { %3491 = vadd.xlane.f32.xlu0 %v3490_v44  ;;  %v3263_v11 = vpop.xlane.xlu0 %3262 }
 0x4ac   : > { %v3348_v36 = vmul.f32 0.125, %v3263_v11  ;;  %v3426_v8 = vmul.f32 %v3386_v28, %v3386_v28  ;;  %v3387_v50 = vsub.f32 %v10591_v33, %v3347_v32 }
 0x4ad   : > { %v3266_v51 = vpop.xlane.xlu1 %3265  ;;  %3482 = vadd.xlane.f32.xlu1 %v3481_v25  ;;  %v3493_v25 = vsel %vm3221_vm15, %v3425_v47, 0.0 }
 0x4ae   : > { %v3496_v4 = vsel %vm2116_vm12, %v3426_v8, 0.0  ;;  %v3388_v34 = vsub.f32 %v10588_v59, %v3348_v36  ;;  %v3349_v49 = vmul.f32 0.125, %v3266_v51  ;;  %v3427_v22 = vmul.f32 %v3387_v50, %v3387_v50 }
 0x4af   : > { %3497 = vadd.xlane.f32.xlu0 %v3496_v4  ;;  %v3269_v39 = vpop.xlane.xlu0 %3268 }
 0x4b0   : > { %v3350_v41 = vmul.f32 0.125, %v3269_v39  ;;  %v3428_v20 = vmul.f32 %v3388_v34, %v3388_v34  ;;  %v3389_v44 = vsub.f32 %v10606_v40, %v3349_v49  ;;  %v3499_v8 = vsel %vm2116_vm12, %v3427_v22, 0.0 }
 0x4b1   : > { %v3272_v0 = vpop.xlane.xlu1 %3271  ;;  %3488 = vadd.xlane.f32.xlu1 %v3487_v7 }
 0x4b2   : > { %v3390_v54 = vsub.f32 %v10615_v52, %v3350_v41  ;;  %v3502_v58 = vsel %vm2116_vm12, %v3428_v20, 0.0  ;;  %v3351_v28 = vmul.f32 0.125, %v3272_v0  ;;  %v3429_v4 = vmul.f32 %v3389_v44, %v3389_v44 }
 0x4b3   : > { %3503 = vadd.xlane.f32.xlu0 %v3502_v58  ;;  %v3275_v27 = vpop.xlane.xlu0 %3274 }
 0x4b4   : > { %v3352_v32 = vmul.f32 0.125, %v3275_v27  ;;  %v3430_v11 = vmul.f32 %v3390_v54, %v3390_v54  ;;  %v3391_v49 = vsub.f32 %v10625_v19, %v3351_v28  ;;  %v3505_v0 = vsel %vm2116_vm12, %v3429_v4, 0.0 }
 0x4b5   : > { %v3278_v36 = vpop.xlane.xlu1 %3277  ;;  %3494 = vadd.xlane.f32.xlu1 %v3493_v25 }
 0x4b6   : > { %v3508_v14 = vsel %vm3221_vm15, %v3430_v11, 0.0  ;;  %v3392_v46 = vsub.f32 %v10622_v2, %v3352_v32  ;;  %v3353_v34 = vmul.f32 0.125, %v3278_v36  ;;  %v3431_v27 = vmul.f32 %v3391_v49, %v3391_v49 }
 0x4b7   : > { %3509 = vadd.xlane.f32.xlu0 %v3508_v14  ;;  %v3281_v51 = vpop.xlane.xlu0 %3280 }
 0x4b8   : > { %v3354_v39 = vmul.f32 0.125, %v3281_v51  ;;  %v3432_v50 = vmul.f32 %v3392_v46, %v3392_v46  ;;  %v3393_v44 = vsub.f32 %v10638_v57, %v3353_v34  ;;  %v3511_v46 = vsel %vm2116_vm12, %v3431_v27, 0.0 }
 0x4b9   : > { %v3284_v7 = vpop.xlane.xlu1 %3283  ;;  %3500 = vadd.xlane.f32.xlu1 %v3499_v8 }
 0x4ba   : > { %v3514_v41 = vsel %vm2116_vm12, %v3432_v50, 0.0  ;;  %v3394_v47 = vsub.f32 %v10643_v15, %v3354_v39  ;;  %v3355_v20 = vmul.f32 0.125, %v3284_v7  ;;  %v3433_v51 = vmul.f32 %v3393_v44, %v3393_v44 }
 0x4bb   : > { %3515 = vadd.xlane.f32.xlu0 %v3514_v41  ;;  %v3287_v54 = vpop.xlane.xlu0 %3286 }
 0x4bc   : > { %v3356_v58 = vmul.f32 0.125, %v3287_v54  ;;  %v3434_v22 = vmul.f32 %v3394_v47, %v3394_v47  ;;  %v3395_v11 = vsub.f32 %v10651_v60, %v3355_v20  ;;  %v3517_v20 = vsel %vm2116_vm12, %v3433_v51, 0.0 }
 0x4bd   : > { %v3290_v25 = vpop.xlane.xlu1 %3289  ;;  %3506 = vadd.xlane.f32.xlu1 %v3505_v0 }
 0x4be   : > { %v3520_v28 = vsel %vm2116_vm12, %v3434_v22, 0.0  ;;  %v3396_v32 = vsub.f32 %v10648_v53, %v3356_v58  ;;  %v3357_v36 = vmul.f32 0.125, %v3290_v25  ;;  %v3435_v7 = vmul.f32 %v3395_v11, %v3395_v11 }
 0x4bf   : > { %3521 = vadd.xlane.f32.xlu0 %v3520_v28  ;;  %v3293_v14 = vpop.xlane.xlu0 %3292 }
 0x4c0   : > { %v3358_v8 = vmul.f32 0.125, %v3293_v14  ;;  %v3436_v4 = vmul.f32 %v3396_v32, %v3396_v32  ;;  %v3397_v41 = vsub.f32 %v10661_v56, %v3357_v36  ;;  %v3523_v44 = vsel %vm3221_vm15, %v3435_v7, 0.0 }
 0x4c1   : > { %v3296_v39 = vpop.xlane.xlu1 %3295  ;;  %3512 = vadd.xlane.f32.xlu1 %v3511_v46 }
 0x4c2   : > { %v3526_v34 = vsel %vm2116_vm12, %v3436_v4, 0.0  ;;  %v3398_v50 = vsub.f32 %v10658_v45, %v3358_v8  ;;  %v3359_v47 = vmul.f32 0.125, %v3296_v39  ;;  %v3437_v28 = vmul.f32 %v3397_v41, %v3397_v41 }
 0x4c3   : > { %3527 = vadd.xlane.f32.xlu0 %v3526_v34  ;;  %v3299_v49 = vpop.xlane.xlu0 %3298 }
 0x4c4   : > { %v3360_v0 = vmul.f32 0.125, %v3299_v49  ;;  %v3438_v54 = vmul.f32 %v3398_v50, %v3398_v50  ;;  %v3399_v36 = vsub.f32 %v10671_v62, %v3359_v47  ;;  %v3529_v39 = vsel %vm2116_vm12, %v3437_v28, 0.0 }
 0x4c5   : > { %v3302_v58 = vpop.xlane.xlu1 %3301  ;;  %3518 = vadd.xlane.f32.xlu1 %v3517_v20 }
 0x4c6   : > { %v3400_v27 = vsub.f32 %v10668_v9, %v3360_v0  ;;  %v3532_v22 = vsel %vm2116_vm12, %v3438_v54, 0.0  ;;  %v3361_v32 = vmul.f32 0.125, %v3302_v58  ;;  %v3439_v49 = vmul.f32 %v3399_v36, %v3399_v36 }
 0x4c7   : > { %3533 = vadd.xlane.f32.xlu0 %v3532_v22  ;;  %v3305_v25 = vpop.xlane.xlu0 %3304 }
 0x4c8   : > { %v3362_v11 = vmul.f32 0.125, %v3305_v25  ;;  %v3440_v14 = vmul.f32 %v3400_v27, %v3400_v27  ;;  %v3401_v41 = vsub.f32 %v10681_v5, %v3361_v32  ;;  %v3535_v22 = vsel %vm2116_vm12, %v3439_v49, 0.0 }
 0x4c9   : > { %v3308_v46 = vpop.xlane.xlu1 %3307  ;;  %3524 = vadd.xlane.f32.xlu1 %v3523_v44 }
 0x4ca   : > { %v3538_v8 = vsel %vm3221_vm15, %v3440_v14, 0.0  ;;  %v3402_v51 = vsub.f32 %v10678_v12, %v3362_v11  ;;  %v3363_v4 = vmul.f32 0.125, %v3308_v46  ;;  %v3441_v25 = vmul.f32 %v3401_v41, %v3401_v41 }
 0x4cb   : > { %3539 = vadd.xlane.f32.xlu0 %v3538_v8  ;;  %v3311_v34 = vpop.xlane.xlu0 %3310 }
 0x4cc   : > { %v3364_v50 = vmul.f32 0.125, %v3311_v34  ;;  %v3442_v7 = vmul.f32 %v3402_v51, %v3402_v51  ;;  %v3403_v27 = vsub.f32 %v10686_v42, %v3363_v4 }
 0x4cd   : > { %v3314_v20 = vpop.xlane.xlu1 %3313  ;;  %3530 = vadd.xlane.f32.xlu1 %v3529_v39  ;;  %v3541_v39 = vsel %vm2116_vm12, %v3441_v25, 0.0 }
 0x4ce   : > { %v3544_v47 = vsel %vm2116_vm12, %v3442_v7, 0.0  ;;  %v3404_v0 = vsub.f32 %v10691_v24, %v3364_v50  ;;  %v3365_v54 = vmul.f32 0.125, %v3314_v20  ;;  %v3443_v8 = vmul.f32 %v3403_v27, %v3403_v27 }
 0x4cf   : > { %3545 = vadd.xlane.f32.xlu0 %v3544_v47  ;;  %v3317_v58 = vpop.xlane.xlu0 %3316 }
 0x4d0   : > { %v3366_v44 = vmul.f32 0.125, %v3317_v58  ;;  %v3444_v28 = vmul.f32 %v3404_v0, %v3404_v0  ;;  %v3405_v36 = vsub.f32 %v10698_v35, %v3365_v54  ;;  %v3547_v41 = vsel %vm2116_vm12, %v3443_v8, 0.0 }
 0x4d1   : > { %v3320_v11 = vpop.xlane.xlu1 %3319  ;;  %3536 = vadd.xlane.f32.xlu1 %v3535_v22 }
 0x4d2   : > { %v3550_v32 = vsel %vm2116_vm12, %v3444_v28, 0.0  ;;  %v3406_v14 = vsub.f32 %v10701_v38, %v3366_v44  ;;  %v3367_v51 = vmul.f32 0.125, %v3320_v11  ;;  %v3445_v47 = vmul.f32 %v3405_v36, %v3405_v36 }
 0x4d3   : > { %3551 = vadd.xlane.f32.xlu0 %v3550_v32  ;;  %v3323_v46 = vpop.xlane.xlu0 %3322 }
 0x4d4   : > { %v3368_v4 = vmul.f32 0.125, %v3323_v46  ;;  %v3446_v34 = vmul.f32 %v3406_v14, %v3406_v14  ;;  %v3407_v27 = vsub.f32 %v10708_v13, %v3367_v51  ;;  %v3553_v25 = vsel %vm3221_vm15, %v3445_v47, 0.0 }
 0x4d5   : > { %v3326_v50 = vpop.xlane.xlu1 %3325  ;;  %3542 = vadd.xlane.f32.xlu1 %v3541_v39 }
 0x4d6   : > { %v3556_v49 = vsel %vm2116_vm12, %v3446_v34, 0.0  ;;  %v3408_v7 = vsub.f32 %v10711_v31, %v3368_v4  ;;  %v3369_v0 = vmul.f32 0.125, %v3326_v50  ;;  %v3447_v28 = vmul.f32 %v3407_v27, %v3407_v27 }
 0x4d7   : > { %3557 = vadd.xlane.f32.xlu0 %v3556_v49  ;;  %v3329_v20 = vpop.xlane.xlu0 %3328 }
 0x4d8   : > { %v3370_v54 = vmul.f32 0.125, %v3329_v20  ;;  %v3448_v58 = vmul.f32 %v3408_v7, %v3408_v7  ;;  %v3409_v32 = vsub.f32 %v10718_v37, %v3369_v0  ;;  %v3559_v36 = vsel %vm2116_vm12, %v3447_v28, 0.0 }
 0x4d9   : > { %3548 = vadd.xlane.f32.xlu1 %v3547_v41  ;;  %v3985_v51 = vpop.permute.xlu1 %3984 }
 0x4da   : > { %v3410_v22 = vsub.f32 %v10721_v29, %v3370_v54  ;;  %v3562_v44 = vsel %vm2116_vm12, %v3448_v58, 0.0  ;;  %v3449_v46 = vmul.f32 %v3409_v32, %v3409_v32 }
 0x4db   : > { %3563 = vadd.xlane.f32.xlu0 %v3562_v44  ;;  %v3987_v4 = vpop.permute.xlu0 %3986 }
 0x4dc   : > { %v3450_v11 = vmul.f32 %v3410_v22, %v3410_v22  ;;  %v3565_v8 = vsel %vm2116_vm12, %v3449_v46, 0.0 }
 0x4dd   : > { %3554 = vadd.xlane.f32.xlu1 %v3553_v25  ;;  %v3989_v39 = vpop.permute.xlu1 %3988 }
 0x4de   : > { %v3568_v14 = vsel %vm3221_vm15, %v3450_v11, 0.0 }
 0x4df   : > { %3569 = vadd.xlane.f32.xlu0 %v3568_v14  ;;  %v3993_v50 = vpop.permute.xlu0 %3992 }
 0x4e1   : > { %3560 = vadd.xlane.f32.xlu1 %v3559_v36  ;;  %v3991_v34 = vpop.permute.xlu1 %3990 }
 0x4e3   : > { %v3997_v7 = vpop.permute.xlu0 %3996 }
 0x4e5   : > { %3566 = vadd.xlane.f32.xlu1 %v3565_v8  ;;  %v3995_v49 = vpop.permute.xlu1 %3994 }
 0x4e7   : > { %v10863_v20 = vpop.permute.xlu0 %4000 }
 0x4e9   : > { %v3999_v41 = vpop.permute.xlu1 %3998 }
 0x4eb   : > { %v10871_v0 = vpop.permute.xlu0 %4004 }
 0x4ed   : > { %v4003_v47 = vpop.permute.xlu1 %4002 }
 0x4f1   : > { %v4007_v58 = vpop.permute.xlu1 %4006 }
 0x4f5   : > { %4008 = vrot.lane.b32.xlu0 %v10565_v17, %s9031_s18 }
 0x4f6   : > { %4010 = vrot.lane.b32.xlu1 %v10562_v43, %s9031_s18 }
 0x4f9   : > { %4012 = vrot.lane.b32.xlu0 %v10581_v10, %s9031_s18 }
 0x4fa   : > { %4014 = vrot.lane.b32.xlu1 %v10578_v26, %s9031_s18 }
 0x4fd   : > { %4016 = vrot.lane.b32.xlu0 %v10591_v33, %s9031_s18 }
 0x4fe   : > { %4018 = vrot.lane.b32.xlu1 %v10588_v59, %s9031_s18 }
 0x501   : > { %4020 = vrot.lane.b32.xlu0 %v10606_v40, %s9031_s18 }
 0x502   : > { %4022 = vrot.lane.b32.xlu1 %v10615_v52, %s9031_s18 }
 0x505   : > { %4024 = vrot.lane.b32.xlu0 %v10625_v19, %s9031_s18 }
 0x506   : > { %4026 = vrot.lane.b32.xlu1 %v10622_v2, %s9031_s18 }
 0x509   : > { %4028 = vrot.lane.b32.xlu0 %v10638_v57, %s9031_s18 }
 0x50a   : > { %4030 = vrot.lane.b32.xlu1 %v10643_v15, %s9031_s18 }
 0x50d   : > { %4032 = vrot.lane.b32.xlu0 %v10651_v60, %s9031_s18 }
 0x50e   : > { %4034 = vrot.lane.b32.xlu1 %v10648_v53, %s9031_s18 }
 0x511   : > { %4036 = vrot.lane.b32.xlu0 %v10661_v56, %s9031_s18 }
 0x512   : > { %4038 = vrot.lane.b32.xlu1 %v10658_v45, %s9031_s18 }
 0x515   : > { %4040 = vrot.lane.b32.xlu0 %v10671_v62, %s9031_s18 }
 0x516   : > { %4042 = vrot.lane.b32.xlu1 %v10668_v9, %s9031_s18 }
 0x519   : > { %4044 = vrot.lane.b32.xlu0 %v10681_v5, %s9031_s18 }
 0x51a   : > { %4046 = vrot.lane.b32.xlu1 %v10678_v12, %s9031_s18 }
 0x51c   : > { %v10877_v54 = vpop.xlane.xlu0 %3455 }
 0x51d   : > { %14178 = vst [vmem:[#allocation36_spill] sm:$0xff] %v10877_v54  ;;  %4048 = vrot.lane.b32.xlu0 %v10686_v42, %s9031_s18 }
 0x51e   : > { %4050 = vrot.lane.b32.xlu1 %v10691_v24, %s9031_s18 }
 0x520   : > { %v10883_v27 = vpop.xlane.xlu0 %3461 }
 0x521   : > { %14179 = vst [vmem:[#allocation37_spill] sm:$0xff] %v10883_v27  ;;  %4052 = vrot.lane.b32.xlu0 %v10698_v35, %s9031_s18 }
 0x522   : > { %v10887_v22 = vpop.xlane.xlu1 %3452  ;;  %4054 = vrot.lane.b32.xlu1 %v10701_v38, %s9031_s18 }
 0x523   : > { %14180 = vst [vmem:[#allocation38_spill] sm:$0xff] %v10887_v22 }
 0x524   : > { %v10891_v44 = vpop.xlane.xlu0 %3467 }
 0x525   : > { %14181 = vst [vmem:[#allocation39_spill] sm:$0xff] %v10891_v44  ;;  %4056 = vrot.lane.b32.xlu0 %v10708_v13, %s9031_s18 }
 0x526   : > { %4058 = vrot.lane.b32.xlu1 %v10711_v31, %s9031_s18  ;;  %v10897_v25 = vpop.xlane.xlu1 %3458 }
 0x527   : > { %14182 = vst [vmem:[#allocation40_spill] sm:$0xff] %v10897_v25 }
 0x528   : > { %v10899_v28 = vpop.xlane.xlu0 %3473 }
 0x529   : > { %14183 = vst [vmem:[#allocation41_spill] sm:$0xff] %v10899_v28  ;;  %4060 = vrot.lane.b32.xlu0 %v10718_v37, %s9031_s18 }
 0x52a   : > { %4062 = vrot.lane.b32.xlu1 %v10721_v29, %s9031_s18  ;;  %v10905_v11 = vpop.xlane.xlu1 %3464 }
 0x52b   : > { %14184 = vst [vmem:[#allocation42_spill] sm:$0xff] %v10905_v11 }
 0x52c   : > { %v10907_v32 = vpop.xlane.xlu0 %3479 }
 0x52d   : > { %14185 = vst [vmem:[#allocation43_spill] sm:$0xff] %v10907_v32 }
 0x52e   : > { %v10909_v14 = vpop.xlane.xlu1 %3470 }
 0x52f   : > { %14186 = vst [vmem:[#allocation44_spill] sm:$0xff] %v10909_v14 }
 0x530   : > { %v10911_v36 = vpop.xlane.xlu0 %3485 }
 0x531   : > { %14187 = vst [vmem:[#allocation45_spill] sm:$0xff] %v10911_v36 }
 0x532   : > { %v10913_v46 = vpop.xlane.xlu1 %3476 }
 0x533   : > { %14188 = vst [vmem:[#allocation46_spill] sm:$0xff] %v10913_v46 }
 0x534   : > { %v10915_v8 = vpop.xlane.xlu0 %3491 }
 0x535   : > { %14189 = vst [vmem:[#allocation47_spill] sm:$0xff] %v10915_v8  ;;  %v4104_v8 = vsel %vm2116_vm12, %v3985_v51, 0.0  ;;  %v4116_v51 = vsel %vm3221_vm15, %v3993_v50, 0.0  ;;  %v4128_v50 = vsel %vm2116_vm12, %v10863_v20, 0.0 }
 0x536   : > { %v10917_v25 = vpop.xlane.xlu1 %3482 }
 0x537   : > { %14190 = vst [vmem:[#allocation48_spill] sm:$0xff] %v10917_v25 }
 0x538   : > { %v10919_v28 = vpop.xlane.xlu0 %3497 }
 0x539   : > { %14191 = vst [vmem:[#allocation49_spill] sm:$0xff] %v10919_v28 }
 0x53a   : > { %v10921_v22 = vpop.xlane.xlu1 %3488 }
 0x53b   : > { %14192 = vst [vmem:[#allocation50_spill] sm:$0xff] %v10921_v22  ;;  %v4110_v22 = vsel %vm2116_vm12, %v3989_v39, 0.0  ;;  %v4119_v39 = vsel %vm2116_vm12, %v3995_v49, 0.0  ;;  %v4131_v49 = vsel %vm3221_vm15, %v4003_v47, 0.0 }
 0x53c   : > { %v10923_v44 = vpop.xlane.xlu0 %3503 }
 0x53d   : > { %14193 = vst [vmem:[#allocation51_spill] sm:$0xff] %v10923_v44 }
 0x53e   : > { %v10925_v27 = vpop.xlane.xlu1 %3494 }
 0x53f   : > { %14194 = vst [vmem:[#allocation52_spill] sm:$0xff] %v10925_v27 }
 0x540   : > { %v10927_v11 = vpop.xlane.xlu0 %3509 }
 0x541   : > { %14195 = vst [vmem:[#allocation53_spill] sm:$0xff] %v10927_v11  ;;  %v4107_v11 = vsel %vm2116_vm12, %v3987_v4, 0.0  ;;  %v4122_v4 = vsel %vm2116_vm12, %v3997_v7, 0.0  ;;  %v4134_v7 = vsel %vm2116_vm12, %v10871_v0, 0.0 }
 0x542   : > { %v10929_v32 = vpop.xlane.xlu1 %3500 }
 0x543   : > { %14196 = vst [vmem:[#allocation54_spill] sm:$0xff] %v10929_v32 }
 0x544   : > { %v10931_v14 = vpop.xlane.xlu0 %3515 }
 0x545   : > { %14197 = vst [vmem:[#allocation55_spill] sm:$0xff] %v10931_v14  ;;  %v4113_v14 = vsel %vm2116_vm12, %v3991_v34, 0.0  ;;  %v4125_v34 = vsel %vm2116_vm12, %v3999_v41, 0.0  ;;  %v4137_v41 = vsel %vm2116_vm12, %v4007_v58, 0.0 }
 0x546   : > { %v10933_v36 = vpop.xlane.xlu1 %3506 }
 0x547   : > { %14198 = vst [vmem:[#allocation56_spill] sm:$0xff] %v10933_v36 }
 0x548   : > { %4105 = vadd.xlane.f32.xlu0 %v4104_v8  ;;  %v10936_v25 = vpop.xlane.xlu0 %3521 }
 0x549   : > { %14199 = vst [vmem:[#allocation57_spill] sm:$0xff] %v10936_v25 }
 0x54a   : > { %v10938_v28 = vpop.xlane.xlu1 %3512 }
 0x54b   : > { %14200 = vst [vmem:[#allocation58_spill] sm:$0xff] %v10938_v28 }
 0x54c   : > { %4111 = vadd.xlane.f32.xlu0 %v4110_v22  ;;  %v10941_v44 = vpop.xlane.xlu0 %3527 }
 0x54d   : > { %14201 = vst [vmem:[#allocation59_spill] sm:$0xff] %v10941_v44 }
 0x54e   : > { %v10944_v27 = vpop.xlane.xlu1 %3518  ;;  %4108 = vadd.xlane.f32.xlu1 %v4107_v11 }
 0x54f   : > { %14202 = vst [vmem:[#allocation60_spill] sm:$0xff] %v10944_v27 }
 0x550   : > { %4114 = vadd.xlane.f32.xlu0 %v4113_v14  ;;  %v10947_v36 = vpop.xlane.xlu0 %3533 }
 0x551   : > { %14203 = vst [vmem:[#allocation61_spill] sm:$0xff] %v10947_v36 }
 0x552   : > { %v10950_v8 = vpop.xlane.xlu1 %3524  ;;  %4117 = vadd.xlane.f32.xlu1 %v4116_v51 }
 0x553   : > { %14204 = vst [vmem:[#allocation62_spill] sm:$0xff] %v10950_v8 }
 0x554   : > { %4120 = vadd.xlane.f32.xlu0 %v4119_v39  ;;  %v10953_v22 = vpop.xlane.xlu0 %3539 }
 0x555   : > { %14205 = vst [vmem:[#allocation63_spill] sm:$0xff] %v10953_v22 }
 0x556   : > { %v10956_v44 = vpop.xlane.xlu1 %3530  ;;  %4123 = vadd.xlane.f32.xlu1 %v4122_v4 }
 0x557   : > { %14206 = vst [vmem:[#allocation64_spill] sm:$0xff] %v10956_v44 }
 0x558   : > { %4126 = vadd.xlane.f32.xlu0 %v4125_v34  ;;  %v10959_v11 = vpop.xlane.xlu0 %3545 }
 0x559   : > { %14207 = vst [vmem:[#allocation65_spill] sm:$0xff] %v10959_v11 }
 0x55a   : > { %v10963_v14 = vpop.xlane.xlu1 %3536  ;;  %4129 = vadd.xlane.f32.xlu1 %v4128_v50 }
 0x55b   : > { %14208 = vst [vmem:[#allocation66_spill] sm:$0xff] %v10963_v14 }
 0x55c   : > { %4132 = vadd.xlane.f32.xlu0 %v4131_v49  ;;  %v10966_v51 = vpop.xlane.xlu0 %3551 }
 0x55d   : > { %14209 = vst [vmem:[#allocation67_spill] sm:$0xff] %v10966_v51 }
 0x55e   : > { %v10970_v39 = vpop.xlane.xlu1 %3542  ;;  %4135 = vadd.xlane.f32.xlu1 %v4134_v7 }
 0x55f   : > { %14210 = vst [vmem:[#allocation68_spill] sm:$0xff] %v10970_v39 }
 0x560   : > { %4138 = vadd.xlane.f32.xlu0 %v4137_v41  ;;  %v10973_v4 = vpop.xlane.xlu0 %3557 }
 0x561   : > { %14211 = vst [vmem:[#allocation69_spill] sm:$0xff] %v10973_v4 }
 0x562   : > { %v10975_v20 = vpop.xlane.xlu1 %3548 }
 0x563   : > { %14212 = vst [vmem:[#allocation70_spill] sm:$0xff] %v10975_v20 }
 0x564   : > { %v10977_v34 = vpop.xlane.xlu0 %3563 }
 0x565   : > { %14213 = vst [vmem:[#allocation71_spill] sm:$0xff] %v10977_v34 }
 0x566   : > { %v10979_v50 = vpop.xlane.xlu1 %3554 }
 0x567   : > { %14214 = vst [vmem:[#allocation72_spill] sm:$0xff] %v10979_v50 }
 0x568   : > { %v10981_v47 = vpop.xlane.xlu0 %3569 }
 0x569   : > { %14215 = vst [vmem:[#allocation73_spill] sm:$0xff] %v10981_v47 }
 0x56a   : > { %v10983_v49 = vpop.xlane.xlu1 %3560 }
 0x56b   : > { %14216 = vst [vmem:[#allocation74_spill] sm:$0xff] %v10983_v49 }
 0x56c   : > { %v4009_v51 = vpop.permute.xlu0 %4008 }
 0x56d   : > { %v4140_v7 = vsel %vm2116_vm12, %v4009_v51, 0.0 }
 0x56e   : > { %v10985_v0 = vpop.xlane.xlu1 %3566  ;;  %4141 = vadd.xlane.f32.xlu1 %v4140_v7 }
 0x56f   : > { %14217 = vst [vmem:[#allocation75_spill] sm:$0xff] %v10985_v0 }
 0x570   : > { %v4013_v58 = vpop.permute.xlu0 %4012 }
 0x571   : > { %v4146_v4 = vsel %vm3221_vm15, %v4013_v58, 0.0 }
 0x572   : > { %v4011_v41 = vpop.permute.xlu1 %4010  ;;  %4147 = vadd.xlane.f32.xlu1 %v4146_v4 }
 0x573   : > { %v4143_v20 = vsel %vm2116_vm12, %v4011_v41, 0.0 }
 0x574   : > { %4144 = vadd.xlane.f32.xlu0 %v4143_v20  ;;  %v4017_v34 = vpop.permute.xlu0 %4016 }
 0x575   : > { %v4152_v50 = vsel %vm2116_vm12, %v4017_v34, 0.0 }
 0x576   : > { %v4015_v47 = vpop.permute.xlu1 %4014  ;;  %4153 = vadd.xlane.f32.xlu1 %v4152_v50 }
 0x577   : > { %v4149_v49 = vsel %vm2116_vm12, %v4015_v47, 0.0 }
 0x578   : > { %4150 = vadd.xlane.f32.xlu0 %v4149_v49  ;;  %v4021_v0 = vpop.permute.xlu0 %4020 }
 0x579   : > { %v4158_v51 = vsel %vm2116_vm12, %v4021_v0, 0.0 }
 0x57a   : > { %v4019_v7 = vpop.permute.xlu1 %4018  ;;  %4159 = vadd.xlane.f32.xlu1 %v4158_v51 }
 0x57b   : > { %v4155_v14 = vsel %vm2116_vm12, %v4019_v7, 0.0 }
 0x57c   : > { %4156 = vadd.xlane.f32.xlu0 %v4155_v14  ;;  %v4025_v58 = vpop.permute.xlu0 %4024 }
 0x57d   : > { %v4164_v4 = vsel %vm2116_vm12, %v4025_v58, 0.0 }
 0x57e   : > { %v4023_v20 = vpop.permute.xlu1 %4022  ;;  %4165 = vadd.xlane.f32.xlu1 %v4164_v4 }
 0x57f   : > { %v4161_v41 = vsel %vm3221_vm15, %v4023_v20, 0.0 }
 0x580   : > { %4162 = vadd.xlane.f32.xlu0 %v4161_v41  ;;  %v4029_v34 = vpop.permute.xlu0 %4028 }
 0x581   : > { %v4170_v50 = vsel %vm2116_vm12, %v4029_v34, 0.0 }
 0x582   : > { %v4027_v47 = vpop.permute.xlu1 %4026  ;;  %4171 = vadd.xlane.f32.xlu1 %v4170_v50 }
 0x583   : > { %v4167_v49 = vsel %vm2116_vm12, %v4027_v47, 0.0 }
 0x584   : > { %4168 = vadd.xlane.f32.xlu0 %v4167_v49  ;;  %v4033_v0 = vpop.permute.xlu0 %4032 }
 0x585   : > { %v4176_v51 = vsel %vm3221_vm15, %v4033_v0, 0.0 }
 0x586   : > { %v4031_v14 = vpop.permute.xlu1 %4030  ;;  %4177 = vadd.xlane.f32.xlu1 %v4176_v51 }
 0x587   : > { %v4173_v7 = vsel %vm2116_vm12, %v4031_v14, 0.0 }
 0x588   : > { %4174 = vadd.xlane.f32.xlu0 %v4173_v7  ;;  %v4037_v58 = vpop.permute.xlu0 %4036 }
 0x589   : > { %v4182_v4 = vsel %vm2116_vm12, %v4037_v58, 0.0 }
 0x58a   : > { %v4035_v20 = vpop.permute.xlu1 %4034  ;;  %4183 = vadd.xlane.f32.xlu1 %v4182_v4 }
 0x58b   : > { %v4179_v41 = vsel %vm2116_vm12, %v4035_v20, 0.0 }
 0x58c   : > { %4180 = vadd.xlane.f32.xlu0 %v4179_v41  ;;  %v4041_v34 = vpop.permute.xlu0 %4040 }
 0x58d   : > { %v4188_v50 = vsel %vm2116_vm12, %v4041_v34, 0.0 }
 0x58e   : > { %v4039_v47 = vpop.permute.xlu1 %4038  ;;  %4189 = vadd.xlane.f32.xlu1 %v4188_v50 }
 0x58f   : > { %v4185_v49 = vsel %vm2116_vm12, %v4039_v47, 0.0 }
 0x590   : > { %4186 = vadd.xlane.f32.xlu0 %v4185_v49  ;;  %v4045_v0 = vpop.permute.xlu0 %4044 }
 0x591   : > { %v4194_v51 = vsel %vm2116_vm12, %v4045_v0, 0.0 }
 0x592   : > { %v4043_v14 = vpop.permute.xlu1 %4042  ;;  %4195 = vadd.xlane.f32.xlu1 %v4194_v51 }
 0x593   : > { %v4191_v7 = vsel %vm3221_vm15, %v4043_v14, 0.0 }
 0x594   : > { %4192 = vadd.xlane.f32.xlu0 %v4191_v7  ;;  %v4049_v58 = vpop.permute.xlu0 %4048 }
 0x595   : > { %v4200_v4 = vsel %vm2116_vm12, %v4049_v58, 0.0 }
 0x596   : > { %v4047_v20 = vpop.permute.xlu1 %4046  ;;  %4201 = vadd.xlane.f32.xlu1 %v4200_v4 }
 0x597   : > { %v4197_v41 = vsel %vm2116_vm12, %v4047_v20, 0.0 }
 0x598   : > { %4198 = vadd.xlane.f32.xlu0 %v4197_v41  ;;  %v4053_v34 = vpop.permute.xlu0 %4052 }
 0x599   : > { %v4206_v50 = vsel %vm3221_vm15, %v4053_v34, 0.0 }
 0x59a   : > { %v4051_v47 = vpop.permute.xlu1 %4050  ;;  %4207 = vadd.xlane.f32.xlu1 %v4206_v50 }
 0x59b   : > { %v4203_v49 = vsel %vm2116_vm12, %v4051_v47, 0.0 }
 0x59c   : > { %4204 = vadd.xlane.f32.xlu0 %v4203_v49  ;;  %v4057_v0 = vpop.permute.xlu0 %4056 }
 0x59d   : > { %v4212_v51 = vsel %vm2116_vm12, %v4057_v0, 0.0 }
 0x59e   : > { %v4055_v14 = vpop.permute.xlu1 %4054  ;;  %4213 = vadd.xlane.f32.xlu1 %v4212_v51 }
 0x59f   : > { %v4209_v7 = vsel %vm2116_vm12, %v4055_v14, 0.0 }
 0x5a0   : > { %4210 = vadd.xlane.f32.xlu0 %v4209_v7  ;;  %v4061_v58 = vpop.permute.xlu0 %4060 }
 0x5a1   : > { %v4218_v4 = vsel %vm2116_vm12, %v4061_v58, 0.0 }
 0x5a2   : > { %v4059_v20 = vpop.permute.xlu1 %4058  ;;  %4219 = vadd.xlane.f32.xlu1 %v4218_v4 }
 0x5a3   : > { %v4215_v41 = vsel %vm2116_vm12, %v4059_v20, 0.0 }
 0x5a4   : > { %4216 = vadd.xlane.f32.xlu0 %v4215_v41 }
 0x5a6   : > { %v4063_v34 = vpop.permute.xlu1 %4062 }
 0x5a7   : > { %v4221_v50 = vsel %vm3221_vm15, %v4063_v34, 0.0 }
 0x5a8   : > { %4222 = vadd.xlane.f32.xlu0 %v4221_v50 }
 0x5d1   : > { %v4106_v47 = vpop.xlane.xlu0 %4105 }
 0x5d2   : > { %v4224_v49 = vmul.f32 0.125, %v4106_v47 }
 0x5d4   : > { %v4264_v0 = vsub.f32 %v10467_v6, %v4224_v49 }
 0x5d5   : > { %v4112_v39 = vpop.xlane.xlu0 %4111 }
 0x5d6   : > { %v4304_v14 = vmul.f32 %v4264_v0, %v4264_v0  ;;  %v4226_v51 = vmul.f32 0.125, %v4112_v39 }
 0x5d7   : > { %v4109_v7 = vpop.xlane.xlu1 %4108 }
 0x5d8   : > { %v4225_v11 = vmul.f32 0.125, %v4109_v7  ;;  %v4266_v58 = vsub.f32 %v10464_v1, %v4226_v51  ;;  %4384 = vrot.lane.b32.xlu1 %v4304_v14, %s9031_s18 }
 0x5d9   : > { %v4115_v20 = vpop.xlane.xlu0 %4114 }
 0x5da   : > { %v4265_v4 = vsub.f32 %v10478_v48, %v4225_v11  ;;  %v4306_v41 = vmul.f32 %v4266_v58, %v4266_v58  ;;  %v4227_v44 = vmul.f32 0.125, %v4115_v20 }
 0x5db   : > { %v4118_v34 = vpop.xlane.xlu1 %4117 }
 0x5dc   : > { %v4305_v50 = vmul.f32 %v4265_v4, %v4265_v4  ;;  %v4228_v22 = vmul.f32 0.125, %v4118_v34  ;;  %v4267_v47 = vsub.f32 %v10487_v16, %v4227_v44  ;;  %4388 = vrot.lane.b32.xlu1 %v4306_v41, %s9031_s18 }
 0x5dd   : > { %v4121_v49 = vpop.xlane.xlu0 %4120 }
 0x5de   : > { %v4268_v39 = vsub.f32 %v10497_v30, %v4228_v22  ;;  %v4307_v0 = vmul.f32 %v4267_v47, %v4267_v47  ;;  %4386 = vrot.lane.b32.xlu0 %v4305_v50, %s9031_s18  ;;  %v4229_v51 = vmul.f32 0.125, %v4121_v49 }
 0x5df   : > { %v4124_v14 = vpop.xlane.xlu1 %4123 }
 0x5e0   : > { %v4308_v7 = vmul.f32 %v4268_v39, %v4268_v39  ;;  %v4230_v36 = vmul.f32 0.125, %v4124_v14  ;;  %v4269_v11 = vsub.f32 %v10494_v63, %v4229_v51  ;;  %4390 = vrot.lane.b32.xlu1 %v4307_v0, %s9031_s18 }
 0x5e1   : > { %v4127_v58 = vpop.xlane.xlu0 %4126 }
 0x5e2   : > { %v4270_v20 = vsub.f32 %v10510_v61, %v4230_v36  ;;  %v4309_v44 = vmul.f32 %v4269_v11, %v4269_v11  ;;  %4392 = vrot.lane.b32.xlu0 %v4308_v7, %s9031_s18  ;;  %v4231_v4 = vmul.f32 0.125, %v4127_v58 }
 0x5e3   : > { %v4130_v41 = vpop.xlane.xlu1 %4129 }
 0x5e4   : > { %v4310_v22 = vmul.f32 %v4270_v20, %v4270_v20  ;;  %v4232_v34 = vmul.f32 0.125, %v4130_v41  ;;  %v4271_v50 = vsub.f32 %v10519_v21, %v4231_v4  ;;  %4394 = vrot.lane.b32.xlu1 %v4309_v44, %s9031_s18 }
 0x5e5   : > { %v4133_v47 = vpop.xlane.xlu0 %4132 }
 0x5e6   : > { %v4272_v49 = vsub.f32 %v10533_v23, %v4232_v34  ;;  %v4311_v39 = vmul.f32 %v4271_v50, %v4271_v50  ;;  %4396 = vrot.lane.b32.xlu0 %v4310_v22, %s9031_s18  ;;  %v4233_v0 = vmul.f32 0.125, %v4133_v47 }
 0x5e7   : > { %v4136_v51 = vpop.xlane.xlu1 %4135 }
 0x5e8   : > { %v4312_v36 = vmul.f32 %v4272_v49, %v4272_v49  ;;  %v4234_v14 = vmul.f32 0.125, %v4136_v51  ;;  %v4273_v7 = vsub.f32 %v10530_v3, %v4233_v0  ;;  %4398 = vrot.lane.b32.xlu1 %v4311_v39, %s9031_s18 }
 0x5e9   : > { %v4139_v11 = vpop.xlane.xlu0 %4138 }
 0x5ea   : > { %v4274_v58 = vsub.f32 %v10549_v55, %v4234_v14  ;;  %v4313_v20 = vmul.f32 %v4273_v7, %v4273_v7  ;;  %4400 = vrot.lane.b32.xlu0 %v4312_v36, %s9031_s18  ;;  %v4235_v44 = vmul.f32 0.125, %v4139_v11 }
 0x5ec   : > { %v4314_v4 = vmul.f32 %v4274_v58, %v4274_v58  ;;  %v4275_v41 = vsub.f32 %v10546_v18, %v4235_v44  ;;  %4402 = vrot.lane.b32.xlu1 %v4313_v20, %s9031_s18 }
 0x5ee   : > { %v4315_v22 = vmul.f32 %v4275_v41, %v4275_v41  ;;  %4404 = vrot.lane.b32.xlu0 %v4314_v4, %s9031_s18 }
 0x5f0   : > { %4406 = vrot.lane.b32.xlu1 %v4315_v22, %s9031_s18 }
 0x5f7   : > { %v4142_v34 = vpop.xlane.xlu1 %4141 }
 0x5f8   : > { %v4236_v50 = vmul.f32 0.125, %v4142_v34 }
 0x5fa   : > { %v4276_v47 = vsub.f32 %v10565_v17, %v4236_v50 }
 0x5fb   : > { %v4148_v49 = vpop.xlane.xlu1 %4147 }
 0x5fc   : > { %v4316_v39 = vmul.f32 %v4276_v47, %v4276_v47  ;;  %v4238_v0 = vmul.f32 0.125, %v4148_v49 }
 0x5fd   : > { %v4145_v51 = vpop.xlane.xlu0 %4144 }
 0x5fe   : > { %v4237_v36 = vmul.f32 0.125, %v4145_v51  ;;  %v4278_v14 = vsub.f32 %v10581_v10, %v4238_v0  ;;  %4408 = vrot.lane.b32.xlu0 %v4316_v39, %s9031_s18 }
 0x5ff   : > { %v4154_v11 = vpop.xlane.xlu1 %4153 }
 0x600   : > { %v4277_v7 = vsub.f32 %v10562_v43, %v4237_v36  ;;  %v4318_v58 = vmul.f32 %v4278_v14, %v4278_v14  ;;  %v4240_v20 = vmul.f32 0.125, %v4154_v11 }
 0x601   : > { %v4151_v44 = vpop.xlane.xlu0 %4150 }
 0x602   : > { %v4317_v4 = vmul.f32 %v4277_v7, %v4277_v7  ;;  %v4239_v41 = vmul.f32 0.125, %v4151_v44  ;;  %v4280_v22 = vsub.f32 %v10591_v33, %v4240_v20  ;;  %4412 = vrot.lane.b32.xlu0 %v4318_v58, %s9031_s18 }
 0x603   : > { %v4160_v50 = vpop.xlane.xlu1 %4159 }
 0x604   : > { %v4279_v34 = vsub.f32 %v10578_v26, %v4239_v41  ;;  %4410 = vrot.lane.b32.xlu1 %v4317_v4, %s9031_s18  ;;  %v4320_v47 = vmul.f32 %v4280_v22, %v4280_v22  ;;  %v4242_v49 = vmul.f32 0.125, %v4160_v50 }
 0x605   : > { %v4157_v39 = vpop.xlane.xlu0 %4156 }
 0x606   : > { %v4319_v0 = vmul.f32 %v4279_v34, %v4279_v34  ;;  %v4241_v51 = vmul.f32 0.125, %v4157_v39  ;;  %v4282_v36 = vsub.f32 %v10606_v40, %v4242_v49  ;;  %4416 = vrot.lane.b32.xlu0 %v4320_v47, %s9031_s18 }
 0x607   : > { %v4166_v7 = vpop.xlane.xlu1 %4165 }
 0x608   : > { %v4281_v14 = vsub.f32 %v10588_v59, %v4241_v51  ;;  %4414 = vrot.lane.b32.xlu1 %v4319_v0, %s9031_s18  ;;  %v4322_v11 = vmul.f32 %v4282_v36, %v4282_v36  ;;  %v4244_v58 = vmul.f32 0.125, %v4166_v7 }
 0x609   : > { %v4163_v20 = vpop.xlane.xlu0 %4162 }
 0x60a   : > { %v4321_v44 = vmul.f32 %v4281_v14, %v4281_v14  ;;  %v4243_v4 = vmul.f32 0.125, %v4163_v20  ;;  %v4284_v41 = vsub.f32 %v10625_v19, %v4244_v58  ;;  %4420 = vrot.lane.b32.xlu0 %v4322_v11, %s9031_s18 }
 0x60b   : > { %v4172_v34 = vpop.xlane.xlu1 %4171 }
 0x60c   : > { %v4283_v22 = vsub.f32 %v10615_v52, %v4243_v4  ;;  %4418 = vrot.lane.b32.xlu1 %v4321_v44, %s9031_s18  ;;  %v4324_v50 = vmul.f32 %v4284_v41, %v4284_v41  ;;  %v4246_v47 = vmul.f32 0.125, %v4172_v34 }
 0x60d   : > { %v4169_v49 = vpop.xlane.xlu0 %4168 }
 0x60e   : > { %v4323_v39 = vmul.f32 %v4283_v22, %v4283_v22  ;;  %v4245_v0 = vmul.f32 0.125, %v4169_v49  ;;  %v4286_v51 = vsub.f32 %v10638_v57, %v4246_v47  ;;  %4424 = vrot.lane.b32.xlu0 %v4324_v50, %s9031_s18 }
 0x60f   : > { %v4178_v14 = vpop.xlane.xlu1 %4177 }
 0x610   : > { %v4285_v36 = vsub.f32 %v10622_v2, %v4245_v0  ;;  %4422 = vrot.lane.b32.xlu1 %v4323_v39, %s9031_s18  ;;  %v4326_v7 = vmul.f32 %v4286_v51, %v4286_v51  ;;  %v4248_v11 = vmul.f32 0.125, %v4178_v14 }
 0x611   : > { %v4175_v58 = vpop.xlane.xlu0 %4174 }
 0x612   : > { %v4325_v20 = vmul.f32 %v4285_v36, %v4285_v36  ;;  %v4247_v44 = vmul.f32 0.125, %v4175_v58  ;;  %v4288_v4 = vsub.f32 %v10651_v60, %v4248_v11  ;;  %4428 = vrot.lane.b32.xlu0 %v4326_v7, %s9031_s18 }
 0x613   : > { %v4184_v22 = vpop.xlane.xlu1 %4183 }
 0x614   : > { %v4287_v41 = vsub.f32 %v10643_v15, %v4247_v44  ;;  %4426 = vrot.lane.b32.xlu1 %v4325_v20, %s9031_s18  ;;  %v4328_v34 = vmul.f32 %v4288_v4, %v4288_v4  ;;  %v4250_v50 = vmul.f32 0.125, %v4184_v22 }
 0x615   : > { %v4181_v47 = vpop.xlane.xlu0 %4180 }
 0x616   : > { %v4327_v49 = vmul.f32 %v4287_v41, %v4287_v41  ;;  %v4249_v39 = vmul.f32 0.125, %v4181_v47  ;;  %v4290_v0 = vsub.f32 %v10661_v56, %v4250_v50  ;;  %4432 = vrot.lane.b32.xlu0 %v4328_v34, %s9031_s18 }
 0x617   : > { %v4190_v36 = vpop.xlane.xlu1 %4189 }
 0x618   : > { %v4289_v51 = vsub.f32 %v10648_v53, %v4249_v39  ;;  %4430 = vrot.lane.b32.xlu1 %v4327_v49, %s9031_s18  ;;  %v4330_v14 = vmul.f32 %v4290_v0, %v4290_v0  ;;  %v4252_v7 = vmul.f32 0.125, %v4190_v36 }
 0x619   : > { %v4187_v11 = vpop.xlane.xlu0 %4186 }
 0x61a   : > { %v4329_v58 = vmul.f32 %v4289_v51, %v4289_v51  ;;  %v4251_v20 = vmul.f32 0.125, %v4187_v11  ;;  %v4292_v44 = vsub.f32 %v10671_v62, %v4252_v7  ;;  %4436 = vrot.lane.b32.xlu0 %v4330_v14, %s9031_s18 }
 0x61b   : > { %v4196_v41 = vpop.xlane.xlu1 %4195 }
 0x61c   : > { %v4291_v4 = vsub.f32 %v10658_v45, %v4251_v20  ;;  %4434 = vrot.lane.b32.xlu1 %v4329_v58, %s9031_s18  ;;  %v4332_v22 = vmul.f32 %v4292_v44, %v4292_v44  ;;  %v4254_v34 = vmul.f32 0.125, %v4196_v41 }
 0x61d   : > { %v4193_v50 = vpop.xlane.xlu0 %4192 }
 0x61e   : > { %v4331_v47 = vmul.f32 %v4291_v4, %v4291_v4  ;;  %v4253_v49 = vmul.f32 0.125, %v4193_v50  ;;  %v4294_v39 = vsub.f32 %v10681_v5, %v4254_v34  ;;  %4440 = vrot.lane.b32.xlu0 %v4332_v22, %s9031_s18 }
 0x61f   : > { %v4202_v51 = vpop.xlane.xlu1 %4201 }
 0x620   : > { %v4293_v0 = vsub.f32 %v10668_v9, %v4253_v49  ;;  %4438 = vrot.lane.b32.xlu1 %v4331_v47, %s9031_s18  ;;  %v4334_v36 = vmul.f32 %v4294_v39, %v4294_v39  ;;  %v4256_v14 = vmul.f32 0.125, %v4202_v51 }
 0x621   : > { %v4199_v7 = vpop.xlane.xlu0 %4198 }
 0x622   : > { %v4333_v11 = vmul.f32 %v4293_v0, %v4293_v0  ;;  %v4255_v58 = vmul.f32 0.125, %v4199_v7  ;;  %v4296_v20 = vsub.f32 %v10686_v42, %v4256_v14  ;;  %4444 = vrot.lane.b32.xlu0 %v4334_v36, %s9031_s18 }
 0x623   : > { %v4208_v4 = vpop.xlane.xlu1 %4207 }
 0x624   : > { %v4295_v44 = vsub.f32 %v10678_v12, %v4255_v58  ;;  %4442 = vrot.lane.b32.xlu1 %v4333_v11, %s9031_s18  ;;  %v4336_v41 = vmul.f32 %v4296_v20, %v4296_v20  ;;  %v4258_v22 = vmul.f32 0.125, %v4208_v4 }
 0x625   : > { %v4205_v34 = vpop.xlane.xlu0 %4204 }
 0x626   : > { %v4335_v50 = vmul.f32 %v4295_v44, %v4295_v44  ;;  %v4257_v47 = vmul.f32 0.125, %v4205_v34  ;;  %v4298_v49 = vsub.f32 %v10698_v35, %v4258_v22  ;;  %4448 = vrot.lane.b32.xlu0 %v4336_v41, %s9031_s18 }
 0x627   : > { %v4214_v0 = vpop.xlane.xlu1 %4213 }
 0x628   : > { %v4297_v39 = vsub.f32 %v10691_v24, %v4257_v47  ;;  %4446 = vrot.lane.b32.xlu1 %v4335_v50, %s9031_s18  ;;  %v4338_v51 = vmul.f32 %v4298_v49, %v4298_v49  ;;  %v4260_v36 = vmul.f32 0.125, %v4214_v0 }
 0x629   : > { %v4211_v14 = vpop.xlane.xlu0 %4210 }
 0x62a   : > { %v4337_v7 = vmul.f32 %v4297_v39, %v4297_v39  ;;  %v4259_v11 = vmul.f32 0.125, %v4211_v14  ;;  %v4300_v58 = vsub.f32 %v10708_v13, %v4260_v36  ;;  %4452 = vrot.lane.b32.xlu0 %v4338_v51, %s9031_s18 }
 0x62b   : > { %v4220_v44 = vpop.xlane.xlu1 %4219 }
 0x62c   : > { %v4299_v20 = vsub.f32 %v10701_v38, %v4259_v11  ;;  %4450 = vrot.lane.b32.xlu1 %v4337_v7, %s9031_s18  ;;  %v4340_v4 = vmul.f32 %v4300_v58, %v4300_v58  ;;  %v4262_v41 = vmul.f32 0.125, %v4220_v44 }
 0x62d   : > { %v4217_v22 = vpop.xlane.xlu0 %4216 }
 0x62e   : > { %v4339_v34 = vmul.f32 %v4299_v20, %v4299_v20  ;;  %v4261_v50 = vmul.f32 0.125, %v4217_v22  ;;  %v4302_v47 = vsub.f32 %v10718_v37, %v4262_v41  ;;  %4456 = vrot.lane.b32.xlu0 %v4340_v4, %s9031_s18 }
 0x630   : > { %v4301_v49 = vsub.f32 %v10711_v31, %v4261_v50  ;;  %4454 = vrot.lane.b32.xlu1 %v4339_v34, %s9031_s18  ;;  %v4342_v39 = vmul.f32 %v4302_v47, %v4302_v47 }
 0x631   : > { %v4223_v0 = vpop.xlane.xlu0 %4222 }
 0x632   : > { %v4341_v51 = vmul.f32 %v4301_v49, %v4301_v49  ;;  %v4263_v36 = vmul.f32 0.125, %v4223_v0  ;;  %4460 = vrot.lane.b32.xlu0 %v4342_v39, %s9031_s18 }
 0x634   : > { %v4303_v14 = vsub.f32 %v10721_v29, %v4263_v36  ;;  %4458 = vrot.lane.b32.xlu1 %v4341_v51, %s9031_s18 }
 0x636   : > { %v4343_v7 = vmul.f32 %v4303_v14, %v4303_v14 }
 0x638   : > { %4462 = vrot.lane.b32.xlu1 %v4343_v7, %s9031_s18 }
 0x64a   : > { %v4385_v11 = vpop.permute.xlu1 %4384 }
 0x64b   : > { %v4504_v44 = vsel %vm2116_vm12, %v4385_v11, 0.0 }
 0x64e   : > { %v4389_v58 = vpop.permute.xlu1 %4388 }
 0x64f   : > { %v4510_v41 = vsel %vm2116_vm12, %v4389_v58, 0.0 }
 0x650   : > { %v4387_v20 = vpop.permute.xlu0 %4386 }
 0x651   : > { %4505 = vadd.xlane.f32.xlu0 %v4504_v44  ;;  %v4507_v49 = vsel %vm2116_vm12, %v4387_v20, 0.0 }
 0x652   : > { %v4391_v4 = vpop.permute.xlu1 %4390 }
 0x653   : > { %v4513_v50 = vsel %vm2116_vm12, %v4391_v4, 0.0 }
 0x654   : > { %v4393_v22 = vpop.permute.xlu0 %4392 }
 0x655   : > { %4511 = vadd.xlane.f32.xlu0 %v4510_v41  ;;  %v4516_v51 = vsel %vm3221_vm15, %v4393_v22, 0.0 }
 0x656   : > { %v4395_v34 = vpop.permute.xlu1 %4394 }
 0x657   : > { %v4519_v0 = vsel %vm2116_vm12, %v4395_v34, 0.0 }
 0x658   : > { %v4397_v39 = vpop.permute.xlu0 %4396 }
 0x659   : > { %4514 = vadd.xlane.f32.xlu0 %v4513_v50  ;;  %v4522_v11 = vsel %vm2116_vm12, %v4397_v39, 0.0 }
 0x65a   : > { %v4399_v47 = vpop.permute.xlu1 %4398 }
 0x65b   : > { %v4525_v14 = vsel %vm2116_vm12, %v4399_v47, 0.0 }
 0x65c   : > { %4508 = vadd.xlane.f32.xlu1 %v4507_v49  ;;  %v4401_v7 = vpop.permute.xlu0 %4400 }
 0x65d   : > { %4520 = vadd.xlane.f32.xlu0 %v4519_v0  ;;  %v4528_v20 = vsel %vm2116_vm12, %v4401_v7, 0.0 }
 0x65e   : > { %v4403_v36 = vpop.permute.xlu1 %4402 }
 0x65f   : > { %v4531_v58 = vsel %vm3221_vm15, %v4403_v36, 0.0 }
 0x660   : > { %4517 = vadd.xlane.f32.xlu1 %v4516_v51  ;;  %v4405_v4 = vpop.permute.xlu0 %4404 }
 0x661   : > { %4526 = vadd.xlane.f32.xlu0 %v4525_v14  ;;  %v4534_v22 = vsel %vm2116_vm12, %v4405_v4, 0.0 }
 0x662   : > { %v4407_v44 = vpop.permute.xlu1 %4406 }
 0x663   : > { %v4537_v41 = vsel %vm2116_vm12, %v4407_v44, 0.0 }
 0x664   : > { %4523 = vadd.xlane.f32.xlu1 %v4522_v11 }
 0x665   : > { %4532 = vadd.xlane.f32.xlu0 %v4531_v58 }
 0x668   : > { %4529 = vadd.xlane.f32.xlu1 %v4528_v20 }
 0x669   : > { %4538 = vadd.xlane.f32.xlu0 %v4537_v41 }
 0x66c   : > { %4535 = vadd.xlane.f32.xlu1 %v4534_v22 }
 0x670   : > { %v4409_v34 = vpop.permute.xlu0 %4408 }
 0x671   : > { %v4540_v50 = vsel %vm2116_vm12, %v4409_v34, 0.0 }
 0x672   : > { %4541 = vadd.xlane.f32.xlu1 %v4540_v50 }
 0x674   : > { %v4413_v47 = vpop.permute.xlu0 %4412 }
 0x675   : > { %v4546_v39 = vsel %vm3221_vm15, %v4413_v47, 0.0 }
 0x676   : > { %v4411_v49 = vpop.permute.xlu1 %4410  ;;  %4547 = vadd.xlane.f32.xlu1 %v4546_v39 }
 0x677   : > { %v4543_v0 = vsel %vm2116_vm12, %v4411_v49, 0.0 }
 0x678   : > { %4544 = vadd.xlane.f32.xlu0 %v4543_v0  ;;  %v4417_v51 = vpop.permute.xlu0 %4416 }
 0x679   : > { %v4552_v14 = vsel %vm2116_vm12, %v4417_v51, 0.0 }
 0x67a   : > { %v4415_v36 = vpop.permute.xlu1 %4414  ;;  %4553 = vadd.xlane.f32.xlu1 %v4552_v14 }
 0x67b   : > { %v4549_v7 = vsel %vm2116_vm12, %v4415_v36, 0.0 }
 0x67c   : > { %4550 = vadd.xlane.f32.xlu0 %v4549_v7  ;;  %v4421_v11 = vpop.permute.xlu0 %4420 }
 0x67d   : > { %v4558_v44 = vsel %vm2116_vm12, %v4421_v11, 0.0 }
 0x67e   : > { %v4419_v58 = vpop.permute.xlu1 %4418  ;;  %4559 = vadd.xlane.f32.xlu1 %v4558_v44 }
 0x67f   : > { %v4555_v20 = vsel %vm2116_vm12, %v4419_v58, 0.0 }
 0x680   : > { %4556 = vadd.xlane.f32.xlu0 %v4555_v20  ;;  %v4425_v4 = vpop.permute.xlu0 %4424 }
 0x681   : > { %v4564_v22 = vsel %vm2116_vm12, %v4425_v4, 0.0 }
 0x682   : > { %v4423_v41 = vpop.permute.xlu1 %4422  ;;  %4565 = vadd.xlane.f32.xlu1 %v4564_v22 }
 0x683   : > { %v4561_v34 = vsel %vm3221_vm15, %v4423_v41, 0.0 }
 0x684   : > { %4562 = vadd.xlane.f32.xlu0 %v4561_v34  ;;  %v4429_v50 = vpop.permute.xlu0 %4428 }
 0x685   : > { %v4570_v49 = vsel %vm2116_vm12, %v4429_v50, 0.0 }
 0x686   : > { %v4427_v47 = vpop.permute.xlu1 %4426  ;;  %4571 = vadd.xlane.f32.xlu1 %v4570_v49 }
 0x687   : > { %v4567_v39 = vsel %vm2116_vm12, %v4427_v47, 0.0 }
 0x688   : > { %4568 = vadd.xlane.f32.xlu0 %v4567_v39  ;;  %v4433_v0 = vpop.permute.xlu0 %4432 }
 0x689   : > { %v4576_v36 = vsel %vm3221_vm15, %v4433_v0, 0.0 }
 0x68a   : > { %v4431_v51 = vpop.permute.xlu1 %4430  ;;  %4577 = vadd.xlane.f32.xlu1 %v4576_v36 }
 0x68b   : > { %v4573_v14 = vsel %vm2116_vm12, %v4431_v51, 0.0 }
 0x68c   : > { %4574 = vadd.xlane.f32.xlu0 %v4573_v14  ;;  %v4437_v7 = vpop.permute.xlu0 %4436 }
 0x68d   : > { %v4582_v58 = vsel %vm2116_vm12, %v4437_v7, 0.0 }
 0x68e   : > { %v4435_v11 = vpop.permute.xlu1 %4434  ;;  %4583 = vadd.xlane.f32.xlu1 %v4582_v58 }
 0x68f   : > { %v4579_v44 = vsel %vm2116_vm12, %v4435_v11, 0.0 }
 0x690   : > { %4580 = vadd.xlane.f32.xlu0 %v4579_v44  ;;  %v4441_v20 = vpop.permute.xlu0 %4440 }
 0x691   : > { %v4588_v41 = vsel %vm2116_vm12, %v4441_v20, 0.0 }
 0x692   : > { %v4439_v4 = vpop.permute.xlu1 %4438  ;;  %4589 = vadd.xlane.f32.xlu1 %v4588_v41 }
 0x693   : > { %v4585_v22 = vsel %vm2116_vm12, %v4439_v4, 0.0 }
 0x694   : > { %4586 = vadd.xlane.f32.xlu0 %v4585_v22  ;;  %v4445_v34 = vpop.permute.xlu0 %4444 }
 0x695   : > { %v4594_v47 = vsel %vm2116_vm12, %v4445_v34, 0.0 }
 0x696   : > { %v4443_v50 = vpop.permute.xlu1 %4442  ;;  %4595 = vadd.xlane.f32.xlu1 %v4594_v47 }
 0x697   : > { %v4591_v49 = vsel %vm3221_vm15, %v4443_v50, 0.0 }
 0x698   : > { %4592 = vadd.xlane.f32.xlu0 %v4591_v49  ;;  %v4449_v39 = vpop.permute.xlu0 %4448 }
 0x699   : > { %v4600_v51 = vsel %vm2116_vm12, %v4449_v39, 0.0 }
 0x69a   : > { %v4447_v0 = vpop.permute.xlu1 %4446  ;;  %4601 = vadd.xlane.f32.xlu1 %v4600_v51 }
 0x69b   : > { %v4597_v36 = vsel %vm2116_vm12, %v4447_v0, 0.0 }
 0x69c   : > { %4598 = vadd.xlane.f32.xlu0 %v4597_v36  ;;  %v4453_v14 = vpop.permute.xlu0 %4452 }
 0x69d   : > { %v4606_v11 = vsel %vm3221_vm15, %v4453_v14, 0.0 }
 0x69e   : > { %v4451_v7 = vpop.permute.xlu1 %4450  ;;  %4607 = vadd.xlane.f32.xlu1 %v4606_v11 }
 0x69f   : > { %v4603_v58 = vsel %vm2116_vm12, %v4451_v7, 0.0 }
 0x6a0   : > { %4604 = vadd.xlane.f32.xlu0 %v4603_v58  ;;  %v4457_v44 = vpop.permute.xlu0 %4456 }
 0x6a1   : > { %v4612_v4 = vsel %vm2116_vm12, %v4457_v44, 0.0 }
 0x6a2   : > { %v4455_v20 = vpop.permute.xlu1 %4454  ;;  %4613 = vadd.xlane.f32.xlu1 %v4612_v4 }
 0x6a3   : > { %v4609_v41 = vsel %vm2116_vm12, %v4455_v20, 0.0 }
 0x6a4   : > { %4610 = vadd.xlane.f32.xlu0 %v4609_v41  ;;  %v4461_v22 = vpop.permute.xlu0 %4460 }
 0x6a5   : > { %v4618_v50 = vsel %vm2116_vm12, %v4461_v22, 0.0 }
 0x6a6   : > { %v4459_v34 = vpop.permute.xlu1 %4458  ;;  %4619 = vadd.xlane.f32.xlu1 %v4618_v50 }
 0x6a7   : > { %v4615_v47 = vsel %vm2116_vm12, %v4459_v34, 0.0 }
 0x6a8   : > { %4616 = vadd.xlane.f32.xlu0 %v4615_v47 }
 0x6aa   : > { %v4463_v49 = vpop.permute.xlu1 %4462 }
 0x6ab   : > { %v4621_v39 = vsel %vm3221_vm15, %v4463_v49, 0.0 }
 0x6ac   : > { %4622 = vadd.xlane.f32.xlu0 %v4621_v39 }
 0x6b7   : > { %4996 = vrot.lane.b32.xlu1 %v10467_v6, %s9032_s20 }
 0x6bb   : > { %5000 = vrot.lane.b32.xlu1 %v10464_v1, %s9032_s20 }
 0x6bf   : > { %5002 = vrot.lane.b32.xlu1 %v10487_v16, %s9032_s20 }
 0x6c2   : > { %4998 = vrot.lane.b32.xlu0 %v10478_v48, %s9032_s20 }
 0x6c3   : > { %5006 = vrot.lane.b32.xlu1 %v10494_v63, %s9032_s20 }
 0x6c6   : > { %5004 = vrot.lane.b32.xlu0 %v10497_v30, %s9032_s20 }
 0x6c7   : > { %5010 = vrot.lane.b32.xlu1 %v10519_v21, %s9032_s20 }
 0x6ca   : > { %5008 = vrot.lane.b32.xlu0 %v10510_v61, %s9032_s20 }
 0x6cb   : > { %5014 = vrot.lane.b32.xlu1 %v10530_v3, %s9032_s20 }
 0x6ce   : > { %5012 = vrot.lane.b32.xlu0 %v10533_v23, %s9032_s20 }
 0x6cf   : > { %5018 = vrot.lane.b32.xlu1 %v10546_v18, %s9032_s20 }
 0x6d2   : > { %5016 = vrot.lane.b32.xlu0 %v10549_v55, %s9032_s20 }
 0x6d3   : > { %5022 = vrot.lane.b32.xlu1 %v10562_v43, %s9032_s20 }
 0x6d6   : > { %5020 = vrot.lane.b32.xlu0 %v10565_v17, %s9032_s20 }
 0x6d7   : > { %5026 = vrot.lane.b32.xlu1 %v10578_v26, %s9032_s20 }
 0x6da   : > { %5024 = vrot.lane.b32.xlu0 %v10581_v10, %s9032_s20  ;;  %v4506_v0 = vpop.xlane.xlu0 %4505 }
 0x6db   : > { %v4624_v51 = vmul.f32 0.14285715, %v4506_v0  ;;  %5030 = vrot.lane.b32.xlu1 %v10588_v59, %s9032_s20 }
 0x6dd   : > { %v4664_v36 = vmax.f32 %v4624_v51, 1e-06 }
 0x6de   : > { %5028 = vrot.lane.b32.xlu0 %v10591_v33, %s9032_s20  ;;  %v4512_v14 = vpop.xlane.xlu0 %4511 }
 0x6df   : > { %v4626_v7 = vmul.f32 0.14285715, %v4512_v14  ;;  %5034 = vrot.lane.b32.xlu1 %v10615_v52, %s9032_s20  ;;  %v4704_v11 = vmin.f32 %v4664_v36, 1000000.0 }
 0x6e1   : > { %v4666_v44 = vmax.f32 %v4626_v7, 1e-06  ;;  %8586 = vlog2.f32 %v4704_v11 }
 0x6e2   : > { %5032 = vrot.lane.b32.xlu0 %v10606_v40, %s9032_s20  ;;  %v4515_v58 = vpop.xlane.xlu0 %4514 }
 0x6e3   : > { %5038 = vrot.lane.b32.xlu1 %v10622_v2, %s9032_s20  ;;  %v4627_v41 = vmul.f32 0.14285715, %v4515_v58  ;;  %v4706_v34 = vmin.f32 %v4666_v44, 1000000.0 }
 0x6e5   : > { %v4509_v20 = vpop.xlane.xlu1 %4508  ;;  %v4667_v36 = vmax.f32 %v4627_v41, 1e-06  ;;  %8588 = vlog2.f32 %v4706_v34 }
 0x6e6   : > { %v4625_v4 = vmul.f32 0.14285715, %v4509_v20  ;;  %5036 = vrot.lane.b32.xlu0 %v10625_v19, %s9032_s20  ;;  %v4521_v22 = vpop.xlane.xlu0 %4520 }
 0x6e7   : > { %v4629_v47 = vmul.f32 0.14285715, %v4521_v22  ;;  %5042 = vrot.lane.b32.xlu1 %v10643_v15, %s9032_s20 }
 0x6e8   : > { %v4665_v50 = vmax.f32 %v4625_v4, 1e-06 }
 0x6e9   : > { %v4518_v49 = vpop.xlane.xlu1 %4517  ;;  %v4669_v0 = vmax.f32 %v4629_v47, 1e-06 }
 0x6ea   : > { %v4705_v39 = vmin.f32 %v4665_v50, 1000000.0  ;;  %v4628_v51 = vmul.f32 0.14285715, %v4518_v49  ;;  %5040 = vrot.lane.b32.xlu0 %v10638_v57, %s9032_s20  ;;  %v4527_v14 = vpop.xlane.xlu0 %4526  ;;  %v4707_v50 = vmin.f32 %v4667_v36, 1000000.0 }
 0x6eb   : > { %v4709_v7 = vmin.f32 %v4669_v0, 1000000.0  ;;  %v4631_v58 = vmul.f32 0.14285715, %v4527_v14  ;;  %5046 = vrot.lane.b32.xlu1 %v10648_v53, %s9032_s20 }
 0x6ec   : > { %v4668_v11 = vmax.f32 %v4628_v51, 1e-06  ;;  %8590 = vlog2.f32 %v4705_v39 }
 0x6ed   : > { %v4524_v44 = vpop.xlane.xlu1 %4523  ;;  %8592 = vlog2.f32 %v4709_v7  ;;  %v4671_v4 = vmax.f32 %v4631_v58, 1e-06 }
 0x6ee   : > { %v4708_v20 = vmin.f32 %v4668_v11, 1000000.0  ;;  %v4630_v22 = vmul.f32 0.14285715, %v4524_v44  ;;  %5044 = vrot.lane.b32.xlu0 %v10651_v60, %s9032_s20  ;;  %v4533_v47 = vpop.xlane.xlu0 %4532  ;;  %v8587_v11 = vpop.eup %8586 }
 0x6ef   : > { %v4711_v41 = vmin.f32 %v4671_v4, 1000000.0  ;;  %5050 = vrot.lane.b32.xlu1 %v10658_v45, %s9032_s20  ;;  %v4633_v49 = vmul.f32 0.14285715, %v4533_v47  ;;  %v11195_v47 = vmul.f32 0.6931472, %v8587_v11 }
 0x6f0   : > { %8594 = vlog2.f32 %v4708_v20  ;;  %v4670_v34 = vmax.f32 %v4630_v22, 1e-06 }
 0x6f1   : > { %v4530_v0 = vpop.xlane.xlu1 %4529  ;;  %8596 = vlog2.f32 %v4711_v41  ;;  %v4673_v51 = vmax.f32 %v4633_v49, 1e-06  ;;  %14218 = vst [vmem:[#allocation76_spill] sm:$0xff] %v11195_v47  ;;  %v7514_v41 = vld [vmem:[%s14033_s4 + $0x140] sm:$0xff] }
 0x6f2   : > { %v4710_v39 = vmin.f32 %v4670_v34, 1000000.0  ;;  %5048 = vrot.lane.b32.xlu0 %v10661_v56, %s9032_s20  ;;  %8598 = vlog2.f32 %v4707_v50  ;;  %v4632_v14 = vmul.f32 0.14285715, %v4530_v0  ;;  %v4539_v7 = vpop.xlane.xlu0 %4538  ;;  %v8589_v49 = vpop.eup %8588 }
 0x6f3   : > { %v4635_v36 = vmul.f32 0.14285715, %v4539_v7  ;;  %5054 = vrot.lane.b32.xlu1 %v10668_v9, %s9032_s20  ;;  %v4713_v58 = vmin.f32 %v4673_v51, 1000000.0  ;;  %v7519_v7 = vld [vmem:[%s14033_s4 + $0x168] sm:$0xff] }
 0x6f4   : > { %8600 = vlog2.f32 %v4710_v39  ;;  %v4672_v44 = vmax.f32 %v4632_v14, 1e-06  ;;  %v4865_v14 = vmul.f32 %v7514_v41, %v11195_v47 }
 0x6f5   : > { %v4536_v20 = vpop.xlane.xlu1 %4535  ;;  %v4675_v4 = vmax.f32 %v4635_v36, 1e-06  ;;  %8602 = vlog2.f32 %v4713_v58  ;;  %v11208_v36 = vmul.f32 0.6931472, %v8589_v49 }
 0x6f6   : > { %v4634_v22 = vmul.f32 0.14285715, %v4536_v20  ;;  %5052 = vrot.lane.b32.xlu0 %v10671_v62, %s9032_s20  ;;  %v4712_v50 = vmin.f32 %v4672_v44, 1000000.0 }
 0x6f7   : > { %v4715_v34 = vmin.f32 %v4675_v4, 1000000.0  ;;  %5058 = vrot.lane.b32.xlu1 %v10678_v12, %s9032_s20  ;;  %14219 = vst [vmem:[#allocation77_spill] sm:$0xff] %v11208_v36  ;;  %v7516_v4 = vld [vmem:[%s14033_s4 + $0x150] sm:$0xff] }
 0x6f8   : > { %8604 = vlog2.f32 %v4712_v50  ;;  %v4674_v0 = vmax.f32 %v4634_v22, 1e-06  ;;  %v7515_v50 = vld [vmem:[%s14033_s4 + $0x148] sm:$0xff] }
 0x6f9   : > { %v8591_v39 = vpop.eup %8590  ;;  %8606 = vlog2.f32 %v4715_v34 }
 0x6fa   : > { %5056 = vrot.lane.b32.xlu0 %v10681_v5, %s9032_s20  ;;  %v8593_v51 = vpop.eup %8592  ;;  %v4714_v11 = vmin.f32 %v4674_v0, 1000000.0  ;;  %v11220_v41 = vmul.f32 0.6931472, %v8591_v39  ;;  %v4905_v0 = vsel %vm3851_vm0, %v4865_v14, 0.0  ;;  %v4867_v39 = vmul.f32 %v7516_v4, %v11208_v36 }
 0x6fb   : > { %v11210_v58 = vmul.f32 0.6931472, %v8593_v51  ;;  %v4542_v44 = vpop.xlane.xlu1 %4541  ;;  %5062 = vrot.lane.b32.xlu1 %v10691_v24, %s9032_s20  ;;  %v7518_v51 = vld [vmem:[%s14033_s4 + $0x160] sm:$0xf] }
 0x6fc   : > { %8608 = vlog2.f32 %v4714_v11  ;;  %v4636_v22 = vmul.f32 0.14285715, %v4542_v44  ;;  %14221 = vst [vmem:[#allocation79_spill] sm:$0xff] %v11220_v41  ;;  %v7521_v11 = vld [vmem:[%s14033_s4 + $0x178] sm:$0xff] }
 0x6fd   : > { %14220 = vst [vmem:[#allocation78_spill] sm:$0xff] %v11210_v58  ;;  %v8595_v20 = vpop.eup %8594  ;;  %v4870_v34 = vmul.f32 %v7519_v7, %v11210_v58 }
 0x6fe   : > { %5060 = vrot.lane.b32.xlu0 %v10686_v42, %s9032_s20  ;;  %v8597_v49 = vpop.eup %8596  ;;  %v4676_v44 = vmax.f32 %v4636_v22, 1e-06  ;;  %v11234_v58 = vmul.f32 0.6931472, %v8595_v20  ;;  %v7520_v22 = vld [vmem:[%s14033_s4 + $0x170] sm:$0xff]  ;;  %v4866_v20 = vmul.f32 %v7515_v50, %v11220_v41 }
 0x6ff   : > { %v8599_v47 = vpop.eup %8598  ;;  %v4906_v7 = vsel %vm3851_vm0, %v4870_v34, 0.0  ;;  %v11236_v8 = vmul.f32 0.6931472, %v8597_v49  ;;  %v4548_v27 = vpop.xlane.xlu1 %4547  ;;  %6010 = vrot.lane.b32.xlu1 %v10478_v48, %s9033_s16 }
 0x700   : > { %14222 = vst [vmem:[#allocation80_spill] sm:$0xff] %v11234_v58  ;;  %v11240_v25 = vadd.f32 %v4906_v7, %v4905_v0  ;;  %v4716_v28 = vmin.f32 %v4676_v44, 1000000.0  ;;  %v4638_v4 = vmul.f32 0.14285715, %v4548_v27  ;;  %v4935_v44 = vsel %vm3851_vm0, %v4867_v39, 0.0 }
 0x701   : > { %14223 = vst [vmem:[#allocation81_spill] sm:$0xff] %v11236_v8  ;;  %v8601_v14 = vpop.eup %8600  ;;  %v4545_v36 = vpop.xlane.xlu0 %4544  ;;  %v4872_v34 = vmul.f32 %v7521_v11, %v11236_v8  ;;  %v11251_v32 = vmul.f32 0.6931472, %v8599_v47  ;;  %v7517_v27 = vld [vmem:[%s14033_s4 + $0x158] sm:$0xff]  ;;  %v4869_v50 = vmul.f32 %v7518_v51, %v11234_v58  ;;  %v7523_v47 = vld [vmem:[%s14033_s4 + $0x188] sm:$0xf] }
 0x702   : > { %v11247_v49 = vmul.f32 0.6931472, %v8601_v14  ;;  %6008 = vrot.lane.b32.xlu0 %v10467_v6, %s9033_s16  ;;  %8610 = vlog2.f32 %v4716_v28  ;;  %v4678_v0 = vmax.f32 %v4638_v4, 1e-06  ;;  %v4637_v7 = vmul.f32 0.14285715, %v4545_v36  ;;  %v8603_v46 = vpop.eup %8602 }
 0x703   : > { %14225 = vst [vmem:[#allocation83_spill] sm:$0xff] %v11251_v32  ;;  %v4936_v11 = vsel %vm3851_vm0, %v4872_v34, 0.0  ;;  %v7522_v28 = vld [vmem:[%s14033_s4 + $0x180] sm:$0xff]  ;;  %v4554_v36 = vpop.xlane.xlu1 %4553  ;;  %6020 = vrot.lane.b32.xlu1 %v10510_v61, %s9033_s16  ;;  %v11270_v4 = vmul.f32 0.6931472, %v8603_v46  ;;  %v4868_v61 = vmul.f32 %v7517_v27, %v11251_v32 }
 0x704   : > { %14224 = vst [vmem:[#allocation82_spill] sm:$0xff] %v11247_v49  ;;  %v4871_v14 = vmul.f32 %v7520_v22, %v11247_v49  ;;  %v11268_v39 = vadd.f32 %v4936_v11, %v4935_v44  ;;  %v4718_v51 = vmin.f32 %v4678_v0, 1000000.0  ;;  %v4677_v34 = vmax.f32 %v4637_v7, 1e-06  ;;  %v7525_v0 = vld [vmem:[%s14033_s4 + $0x198] sm:$0xff] }
 0x705   : > { %14226 = vst [vmem:[#allocation84_spill] sm:$0xff] %v11270_v4  ;;  %v4551_v58 = vpop.xlane.xlu0 %4550  ;;  %v8605_v22 = vpop.eup %8604  ;;  %v4920_v49 = vsel %vm3851_vm0, %v4866_v20, 0.0  ;;  %v4640_v41 = vmul.f32 0.14285715, %v4554_v36  ;;  %v4874_v46 = vmul.f32 %v7523_v47, %v11270_v4 }
 0x706   : > { %v4921_v8 = vsel %vm3851_vm0, %v4871_v14, 0.0  ;;  %v4639_v54 = vmul.f32 0.14285715, %v4551_v58  ;;  %6018 = vrot.lane.b32.xlu0 %v10494_v63, %s9033_s16  ;;  %v8607_v48 = vpop.eup %8606  ;;  %v11278_v11 = vmul.f32 0.6931472, %v8605_v22  ;;  %8612 = vlog2.f32 %v4718_v51 }
 0x707   : > { %v4922_v44 = vadd.f32 %v4921_v8, %v4920_v49  ;;  %v11283_v20 = vmul.f32 0.6931472, %v8607_v48  ;;  %v4717_v7 = vmin.f32 %v4677_v34, 1000000.0  ;;  %v4680_v58 = vmax.f32 %v4640_v41, 1e-06  ;;  %v11285_v14 = vpop.xlane.xlu1 %4559  ;;  %6022 = vrot.lane.b32.xlu1 %v10519_v21, %s9033_s16 }
 0x708   : > { %14227 = vst [vmem:[#allocation85_spill] sm:$0xff] %v11278_v11  ;;  %v4965_v8 = vsel %vm3912_vm1, %v4869_v50, 0.0  ;;  %v4966_v49 = vsel %vm3912_vm1, %v4874_v46, 0.0  ;;  %v4873_v27 = vmul.f32 %v7522_v28, %v11278_v11  ;;  %v4679_v47 = vmax.f32 %v4639_v54, 1e-06  ;;  %v7524_v41 = vld [vmem:[%s14033_s4 + $0x190] sm:$0xff] }
 0x709   : > { %14228 = vst [vmem:[#allocation86_spill] sm:$0xff] %v11283_v20  ;;  %v4557_v36 = vpop.xlane.xlu0 %4556  ;;  %v8609_v22 = vpop.eup %8608  ;;  %v11292_v4 = vadd.f32 %v4966_v49, %v4965_v8  ;;  %v4876_v48 = vmul.f32 %v7525_v0, %v11283_v20  ;;  %8614 = vlog2.f32 %v4717_v7  ;;  %v4950_v50 = vsel %vm3851_vm0, %v4868_v61, 0.0  ;;  %v7530_v11 = vld [vmem:[%s14033_s4 + $0x1c0] sm:$0xff] }
 0x70a   : > { %6012 = vrot.lane.b32.xlu0 %v10464_v1, %s9033_s16  ;;  %v4951_v51 = vsel %vm3851_vm0, %v4873_v27, 0.0  ;;  %v11302_v28 = vmul.f32 0.6931472, %v8609_v22  ;;  %v4720_v54 = vmin.f32 %v4680_v58, 1000000.0 }
 0x70b   : > { %v11304_v34 = vadd.f32 %v4951_v51, %v4950_v50  ;;  %v4923_v46 = vsel %vm3851_vm0, %v4876_v48, 0.0  ;;  %v4719_v0 = vmin.f32 %v4679_v47, 1000000.0  ;;  %v4566_v8 = vpop.xlane.xlu1 %4565  ;;  %6030 = vrot.lane.b32.xlu1 %v10546_v18, %s9033_s16  ;;  %v4641_v27 = vmul.f32 0.14285715, %v4557_v36 }
 0x70c   : > { %14229 = vst [vmem:[#allocation87_spill] sm:$0xff] %v11302_v28  ;;  %v11309_v7 = vadd.f32 %v4923_v46, %v4922_v44  ;;  %v4875_v49 = vmul.f32 %v7524_v41, %v11302_v28  ;;  %8616 = vlog2.f32 %v4720_v54  ;;  %v4644_v22 = vmul.f32 0.14285715, %v4566_v8  ;;  %v7526_v44 = vld [vmem:[%s14033_s4 + $0x1a0] sm:$0xff] }
 0x70d   : > { %v4563_v61 = vpop.xlane.xlu0 %4562  ;;  %8618 = vlog2.f32 %v4719_v0  ;;  %v4681_v50 = vmax.f32 %v4641_v27, 1e-06  ;;  %v4642_v32 = vmul.f32 0.14285715, %v11285_v14 }
 0x70e   : > { %6028 = vrot.lane.b32.xlu0 %v10549_v55, %s9033_s16  ;;  %v4908_v58 = vsel %vm3851_vm0, %v4875_v49, 0.0  ;;  %v4684_v41 = vmax.f32 %v4644_v22, 1e-06 }
 0x70f   : > { %v8611_v48 = vpop.eup %8610  ;;  %v11316_v47 = vadd.f32 %v4908_v58, %v11240_v25  ;;  %v4572_v51 = vpop.xlane.xlu1 %4571  ;;  %6024 = vrot.lane.b32.xlu1 %v10533_v23, %s9033_s16  ;;  %v4721_v46 = vmin.f32 %v4681_v50, 1000000.0 }
 0x710   : > { %v11323_v36 = vmul.f32 0.6931472, %v8611_v48  ;;  %v4724_v0 = vmin.f32 %v4684_v41, 1000000.0  ;;  %v7528_v48 = vld [vmem:[%s14033_s4 + $0x1b0] sm:$0xf] }
 0x711   : > { %v4569_v54 = vpop.xlane.xlu0 %4568  ;;  %8620 = vlog2.f32 %v4721_v46 }
 0x712   : > { %14230 = vst [vmem:[#allocation88_spill] sm:$0xff] %v11323_v36  ;;  %v4645_v8 = vmul.f32 0.14285715, %v4569_v54  ;;  %6014 = vrot.lane.b32.xlu0 %v10487_v16, %s9033_s16  ;;  %v4877_v25 = vmul.f32 %v7526_v44, %v11323_v36  ;;  %8622 = vlog2.f32 %v4724_v0 }
 0x713   : > { %v4578_v58 = vpop.xlane.xlu1 %4577  ;;  %6038 = vrot.lane.b32.xlu1 %v10578_v26, %s9033_s16  ;;  %v8613_v27 = vpop.eup %8612 }
 0x714   : > { %v4685_v49 = vmax.f32 %v4645_v8, 1e-06  ;;  %v4938_v22 = vsel %vm3851_vm0, %v4877_v25, 0.0  ;;  %v11337_v54 = vmul.f32 0.6931472, %v8613_v27  ;;  %v7527_v8 = vld [vmem:[%s14033_s4 + $0x1a8] sm:$0xff] }
 0x715   : > { %v4575_v50 = vpop.xlane.xlu0 %4574  ;;  %v11335_v41 = vadd.f32 %v4938_v22, %v11268_v39  ;;  %v4648_v14 = vmul.f32 0.14285715, %v4578_v58 }
 0x716   : > { %14231 = vst [vmem:[#allocation89_spill] sm:$0xff] %v11337_v54  ;;  %v4725_v44 = vmin.f32 %v4685_v49, 1000000.0  ;;  %6032 = vrot.lane.b32.xlu0 %v10565_v17, %s9033_s16  ;;  %v8615_v46 = vpop.eup %8614  ;;  %v4879_v25 = vmul.f32 %v7528_v48, %v11337_v54  ;;  %v4643_v48 = vmul.f32 0.14285715, %v4563_v61 }
 0x717   : > { %v11345_v36 = vmul.f32 0.6931472, %v8615_v46  ;;  %v4584_v0 = vpop.xlane.xlu1 %4583  ;;  %6016 = vrot.lane.b32.xlu1 %v10497_v30, %s9033_s16  ;;  %v4682_v30 = vmax.f32 %v4642_v32, 1e-06 }
 0x718   : > { %8624 = vlog2.f32 %v4725_v44  ;;  %v4968_v49 = vsel %vm3912_vm1, %v4879_v25, 0.0  ;;  %v4646_v25 = vmul.f32 0.14285715, %v4572_v51 }
 0x719   : > { %14232 = vst [vmem:[#allocation90_spill] sm:$0xff] %v11345_v36  ;;  %v4581_v39 = vpop.xlane.xlu0 %4580  ;;  %v8617_v27 = vpop.eup %8616  ;;  %v4878_v22 = vmul.f32 %v7527_v8, %v11345_v36  ;;  %v11358_v46 = vadd.f32 %v4968_v49, %v11292_v4  ;;  %v7529_v8 = vld [vmem:[%s14033_s4 + $0x1b8] sm:$0xff] }
 0x71a   : > { %6040 = vrot.lane.b32.xlu0 %v10591_v33, %s9033_s16  ;;  %v8619_v44 = vpop.eup %8618  ;;  %v11360_v54 = vmul.f32 0.6931472, %v8617_v27  ;;  %v4683_v33 = vmax.f32 %v4643_v48, 1e-06  ;;  %v4686_v58 = vmax.f32 %v4646_v25, 1e-06 }
 0x71b   : > { %v4953_v36 = vsel %vm3851_vm0, %v4878_v22, 0.0  ;;  %v11366_v28 = vmul.f32 0.6931472, %v8619_v44  ;;  %v4590_v61 = vpop.xlane.xlu1 %4589  ;;  %6034 = vrot.lane.b32.xlu1 %v10562_v43, %s9033_s16  ;;  %v4647_v22 = vmul.f32 0.14285715, %v4575_v50  ;;  %v7531_v48 = vld [vmem:[%s14033_s4 + $0x1c8] sm:$0xff] }
 0x71c   : > { %14233 = vst [vmem:[#allocation91_spill] sm:$0xff] %v11360_v54  ;;  %v11371_v20 = vadd.f32 %v4953_v36, %v11304_v34  ;;  %v4881_v4 = vmul.f32 %v7530_v11, %v11360_v54  ;;  %v4688_v34 = vmax.f32 %v4648_v14, 1e-06  ;;  %v4650_v36 = vmul.f32 0.14285715, %v4584_v0  ;;  %v7534_v0 = vld [vmem:[%s14033_s4 + $0x1e0] sm:$0xff] }
 0x71d   : > { %14234 = vst [vmem:[#allocation92_spill] sm:$0xff] %v11366_v28  ;;  %v4587_v27 = vpop.xlane.xlu0 %4586  ;;  %v4880_v49 = vmul.f32 %v7529_v8, %v11366_v28  ;;  %v4649_v8 = vmul.f32 0.14285715, %v4581_v39  ;;  %v4687_v39 = vmax.f32 %v4647_v22, 1e-06 }
 0x71e   : > { %6026 = vrot.lane.b32.xlu0 %v10530_v3, %s9033_s16  ;;  %v4925_v51 = vsel %vm3851_vm0, %v4881_v4, 0.0  ;;  %v8621_v11 = vpop.eup %8620  ;;  %v4651_v25 = vmul.f32 0.14285715, %v4587_v27 }
 0x71f   : > { %v4926_v44 = vadd.f32 %v4925_v51, %v11309_v7  ;;  %v4910_v43 = vsel %vm3851_vm0, %v4880_v49, 0.0  ;;  %v4596_v17 = vpop.xlane.xlu1 %4595  ;;  %6048 = vrot.lane.b32.xlu1 %v10625_v19, %s9033_s16  ;;  %v8623_v4 = vpop.eup %8622  ;;  %v4722_v7 = vmin.f32 %v4682_v30, 1000000.0  ;;  %v11386_v51 = vmul.f32 0.6931472, %v8621_v11 }
 0x720   : > { %v4911_v32 = vadd.f32 %v4910_v43, %v11316_v47  ;;  %v11393_v14 = vmul.f32 0.6931472, %v8623_v4  ;;  %v4723_v43 = vmin.f32 %v4683_v33, 1000000.0  ;;  %v7535_v47 = vld [vmem:[%s14033_s4 + $0x1e8] sm:$0xff] }
 0x721   : > { %v4593_v50 = vpop.xlane.xlu0 %4592  ;;  %14235 = vst [vmem:[#allocation93_spill] sm:$0xff] %v11386_v51  ;;  %v4882_v27 = vmul.f32 %v7531_v48, %v11386_v51  ;;  %v4726_v30 = vmin.f32 %v4686_v58, 1000000.0  ;;  %v4728_v49 = vmin.f32 %v4688_v34, 1000000.0  ;;  %8626 = vlog2.f32 %v4722_v7  ;;  %v7544_v51 = vld [vmem:[%s14033_s4 + $0x230] sm:$0xff] }
 0x722   : > { %6042 = vrot.lane.b32.xlu0 %v10588_v59, %s9033_s16  ;;  %14236 = vst [vmem:[#allocation94_spill] sm:$0xff] %v11393_v14  ;;  %v4690_v11 = vmax.f32 %v4650_v36, 1e-06  ;;  %v4885_v59 = vmul.f32 %v7534_v0, %v11393_v14  ;;  %v4689_v4 = vmax.f32 %v4649_v8, 1e-06  ;;  %8628 = vlog2.f32 %v4723_v43 }
 0x723   : > { %v4602_v28 = vpop.xlane.xlu1 %4601  ;;  %6036 = vrot.lane.b32.xlu1 %v10581_v10, %s9033_s16  ;;  %v4652_v19 = vmul.f32 0.14285715, %v4590_v61  ;;  %v4691_v33 = vmax.f32 %v4651_v25, 1e-06  ;;  %v4940_v26 = vsel %vm3851_vm0, %v4882_v27, 0.0  ;;  %8630 = vlog2.f32 %v4726_v30 }
 0x724   : > { %v4654_v22 = vmul.f32 0.14285715, %v4596_v17  ;;  %v11408_v58 = vadd.f32 %v4940_v26, %v11335_v41  ;;  %v4912_v34 = vsel %vm3851_vm0, %v4885_v59, 0.0  ;;  %v4727_v36 = vmin.f32 %v4687_v39, 1000000.0 }
 0x725   : > { %v8625_v54 = vpop.eup %8624  ;;  %v4599_v3 = vpop.xlane.xlu0 %4598  ;;  %v11411_v48 = vadd.f32 %v4912_v34, %v4911_v32  ;;  %v4730_v8 = vmin.f32 %v4690_v11, 1000000.0  ;;  %v4729_v17 = vmin.f32 %v4689_v4, 1000000.0  ;;  %8632 = vlog2.f32 %v4728_v49 }
 0x726   : > { %v11403_v16 = vmul.f32 0.6931472, %v8625_v54  ;;  %6050 = vrot.lane.b32.xlu0 %v10622_v2, %s9033_s16  ;;  %v4692_v54 = vmax.f32 %v4652_v19, 1e-06  ;;  %v4731_v41 = vmin.f32 %v4691_v33, 1000000.0  ;;  %8634 = vlog2.f32 %v4727_v36 }
 0x727   : > { %v4608_v25 = vpop.xlane.xlu1 %4607  ;;  %6052 = vrot.lane.b32.xlu1 %v10638_v57, %s9033_s16  ;;  %v4694_v59 = vmax.f32 %v4654_v22, 1e-06  ;;  %8636 = vlog2.f32 %v4730_v8  ;;  %v4653_v43 = vmul.f32 0.14285715, %v4593_v50  ;;  %v4655_v19 = vmul.f32 0.14285715, %v4599_v3 }
 0x728   : > { %14237 = vst [vmem:[#allocation95_spill] sm:$0xff] %v11403_v16  ;;  %v4886_v61 = vmul.f32 %v7535_v47, %v11403_v16  ;;  %v4656_v47 = vmul.f32 0.14285715, %v4602_v28  ;;  %8638 = vlog2.f32 %v4729_v17  ;;  %v4732_v30 = vmin.f32 %v4692_v54, 1000000.0  ;;  %v7540_v16 = vld [vmem:[%s14033_s4 + $0x210] sm:$0xff] }
 0x729   : > { %v4605_v7 = vpop.xlane.xlu0 %4604  ;;  %v4734_v0 = vmin.f32 %v4694_v59, 1000000.0  ;;  %8640 = vlog2.f32 %v4731_v41  ;;  %v4693_v49 = vmax.f32 %v4653_v43, 1e-06  ;;  %v4695_v11 = vmax.f32 %v4655_v19, 1e-06 }
 0x72a   : > { %v4927_v26 = vsel %vm3851_vm0, %v4886_v61, 0.0  ;;  %6044 = vrot.lane.b32.xlu0 %v10606_v40, %s9033_s16  ;;  %v4658_v3 = vmul.f32 0.14285715, %v4608_v25  ;;  %v4657_v34 = vmul.f32 0.14285715, %v4605_v7 }
 0x72b   : > { %v11419_v32 = vadd.f32 %v4927_v26, %v4926_v44  ;;  %v4614_v39 = vpop.xlane.xlu1 %4613  ;;  %6060 = vrot.lane.b32.xlu1 %v10661_v56, %s9033_s16  ;;  %8642 = vlog2.f32 %v4734_v0  ;;  %v4696_v44 = vmax.f32 %v4656_v47, 1e-06  ;;  %v4735_v4 = vmin.f32 %v4695_v11, 1000000.0 }
 0x72c   : > { %8644 = vlog2.f32 %v4732_v30  ;;  %v4733_v22 = vmin.f32 %v4693_v49, 1000000.0  ;;  %v4698_v61 = vmax.f32 %v4658_v3, 1e-06  ;;  %v4697_v8 = vmax.f32 %v4657_v34, 1e-06 }
 0x72d   : > { %v4611_v27 = vpop.xlane.xlu0 %4610  ;;  %v4736_v50 = vmin.f32 %v4696_v44, 1000000.0  ;;  %v4660_v17 = vmul.f32 0.14285715, %v4614_v39  ;;  %v7532_v39 = vld [vmem:[%s14033_s4 + $0x1d0] sm:$0xff] }
 0x72e   : > { %6058 = vrot.lane.b32.xlu0 %v10648_v53, %s9033_s16  ;;  %v8627_v36 = vpop.eup %8626  ;;  %v4659_v41 = vmul.f32 0.14285715, %v4611_v27  ;;  %v4738_v7 = vmin.f32 %v4698_v61, 1000000.0  ;;  %v4737_v43 = vmin.f32 %v4697_v8, 1000000.0 }
 0x72f   : > { %5068 = vrot.lane.b32.xlu1 %v10708_v13, %s9032_s20  ;;  %v4620_v28 = vpop.xlane.xlu1 %4619  ;;  %8646 = vlog2.f32 %v4736_v50  ;;  %v8629_v26 = vpop.eup %8628  ;;  %v4700_v47 = vmax.f32 %v4660_v17, 1e-06  ;;  %v11438_v30 = vmul.f32 0.6931472, %v8627_v36  ;;  %v7533_v3 = vld [vmem:[%s14033_s4 + $0x1d8] sm:$0xf] }
 0x730   : > { %8648 = vlog2.f32 %v4735_v4  ;;  %v4662_v59 = vmul.f32 0.14285715, %v4620_v28  ;;  %v8631_v25 = vpop.eup %8630  ;;  %v4699_v49 = vmax.f32 %v4659_v41, 1e-06  ;;  %v11440_v11 = vmul.f32 0.6931472, %v8629_v26 }
 0x731   : > { %v4617_v33 = vpop.xlane.xlu0 %4616  ;;  %8650 = vlog2.f32 %v4733_v22  ;;  %14238 = vst [vmem:[#allocation96_spill] sm:$0xff] %v11438_v30  ;;  %v4740_v28 = vmin.f32 %v4700_v47, 1000000.0  ;;  %v11449_v34 = vmul.f32 0.6931472, %v8631_v25 }
 0x732   : > { %5066 = vrot.lane.b32.xlu0 %v10701_v38, %s9032_s20  ;;  %v8633_v19 = vpop.eup %8632  ;;  %v4702_v44 = vmax.f32 %v4662_v59, 1e-06  ;;  %14239 = vst [vmem:[#allocation97_spill] sm:$0xff] %v11440_v11  ;;  %8652 = vlog2.f32 %v4738_v7  ;;  %v4661_v50 = vmul.f32 0.14285715, %v4617_v33  ;;  %v7536_v33 = vld [vmem:[%s14033_s4 + $0x1f0] sm:$0xff]  ;;  %v4883_v7 = vmul.f32 %v7532_v39, %v11438_v30 }
 0x733   : > { %6054 = vrot.lane.b32.xlu1 %v10643_v15, %s9033_s16  ;;  %v11431_v54 = vpop.permute.xlu1 %4996  ;;  %v8635_v27 = vpop.eup %8634  ;;  %14240 = vst [vmem:[#allocation98_spill] sm:$0xff] %v11449_v34  ;;  %8654 = vlog2.f32 %v4737_v43  ;;  %v4739_v36 = vmin.f32 %v4699_v49, 1000000.0  ;;  %v4884_v43 = vmul.f32 %v7533_v3, %v11440_v11  ;;  %v7538_v47 = vld [vmem:[%s14033_s4 + $0x200] sm:$0xf]  ;;  %v7537_v49 = vld [vmem:[%s14033_s4 + $0x1f8] sm:$0xff]  ;;  %v4887_v39 = vmul.f32 %v7536_v33, %v11449_v34 }
 0x734   : > { %v8637_v22 = vpop.eup %8636  ;;  %8656 = vlog2.f32 %v4740_v28  ;;  %v4742_v17 = vmin.f32 %v4702_v44, 1000000.0  ;;  %v4701_v41 = vmax.f32 %v4661_v50, 1e-06  ;;  %v11466_v44 = vmul.f32 0.6931472, %v8635_v27 }
 0x735   : > { %v4623_v0 = vpop.xlane.xlu0 %4622  ;;  %v8639_v8 = vpop.eup %8638  ;;  %8658 = vlog2.f32 %v4739_v36  ;;  %v11473_v28 = vmul.f32 0.6931472, %v8633_v19  ;;  %v11480_v27 = vmul.f32 0.6931472, %v8637_v22  ;;  %v4955_v22 = vsel %vm3851_vm0, %v4883_v7, 0.0 }
 0x736   : > { %6046 = vrot.lane.b32.xlu0 %v10615_v52, %s9033_s16  ;;  %v8641_v26 = vpop.eup %8640  ;;  %v4663_v59 = vmul.f32 0.14285715, %v4623_v0  ;;  %14241 = vst [vmem:[#allocation99_spill] sm:$0xff] %v11466_v44  ;;  %8660 = vlog2.f32 %v4742_v17  ;;  %v4741_v50 = vmin.f32 %v4701_v41, 1000000.0  ;;  %v7539_v17 = vld [vmem:[%s14033_s4 + $0x208] sm:$0xff]  ;;  %v4888_v14 = vmul.f32 %v7537_v49, %v11466_v44 }
 0x737   : > { %6068 = vrot.lane.b32.xlu1 %v10681_v5, %s9033_s16  ;;  %v11444_v4 = vpop.permute.xlu1 %5000  ;;  %14242 = vst [vmem:[#allocation100_spill] sm:$0xff] %v11473_v28  ;;  %14243 = vst [vmem:[#allocation101_spill] sm:$0xff] %v11480_v27  ;;  %v11485_v11 = vmul.f32 0.6931472, %v8639_v8  ;;  %v11489_v33 = vmul.f32 0.6931472, %v8641_v26  ;;  %v4889_v49 = vmul.f32 %v7538_v47, %v11473_v28  ;;  %v4891_v30 = vmul.f32 %v7540_v16, %v11480_v27 }
 0x738   : > { %v8643_v25 = vpop.eup %8642  ;;  %v4703_v3 = vmax.f32 %v4663_v59, 1e-06  ;;  %8662 = vlog2.f32 %v4741_v50  ;;  %v7541_v8 = vld [vmem:[%s14033_s4 + $0x218] sm:$0xff]  ;;  %v4970_v50 = vsel %vm3912_vm1, %v4884_v43, 0.0  ;;  %v4942_v7 = vsel %vm3851_vm0, %v4887_v39, 0.0  ;;  %v7542_v47 = vld [vmem:[%s14033_s4 + $0x220] sm:$0xff] }
 0x739   : > { %v11451_v61 = vpop.permute.xlu0 %4998  ;;  %14244 = vst [vmem:[#allocation102_spill] sm:$0xff] %v11485_v11  ;;  %v8645_v19 = vpop.eup %8644  ;;  %14245 = vst [vmem:[#allocation103_spill] sm:$0xff] %v11489_v33  ;;  %v11491_v41 = vmul.f32 0.6931472, %v8643_v25  ;;  %v4892_v39 = vmul.f32 %v7541_v8, %v11489_v33  ;;  %v4957_v16 = vsel %vm3851_vm0, %v4888_v14, 0.0  ;;  %v4971_v28 = vadd.f32 %v4970_v50, %v11358_v46 }
 0x73a   : > { %6062 = vrot.lane.b32.xlu0 %v10658_v45, %s9033_s16  ;;  %v4743_v59 = vmin.f32 %v4703_v3, 1000000.0  ;;  %v7545_v3 = vld [vmem:[%s14033_s4 + $0x238] sm:$0xff]  ;;  %v11515_v5 = vmul.f32 0.6931472, %v8645_v19  ;;  %v4943_v8 = vadd.f32 %v4942_v7, %v11408_v58 }
 0x73b   : > { %5070 = vrot.lane.b32.xlu1 %v10711_v31, %s9032_s20  ;;  %v11470_v0 = vpop.permute.xlu1 %5002  ;;  %14246 = vst [vmem:[#allocation104_spill] sm:$0xff] %v11491_v41  ;;  %v7543_v14 = vld [vmem:[%s14033_s4 + $0x228] sm:$0xf] }
 0x73c   : > { %v8647_v34 = vpop.eup %8646  ;;  %8664 = vlog2.f32 %v4743_v59  ;;  %14247 = vst [vmem:[#allocation105_spill] sm:$0xff] %v11515_v5  ;;  %v4895_v59 = vmul.f32 %v7544_v51, %v11491_v41  ;;  %v4972_v51 = vsel %vm3912_vm1, %v4889_v49, 0.0  ;;  %v4929_v41 = vsel %vm3851_vm0, %v4891_v30, 0.0 }
 0x73d   : > { %v11475_v36 = vpop.permute.xlu0 %5004  ;;  %v8649_v25 = vpop.eup %8648  ;;  %v11527_v27 = vmul.f32 0.6931472, %v8647_v34  ;;  %v7546_v34 = vld [vmem:[%s14033_s4 + $0x240] sm:$0xff]  ;;  %v4893_v46 = vmul.f32 %v7542_v47, %v11515_v5  ;;  %v4944_v49 = vsel %vm3851_vm0, %v4892_v39, 0.0 }
 0x73e   : > { %6070 = vrot.lane.b32.xlu0 %v10678_v12, %s9033_s16  ;;  %v11517_v12 = vmul.f32 0.6931472, %v8649_v25  ;;  %v8651_v43 = vpop.eup %8650  ;;  %v4916_v33 = vsel %vm3851_vm0, %v4895_v59, 0.0  ;;  %v4930_v59 = vadd.f32 %v4929_v41, %v11419_v32 }
 0x73f   : > { %6064 = vrot.lane.b32.xlu1 %v10671_v62, %s9033_s16  ;;  %v11503_v26 = vpop.permute.xlu1 %5006  ;;  %v4890_v62 = vmul.f32 %v7539_v17, %v11485_v11  ;;  %14249 = vst [vmem:[#allocation107_spill] sm:$0xff] %v11527_v27  ;;  %v8653_v25 = vpop.eup %8652  ;;  %v4956_v11 = vadd.f32 %v4955_v22, %v11371_v20  ;;  %v11549_v58 = vmul.f32 0.6931472, %v8651_v43  ;;  %v7547_v22 = vld [vmem:[%s14033_s4 + $0x248] sm:$0xff]  ;;  %v4897_v47 = vmul.f32 %v7546_v34, %v11527_v27 }
 0x740   : > { %14248 = vst [vmem:[#allocation106_spill] sm:$0xff] %v11517_v12  ;;  %v4896_v17 = vmul.f32 %v7545_v3, %v11517_v12  ;;  %v8655_v12 = vpop.eup %8654 }
 0x741   : > { %v11511_v44 = vpop.permute.xlu0 %5008  ;;  %v4914_v20 = vsel %vm3851_vm0, %v4890_v62, 0.0  ;;  %14250 = vst [vmem:[#allocation108_spill] sm:$0xff] %v11549_v58  ;;  %v8657_v50 = vpop.eup %8656  ;;  %v4958_v7 = vadd.f32 %v4957_v16, %v4956_v11  ;;  %v11558_v30 = vmul.f32 0.6931472, %v8655_v12  ;;  %v7550_v62 = vld [vmem:[%s14033_s4 + $0x260] sm:$0xff]  ;;  %v7549_v11 = vld [vmem:[%s14033_s4 + $0x258] sm:$0xff]  ;;  %v4894_v32 = vmul.f32 %v7543_v14, %v11549_v58 }
 0x742   : > { %6056 = vrot.lane.b32.xlu0 %v10651_v60, %s9033_s16  ;;  %v8659_v43 = vpop.eup %8658  ;;  %v4931_v5 = vsel %vm3851_vm0, %v4896_v17, 0.0  ;;  %v4915_v16 = vadd.f32 %v4914_v20, %v11411_v48  ;;  %v7548_v17 = vld [vmem:[%s14033_s4 + $0x250] sm:$0xf]  ;;  %v4959_v60 = vsel %vm3851_vm0, %v4893_v46, 0.0  ;;  %v4945_v20 = vadd.f32 %v4944_v49, %v4943_v8 }
 0x743   : > { %6078 = vrot.lane.b32.xlu1 %v10701_v38, %s9033_s16  ;;  %v11532_v19 = vpop.permute.xlu1 %5010  ;;  %14251 = vst [vmem:[#allocation109_spill] sm:$0xff] %v11558_v30  ;;  %v11565_v38 = vmul.f32 0.6931472, %v8653_v25  ;;  %v8661_v39 = vpop.eup %8660  ;;  %v4898_v25 = vmul.f32 %v7547_v22, %v11558_v30  ;;  %v11582_v34 = vmul.f32 0.6931472, %v8659_v43  ;;  %v4932_v43 = vadd.f32 %v4931_v5, %v4930_v59 }
 0x744   : > { %v11592_v41 = vmul.f32 0.6931472, %v8661_v39  ;;  %v4917_v22 = vadd.f32 %v4916_v33, %v4915_v16  ;;  %v4946_v45 = vsel %vm3851_vm0, %v4897_v47, 0.0  ;;  %v4973_v59 = vadd.f32 %v4972_v51, %v4971_v28 }
 0x745   : > { %v11544_v3 = vpop.permute.xlu0 %5012  ;;  %14252 = vst [vmem:[#allocation110_spill] sm:$0xff] %v11565_v38  ;;  %14254 = vst [vmem:[#allocation112_spill] sm:$0xff] %v11582_v34  ;;  %v4900_v30 = vmul.f32 %v7549_v11, %v11582_v34  ;;  %v8663_v15 = vpop.eup %8662  ;;  %v4899_v52 = vmul.f32 %v7548_v17, %v11565_v38  ;;  %v4961_v5 = vsel %vm3851_vm0, %v4898_v25, 0.0  ;;  %v4960_v16 = vadd.f32 %v4959_v60, %v4958_v7 }
 0x746   : > { %6072 = vrot.lane.b32.xlu0 %v10686_v42, %s9033_s16  ;;  %v11567_v42 = vmul.f32 0.6931472, %v8657_v50  ;;  %v7552_v50 = vld [vmem:[%s14033_s4 + $0x270] sm:$0xff]  ;;  %14255 = vst [vmem:[#allocation113_spill] sm:$0xff] %v11592_v41  ;;  %v11610_v47 = vmul.f32 0.6931472, %v8663_v15 }
 0x747   : > { %5064 = vrot.lane.b32.xlu1 %v10698_v35, %s9032_s20  ;;  %v11574_v12 = vpop.permute.xlu1 %5014  ;;  %v4903_v14 = vmul.f32 %v7552_v50, %v11592_v41  ;;  %v4918_v49 = vsel %vm3851_vm0, %v4900_v30, 0.0  ;;  %v4974_v17 = vsel %vm3912_vm1, %v4894_v32, 0.0  ;;  %v7553_v15 = vld [vmem:[%s14033_s4 + $0x278] sm:$0xf]  ;;  %v4976_v28 = vsel %vm3912_vm1, %v4899_v52, 0.0 }
 0x748   : > { %14253 = vst [vmem:[#allocation111_spill] sm:$0xff] %v11567_v42  ;;  %v4901_v48 = vmul.f32 %v7550_v62, %v11567_v42  ;;  %v7551_v62 = vld [vmem:[%s14033_s4 + $0x268] sm:$0xff]  ;;  %14256 = vst [vmem:[#allocation114_spill] sm:$0xff] %v11610_v47  ;;  %v4919_v50 = vadd.f32 %v4918_v49, %v4917_v22  ;;  %v4962_v60 = vadd.f32 %v4961_v5, %v4960_v16  ;;  %v5122_v41 = vsel %vm2116_vm12, %v11444_v4, 0.0 }
 0x749   : > { %v11587_v27 = vpop.permute.xlu0 %5016  ;;  %v8665_v39 = vpop.eup %8664  ;;  %v4963_v25 = vsel %vm3851_vm0, %v4903_v14, 0.0  ;;  %v4902_v30 = vmul.f32 %v7551_v62, %v11610_v47  ;;  %v4975_v32 = vadd.f32 %v4974_v17, %v4973_v59  ;;  %v5134_v42 = vsel %vm2116_vm12, %v11511_v44, 0.0 }
 0x74a   : > { %6080 = vrot.lane.b32.xlu0 %v10708_v13, %s9033_s16  ;;  %v4933_v46 = vsel %vm3851_vm0, %v4901_v48, 0.0  ;;  %v4947_v48 = vadd.f32 %v4946_v45, %v4945_v20  ;;  %v4980_v51 = vsel %vm3851_vm0, %v4919_v50, 0.0  ;;  %v11625_v7 = vmul.f32 0.6931472, %v8665_v39 }
 0x74b   : > { %6066 = vrot.lane.b32.xlu1 %v10668_v9, %s9033_s16  ;;  %v11606_v33 = vpop.permute.xlu1 %5018  ;;  %v4934_v8 = vadd.f32 %v4933_v46, %v4932_v43  ;;  %v4948_v22 = vsel %vm3851_vm0, %v4902_v30, 0.0  ;;  %v4964_v46 = vadd.f32 %v4963_v25, %v4962_v60  ;;  %v4977_v62 = vadd.f32 %v4976_v28, %v4975_v32 }
 0x74c   : > { %14257 = vst [vmem:[#allocation115_spill] sm:$0xff] %v11625_v7  ;;  %v4949_v14 = vadd.f32 %v4948_v22, %v4947_v48  ;;  %v4904_v52 = vmul.f32 %v7553_v15, %v11625_v7  ;;  %v5131_v7 = vsel %vm2116_vm12, %v11503_v26, 0.0  ;;  %v5149_v4 = vsel %vm2116_vm12, %v11606_v33, 0.0 }
 0x74d   : > { %v11612_v11 = vpop.permute.xlu0 %5020  ;;  %v4981_v38 = vsel %vm3851_vm0, %v4934_v8, 0.0  ;;  %v4985_v16 = vsel %vm3851_vm0, %v4964_v46, 0.0 }
 0x74e   : > { %5072 = vrot.lane.b32.xlu0 %v10718_v37, %s9032_s20  ;;  %v4982_v20 = vadd.f32 %v4981_v38, %v4980_v51  ;;  %v4983_v5 = vsel %vm3851_vm0, %v4949_v14, 0.0  ;;  %v4978_v8 = vsel %vm3912_vm1, %v4904_v52, 0.0  ;;  %v5152_v33 = vsel %vm2116_vm12, %v11612_v11, 0.0 }
 0x74f   : > { %6082 = vrot.lane.b32.xlu1 %v10711_v31, %s9033_s16  ;;  %v11629_v45 = vpop.permute.xlu1 %5022  ;;  %v4979_v39 = vadd.f32 %v4978_v8, %v4977_v62 }
 0x750   : > { %v4984_v49 = vadd.f32 %v4983_v5, %v4982_v20 }
 0x751   : > { %v11632_v43 = vpop.permute.xlu0 %5024  ;;  %v4987_v50 = vsel %vm3912_vm1, %v4979_v39, 0.0 }
 0x752   : > { %6074 = vrot.lane.b32.xlu0 %v10691_v24, %s9033_s16  ;;  %v4986_v17 = vadd.f32 %v4985_v16, %v4984_v49  ;;  %v5116_v16 = vsel %vm2116_vm12, %v11431_v54, 0.0 }
 0x753   : > { %6076 = vrot.lane.b32.xlu1 %v10698_v35, %s9033_s16  ;;  %v11641_v38 = vpop.permute.xlu1 %5026 }
 0x754   : > { %v11653_v25 = vadd.f32 %v4987_v50, %v4986_v17  ;;  %v5119_v50 = vsel %vm2116_vm12, %v11451_v61, 0.0  ;;  %v5137_v61 = vsel %vm2116_vm12, %v11532_v19, 0.0  ;;  %v5125_v19 = vsel %vm2116_vm12, %v11470_v0, 0.0 }
 0x755   : > { %v11643_v59 = vpop.permute.xlu0 %5028  ;;  %v5161_v0 = vsel %vm2116_vm12, %v11641_v38, 0.0  ;;  %v5143_v38 = vsel %vm3221_vm15, %v11574_v12, 0.0 }
 0x756   : > { %5074 = vrot.lane.b32.xlu0 %v10721_v29, %s9032_s20  ;;  %14258 = vst [vmem:[#allocation116_spill] sm:$0xff] %v11653_v25 }
 0x757   : > { %6086 = vrot.lane.b32.xlu1 %v10721_v29, %s9033_s16  ;;  %v11651_v48 = vpop.permute.xlu1 %5030 }
 0x759   : > { %v11655_v30 = vpop.permute.xlu0 %5032 }
 0x75a   : > { %6084 = vrot.lane.b32.xlu0 %v10718_v37, %s9033_s16 }
 0x75b   : > { %v11659_v15 = vpop.permute.xlu1 %5034 }
 0x75d   : > { %v11661_v28 = vpop.permute.xlu0 %5036 }
 0x75e   : > { %v5176_v12 = vsel %vm2116_vm12, %v11661_v28, 0.0  ;;  %v5158_v28 = vsel %vm3221_vm15, %v11632_v43, 0.0 }
 0x75f   : > { %v11663_v60 = vpop.permute.xlu1 %5038 }
 0x761   : > { %v11665_v51 = vpop.permute.xlu0 %5040 }
 0x763   : > { %v11667_v32 = vpop.permute.xlu1 %5042 }
 0x765   : > { %v11669_v20 = vpop.permute.xlu0 %5044 }
 0x767   : > { %v11671_v22 = vpop.permute.xlu1 %5046 }
 0x768   : > { %v5191_v43 = vsel %vm2116_vm12, %v11671_v22, 0.0 }
 0x769   : > { %v11673_v46 = vpop.permute.xlu0 %5048 }
 0x76b   : > { %v11675_v14 = vpop.permute.xlu1 %5050 }
 0x76d   : > { %v11677_v52 = vpop.permute.xlu0 %5052 }
 0x76f   : > { %v11679_v62 = vpop.permute.xlu1 %5054 }
 0x771   : > { %v11681_v5 = vpop.permute.xlu0 %5056 }
 0x773   : > { %v11683_v8 = vpop.permute.xlu1 %5058 }
 0x775   : > { %v11685_v49 = vpop.permute.xlu0 %5060 }
 0x777   : > { %v11687_v39 = vpop.permute.xlu1 %5062 }
 0x779   : > { %5117 = vadd.xlane.f32.xlu0 %v5116_v16  ;;  %v6009_v17 = vpop.permute.xlu0 %6008  ;;  %v5146_v16 = vsel %vm2116_vm12, %v11587_v27, 0.0 }
 0x77b   : > { %5120 = vadd.xlane.f32.xlu1 %v5119_v50  ;;  %v6011_v47 = vpop.permute.xlu1 %6010 }
 0x77c   : > { %v6131_v50 = vsel %vm2116_vm12, %v6011_v47, 0.0  ;;  %v5164_v47 = vsel %vm2116_vm12, %v11643_v59, 0.0 }
 0x77d   : > { %5132 = vadd.xlane.f32.xlu0 %v5131_v7  ;;  %v6019_v34 = vpop.permute.xlu0 %6018  ;;  %v6128_v7 = vsel %vm2116_vm12, %v6009_v17, 0.0 }
 0x77f   : > { %5123 = vadd.xlane.f32.xlu1 %v5122_v41  ;;  %v6021_v54 = vpop.permute.xlu1 %6020 }
 0x781   : > { %5135 = vadd.xlane.f32.xlu0 %v5134_v42  ;;  %v6013_v26 = vpop.permute.xlu0 %6012  ;;  %v6143_v42 = vsel %vm2116_vm12, %v6019_v34, 0.0  ;;  %v5140_v34 = vsel %vm2116_vm12, %v11544_v3, 0.0 }
 0x782   : > { %v6134_v11 = vsel %vm2116_vm12, %v6013_v26, 0.0  ;;  %v5167_v26 = vsel %vm2116_vm12, %v11651_v48, 0.0 }
 0x783   : > { %5147 = vadd.xlane.f32.xlu1 %v5146_v16  ;;  %v6023_v41 = vpop.permute.xlu1 %6022  ;;  %v6146_v16 = vsel %vm2116_vm12, %v6021_v54, 0.0 }
 0x785   : > { %5138 = vadd.xlane.f32.xlu0 %v5137_v61  ;;  %v6029_v44 = vpop.permute.xlu0 %6028 }
 0x787   : > { %6129 = vadd.xlane.f32.xlu1 %v6128_v7  ;;  %v6031_v27 = vpop.permute.xlu1 %6030 }
 0x789   : > { %5150 = vadd.xlane.f32.xlu0 %v5149_v4  ;;  %v6015_v17 = vpop.permute.xlu0 %6014  ;;  %v6149_v4 = vsel %vm2116_vm12, %v6023_v41, 0.0  ;;  %v5128_v41 = vsel %vm3221_vm15, %v11475_v36, 0.0 }
 0x78a   : > { %v6137_v48 = vsel %vm2116_vm12, %v6015_v17, 0.0  ;;  %v5182_v17 = vsel %vm2116_vm12, %v11665_v51, 0.0 }
 0x78b   : > { %6144 = vadd.xlane.f32.xlu1 %v6143_v42  ;;  %v6025_v61 = vpop.permute.xlu1 %6024  ;;  %v6161_v42 = vsel %vm2116_vm12, %v6031_v27, 0.0  ;;  %v5155_v27 = vsel %vm2116_vm12, %v11629_v45, 0.0 }
 0x78c   : > { %v6152_v36 = vsel %vm2116_vm12, %v6025_v61, 0.0 }
 0x78d   : > { %6132 = vadd.xlane.f32.xlu0 %v6131_v50  ;;  %v6033_v7 = vpop.permute.xlu0 %6032  ;;  %v6158_v50 = vsel %vm2116_vm12, %v6029_v44, 0.0 }
 0x78f   : > { %5126 = vadd.xlane.f32.xlu1 %v5125_v19  ;;  %v6039_v54 = vpop.permute.xlu1 %6038 }
 0x790   : > { %v6173_v45 = vsel %vm2116_vm12, %v6039_v54, 0.0  ;;  %v5170_v54 = vsel %vm2116_vm12, %v11655_v30, 0.0 }
 0x791   : > { %6147 = vadd.xlane.f32.xlu0 %v6146_v16  ;;  %v6041_v3 = vpop.permute.xlu0 %6040 }
 0x793   : > { %5153 = vadd.xlane.f32.xlu1 %v5152_v33  ;;  %v6017_v59 = vpop.permute.xlu1 %6016  ;;  %v5179_v33 = vsel %vm2116_vm12, %v11663_v60, 0.0 }
 0x794   : > { %v6140_v51 = vsel %vm3221_vm15, %v6017_v59, 0.0  ;;  %v5185_v59 = vsel %vm2116_vm12, %v11667_v32, 0.0  ;;  %v5209_v32 = vsel %vm2116_vm12, %v11683_v8, 0.0  ;;  %v5200_v8 = vsel %vm2116_vm12, %v11677_v52, 0.0 }
 0x795   : > { %5141 = vadd.xlane.f32.xlu0 %v5140_v34  ;;  %v6027_v19 = vpop.permute.xlu0 %6026 }
 0x797   : > { %5165 = vadd.xlane.f32.xlu1 %v5164_v47  ;;  %v6035_v16 = vpop.permute.xlu1 %6034 }
 0x799   : > { %5162 = vadd.xlane.f32.xlu0 %v5161_v0  ;;  %v6043_v44 = vpop.permute.xlu0 %6042 }
 0x79a   : > { %v6179_v30 = vsel %vm2116_vm12, %v6043_v44, 0.0 }
 0x79b   : > { %6150 = vadd.xlane.f32.xlu1 %v6149_v4  ;;  %v6049_v34 = vpop.permute.xlu1 %6048  ;;  %v6164_v4 = vsel %vm2116_vm12, %v6033_v7, 0.0 }
 0x79c   : > { %v6188_v22 = vsel %vm2116_vm12, %v6049_v34, 0.0 }
 0x79d   : > { %6135 = vadd.xlane.f32.xlu0 %v6134_v11  ;;  %v6051_v47 = vpop.permute.xlu0 %6050  ;;  %v6176_v11 = vsel %vm2116_vm12, %v6041_v3, 0.0 }
 0x79f   : > { %6162 = vadd.xlane.f32.xlu1 %v6161_v42  ;;  %v6037_v0 = vpop.permute.xlu1 %6036 }
 0x7a1   : > { %6159 = vadd.xlane.f32.xlu0 %v6158_v50  ;;  %v6045_v60 = vpop.permute.xlu0 %6044  ;;  %v5194_v50 = vsel %vm2116_vm12, %v11673_v46, 0.0 }
 0x7a3   : > { %5144 = vadd.xlane.f32.xlu1 %v5143_v38  ;;  %v6053_v61 = vpop.permute.xlu1 %6052  ;;  %v6155_v38 = vsel %vm3221_vm15, %v6027_v19, 0.0 }
 0x7a5   : > { %5129 = vadd.xlane.f32.xlu0 %v5128_v41  ;;  %v6059_v42 = vpop.permute.xlu0 %6058 }
 0x7a7   : > { %5168 = vadd.xlane.f32.xlu1 %v5167_v26  ;;  %v6061_v7 = vpop.permute.xlu1 %6060 }
 0x7a9   : > { %5156 = vadd.xlane.f32.xlu0 %v5155_v27  ;;  %v5067_v3 = vpop.permute.xlu0 %5066  ;;  %v6167_v27 = vsel %vm2116_vm12, %v6035_v16, 0.0  ;;  %v5206_v16 = vsel %vm2116_vm12, %v11681_v5, 0.0  ;;  %v6182_v5 = vsel %vm2116_vm12, %v6045_v60, 0.0 }
 0x7aa   : > { %v5221_v60 = vsel %vm2116_vm12, %v5067_v3, 0.0 }
 0x7ab   : > { %5180 = vadd.xlane.f32.xlu1 %v5179_v33  ;;  %v5069_v41 = vpop.permute.xlu1 %5068  ;;  %v6191_v33 = vsel %vm2116_vm12, %v6051_v47, 0.0  ;;  %v5197_v47 = vsel %vm2116_vm12, %v11675_v14, 0.0  ;;  %v6206_v14 = vsel %vm2116_vm12, %v6061_v7, 0.0 }
 0x7ad   : > { %5177 = vadd.xlane.f32.xlu0 %v5176_v12  ;;  %v6047_v26 = vpop.permute.xlu0 %6046  ;;  %v5173_v12 = vsel %vm3221_vm15, %v11659_v15, 0.0 }
 0x7af   : > { %6153 = vadd.xlane.f32.xlu1 %v6152_v36  ;;  %v6055_v46 = vpop.permute.xlu1 %6054 }
 0x7b1   : > { %6138 = vadd.xlane.f32.xlu0 %v6137_v48  ;;  %v6063_v19 = vpop.permute.xlu0 %6062  ;;  %v6170_v48 = vsel %vm3221_vm15, %v6037_v0, 0.0 }
 0x7b3   : > { %6174 = vadd.xlane.f32.xlu1 %v6173_v45  ;;  %v6069_v44 = vpop.permute.xlu1 %6068  ;;  %v6194_v45 = vsel %vm2116_vm12, %v6053_v61, 0.0  ;;  %v5188_v61 = vsel %vm3221_vm15, %v11669_v20, 0.0  ;;  %v6209_v20 = vsel %vm2116_vm12, %v6063_v19, 0.0 }
 0x7b5   : > { %6165 = vadd.xlane.f32.xlu0 %v6164_v4  ;;  %v6071_v36 = vpop.permute.xlu0 %6070 }
 0x7b7   : > { %5159 = vadd.xlane.f32.xlu1 %v5158_v28  ;;  %v5071_v34 = vpop.permute.xlu1 %5070 }
 0x7b9   : > { %6177 = vadd.xlane.f32.xlu0 %v6176_v11  ;;  %v6057_v15 = vpop.permute.xlu0 %6056  ;;  %v6203_v11 = vsel %vm2116_vm12, %v6059_v42, 0.0  ;;  %v6185_v42 = vsel %vm3221_vm15, %v6047_v26, 0.0 }
 0x7bb   : > { %5183 = vadd.xlane.f32.xlu1 %v5182_v17  ;;  %v6065_v4 = vpop.permute.xlu1 %6064 }
 0x7bd   : > { %5171 = vadd.xlane.f32.xlu0 %v5170_v54  ;;  %v6073_v28 = vpop.permute.xlu0 %6072  ;;  %v5212_v54 = vsel %vm2116_vm12, %v11685_v49, 0.0  ;;  %v6221_v49 = vsel %vm2116_vm12, %v6071_v36, 0.0 }
 0x7bf   : > { %5195 = vadd.xlane.f32.xlu1 %v5194_v50  ;;  %v6079_v0 = vpop.permute.xlu1 %6078 }
 0x7c1   : > { %5192 = vadd.xlane.f32.xlu0 %v5191_v43  ;;  %v6081_v17 = vpop.permute.xlu0 %6080  ;;  %v5224_v43 = vsel %vm2116_vm12, %v5069_v41, 0.0  ;;  %v5215_v41 = vsel %vm2116_vm12, %v11687_v39, 0.0 }
 0x7c3   : > { %6156 = vadd.xlane.f32.xlu1 %v6155_v38  ;;  %v5065_v7 = vpop.permute.xlu1 %5064  ;;  %v6197_v38 = vsel %vm2116_vm12, %v6055_v46, 0.0 }
 0x7c5   : > { %6141 = vadd.xlane.f32.xlu0 %v6140_v51  ;;  %v5073_v50 = vpop.permute.xlu0 %5072  ;;  %v6218_v51 = vsel %vm2116_vm12, %v6069_v44, 0.0 }
 0x7c7   : > { %6180 = vadd.xlane.f32.xlu1 %v6179_v30  ;;  %v6067_v52 = vpop.permute.xlu1 %6066 }
 0x7c9   : > { %6168 = vadd.xlane.f32.xlu0 %v6167_v27  ;;  %v6075_v3 = vpop.permute.xlu0 %6074  ;;  %v5203_v27 = vsel %vm3221_vm15, %v11679_v62, 0.0  ;;  %v6236_v62 = vsel %vm2116_vm12, %v6081_v17, 0.0 }
 0x7cb   : > { %6192 = vadd.xlane.f32.xlu1 %v6191_v33  ;;  %v6083_v30 = vpop.permute.xlu1 %6082  ;;  %v6200_v33 = vsel %vm3221_vm15, %v6057_v15, 0.0 }
 0x7cd   : > { %6189 = vadd.xlane.f32.xlu0 %v6188_v22  ;;  %v5075_v26 = vpop.permute.xlu0 %5074  ;;  %v5227_v22 = vsel %vm2116_vm12, %v5071_v34, 0.0  ;;  %v5230_v34 = vsel %vm2116_vm12, %v5073_v50, 0.0 }
 0x7cf   : > { %5186 = vadd.xlane.f32.xlu1 %v5185_v59  ;;  %v6077_v46 = vpop.permute.xlu1 %6076  ;;  %v6224_v59 = vsel %vm2116_vm12, %v6073_v28, 0.0  ;;  %v5233_v28 = vsel %vm3221_vm15, %v5075_v26, 0.0 }
 0x7d0   : > { %v6230_v17 = vsel %vm3221_vm15, %v6077_v46, 0.0 }
 0x7d1   : > { %5174 = vadd.xlane.f32.xlu0 %v5173_v12  ;;  %v6085_v19 = vpop.permute.xlu0 %6084  ;;  %v6212_v12 = vsel %vm2116_vm12, %v6065_v4, 0.0 }
 0x7d3   : > { %5207 = vadd.xlane.f32.xlu1 %v5206_v16  ;;  %v6087_v39 = vpop.permute.xlu1 %6086  ;;  %v6233_v16 = vsel %vm2116_vm12, %v6079_v0, 0.0 }
 0x7d5   : > { %5198 = vadd.xlane.f32.xlu0 %v5197_v47 }
 0x7d7   : > { %6171 = vadd.xlane.f32.xlu1 %v6170_v48  ;;  %v5218_v48 = vsel %vm3221_vm15, %v5065_v7, 0.0  ;;  %v6245_v7 = vsel %vm3221_vm15, %v6087_v39, 0.0  ;;  %v14260_v39 = vld [vmem:[#allocation16_spill] sm:$0xff] }
 0x7d9   : > { %5210 = vadd.xlane.f32.xlu0 %v5209_v32 }
 0x7db   : > { %6195 = vadd.xlane.f32.xlu1 %v6194_v45  ;;  %v6227_v45 = vsel %vm2116_vm12, %v6075_v3, 0.0 }
 0x7dd   : > { %6183 = vadd.xlane.f32.xlu0 %v6182_v5  ;;  %v6215_v5 = vsel %vm3221_vm15, %v6067_v52, 0.0 }
 0x7df   : > { %6207 = vadd.xlane.f32.xlu1 %v6206_v14 }
 0x7e1   : > { %6204 = vadd.xlane.f32.xlu0 %v6203_v11  ;;  %v6239_v11 = vsel %vm2116_vm12, %v6083_v30, 0.0 }
 0x7e3   : > { %5201 = vadd.xlane.f32.xlu1 %v5200_v8 }
 0x7e5   : > { %5189 = vadd.xlane.f32.xlu0 %v5188_v61  ;;  %v6242_v61 = vsel %vm2116_vm12, %v6085_v19, 0.0  ;;  %v14259_v19 = vld [vmem:[#allocation19_spill] sm:$0xff] }
 0x7e7   : > { %5222 = vadd.xlane.f32.xlu1 %v5221_v60 }
 0x7e9   : > { %5213 = vadd.xlane.f32.xlu0 %v5212_v54 }
 0x7eb   : > { %6186 = vadd.xlane.f32.xlu1 %v6185_v42 }
 0x7ed   : > { %5225 = vadd.xlane.f32.xlu0 %v5224_v43 }
 0x7ef   : > { %6210 = vadd.xlane.f32.xlu1 %v6209_v20 }
 0x7f1   : > { %6198 = vadd.xlane.f32.xlu0 %v6197_v38 }
 0x7f3   : > { %6222 = vadd.xlane.f32.xlu1 %v6221_v49 }
 0x7f5   : > { %6219 = vadd.xlane.f32.xlu0 %v6218_v51 }
 0x7f7   : > { %5216 = vadd.xlane.f32.xlu1 %v5215_v41 }
 0x7f9   : > { %5204 = vadd.xlane.f32.xlu0 %v5203_v27 }
 0x7fb   : > { %6201 = vadd.xlane.f32.xlu1 %v6200_v33 }
 0x7fd   : > { %5228 = vadd.xlane.f32.xlu0 %v5227_v22 }
 0x7ff   : > { %6225 = vadd.xlane.f32.xlu1 %v6224_v59 }
 0x801   : > { %6213 = vadd.xlane.f32.xlu0 %v6212_v12 }
 0x802   : > { %v5118_v44 = vpop.xlane.xlu0 %5117 }
 0x803   : > { %6237 = vadd.xlane.f32.xlu1 %v6236_v62  ;;  %v5236_v43 = vmul.f32 0.125, %v5118_v44 }
 0x804   : > { %v5121_v36 = vpop.xlane.xlu1 %5120 }
 0x805   : > { %6234 = vadd.xlane.f32.xlu0 %v6233_v16  ;;  %v5276_v38 = vsub.f32 %v10467_v6, %v5236_v43  ;;  %v5237_v27 = vmul.f32 0.125, %v5121_v36 }
 0x806   : > { %v5133_v47 = vpop.xlane.xlu0 %5132 }
 0x807   : > { %5231 = vadd.xlane.f32.xlu1 %v5230_v34  ;;  %v5241_v3 = vmul.f32 0.125, %v5133_v47  ;;  %v5316_v30 = vmul.f32 %v5276_v38, %v5276_v38  ;;  %v5277_v44 = vsub.f32 %v14260_v39, %v5237_v27 }
 0x808   : > { %v5124_v32 = vpop.xlane.xlu1 %5123 }
 0x809   : > { %5219 = vadd.xlane.f32.xlu0 %v5218_v48  ;;  %v5281_v41 = vsub.f32 %v10494_v63, %v5241_v3  ;;  %v5238_v62 = vmul.f32 0.125, %v5124_v32 }
 0x80a   : > { %v5136_v15 = vpop.xlane.xlu0 %5135 }
 0x80b   : > { %6228 = vadd.xlane.f32.xlu1 %v6227_v45  ;;  %v5242_v26 = vmul.f32 0.125, %v5136_v15  ;;  %v5321_v22 = vmul.f32 %v5281_v41, %v5281_v41  ;;  %v5317_v15 = vmul.f32 %v5277_v44, %v5277_v44  ;;  %v5278_v45 = vsub.f32 %v10464_v1, %v5238_v62 }
 0x80c   : > { %v5148_v4 = vpop.xlane.xlu1 %5147 }
 0x80d   : > { %6216 = vadd.xlane.f32.xlu0 %v6215_v5  ;;  %v5282_v59 = vsub.f32 %v14259_v19, %v5242_v26  ;;  %v5246_v5 = vmul.f32 0.125, %v5148_v4 }
 0x80e   : > { %v5139_v14 = vpop.xlane.xlu0 %5138 }
 0x80f   : > { %5234 = vadd.xlane.f32.xlu1 %v5233_v28  ;;  %v5243_v12 = vmul.f32 0.125, %v5139_v14  ;;  %v5322_v34 = vmul.f32 %v5282_v59, %v5282_v59 }
 0x810   : > { %v6130_v0 = vpop.xlane.xlu1 %6129 }
 0x811   : > { %6240 = vadd.xlane.f32.xlu0 %v6239_v11  ;;  %v5283_v36 = vsub.f32 %v10519_v21, %v5243_v12 }
 0x812   : > { %v5151_v8 = vpop.xlane.xlu0 %5150 }
 0x813   : > { %6243 = vadd.xlane.f32.xlu1 %v6242_v61  ;;  %v5247_v48 = vmul.f32 0.125, %v5151_v8  ;;  %v5323_v32 = vmul.f32 %v5283_v36, %v5283_v36  ;;  %v6248_v8 = vmul.f32 0.125, %v6130_v0 }
 0x814   : > { %v6145_v60 = vpop.xlane.xlu1 %6144 }
 0x815   : > { %6231 = vadd.xlane.f32.xlu0 %v6230_v17  ;;  %v5287_v11 = vsub.f32 %v10546_v18, %v5247_v48  ;;  %v5318_v17 = vmul.f32 %v5278_v45, %v5278_v45  ;;  %v6253_v26 = vmul.f32 0.125, %v6145_v60 }
 0x816   : > { %v6133_v54 = vpop.xlane.xlu0 %6132 }
 0x817   : > { %v6249_v61 = vmul.f32 0.125, %v6133_v54  ;;  %v5327_v38 = vmul.f32 %v5287_v11, %v5287_v11  ;;  %v6288_v54 = vsub.f32 %v10467_v6, %v6248_v8 }
 0x818   : > { %v5127_v42 = vpop.xlane.xlu1 %5126 }
 0x819   : > { %6246 = vadd.xlane.f32.xlu0 %v6245_v7  ;;  %v5286_v7 = vsub.f32 %v10549_v55, %v5246_v5  ;;  %v6289_v3 = vsub.f32 %v14260_v39, %v6249_v61  ;;  %v6328_v39 = vmul.f32 %v6288_v54, %v6288_v54  ;;  %v5239_v44 = vmul.f32 0.125, %v5127_v42  ;;  %v14262_v5 = vld [vmem:[#allocation23_spill] sm:$0xff]  ;;  %v14263_v61 = vld [vmem:[#allocation22_spill] sm:$0xff] }
 0x81a   : > { %v6148_v50 = vpop.xlane.xlu0 %6147 }
 0x81b   : > { %v5326_v41 = vmul.f32 %v5286_v7, %v5286_v7 }
 0x81c   : > { %v11803_v52 = vpop.xlane.xlu1 %5153 }
 0x81e   : > { %v5142_v20 = vpop.xlane.xlu0 %5141 }
 0x81f   : > { %v5244_v12 = vmul.f32 0.125, %v5142_v20  ;;  %v14261_v20 = vld [vmem:[#allocation17_spill] sm:$0xff] }
 0x820   : > { %v11806_v49 = vpop.xlane.xlu1 %5165  ;;  %v5279_v48 = vsub.f32 %v14261_v20, %v5239_v44 }
 0x821   : > { %v5252_v7 = vmul.f32 0.125, %v11806_v49 }
 0x822   : > { %v5163_v51 = vpop.xlane.xlu0 %5162 }
 0x823   : > { %v5251_v36 = vmul.f32 0.125, %v5163_v51  ;;  %v5319_v51 = vmul.f32 %v5279_v48, %v5279_v48 }
 0x824   : > { %v11809_v46 = vpop.xlane.xlu1 %6150  ;;  %5396 = vrot.lane.b32.xlu1 %v5316_v30, %s9032_s20  ;;  %v6254_v30 = vmul.f32 0.125, %v6148_v50  ;;  %v6293_v50 = vsub.f32 %v10494_v63, %v6253_v26 }
 0x825   : > { %v6255_v26 = vmul.f32 0.125, %v11809_v46 }
 0x826   : > { %v6136_v33 = vpop.xlane.xlu0 %6135  ;;  %v6294_v59 = vsub.f32 %v14259_v19, %v6254_v30  ;;  %v6333_v19 = vmul.f32 %v6293_v50, %v6293_v50 }
 0x827   : > { %v6250_v11 = vmul.f32 0.125, %v6136_v33 }
 0x828   : > { %v11814_v16 = vpop.xlane.xlu1 %6162  ;;  %5406 = vrot.lane.b32.xlu1 %v5321_v22, %s9032_s20  ;;  %v6329_v22 = vmul.f32 %v6289_v3, %v6289_v3  ;;  %v6334_v60 = vmul.f32 %v6294_v59, %v6294_v59 }
 0x829   : > { %v6290_v3 = vsub.f32 %v10464_v1, %v6250_v11  ;;  %v6259_v50 = vmul.f32 0.125, %v11814_v16 }
 0x82a   : > { %v6160_v47 = vpop.xlane.xlu0 %6159 }
 0x82b   : > { %v6258_v30 = vmul.f32 0.125, %v6160_v47  ;;  %v6330_v59 = vmul.f32 %v6290_v3, %v6290_v3  ;;  %v6295_v47 = vsub.f32 %v10519_v21, %v6255_v26  ;;  %v14268_v3 = vld [vmem:[#allocation27_spill] sm:$0xff] }
 0x82c   : > { %v11819_v28 = vpop.xlane.xlu1 %5144  ;;  %5408 = vrot.lane.b32.xlu1 %v5322_v34, %s9032_s20  ;;  %v5284_v34 = vsub.f32 %v10533_v23, %v5244_v12 }
 0x82d   : > { %v6298_v12 = vsub.f32 %v10549_v55, %v6258_v30  ;;  %v5245_v21 = vmul.f32 0.125, %v11819_v28 }
 0x82e   : > { %v11822_v14 = vpop.xlane.xlu0 %5129  ;;  %v5324_v42 = vmul.f32 %v5284_v34, %v5284_v34  ;;  %v14265_v34 = vld [vmem:[#allocation18_spill] sm:$0xff] }
 0x82f   : > { %5398 = vrot.lane.b32.xlu0 %v5317_v15, %s9032_s20  ;;  %v5248_v15 = vmul.f32 0.125, %v11803_v52 }
 0x830   : > { %v11827_v43 = vpop.xlane.xlu1 %5168  ;;  %5410 = vrot.lane.b32.xlu1 %v5323_v32, %s9032_s20  ;;  %v5291_v32 = vsub.f32 %v14262_v5, %v5251_v36 }
 0x832   : > { %v11830_v4 = vpop.xlane.xlu0 %5156 }
 0x833   : > { %5400 = vrot.lane.b32.xlu0 %v5318_v17, %s9032_s20  ;;  %v5288_v17 = vsub.f32 %v14263_v61, %v5248_v15  ;;  %v5249_v55 = vmul.f32 0.125, %v11830_v4 }
 0x834   : > { %v11835_v27 = vpop.xlane.xlu1 %5180  ;;  %5418 = vrot.lane.b32.xlu1 %v5327_v38, %s9032_s20  ;;  %v5331_v38 = vmul.f32 %v5291_v32, %v5291_v32 }
 0x835   : > { %v5328_v33 = vmul.f32 %v5288_v17, %v5288_v17 }
 0x836   : > { %v11838_v0 = vpop.xlane.xlu0 %5177 }
 0x837   : > { %5416 = vrot.lane.b32.xlu0 %v5326_v41, %s9032_s20  ;;  %v14264_v41 = vld [vmem:[#allocation25_spill] sm:$0xff]  ;;  %v5256_v11 = vmul.f32 0.125, %v11838_v0 }
 0x838   : > { %v11843_v62 = vpop.xlane.xlu1 %6153  ;;  %6410 = vrot.lane.b32.xlu1 %v6329_v22, %s9033_s16  ;;  %v5292_v54 = vsub.f32 %v14264_v41, %v5252_v7 }
 0x839   : > { %v5296_v30 = vsub.f32 %v14268_v3, %v5256_v11 }
 0x83a   : > { %v11846_v6 = vpop.xlane.xlu0 %6138  ;;  %v5332_v1 = vmul.f32 %v5292_v54, %v5292_v54  ;;  %v14269_v54 = vld [vmem:[#allocation24_spill] sm:$0xff] }
 0x83b   : > { %6408 = vrot.lane.b32.xlu0 %v6328_v39, %s9033_s16  ;;  %v5240_v39 = vmul.f32 0.125, %v11822_v14  ;;  %v6335_v14 = vmul.f32 %v6295_v47, %v6295_v47 }
 0x83c   : > { %v11852_v45 = vpop.xlane.xlu1 %6174  ;;  %6420 = vrot.lane.b32.xlu1 %v6334_v60, %s9033_s16  ;;  %v6338_v60 = vmul.f32 %v6298_v12, %v6298_v12 }
 0x83d   : > { %v5280_v36 = vsub.f32 %v14265_v34, %v5240_v39  ;;  %v5336_v39 = vmul.f32 %v5296_v30, %v5296_v30 }
 0x83e   : > { %v11855_v63 = vpop.xlane.xlu0 %6165 }
 0x83f   : > { %6418 = vrot.lane.b32.xlu0 %v6333_v19, %s9033_s16  ;;  %v6299_v19 = vsub.f32 %v10546_v18, %v6259_v50  ;;  %v5320_v15 = vmul.f32 %v5280_v36, %v5280_v36  ;;  %v5253_v18 = vmul.f32 0.125, %v11827_v43  ;;  %v6260_v47 = vmul.f32 0.125, %v11855_v63 }
 0x840   : > { %v11861_v8 = vpop.xlane.xlu1 %5159  ;;  %5412 = vrot.lane.b32.xlu1 %v5324_v42, %s9032_s20  ;;  %v14266_v42 = vld [vmem:[#allocation21_spill] sm:$0xff] }
 0x841   : > { %v5289_v32 = vsub.f32 %v14266_v42, %v5249_v55  ;;  %v6339_v4 = vmul.f32 %v6299_v19, %v6299_v19  ;;  %v5293_v26 = vsub.f32 %v14269_v54, %v5253_v18 }
 0x842   : > { %v11864_v52 = vpop.xlane.xlu0 %6177 }
 0x843   : > { %5402 = vrot.lane.b32.xlu0 %v5319_v51, %s9032_s20  ;;  %v14267_v51 = vld [vmem:[#allocation20_spill] sm:$0xff] }
 0x844   : > { %v11870_v22 = vpop.xlane.xlu1 %5183  ;;  %5426 = vrot.lane.b32.xlu1 %v5331_v38, %s9032_s20  ;;  %v5285_v17 = vsub.f32 %v14267_v51, %v5245_v21  ;;  %v5329_v38 = vmul.f32 %v5289_v32, %v5289_v32  ;;  %v6263_v21 = vmul.f32 0.125, %v11852_v45 }
 0x846   : > { %v11873_v49 = vpop.xlane.xlu0 %5171  ;;  %v5325_v0 = vmul.f32 %v5285_v17, %v5285_v17 }
 0x847   : > { %5420 = vrot.lane.b32.xlu0 %v5328_v33, %s9032_s20  ;;  %v6251_v33 = vmul.f32 0.125, %v11846_v6  ;;  %v5333_v6 = vmul.f32 %v5293_v26, %v5293_v26 }
 0x848   : > { %v11880_v44 = vpop.xlane.xlu1 %5195  ;;  %6412 = vrot.lane.b32.xlu1 %v6330_v59, %s9033_s16  ;;  %v5257_v59 = vmul.f32 0.125, %v11835_v27 }
 0x84a   : > { %v11883_v46 = vpop.xlane.xlu0 %5192  ;;  %v5297_v50 = vsub.f32 %v10622_v2, %v5257_v59 }
 0x84b   : > { %5428 = vrot.lane.b32.xlu0 %v5332_v1, %s9032_s20  ;;  %v6291_v1 = vsub.f32 %v14261_v20, %v6251_v33  ;;  %v6264_v20 = vmul.f32 0.125, %v11864_v52 }
 0x84c   : > { %v11890_v48 = vpop.xlane.xlu1 %6156  ;;  %6428 = vrot.lane.b32.xlu1 %v6338_v60, %s9033_s16  ;;  %v6256_v60 = vmul.f32 0.125, %v11843_v62  ;;  %v5337_v63 = vmul.f32 %v5297_v50, %v5297_v50 }
 0x84d   : > { %v6331_v55 = vmul.f32 %v6291_v1, %v6291_v1  ;;  %v6304_v11 = vsub.f32 %v14264_v41, %v6264_v20  ;;  %v5261_v41 = vmul.f32 0.125, %v11883_v46  ;;  %v5262_v1 = vmul.f32 0.125, %v11880_v44 }
 0x84e   : > { %v11893_v16 = vpop.xlane.xlu0 %6141  ;;  %v6296_v19 = vsub.f32 %v10533_v23, %v6256_v60  ;;  %v5250_v23 = vmul.f32 0.125, %v11861_v8 }
 0x84f   : > { %6422 = vrot.lane.b32.xlu0 %v6335_v14, %s9033_s16  ;;  %v6300_v14 = vsub.f32 %v14263_v61, %v6260_v47  ;;  %v5254_v61 = vmul.f32 0.125, %v11873_v49  ;;  %v6344_v18 = vmul.f32 %v6304_v11, %v6304_v11  ;;  %v5301_v26 = vsub.f32 %v10648_v53, %v5261_v41 }
 0x850   : > { %v11900_v7 = vpop.xlane.xlu1 %6180  ;;  %5404 = vrot.lane.b32.xlu1 %v5320_v15, %s9032_s20  ;;  %v6336_v52 = vmul.f32 %v6296_v19, %v6296_v19  ;;  %v5290_v30 = vsub.f32 %v10581_v10, %v5250_v23  ;;  %v6252_v59 = vmul.f32 0.125, %v11893_v16 }
 0x851   : > { %v6340_v32 = vmul.f32 %v6300_v14, %v6300_v14  ;;  %v6257_v14 = vmul.f32 0.125, %v11890_v48 }
 0x852   : > { %v11903_v28 = vpop.xlane.xlu0 %6168  ;;  %v5330_v46 = vmul.f32 %v5290_v30, %v5290_v30  ;;  %v6292_v50 = vsub.f32 %v14265_v34, %v6252_v59 }
 0x853   : > { %6430 = vrot.lane.b32.xlu0 %v6339_v4, %s9033_s16  ;;  %v6303_v4 = vsub.f32 %v14262_v5, %v6263_v21  ;;  %v5258_v5 = vmul.f32 0.125, %v11870_v22  ;;  %v6261_v60 = vmul.f32 0.125, %v11903_v28  ;;  %v6297_v21 = vsub.f32 %v14267_v51, %v6257_v14 }
 0x854   : > { %v11910_v12 = vpop.xlane.xlu1 %6192  ;;  %5422 = vrot.lane.b32.xlu1 %v5329_v38, %s9032_s20  ;;  %v5294_v38 = vsub.f32 %v10606_v40, %v5254_v61 }
 0x855   : > { %v6343_v49 = vmul.f32 %v6303_v4, %v6303_v4  ;;  %v6301_v19 = vsub.f32 %v14266_v42, %v6261_v60  ;;  %v6269_v51 = vmul.f32 0.125, %v11910_v12 }
 0x856   : > { %v11913_v43 = vpop.xlane.xlu0 %6189 }
 0x857   : > { %5414 = vrot.lane.b32.xlu0 %v5325_v0, %s9032_s20  ;;  %v5334_v0 = vmul.f32 %v5294_v38, %v5294_v38  ;;  %v6268_v34 = vmul.f32 0.125, %v11913_v43  ;;  %v6341_v61 = vmul.f32 %v6301_v19, %v6301_v19  ;;  %v6337_v43 = vmul.f32 %v6297_v21, %v6297_v21  ;;  %v14270_v38 = vld [vmem:[#allocation26_spill] sm:$0xff] }
 0x858   : > { %v11920_v36 = vpop.xlane.xlu1 %5186  ;;  %5436 = vrot.lane.b32.xlu1 %v5336_v39, %s9032_s20  ;;  %v5298_v39 = vsub.f32 %v10638_v57, %v5258_v5 }
 0x85a   : > { %v11923_v27 = vpop.xlane.xlu0 %5174  ;;  %v5338_v16 = vmul.f32 %v5298_v39, %v5298_v39 }
 0x85b   : > { %5430 = vrot.lane.b32.xlu0 %v5333_v6, %s9032_s20  ;;  %v5341_v6 = vmul.f32 %v5301_v26, %v5301_v26  ;;  %v5255_v42 = vmul.f32 0.125, %v11923_v27 }
 0x85c   : > { %v11930_v15 = vpop.xlane.xlu1 %5207  ;;  %6414 = vrot.lane.b32.xlu1 %v6331_v55, %s9033_s16  ;;  %v5302_v55 = vsub.f32 %v10661_v56, %v5262_v1 }
 0x85d   : > { %v5295_v41 = vsub.f32 %v14270_v38, %v5255_v42 }
 0x85e   : > { %v11933_v62 = vpop.xlane.xlu0 %5198  ;;  %v5342_v28 = vmul.f32 %v5302_v55, %v5302_v55  ;;  %v14274_v55 = vld [vmem:[#allocation33_spill] sm:$0xff] }
 0x85f   : > { %5438 = vrot.lane.b32.xlu0 %v5337_v63, %s9032_s20  ;;  %v6332_v63 = vmul.f32 %v6292_v50, %v6292_v50  ;;  %v5335_v5 = vmul.f32 %v5295_v41, %v5295_v41  ;;  %v14273_v50 = vld [vmem:[#allocation32_spill] sm:$0xff]  ;;  %v14275_v41 = vld [vmem:[#allocation29_spill] sm:$0xff] }
 0x860   : > { %v11940_v17 = vpop.xlane.xlu1 %6171  ;;  %6432 = vrot.lane.b32.xlu1 %v6340_v32, %s9033_s16  ;;  %v6265_v32 = vmul.f32 0.125, %v11900_v7 }
 0x862   : > { %v11943_v45 = vpop.xlane.xlu0 %5210  ;;  %v6305_v4 = vsub.f32 %v14269_v54, %v6265_v32  ;;  %v5259_v54 = vmul.f32 0.125, %v11920_v36 }
 0x863   : > { %6424 = vrot.lane.b32.xlu0 %v6336_v52, %s9033_s16  ;;  %v6308_v52 = vsub.f32 %v14268_v3, %v6268_v34  ;;  %v5263_v3 = vmul.f32 0.125, %v11933_v62  ;;  %v5267_v59 = vmul.f32 0.125, %v11943_v45 }
 0x864   : > { %v11950_v33 = vpop.xlane.xlu1 %6195  ;;  %6440 = vrot.lane.b32.xlu1 %v6344_v18, %s9033_s16  ;;  %v6345_v27 = vmul.f32 %v6305_v4, %v6305_v4 }
 0x865   : > { %v6348_v18 = vmul.f32 %v6308_v52, %v6308_v52  ;;  %v5307_v60 = vsub.f32 %v14273_v50, %v5267_v59 }
 0x866   : > { %v11953_v8 = vpop.xlane.xlu0 %6183 }
 0x867   : > { %6438 = vrot.lane.b32.xlu0 %v6343_v49, %s9033_s16  ;;  %v6309_v49 = vsub.f32 %v10622_v2, %v6269_v51  ;;  %v5266_v2 = vmul.f32 0.125, %v11930_v15  ;;  %v5347_v34 = vmul.f32 %v5307_v60, %v5307_v60 }
 0x868   : > { %v11960_v47 = vpop.xlane.xlu1 %6207  ;;  %5432 = vrot.lane.b32.xlu1 %v5334_v0, %s9032_s20  ;;  %v14271_v0 = vld [vmem:[#allocation30_spill] sm:$0xff] }
 0x869   : > { %v5303_v26 = vsub.f32 %v14271_v0, %v5263_v3  ;;  %v6349_v62 = vmul.f32 %v6309_v49, %v6309_v49  ;;  %v5306_v14 = vsub.f32 %v14274_v55, %v5266_v2 }
 0x86a   : > { %v11963_v22 = vpop.xlane.xlu0 %6204 }
 0x86b   : > { %5424 = vrot.lane.b32.xlu0 %v5330_v46, %s9032_s20  ;;  %v14272_v46 = vld [vmem:[#allocation28_spill] sm:$0xff]  ;;  %v6273_v21 = vmul.f32 0.125, %v11963_v22 }
 0x86c   : > { %v11970_v20 = vpop.xlane.xlu1 %5201  ;;  %5446 = vrot.lane.b32.xlu1 %v5341_v6, %s9032_s20  ;;  %v5299_v39 = vsub.f32 %v14272_v46, %v5259_v54  ;;  %v5343_v6 = vmul.f32 %v5303_v26, %v5303_v26 }
 0x86e   : > { %v11973_v44 = vpop.xlane.xlu0 %5189  ;;  %v5339_v45 = vmul.f32 %v5299_v39, %v5299_v39 }
 0x86f   : > { %5440 = vrot.lane.b32.xlu0 %v5338_v16, %s9032_s20  ;;  %v6266_v16 = vmul.f32 0.125, %v11953_v8  ;;  %v5346_v8 = vmul.f32 %v5306_v14, %v5306_v14 }
 0x870   : > { %v11980_v11 = vpop.xlane.xlu1 %5222  ;;  %6416 = vrot.lane.b32.xlu1 %v6332_v63, %s9033_s16  ;;  %v6262_v63 = vmul.f32 0.125, %v11940_v17 }
 0x872   : > { %v11983_v48 = vpop.xlane.xlu0 %5213  ;;  %v6302_v32 = vsub.f32 %v10581_v10, %v6262_v63  ;;  %v6274_v10 = vmul.f32 0.125, %v11960_v47 }
 0x873   : > { %5448 = vrot.lane.b32.xlu0 %v5342_v28, %s9032_s20  ;;  %v6306_v28 = vsub.f32 %v10606_v40, %v6266_v16  ;;  %v5260_v40 = vmul.f32 0.125, %v11973_v44 }
 0x874   : > { %v11990_v23 = vpop.xlane.xlu1 %6186  ;;  %6434 = vrot.lane.b32.xlu1 %v6341_v61, %s9033_s16  ;;  %v6270_v61 = vmul.f32 0.125, %v11950_v33  ;;  %v6342_v22 = vmul.f32 %v6302_v32, %v6302_v32 }
 0x875   : > { %v6346_v42 = vmul.f32 %v6306_v28, %v6306_v28  ;;  %v5300_v3 = vsub.f32 %v14275_v41, %v5260_v40  ;;  %v6267_v63 = vmul.f32 0.125, %v11990_v23 }
 0x876   : > { %v11993_v7 = vpop.xlane.xlu0 %5225  ;;  %v6310_v4 = vsub.f32 %v10638_v57, %v6270_v61  ;;  %v5264_v57 = vmul.f32 0.125, %v11970_v20 }
 0x877   : > { %6426 = vrot.lane.b32.xlu0 %v6337_v43, %s9033_s16  ;;  %v6313_v43 = vsub.f32 %v10648_v53, %v6273_v21  ;;  %v5268_v53 = vmul.f32 0.125, %v11983_v48  ;;  %v5340_v54 = vmul.f32 %v5300_v3, %v5300_v3  ;;  %v5272_v59 = vmul.f32 0.125, %v11993_v7 }
 0x878   : > { %v12000_v30 = vpop.xlane.xlu1 %6210  ;;  %6448 = vrot.lane.b32.xlu1 %v6348_v18, %s9033_s16  ;;  %v6350_v44 = vmul.f32 %v6310_v4, %v6310_v4  ;;  %v6307_v32 = vsub.f32 %v14270_v38, %v6267_v63 }
 0x879   : > { %v6353_v18 = vmul.f32 %v6313_v43, %v6313_v43  ;;  %v5312_v60 = vsub.f32 %v10708_v13, %v5272_v59  ;;  %v6275_v61 = vmul.f32 0.125, %v12000_v30 }
 0x87a   : > { %v12003_v12 = vpop.xlane.xlu0 %6198 }
 0x87b   : > { %6442 = vrot.lane.b32.xlu0 %v6345_v27, %s9033_s16  ;;  %v6314_v27 = vsub.f32 %v10661_v56, %v6274_v10  ;;  %v5271_v56 = vmul.f32 0.125, %v11980_v11  ;;  %v6271_v16 = vmul.f32 0.125, %v12003_v12  ;;  %v5352_v28 = vmul.f32 %v5312_v60, %v5312_v60 }
 0x87c   : > { %v12010_v1 = vpop.xlane.xlu1 %6222  ;;  %5434 = vrot.lane.b32.xlu1 %v5335_v5, %s9032_s20  ;;  %v14276_v5 = vld [vmem:[#allocation34_spill] sm:$0xff] }
 0x87d   : > { %v5308_v26 = vsub.f32 %v14276_v5, %v5268_v53  ;;  %v6354_v48 = vmul.f32 %v6314_v27, %v6314_v27  ;;  %v6311_v21 = vsub.f32 %v14272_v46, %v6271_v16  ;;  %v6279_v38 = vmul.f32 0.125, %v12010_v1 }
 0x87e   : > { %v12013_v36 = vpop.xlane.xlu0 %6219 }
 0x87f   : > { %6450 = vrot.lane.b32.xlu0 %v6349_v62, %s9033_s16  ;;  %v14277_v62 = vld [vmem:[#allocation31_spill] sm:$0xff]  ;;  %v6351_v43 = vmul.f32 %v6311_v21, %v6311_v21  ;;  %v6319_v3 = vsub.f32 %v14273_v50, %v6279_v38 }
 0x880   : > { %v12020_v19 = vpop.xlane.xlu1 %5216  ;;  %5450 = vrot.lane.b32.xlu1 %v5343_v6, %s9032_s20  ;;  %v5304_v39 = vsub.f32 %v14277_v62, %v5264_v57  ;;  %v5348_v6 = vmul.f32 %v5308_v26, %v5308_v26 }
 0x882   : > { %v12023_v15 = vpop.xlane.xlu0 %5204  ;;  %v5344_v7 = vmul.f32 %v5304_v39, %v5304_v39 }
 0x883   : > { %5442 = vrot.lane.b32.xlu0 %v5339_v45, %s9032_s20  ;;  %v14278_v45 = vld [vmem:[#allocation35_spill] sm:$0xff]  ;;  %v5265_v46 = vmul.f32 0.125, %v12023_v15 }
 0x884   : > { %v12030_v52 = vpop.xlane.xlu1 %6201  ;;  %5458 = vrot.lane.b32.xlu1 %v5347_v34, %s9032_s20  ;;  %v5311_v14 = vsub.f32 %v14278_v45, %v5271_v56 }
 0x885   : > { %v6272_v50 = vmul.f32 0.125, %v12030_v52 }
 0x886   : > { %v12033_v17 = vpop.xlane.xlu0 %5228  ;;  %v5351_v12 = vmul.f32 %v5311_v14, %v5311_v14 }
 0x887   : > { %5456 = vrot.lane.b32.xlu0 %v5346_v8, %s9032_s20  ;;  %v6278_v8 = vmul.f32 0.125, %v12013_v36  ;;  %v6347_v36 = vmul.f32 %v6307_v32, %v6307_v32  ;;  %v6312_v56 = vsub.f32 %v14275_v41, %v6272_v50 }
 0x888   : > { %v12040_v51 = vpop.xlane.xlu1 %6225  ;;  %6444 = vrot.lane.b32.xlu1 %v6346_v42, %s9033_s16 }
 0x889   : > { %v6318_v40 = vsub.f32 %v14274_v55, %v6278_v8  ;;  %v5273_v55 = vmul.f32 0.125, %v12033_v17  ;;  %v6359_v17 = vmul.f32 %v6319_v3, %v6319_v3 }
 0x88a   : > { %v12043_v33 = vpop.xlane.xlu0 %6213 }
 0x88b   : > { %6436 = vrot.lane.b32.xlu0 %v6342_v22, %s9033_s16  ;;  %v6315_v22 = vsub.f32 %v14271_v0, %v6275_v61  ;;  %v6358_v10 = vmul.f32 %v6318_v40, %v6318_v40  ;;  %v5269_v0 = vmul.f32 0.125, %v12020_v19  ;;  %v5313_v27 = vsub.f32 %v10711_v31, %v5273_v55 }
 0x88c   : > { %v12050_v49 = vpop.xlane.xlu1 %6237  ;;  %6458 = vrot.lane.b32.xlu1 %v6353_v18, %s9033_s16  ;;  %v5305_v18 = vsub.f32 %v10668_v9, %v5265_v46  ;;  %v6276_v57 = vmul.f32 0.125, %v12043_v33 }
 0x88d   : > { %v6355_v15 = vmul.f32 %v6315_v22, %v6315_v22  ;;  %v5353_v59 = vmul.f32 %v5313_v27, %v5313_v27  ;;  %v6284_v41 = vmul.f32 0.125, %v12050_v49 }
 0x88e   : > { %v12053_v47 = vpop.xlane.xlu0 %6234 }
 0x88f   : > { %6452 = vrot.lane.b32.xlu0 %v6350_v44, %s9033_s16  ;;  %v5345_v44 = vmul.f32 %v5305_v18, %v5305_v18  ;;  %v6283_v39 = vmul.f32 0.125, %v12053_v47  ;;  %v6352_v47 = vmul.f32 %v6312_v56, %v6312_v56  ;;  %v6324_v8 = vsub.f32 %v10708_v13, %v6284_v41 }
 0x890   : > { %v12060_v2 = vpop.xlane.xlu1 %5231  ;;  %5444 = vrot.lane.b32.xlu1 %v5340_v54, %s9032_s20  ;;  %v5309_v54 = vsub.f32 %v10691_v24, %v5269_v0 }
 0x892   : > { %v12063_v20 = vpop.xlane.xlu0 %5219  ;;  %v5349_v33 = vmul.f32 %v5309_v54, %v5309_v54 }
 0x893   : > { %6460 = vrot.lane.b32.xlu0 %v6354_v48, %s9033_s16  ;;  %v6316_v48 = vsub.f32 %v14277_v62, %v6276_v57  ;;  %v5270_v62 = vmul.f32 0.125, %v12063_v20 }
 0x894   : > { %v12070_v34 = vpop.xlane.xlu1 %6228  ;;  %5460 = vrot.lane.b32.xlu1 %v5348_v6, %s9032_s20  ;;  %v6280_v6 = vmul.f32 0.125, %v12040_v51 }
 0x895   : > { %v6356_v16 = vmul.f32 %v6316_v48, %v6316_v48  ;;  %v5310_v21 = vsub.f32 %v10698_v35, %v5270_v62  ;;  %v6281_v13 = vmul.f32 0.125, %v12070_v34 }
 0x896   : > { %v12073_v11 = vpop.xlane.xlu0 %6216  ;;  %v6320_v14 = vsub.f32 %v14276_v5, %v6280_v6  ;;  %v5274_v5 = vmul.f32 0.125, %v12060_v2 }
 0x897   : > { %5452 = vrot.lane.b32.xlu0 %v5344_v7, %s9032_s20  ;;  %v6323_v7 = vsub.f32 %v14278_v45, %v6283_v39  ;;  %v6277_v45 = vmul.f32 0.125, %v12073_v11  ;;  %v5350_v32 = vmul.f32 %v5310_v21, %v5310_v21  ;;  %v6364_v11 = vmul.f32 %v6324_v8, %v6324_v8 }
 0x898   : > { %v12080_v42 = vpop.xlane.xlu1 %5234  ;;  %5468 = vrot.lane.b32.xlu1 %v5352_v28, %s9032_s20  ;;  %v6360_v20 = vmul.f32 %v6320_v14, %v6320_v14  ;;  %v5314_v40 = vsub.f32 %v10718_v37, %v5274_v5  ;;  %v6321_v38 = vsub.f32 %v10691_v24, %v6281_v13 }
 0x899   : > { %v6363_v28 = vmul.f32 %v6323_v7, %v6323_v7  ;;  %v6317_v61 = vsub.f32 %v10668_v9, %v6277_v45 }
 0x89a   : > { %v12083_v23 = vpop.xlane.xlu0 %6240 }
 0x89b   : > { %5466 = vrot.lane.b32.xlu0 %v5351_v12, %s9032_s20 }
 0x89c   : > { %v12090_v4 = vpop.xlane.xlu1 %6243  ;;  %6454 = vrot.lane.b32.xlu1 %v6351_v43, %s9033_s16  ;;  %v6285_v43 = vmul.f32 0.125, %v12083_v23  ;;  %v5354_v23 = vmul.f32 %v5314_v40, %v5314_v40 }
 0x89d   : > { %v6286_v24 = vmul.f32 0.125, %v12090_v4 }
 0x89e   : > { %v12093_v30 = vpop.xlane.xlu0 %6231  ;;  %v6325_v22 = vsub.f32 %v10711_v31, %v6285_v43 }
 0x89f   : > { %6446 = vrot.lane.b32.xlu0 %v6347_v36, %s9033_s16  ;;  %v6357_v36 = vmul.f32 %v6317_v61, %v6317_v61  ;;  %v6282_v9 = vmul.f32 0.125, %v12093_v30  ;;  %v6361_v30 = vmul.f32 %v6321_v38, %v6321_v38 }
 0x8a0   : > { %v12100_v53 = vpop.permute.xlu1 %5396  ;;  %6468 = vrot.lane.b32.xlu1 %v6358_v10, %s9033_s16  ;;  %v5275_v10 = vmul.f32 0.125, %v12080_v42  ;;  %v6365_v55 = vmul.f32 %v6325_v22, %v6325_v22 }
 0x8a1   : > { %v5516_v45 = vsel %vm2116_vm12, %v12100_v53, 0.0 }
 0x8a2   : > { %v12103_v1 = vpop.xlane.xlu0 %6246  ;;  %v5315_v3 = vsub.f32 %v10721_v29, %v5275_v10 }
 0x8a3   : > { %6462 = vrot.lane.b32.xlu0 %v6355_v15, %s9033_s16  ;;  %v6322_v15 = vsub.f32 %v10698_v35, %v6282_v9  ;;  %v6287_v31 = vmul.f32 0.125, %v12103_v1  ;;  %v6326_v1 = vsub.f32 %v10718_v37, %v6286_v24 }
 0x8a4   : > { %v12110_v26 = vpop.permute.xlu1 %5406  ;;  %5454 = vrot.lane.b32.xlu1 %v5345_v44, %s9032_s20  ;;  %v5355_v35 = vmul.f32 %v5315_v3, %v5315_v3 }
 0x8a5   : > { %v6362_v44 = vmul.f32 %v6322_v15, %v6322_v15  ;;  %v6327_v27 = vsub.f32 %v10721_v29, %v6287_v31  ;;  %v6366_v54 = vmul.f32 %v6326_v1, %v6326_v1  ;;  %v5531_v5 = vsel %vm2116_vm12, %v12110_v26, 0.0 }
 0x8a6   : > { %v12113_v19 = vpop.permute.xlu0 %5398 }
 0x8a7   : > { %6470 = vrot.lane.b32.xlu0 %v6359_v17, %s9033_s16  ;;  %v6367_v4 = vmul.f32 %v6327_v27, %v6327_v27  ;;  %v5519_v8 = vsel %vm2116_vm12, %v12113_v19, 0.0 }
 0x8a8   : > { %v12120_v60 = vpop.permute.xlu1 %5408  ;;  %5470 = vrot.lane.b32.xlu1 %v5353_v59, %s9032_s20 }
 0x8a9   : > { %v5534_v53 = vsel %vm2116_vm12, %v12120_v60, 0.0 }
 0x8aa   : > { %v12123_v52 = vpop.permute.xlu0 %5400 }
 0x8ab   : > { %5462 = vrot.lane.b32.xlu0 %v5349_v33, %s9032_s20  ;;  %v5522_v61 = vsel %vm2116_vm12, %v12123_v52, 0.0 }
 0x8ac   : > { %v12130_v63 = vpop.permute.xlu1 %5410  ;;  %6464 = vrot.lane.b32.xlu1 %v6356_v16, %s9033_s16 }
 0x8ad   : > { %v5537_v26 = vsel %vm2116_vm12, %v12130_v63, 0.0 }
 0x8ae   : > { %v12133_v51 = vpop.permute.xlu0 %5416 }
 0x8af   : > { %6456 = vrot.lane.b32.xlu0 %v6352_v47, %s9033_s16  ;;  %v5546_v19 = vsel %vm2116_vm12, %v12133_v51, 0.0 }
 0x8b0   : > { %v12140_v12 = vpop.permute.xlu1 %5418  ;;  %6478 = vrot.lane.b32.xlu1 %v6363_v28, %s9033_s16 }
 0x8b1   : > { %v5549_v60 = vsel %vm2116_vm12, %v12140_v12, 0.0 }
 0x8b2   : > { %v12143_v49 = vpop.permute.xlu0 %6408 }
 0x8b3   : > { %6472 = vrot.lane.b32.xlu0 %v6360_v20, %s9033_s16  ;;  %v6528_v52 = vsel %vm2116_vm12, %v12143_v49, 0.0 }
 0x8b4   : > { %v12150_v46 = vpop.permute.xlu1 %6410  ;;  %5464 = vrot.lane.b32.xlu1 %v5350_v32, %s9032_s20 }
 0x8b5   : > { %v6531_v63 = vsel %vm2116_vm12, %v12150_v46, 0.0 }
 0x8b6   : > { %v12153_v2 = vpop.permute.xlu0 %6418 }
 0x8b7   : > { %6480 = vrot.lane.b32.xlu0 %v6364_v11, %s9033_s16  ;;  %v6543_v51 = vsel %vm2116_vm12, %v12153_v2, 0.0 }
 0x8b8   : > { %v12160_v18 = vpop.permute.xlu1 %6420  ;;  %6466 = vrot.lane.b32.xlu1 %v6357_v36, %s9033_s16 }
 0x8b9   : > { %v6546_v12 = vsel %vm2116_vm12, %v12160_v18, 0.0 }
 0x8ba   : > { %v12163_v34 = vpop.permute.xlu0 %5402 }
 0x8bb   : > { %5472 = vrot.lane.b32.xlu0 %v5354_v23, %s9032_s20  ;;  %v5525_v49 = vsel %vm2116_vm12, %v12163_v34, 0.0 }
 0x8bc   : > { %v12170_v0 = vpop.permute.xlu1 %5412  ;;  %6482 = vrot.lane.b32.xlu1 %v6365_v55, %s9033_s16 }
 0x8bd   : > { %v5540_v46 = vsel %vm2116_vm12, %v12170_v0, 0.0 }
 0x8be   : > { %v12173_v42 = vpop.permute.xlu0 %5420 }
 0x8bf   : > { %6474 = vrot.lane.b32.xlu0 %v6361_v30, %s9033_s16  ;;  %v5552_v2 = vsel %vm2116_vm12, %v12173_v42, 0.0  ;;  %v14279_v30 = vld [vmem:[#allocation36_spill] sm:$0xff]  ;;  %v14280_v42 = vld [vmem:[#allocation37_spill] sm:$0xff] }
 0x8c0   : > { %v12178_v57 = vpop.permute.xlu1 %5426  ;;  %6476 = vrot.lane.b32.xlu1 %v6362_v44, %s9033_s16  ;;  %v3572_v3 = vmul.f32 0.14285715, %v14279_v30  ;;  %v3574_v44 = vmul.f32 0.14285715, %v14280_v42 }
 0x8c1   : > { %v5561_v18 = vsel %vm2116_vm12, %v12178_v57, 0.0 }
 0x8c2   : > { %v12181_v17 = vpop.permute.xlu0 %5428  ;;  %v3612_v57 = vmax.f32 %v3572_v3, 1e-06  ;;  %v14288_v3 = vld [vmem:[#allocation45_spill] sm:$0xff] }
 0x8c3   : > { %5474 = vrot.lane.b32.xlu0 %v5355_v35, %s9032_s20  ;;  %v5564_v38 = vsel %vm2116_vm12, %v12181_v17, 0.0  ;;  %v14281_v35 = vld [vmem:[#allocation39_spill] sm:$0xff] }
 0x8c4   : > { %v12184_v50 = vpop.permute.xlu1 %6412  ;;  %6486 = vrot.lane.b32.xlu1 %v6367_v4, %s9033_s16  ;;  %v3576_v1 = vmul.f32 0.14285715, %v14281_v35  ;;  %v14282_v4 = vld [vmem:[#allocation38_spill] sm:$0xff] }
 0x8c5   : > { %v6534_v15 = vsel %vm2116_vm12, %v12184_v50, 0.0 }
 0x8c6   : > { %v12187_v29 = vpop.permute.xlu0 %6422 }
 0x8c7   : > { %6484 = vrot.lane.b32.xlu0 %v6366_v54, %s9033_s16  ;;  %v6549_v55 = vsel %vm2116_vm12, %v12187_v29, 0.0  ;;  %v3571_v54 = vmul.f32 0.14285715, %v14282_v4 }
 0x8c8   : > { %v12190_v59 = vpop.permute.xlu1 %6428 }
 0x8c9   : > { %v6558_v0 = vsel %vm2116_vm12, %v12190_v59, 0.0  ;;  %v3614_v59 = vmax.f32 %v3574_v44, 1e-06  ;;  %v14289_v44 = vld [vmem:[#allocation46_spill] sm:$0xff] }
 0x8ca   : > { %v12192_v37 = vpop.permute.xlu0 %6430  ;;  %v3579_v35 = vmul.f32 0.14285715, %v14289_v44 }
 0x8cb   : > { %v6561_v24 = vsel %vm2116_vm12, %v12192_v37, 0.0  ;;  %v14283_v37 = vld [vmem:[#allocation40_spill] sm:$0xff] }
 0x8cc   : > { %v12194_v48 = vpop.permute.xlu1 %5404 }
 0x8cd   : > { %v5528_v29 = vsel %vm3221_vm15, %v12194_v48, 0.0 }
 0x8ce   : > { %v12196_v39 = vpop.permute.xlu0 %5414 }
 0x8cf   : > { %v5543_v17 = vsel %vm3221_vm15, %v12196_v39, 0.0 }
 0x8d0   : > { %v12198_v33 = vpop.permute.xlu1 %5422 }
 0x8d1   : > { %v5555_v48 = vsel %vm2116_vm12, %v12198_v33, 0.0  ;;  %v3582_v33 = vmul.f32 0.14285715, %v14288_v3 }
 0x8d2   : > { %v12200_v56 = vpop.permute.xlu0 %5430 }
 0x8d3   : > { %v5567_v39 = vsel %vm2116_vm12, %v12200_v56, 0.0 }
 0x8d4   : > { %v12202_v6 = vpop.permute.xlu1 %5436 }
 0x8d6   : > { %v12204_v16 = vpop.permute.xlu0 %5438 }
 0x8d7   : > { %v5579_v56 = vsel %vm2116_vm12, %v12204_v16, 0.0 }
 0x8d8   : > { %v12206_v7 = vpop.permute.xlu1 %6414 }
 0x8da   : > { %v12208_v62 = vpop.permute.xlu0 %6424 }
 0x8db   : > { %v6552_v16 = vsel %vm2116_vm12, %v12208_v62, 0.0 }
 0x8dc   : > { %v12210_v47 = vpop.permute.xlu1 %6432 }
 0x8de   : > { %v12212_v14 = vpop.permute.xlu0 %6438 }
 0x8e0   : > { %v12214_v41 = vpop.permute.xlu1 %6440 }
 0x8e2   : > { %v12216_v28 = vpop.permute.xlu0 %5424 }
 0x8e4   : > { %v12218_v21 = vpop.permute.xlu1 %5432 }
 0x8e5   : > { %v5570_v44 = vsel %vm2116_vm12, %v12218_v21, 0.0  ;;  %v3776_v21 = vld [vmem:[%s14033_s4 + $0x28] sm:$0xff] }
 0x8e6   : > { %5517 = vadd.xlane.f32.xlu0 %v5516_v45  ;;  %v12222_v20 = vpop.permute.xlu0 %5440  ;;  %v3573_v45 = vmul.f32 0.14285715, %v14283_v37  ;;  %v3619_v37 = vmax.f32 %v3579_v35, 1e-06 }
 0x8e7   : > { %v5582_v3 = vsel %vm2116_vm12, %v12222_v20, 0.0 }
 0x8e8   : > { %5520 = vadd.xlane.f32.xlu1 %v5519_v8  ;;  %v12228_v32 = vpop.permute.xlu1 %5446  ;;  %v3616_v8 = vmax.f32 %v3576_v1, 1e-06 }
 0x8ea   : > { %5532 = vadd.xlane.f32.xlu0 %v5531_v5  ;;  %v12232_v43 = vpop.permute.xlu0 %5448  ;;  %v14284_v5 = vld [vmem:[#allocation41_spill] sm:$0xff] }
 0x8ec   : > { %5523 = vadd.xlane.f32.xlu1 %v5522_v61  ;;  %v12236_v11 = vpop.permute.xlu1 %6416  ;;  %v3578_v61 = vmul.f32 0.14285715, %v14284_v5 }
 0x8ee   : > { %5535 = vadd.xlane.f32.xlu0 %v5534_v53  ;;  %v12242_v40 = vpop.permute.xlu0 %6426  ;;  %v3652_v53 = vmin.f32 %v3612_v57, 1000000.0 }
 0x8f0   : > { %5547 = vadd.xlane.f32.xlu1 %v5546_v19  ;;  %v12248_v13 = vpop.permute.xlu1 %6434  ;;  %v14285_v19 = vld [vmem:[#allocation43_spill] sm:$0xff]  ;;  %8666 = vlog2.f32 %v3652_v53 }
 0x8f2   : > { %5538 = vadd.xlane.f32.xlu0 %v5537_v26  ;;  %v12252_v36 = vpop.permute.xlu0 %6442  ;;  %v3580_v26 = vmul.f32 0.14285715, %v14285_v19  ;;  %v6573_v19 = vsel %vm2116_vm12, %v12212_v14, 0.0 }
 0x8f4   : > { %6529 = vadd.xlane.f32.xlu1 %v6528_v52  ;;  %v12256_v22 = vpop.permute.xlu1 %6448 }
 0x8f6   : > { %5550 = vadd.xlane.f32.xlu0 %v5549_v60  ;;  %v12262_v9 = vpop.permute.xlu0 %6450  ;;  %v3611_v60 = vmax.f32 %v3571_v54, 1e-06  ;;  %v3622_v54 = vmax.f32 %v3582_v33, 1e-06 }
 0x8f8   : > { %6544 = vadd.xlane.f32.xlu1 %v6543_v51  ;;  %v12268_v23 = vpop.permute.xlu1 %5434  ;;  %v3654_v51 = vmin.f32 %v3614_v59, 1000000.0  ;;  %v3651_v30 = vmin.f32 %v3611_v60, 1000000.0 }
 0x8fa   : > { %6532 = vadd.xlane.f32.xlu0 %v6531_v63  ;;  %v12272_v10 = vpop.permute.xlu0 %5442  ;;  %v3613_v63 = vmax.f32 %v3573_v45, 1e-06  ;;  %8668 = vlog2.f32 %v3654_v51  ;;  %v14290_v45 = vld [vmem:[#allocation47_spill] sm:$0xff] }
 0x8fc   : > { %5526 = vadd.xlane.f32.xlu1 %v5525_v49  ;;  %v12276_v34 = vpop.permute.xlu1 %5450  ;;  %v14286_v49 = vld [vmem:[#allocation44_spill] sm:$0xff] }
 0x8fe   : > { %6547 = vadd.xlane.f32.xlu0 %v6546_v12  ;;  %v12282_v31 = vpop.permute.xlu0 %5456  ;;  %v3577_v12 = vmul.f32 0.14285715, %v14286_v49  ;;  %v8667_v49 = vpop.eup %8666 }
 0x900   : > { %5553 = vadd.xlane.f32.xlu1 %v5552_v2  ;;  %v12290_v27 = vpop.permute.xlu1 %5458  ;;  %v3656_v2 = vmin.f32 %v3616_v8, 1000000.0  ;;  %v3617_v42 = vmax.f32 %v3577_v12, 1e-06  ;;  %v3584_v8 = vmul.f32 0.14285715, %v14290_v45 }
 0x901   : > { %v14292_v12 = vld [vmem:[#allocation49_spill] sm:$0xff] }
 0x902   : > { %5541 = vadd.xlane.f32.xlu0 %v5540_v46  ;;  %v12296_v50 = vpop.permute.xlu0 %6436  ;;  %v3618_v46 = vmax.f32 %v3578_v61, 1e-06  ;;  %8670 = vlog2.f32 %v3656_v2  ;;  %v3657_v59 = vmin.f32 %v3617_v42, 1000000.0  ;;  %v14291_v61 = vld [vmem:[#allocation48_spill] sm:$0xff]  ;;  %v6576_v2 = vsel %vm2116_vm12, %v12214_v41, 0.0 }
 0x903   : > { %8672 = vlog2.f32 %v3651_v30  ;;  %v3581_v53 = vmul.f32 0.14285715, %v14291_v61  ;;  %v3624_v60 = vmax.f32 %v3584_v8, 1e-06  ;;  %v3586_v14 = vmul.f32 0.14285715, %v14292_v12 }
 0x904   : > { %5565 = vadd.xlane.f32.xlu1 %v5564_v38  ;;  %v12303_v52 = vpop.permute.xlu1 %6444  ;;  %v3658_v57 = vmin.f32 %v3618_v46, 1000000.0  ;;  %v12345_v30 = vmul.f32 0.6931472, %v8667_v49  ;;  %v3772_v41 = vld [vmem:[%s14033_s4 + $0x8] sm:$0xff]  ;;  %v5594_v8 = vsel %vm2116_vm12, %v12232_v43, 0.0 }
 0x905   : > { %v3621_v51 = vmax.f32 %v3581_v53, 1e-06  ;;  %v3626_v33 = vmax.f32 %v3586_v14, 1e-06 }
 0x906   : > { %5562 = vadd.xlane.f32.xlu0 %v5561_v18  ;;  %v12310_v38 = vpop.permute.xlu0 %6452  ;;  %v14287_v18 = vld [vmem:[#allocation42_spill] sm:$0xff] }
 0x907   : > { %v3666_v61 = vmin.f32 %v3626_v33, 1000000.0  ;;  %v6540_v33 = vsel %vm3221_vm15, %v12236_v11, 0.0  ;;  %v3777_v11 = vld [vmem:[%s14033_s4 + $0x30] sm:$0xff] }
 0x908   : > { %6550 = vadd.xlane.f32.xlu1 %v6549_v55  ;;  %v3575_v55 = vmul.f32 0.14285715, %v14287_v18  ;;  %v12319_v1 = vpop.permute.xlu1 %6458  ;;  %v8669_v18 = vpop.eup %8668 }
 0x90a   : > { %6535 = vadd.xlane.f32.xlu0 %v6534_v15  ;;  %v3620_v15 = vmax.f32 %v3580_v26, 1e-06  ;;  %v3662_v26 = vmin.f32 %v3622_v54, 1000000.0  ;;  %v14295_v54 = vld [vmem:[#allocation52_spill] sm:$0xff] }
 0x90c   : > { %6562 = vadd.xlane.f32.xlu1 %v6561_v24  ;;  %v5576_v24 = vsel %vm2116_vm12, %v12202_v6, 0.0  ;;  %v3660_v4 = vmin.f32 %v3620_v15, 1000000.0  ;;  %v6537_v6 = vsel %vm2116_vm12, %v12206_v7, 0.0  ;;  %v12329_v62 = vpop.permute.xlu1 %5444  ;;  %v6564_v7 = vsel %vm2116_vm12, %v12210_v47, 0.0 }
 0x90d   : > { %v3664_v47 = vmin.f32 %v3624_v60, 1000000.0  ;;  %v3773_v60 = vld [vmem:[%s14033_s4 + $0x10] sm:$0xff] }
 0x90e   : > { %6559 = vadd.xlane.f32.xlu0 %v6558_v0  ;;  %v3653_v0 = vmin.f32 %v3613_v63, 1000000.0  ;;  %v5558_v63 = vsel %vm3221_vm15, %v12216_v28, 0.0  ;;  %v3661_v28 = vmin.f32 %v3621_v51, 1000000.0 }
 0x910   : > { %5544 = vadd.xlane.f32.xlu1 %v5543_v17  ;;  %v3615_v17 = vmax.f32 %v3575_v55, 1e-06  ;;  %8674 = vlog2.f32 %v3653_v0  ;;  %v12342_v46 = vpop.permute.xlu1 %5460  ;;  %v14293_v55 = vld [vmem:[#allocation50_spill] sm:$0xff] }
 0x911   : > { %8676 = vlog2.f32 %v3658_v57  ;;  %v3583_v15 = vmul.f32 0.14285715, %v14293_v55  ;;  %v3774_v57 = vld [vmem:[%s14033_s4 + $0x18] sm:$0xff]  ;;  %v6555_v55 = vsel %vm3221_vm15, %v12242_v40, 0.0 }
 0x912   : > { %5529 = vadd.xlane.f32.xlu0 %v5528_v29  ;;  %v12323_v29 = vpop.permute.xlu0 %6460  ;;  %v3655_v5 = vmin.f32 %v3615_v17, 1000000.0  ;;  %8678 = vlog2.f32 %v3660_v4  ;;  %v12360_v17 = vmul.f32 0.6931472, %v8669_v18 }
 0x913   : > { %8680 = vlog2.f32 %v3657_v59 }
 0x914   : > { %5568 = vadd.xlane.f32.xlu1 %v5567_v39  ;;  %v3659_v39 = vmin.f32 %v3619_v37, 1000000.0  ;;  %8682 = vlog2.f32 %v3655_v5  ;;  %v3812_v37 = vmul.f32 %v3772_v41, %v12345_v30  ;;  %v12369_v45 = vpop.permute.xlu1 %5468 }
 0x915   : > { %8684 = vlog2.f32 %v3662_v26  ;;  %v3771_v26 = vld [vmem:[%s14033_s4] sm:$0xff] }
 0x916   : > { %5556 = vadd.xlane.f32.xlu0 %v5555_v48  ;;  %v12335_v48 = vpop.permute.xlu0 %5452  ;;  %8686 = vlog2.f32 %v3659_v39  ;;  %v3814_v39 = vmul.f32 %v3774_v57, %v12360_v17 }
 0x917   : > { %8688 = vlog2.f32 %v3664_v47 }
 0x918   : > { %5580 = vadd.xlane.f32.xlu1 %v5579_v56  ;;  %v8671_v56 = vpop.eup %8670  ;;  %8690 = vlog2.f32 %v3661_v28  ;;  %v12414_v57 = vpop.permute.xlu1 %6454 }
 0x919   : > { %v8673_v35 = vpop.eup %8672  ;;  %v12362_v4 = vmul.f32 0.6931472, %v8671_v56  ;;  %v3778_v56 = vld [vmem:[%s14033_s4 + $0x38] sm:$0xff]  ;;  %8692 = vlog2.f32 %v3666_v61  ;;  %v6579_v61 = vsel %vm2116_vm12, %v12252_v36, 0.0 }
 0x91a   : > { %5577 = vadd.xlane.f32.xlu0 %v5576_v24  ;;  %v14294_v24 = vld [vmem:[#allocation51_spill] sm:$0xff]  ;;  %v12353_v42 = vpop.permute.xlu0 %5466  ;;  %v3782_v36 = vld [vmem:[%s14033_s4 + $0x58] sm:$0xff] }
 0x91b   : > { %v3588_v0 = vmul.f32 0.14285715, %v14294_v24 }
 0x91c   : > { %6553 = vadd.xlane.f32.xlu1 %v6552_v16  ;;  %v3623_v16 = vmax.f32 %v3583_v15, 1e-06 }
 0x91d   : > { %v8675_v20 = vpop.eup %8674  ;;  %v3628_v53 = vmax.f32 %v3588_v0, 1e-06 }
 0x91e   : > { %6538 = vadd.xlane.f32.xlu0 %v6537_v6  ;;  %v3585_v6 = vmul.f32 0.14285715, %v14295_v54  ;;  %v8677_v59 = vpop.eup %8676  ;;  %v12384_v43 = vmul.f32 0.6931472, %v8675_v20  ;;  %v3663_v49 = vmin.f32 %v3623_v16, 1000000.0  ;;  %v12390_v14 = vpop.permute.xlu0 %6446 }
 0x91f   : > { %v8679_v5 = vpop.eup %8678  ;;  %v12395_v47 = vmul.f32 0.6931472, %v8677_v59  ;;  %v3668_v28 = vmin.f32 %v3628_v53, 1000000.0 }
 0x920   : > { %6574 = vadd.xlane.f32.xlu1 %v6573_v19  ;;  %v5591_v19 = vsel %vm2116_vm12, %v12228_v32, 0.0  ;;  %v8681_v51 = vpop.eup %8680  ;;  %v3780_v32 = vld [vmem:[%s14033_s4 + $0x48] sm:$0xf]  ;;  %v3625_v12 = vmax.f32 %v3585_v6, 1e-06  ;;  %v3813_v40 = vmul.f32 %v3773_v60, %v12384_v43  ;;  %8694 = vlog2.f32 %v3663_v49 }
 0x921   : > { %v12397_v18 = vmul.f32 0.6931472, %v8679_v5  ;;  %v8683_v15 = vpop.eup %8682  ;;  %v14297_v6 = vld [vmem:[#allocation54_spill] sm:$0xff]  ;;  %8696 = vlog2.f32 %v3668_v28 }
 0x922   : > { %6565 = vadd.xlane.f32.xlu0 %v6564_v7  ;;  %v12378_v7 = vmul.f32 0.6931472, %v8673_v35  ;;  %v8685_v24 = vpop.eup %8684  ;;  %v12412_v35 = vmul.f32 0.6931472, %v8681_v51  ;;  %v3665_v54 = vmin.f32 %v3625_v12, 1000000.0 }
 0x923   : > { %v8687_v20 = vpop.eup %8686  ;;  %v3587_v59 = vmul.f32 0.14285715, %v14297_v6  ;;  %v3820_v5 = vmul.f32 %v3780_v32, %v12397_v18  ;;  %v12430_v53 = vmul.f32 0.6931472, %v8685_v24  ;;  %v14298_v32 = vld [vmem:[#allocation55_spill] sm:$0xff]  ;;  %v12453_v24 = vpop.permute.xlu1 %6468  ;;  %v6588_v6 = vsel %vm2116_vm12, %v12256_v22, 0.0 }
 0x924   : > { %5559 = vadd.xlane.f32.xlu1 %v5558_v63  ;;  %v3816_v63 = vmul.f32 %v3776_v21, %v12362_v4  ;;  %v3811_v0 = vmul.f32 %v3771_v26, %v12378_v7  ;;  %v12424_v21 = vmul.f32 0.6931472, %v8683_v15  ;;  %v12432_v26 = vpop.permute.xlu0 %6462  ;;  %v3817_v51 = vmul.f32 %v3777_v11, %v12412_v35  ;;  %v8689_v12 = vpop.eup %8688 }
 0x925   : > { %v3592_v49 = vmul.f32 0.14285715, %v14298_v32  ;;  %8698 = vlog2.f32 %v3665_v54  ;;  %v3627_v15 = vmax.f32 %v3587_v59, 1e-06  ;;  %v3822_v11 = vmul.f32 %v3782_v36, %v12430_v53  ;;  %v14302_v32 = vld [vmem:[#allocation57_spill] sm:$0xff] }
 0x926   : > { %6577 = vadd.xlane.f32.xlu0 %v6576_v2  ;;  %v12393_v2 = vsel %vm3851_vm0, %v3812_v37, 0.0  ;;  %v3853_v16 = vsel %vm3851_vm0, %v3816_v63, 0.0  ;;  %v3775_v37 = vld [vmem:[%s14033_s4 + $0x20] sm:$0xf]  ;;  %v3852_v60 = vsel %vm3851_vm0, %v3811_v0, 0.0  ;;  %v6591_v0 = vsel %vm2116_vm12, %v12262_v9, 0.0 }
 0x927   : > { %v12438_v63 = vmul.f32 0.6931472, %v8687_v20  ;;  %v8691_v20 = vpop.eup %8690  ;;  %v3632_v9 = vmax.f32 %v3592_v49, 1e-06 }
 0x928   : > { %5583 = vadd.xlane.f32.xlu1 %v5582_v3  ;;  %v14296_v3 = vld [vmem:[#allocation53_spill] sm:$0xff]  ;;  %v12471_v22 = vpop.permute.xlu0 %6470  ;;  %v12474_v36 = vmul.f32 0.6931472, %v8691_v20  ;;  %v14303_v20 = vld [vmem:[#allocation59_spill] sm:$0xff] }
 0x929   : > { %v3590_v41 = vmul.f32 0.14285715, %v14296_v3  ;;  %v3882_v3 = vsel %vm3851_vm0, %v3813_v40, 0.0  ;;  %v3868_v40 = vsel %vm3851_vm0, %v3817_v51, 0.0 }
 0x92a   : > { %5571 = vadd.xlane.f32.xlu0 %v5570_v44  ;;  %v12409_v44 = vsel %vm3851_vm0, %v3814_v39, 0.0  ;;  %v6567_v39 = vsel %vm2116_vm12, %v12248_v13, 0.0  ;;  %v3779_v13 = vld [vmem:[%s14033_s4 + $0x40] sm:$0xff]  ;;  %v3869_v49 = vadd.f32 %v3868_v40, %v12393_v2  ;;  %v3596_v2 = vmul.f32 0.14285715, %v14303_v20  ;;  %v14304_v40 = vld [vmem:[#allocation60_spill] sm:$0xff] }
 0x92b   : > { %v3819_v59 = vmul.f32 %v3779_v13, %v12438_v63  ;;  %v3594_v13 = vmul.f32 0.14285715, %v14302_v32  ;;  %v14308_v20 = vld [vmem:[#allocation61_spill] sm:$0xff] }
 0x92c   : > { %5595 = vadd.xlane.f32.xlu1 %v5594_v8  ;;  %v3818_v8 = vmul.f32 %v3778_v56, %v12395_v47  ;;  %v14299_v56 = vld [vmem:[#allocation56_spill] sm:$0xff] }
 0x92d   : > { %v3589_v28 = vmul.f32 0.14285715, %v14299_v56  ;;  %v3634_v32 = vmax.f32 %v3594_v13, 1e-06 }
 0x92e   : > { %5592 = vadd.xlane.f32.xlu0 %v5591_v19  ;;  %v3630_v19 = vmax.f32 %v3590_v41, 1e-06  ;;  %v3815_v41 = vmul.f32 %v3775_v37, %v12424_v21  ;;  %v3784_v37 = vld [vmem:[%s14033_s4 + $0x68] sm:$0xff] }
 0x930   : > { %6556 = vadd.xlane.f32.xlu1 %v6555_v55  ;;  %v12444_v55 = vadd.f32 %v3853_v16, %v3852_v60  ;;  %v3914_v16 = vsel %vm3912_vm1, %v3820_v5, 0.0  ;;  %v3670_v54 = vmin.f32 %v3630_v19, 1000000.0  ;;  %v3629_v19 = vmax.f32 %v3589_v28, 1e-06  ;;  %v3781_v28 = vld [vmem:[%s14033_s4 + $0x50] sm:$0xff] }
 0x931   : > { %v3913_v51 = vsel %vm3912_vm1, %v3815_v41, 0.0  ;;  %v8693_v41 = vpop.eup %8692 }
 0x932   : > { %6541 = vadd.xlane.f32.xlu0 %v6540_v33  ;;  %v3883_v33 = vsel %vm3851_vm0, %v3818_v8, 0.0  ;;  %v12466_v8 = vmul.f32 0.6931472, %v8689_v12  ;;  %v5585_v12 = vsel %vm2116_vm12, %v12272_v10, 0.0  ;;  %v12480_v56 = vadd.f32 %v3914_v16, %v3913_v51  ;;  %v12491_v16 = vpop.permute.xlu1 %5454  ;;  %v8695_v51 = vpop.eup %8694 }
 0x933   : > { %v12468_v5 = vadd.f32 %v3883_v33, %v3882_v3  ;;  %v5573_v3 = vsel %vm3221_vm15, %v12268_v23, 0.0  ;;  %v3898_v33 = vsel %vm3851_vm0, %v3819_v59, 0.0  ;;  %v3672_v10 = vmin.f32 %v3632_v9, 1000000.0 }
 0x934   : > { %6580 = vadd.xlane.f32.xlu1 %v6579_v61  ;;  %14300 = vst [vmem:[#allocation19_spill] sm:$0xff] %v12466_v8  ;;  %v3667_v61 = vmin.f32 %v3627_v15, 1000000.0  ;;  %v3870_v15 = vsel %vm3851_vm0, %v3822_v11, 0.0  ;;  %8700 = vlog2.f32 %v3670_v54  ;;  %v3669_v11 = vmin.f32 %v3629_v19, 1000000.0  ;;  %v8697_v19 = vpop.eup %8696 }
 0x935   : > { %v3821_v23 = vmul.f32 %v3781_v28, %v12474_v36  ;;  %v5606_v59 = vsel %vm2116_vm12, %v12282_v31, 0.0  ;;  %v12498_v9 = vadd.f32 %v3870_v15, %v3869_v49  ;;  %v5597_v54 = vsel %vm2116_vm12, %v12276_v34, 0.0 }
 0x936   : > { %6568 = vadd.xlane.f32.xlu0 %v6567_v39  ;;  %v14301_v39 = vld [vmem:[#allocation58_spill] sm:$0xff]  ;;  %8702 = vlog2.f32 %v3667_v61  ;;  %v3786_v61 = vld [vmem:[%s14033_s4 + $0x78] sm:$0xff]  ;;  %v3636_v31 = vmax.f32 %v3596_v2, 1e-06  ;;  %v12511_v49 = vmul.f32 0.6931472, %v8695_v51 }
 0x937   : > { %v3591_v60 = vmul.f32 0.14285715, %v14301_v39  ;;  %v3593_v39 = vmul.f32 0.14285715, %v14304_v40  ;;  %8704 = vlog2.f32 %v3672_v10  ;;  %v3855_v34 = vsel %vm3851_vm0, %v3821_v23, 0.0  ;;  %v12515_v40 = vpop.permute.xlu1 %5470  ;;  %v3783_v2 = vld [vmem:[%s14033_s4 + $0x60] sm:$0xff] }
 0x938   : > { %6592 = vadd.xlane.f32.xlu1 %v6591_v0  ;;  %v3824_v0 = vmul.f32 %v3784_v37, %v12466_v8  ;;  %v3899_v37 = vadd.f32 %v3898_v33, %v12409_v44  ;;  %v14306_v44 = vld [vmem:[#allocation62_spill] sm:$0xff]  ;;  %14307 = vst [vmem:[#allocation17_spill] sm:$0xff] %v12511_v49  ;;  %8706 = vlog2.f32 %v3669_v11  ;;  %v3674_v33 = vmin.f32 %v3634_v32, 1000000.0 }
 0x939   : > { %v3595_v13 = vmul.f32 0.14285715, %v14306_v44  ;;  %v3633_v28 = vmax.f32 %v3593_v39, 1e-06  ;;  %v6570_v10 = vsel %vm3221_vm15, %v12296_v50, 0.0  ;;  %v5609_v23 = vsel %vm2116_vm12, %v12290_v27, 0.0 }
 0x93a   : > { %6589 = vadd.xlane.f32.xlu0 %v6588_v6  ;;  %v3631_v6 = vmax.f32 %v3591_v60, 1e-06  ;;  %v3900_v60 = vsel %vm3851_vm0, %v3824_v0, 0.0  ;;  %v3598_v0 = vmul.f32 0.14285715, %v14308_v20  ;;  %v14310_v44 = vld [vmem:[#allocation64_spill] sm:$0xff]  ;;  %v12532_v20 = vadd.f32 %v3855_v34, %v12444_v55 }
 0x93b   : > { %v12523_v11 = vmul.f32 0.6931472, %v8697_v19  ;;  %v12528_v32 = vadd.f32 %v3900_v60, %v3899_v37  ;;  %v3597_v50 = vmul.f32 0.14285715, %v14310_v44  ;;  %v3673_v19 = vmin.f32 %v3633_v28, 1000000.0 }
 0x93c   : > { %5586 = vadd.xlane.f32.xlu1 %v5585_v12  ;;  %v12500_v12 = vmul.f32 0.6931472, %v8693_v41  ;;  %v3671_v15 = vmin.f32 %v3631_v6, 1000000.0  ;;  %v8699_v41 = vpop.eup %8698  ;;  %v14309_v6 = vld [vmem:[#allocation63_spill] sm:$0xff]  ;;  %v3823_v27 = vmul.f32 %v3783_v2, %v12511_v49  ;;  %v14312_v37 = vld [vmem:[#allocation68_spill] sm:$0xff] }
 0x93d   : > { %v3600_v39 = vmul.f32 0.14285715, %v14309_v6  ;;  %v12534_v25 = vmul.f32 0.6931472, %v8699_v41  ;;  %v3601_v60 = vmul.f32 0.14285715, %v14312_v37 }
 0x93e   : > { %5574 = vadd.xlane.f32.xlu0 %v5573_v3  ;;  %14305 = vst [vmem:[#allocation16_spill] sm:$0xff] %v12500_v12  ;;  %v12502_v3 = vpop.permute.xlu0 %5462  ;;  %v3826_v51 = vmul.f32 %v3786_v61, %v12500_v12  ;;  %v14311_v61 = vld [vmem:[#allocation65_spill] sm:$0xff]  ;;  %v14313_v55 = vld [vmem:[#allocation66_spill] sm:$0xff]  ;;  %v6582_v28 = vsel %vm2116_vm12, %v12303_v52, 0.0  ;;  %8708 = vlog2.f32 %v3671_v15  ;;  %v3637_v44 = vmax.f32 %v3597_v50, 1e-06 }
 0x93f   : > { %v3602_v58 = vmul.f32 0.14285715, %v14311_v61  ;;  %v3599_v34 = vmul.f32 0.14285715, %v14313_v55  ;;  %v14314_v61 = vld [vmem:[#allocation69_spill] sm:$0xff]  ;;  %8710 = vlog2.f32 %v3674_v33  ;;  %v12553_v55 = vsel %vm3851_vm0, %v3823_v27, 0.0 }
 0x940   : > { %5607 = vadd.xlane.f32.xlu1 %v5606_v59  ;;  %v3676_v59 = vmin.f32 %v3636_v31, 1000000.0  ;;  %v6594_v31 = vsel %vm2116_vm12, %v12310_v38, 0.0  ;;  %v3606_v2 = vmul.f32 0.14285715, %v14314_v61  ;;  %v14315_v38 = vld [vmem:[#allocation67_spill] sm:$0xff] }
 0x941   : > { %v3642_v37 = vmax.f32 %v3602_v58, 1e-06  ;;  %v3604_v12 = vmul.f32 0.14285715, %v14315_v38  ;;  %v8701_v8 = vpop.eup %8700  ;;  %v6606_v15 = vsel %vm2116_vm12, %v12323_v29, 0.0  ;;  %v6603_v58 = vsel %vm2116_vm12, %v12319_v1, 0.0 }
 0x942   : > { %5598 = vadd.xlane.f32.xlu0 %v5597_v54  ;;  %v3635_v54 = vmax.f32 %v3595_v13, 1e-06  ;;  %v12537_v6 = vpop.permute.xlu0 %6456  ;;  %v3857_v13 = vsel %vm3851_vm0, %v3826_v51, 0.0  ;;  %v14316_v51 = vld [vmem:[#allocation74_spill] sm:$0xff]  ;;  %8712 = vlog2.f32 %v3676_v59  ;;  %v3639_v61 = vmax.f32 %v3599_v34, 1e-06 }
 0x943   : > { %8714 = vlog2.f32 %v3673_v19  ;;  %v3677_v33 = vmin.f32 %v3637_v44, 1000000.0  ;;  %v14317_v38 = vld [vmem:[#allocation70_spill] sm:$0xff]  ;;  %v3644_v29 = vmax.f32 %v3604_v12, 1e-06  ;;  %v14318_v1 = vld [vmem:[#allocation71_spill] sm:$0xff] }
 0x944   : > { %6571 = vadd.xlane.f32.xlu1 %v6570_v10  ;;  %v3638_v10 = vmax.f32 %v3598_v0, 1e-06  ;;  %v3675_v41 = vmin.f32 %v3635_v54, 1000000.0  ;;  %v12548_v0 = vpop.permute.xlu1 %6464  ;;  %v8703_v54 = vpop.eup %8702  ;;  %v3603_v27 = vmul.f32 0.14285715, %v14317_v38 }
 0x945   : > { %v5600_v44 = vsel %vm2116_vm12, %v12335_v48, 0.0  ;;  %v5588_v12 = vsel %vm3221_vm15, %v12329_v62, 0.0  ;;  %v3787_v48 = vld [vmem:[%s14033_s4 + $0x80] sm:$0xff]  ;;  %v3684_v62 = vmin.f32 %v3644_v29, 1000000.0 }
 0x946   : > { %5610 = vadd.xlane.f32.xlu0 %v5609_v23  ;;  %v3640_v23 = vmax.f32 %v3600_v39, 1e-06  ;;  %v3607_v39 = vmul.f32 0.14285715, %v14316_v51  ;;  %v3678_v52 = vmin.f32 %v3638_v10, 1000000.0  ;;  %v8705_v10 = vpop.eup %8704  ;;  %8716 = vlog2.f32 %v3675_v41 }
 0x947   : > { %v3646_v51 = vmax.f32 %v3606_v2, 1e-06  ;;  %v8707_v59 = vpop.eup %8706  ;;  %v12570_v2 = vmul.f32 0.6931472, %v8703_v54  ;;  %v3679_v41 = vmin.f32 %v3639_v61, 1000000.0 }
 0x948   : > { %6595 = vadd.xlane.f32.xlu1 %v6594_v31  ;;  %v3641_v31 = vmax.f32 %v3601_v60, 1e-06  ;;  %v3680_v50 = vmin.f32 %v3640_v23, 1000000.0  ;;  %v3682_v60 = vmin.f32 %v3642_v37, 1000000.0  ;;  %8718 = vlog2.f32 %v3678_v52  ;;  %v12566_v19 = vpop.permute.xlu1 %6478 }
 0x949   : > { %v3647_v49 = vmax.f32 %v3607_v39, 1e-06  ;;  %v3785_v23 = vld [vmem:[%s14033_s4 + $0x70] sm:$0xf]  ;;  %v3643_v37 = vmax.f32 %v3603_v27, 1e-06 }
 0x94a   : > { %6583 = vadd.xlane.f32.xlu0 %v6582_v28  ;;  %v12557_v28 = vpop.permute.xlu0 %6472  ;;  %v3681_v34 = vmin.f32 %v3641_v31, 1000000.0  ;;  %8720 = vlog2.f32 %v3680_v50  ;;  %v3686_v39 = vmin.f32 %v3646_v51, 1000000.0  ;;  %v14319_v52 = vld [vmem:[#allocation72_spill] sm:$0xff]  ;;  %v14320_v50 = vld [vmem:[#allocation75_spill] sm:$0xff]  ;;  %v3825_v51 = vmul.f32 %v3785_v23, %v12534_v25 }
 0x94b   : > { %8722 = vlog2.f32 %v3677_v33  ;;  %v3605_v31 = vmul.f32 0.14285715, %v14319_v52  ;;  %v3687_v54 = vmin.f32 %v3647_v49, 1000000.0  ;;  %v3609_v61 = vmul.f32 0.14285715, %v14320_v50 }
 0x94c   : > { %6607 = vadd.xlane.f32.xlu1 %v6606_v15  ;;  %v3608_v15 = vmul.f32 0.14285715, %v14318_v1  ;;  %8724 = vlog2.f32 %v3682_v60  ;;  %v5621_v27 = vsel %vm2116_vm12, %v12353_v42, 0.0  ;;  %v5612_v49 = vsel %vm2116_vm12, %v12342_v46, 0.0  ;;  %v3790_v29 = vld [vmem:[%s14033_s4 + $0x98] sm:$0xf]  ;;  %v8709_v1 = vpop.eup %8708 }
 0x94d   : > { %8726 = vlog2.f32 %v3681_v34  ;;  %v3827_v60 = vmul.f32 %v3787_v48, %v12570_v2  ;;  %v3683_v42 = vmin.f32 %v3643_v37, 1000000.0  ;;  %v3645_v23 = vmax.f32 %v3605_v31, 1e-06  ;;  %v12598_v34 = vpop.permute.xlu1 %5464  ;;  %v3792_v52 = vld [vmem:[%s14033_s4 + $0xa8] sm:$0xff] }
 0x94e   : > { %6604 = vadd.xlane.f32.xlu0 %v6603_v58  ;;  %v12576_v58 = vadd.f32 %v3857_v13, %v12532_v20  ;;  %v12582_v38 = vpop.permute.xlu0 %6480  ;;  %v3648_v33 = vmax.f32 %v3608_v15, 1e-06  ;;  %v3788_v20 = vld [vmem:[%s14033_s4 + $0x88] sm:$0xff]  ;;  %v12590_v13 = vmul.f32 0.6931472, %v8701_v8  ;;  %8728 = vlog2.f32 %v3679_v41  ;;  %v14322_v15 = vld [vmem:[#allocation73_spill] sm:$0xff]  ;;  %v8711_v41 = vpop.eup %8710 }
 0x94f   : > { %8730 = vlog2.f32 %v3686_v39  ;;  %v12600_v8 = vmul.f32 0.6931472, %v8705_v10  ;;  %v3649_v46 = vmax.f32 %v3609_v61, 1e-06  ;;  %v6585_v39 = vsel %vm3221_vm15, %v12390_v14, 0.0  ;;  %v8713_v61 = vpop.eup %8712 }
 0x950   : > { %5601 = vadd.xlane.f32.xlu1 %v5600_v44  ;;  %8732 = vlog2.f32 %v3687_v54  ;;  %v3610_v44 = vmul.f32 0.14285715, %v14322_v15  ;;  %v3688_v37 = vmin.f32 %v3648_v33, 1000000.0  ;;  %v3886_v10 = vadd.f32 %v12553_v55, %v12468_v5  ;;  %v8715_v55 = vpop.eup %8714 }
 0x951   : > { %14321 = vst [vmem:[#allocation23_spill] sm:$0xff] %v12600_v8  ;;  %8734 = vlog2.f32 %v3684_v62  ;;  %v3828_v31 = vmul.f32 %v3788_v20, %v12523_v11  ;;  %v3830_v48 = vmul.f32 %v3790_v29, %v12590_v13  ;;  %v5624_v50 = vsel %vm2116_vm12, %v12369_v45, 0.0  ;;  %v3791_v20 = vld [vmem:[%s14033_s4 + $0xa0] sm:$0xff] }
 0x952   : > { %5589 = vadd.xlane.f32.xlu0 %v5588_v12  ;;  %v12603_v12 = vmul.f32 0.6931472, %v8707_v59  ;;  %v3789_v59 = vld [vmem:[%s14033_s4 + $0x90] sm:$0xff]  ;;  %v12617_v54 = vpop.permute.xlu0 %5472  ;;  %v3916_v14 = vsel %vm3912_vm1, %v3825_v51, 0.0  ;;  %v12622_v62 = vmul.f32 0.6931472, %v8709_v1  ;;  %8736 = vlog2.f32 %v3683_v42  ;;  %v12632_v42 = vpop.permute.xlu1 %6466 }
 0x953   : > { %v3685_v5 = vmin.f32 %v3645_v23, 1000000.0  ;;  %v3872_v33 = vsel %vm3851_vm0, %v3827_v60, 0.0  ;;  %v3689_v45 = vmin.f32 %v3649_v46, 1000000.0  ;;  %v8717_v29 = vpop.eup %8716  ;;  %8738 = vlog2.f32 %v3688_v37 }
 0x954   : > { %5622 = vadd.xlane.f32.xlu1 %v5621_v27  ;;  %v3832_v27 = vmul.f32 %v3792_v52, %v12600_v8  ;;  %v3829_v15 = vmul.f32 %v3789_v59, %v12603_v12  ;;  %v12630_v51 = vmul.f32 0.6931472, %v8711_v41  ;;  %v6609_v23 = vsel %vm2116_vm12, %v12432_v26, 0.0 }
 0x955   : > { %v8719_v60 = vpop.eup %8718  ;;  %v3917_v1 = vadd.f32 %v3916_v14, %v12480_v56  ;;  %v3887_v52 = vsel %vm3851_vm0, %v3828_v31, 0.0  ;;  %v6597_v46 = vsel %vm2116_vm12, %v12414_v57, 0.0  ;;  %v3873_v37 = vadd.f32 %v3872_v33, %v12498_v9 }
 0x956   : > { %5613 = vadd.xlane.f32.xlu0 %v5612_v49  ;;  %v3650_v49 = vmax.f32 %v3610_v44, 1e-06  ;;  %14323 = vst [vmem:[#allocation22_spill] sm:$0xff] %v12630_v51  ;;  %v3794_v44 = vld [vmem:[%s14033_s4 + $0xb8] sm:$0xff]  ;;  %v3831_v26 = vmul.f32 %v3791_v20, %v12622_v62  ;;  %v12646_v59 = vmul.f32 0.6931472, %v8713_v61  ;;  %8740 = vlog2.f32 %v3685_v5  ;;  %v12654_v14 = vpop.permute.xlu0 %6474 }
 0x957   : > { %v8721_v41 = vpop.eup %8720  ;;  %v3874_v31 = vsel %vm3851_vm0, %v3832_v27, 0.0  ;;  %8742 = vlog2.f32 %v3689_v45  ;;  %v3902_v33 = vsel %vm3851_vm0, %v3829_v15, 0.0  ;;  %v3834_v61 = vmul.f32 %v3794_v44, %v12630_v51  ;;  %v3793_v5 = vld [vmem:[%s14033_s4 + $0xb0] sm:$0xff]  ;;  %v3795_v45 = vld [vmem:[%s14033_s4 + $0xc0] sm:$0xf] }
 0x958   : > { %6586 = vadd.xlane.f32.xlu1 %v6585_v39  ;;  %v3918_v39 = vsel %vm3912_vm1, %v3830_v48, 0.0  ;;  %14324 = vst [vmem:[#allocation25_spill] sm:$0xff] %v12646_v59  ;;  %v8723_v56 = vpop.eup %8722  ;;  %v12649_v48 = vmul.f32 0.6931472, %v8715_v55  ;;  %v3690_v57 = vmin.f32 %v3650_v49, 1000000.0 }
 0x959   : > { %v8725_v9 = vpop.eup %8724  ;;  %v12661_v27 = vmul.f32 0.6931472, %v8717_v29  ;;  %v6621_v55 = vsel %vm2116_vm12, %v12471_v22, 0.0  ;;  %v12667_v49 = vadd.f32 %v3918_v39, %v3917_v1  ;;  %v12672_v15 = vmul.f32 0.6931472, %v8719_v60  ;;  %v3798_v1 = vld [vmem:[%s14033_s4 + $0xd8] sm:$0xff]  ;;  %v12685_v39 = vpop.permute.xlu1 %6482 }
 0x95a   : > { %5625 = vadd.xlane.f32.xlu0 %v5624_v50  ;;  %v3796_v50 = vld [vmem:[%s14033_s4 + $0xc8] sm:$0xff]  ;;  %v8727_v20 = vpop.eup %8726  ;;  %v6618_v44 = vsel %vm2116_vm12, %v12453_v24, 0.0  ;;  %v3859_v22 = vsel %vm3851_vm0, %v3831_v26, 0.0  ;;  %v3903_v24 = vadd.f32 %v3902_v33, %v12528_v32  ;;  %v12692_v26 = vmul.f32 0.6931472, %v8725_v9  ;;  %v12715_v51 = vpop.permute.xlu0 %5474 }
 0x95b   : > { %14325 = vst [vmem:[#allocation18_spill] sm:$0xff] %v12661_v27  ;;  %14326 = vst [vmem:[#allocation21_spill] sm:$0xff] %v12672_v15  ;;  %v8729_v29 = vpop.eup %8728  ;;  %8744 = vlog2.f32 %v3690_v57  ;;  %v5615_v32 = vsel %vm2116_vm12, %v12502_v3, 0.0  ;;  %v3838_v9 = vmul.f32 %v3798_v1, %v12672_v15  ;;  %v3800_v57 = vld [vmem:[%s14033_s4 + $0xe8] sm:$0xf] }
 0x95c   : > { %6610 = vadd.xlane.f32.xlu1 %v6609_v23  ;;  %v12665_v23 = vadd.f32 %v3887_v52, %v3886_v10  ;;  %v3836_v10 = vmul.f32 %v3796_v50, %v12646_v59  ;;  %v12683_v52 = vmul.f32 0.6931472, %v8723_v56  ;;  %v8731_v60 = vpop.eup %8730  ;;  %14327 = vst [vmem:[#allocation20_spill] sm:$0xff] %v12692_v26  ;;  %v3904_v50 = vsel %vm3851_vm0, %v3834_v61, 0.0 }
 0x95d   : > { %v3835_v56 = vmul.f32 %v3795_v45, %v12661_v27  ;;  %v12699_v59 = vmul.f32 0.6931472, %v8727_v20  ;;  %v12708_v61 = vmul.f32 0.6931472, %v8721_v41  ;;  %v3801_v45 = vld [vmem:[%s14033_s4 + $0xf0] sm:$0xff]  ;;  %v5603_v20 = vsel %vm3221_vm15, %v12491_v16, 0.0 }
 0x95e   : > { %6598 = vadd.xlane.f32.xlu0 %v6597_v46  ;;  %v12676_v46 = vadd.f32 %v3874_v31, %v3873_v37  ;;  %v3797_v37 = vld [vmem:[%s14033_s4 + $0xd0] sm:$0xff]  ;;  %v8733_v31 = vpop.eup %8732  ;;  %v3861_v3 = vsel %vm3851_vm0, %v3836_v10, 0.0  ;;  %v12721_v1 = vmul.f32 0.6931472, %v8731_v60  ;;  %v3905_v15 = vadd.f32 %v3904_v50, %v3903_v24  ;;  %v3799_v16 = vld [vmem:[%s14033_s4 + $0xe0] sm:$0xff]  ;;  %v3806_v10 = vld [vmem:[%s14033_s4 + $0x118] sm:$0xff]  ;;  %v12742_v50 = vpop.permute.xlu1 %6476 }
 0x95f   : > { %14328 = vst [vmem:[#allocation27_spill] sm:$0xff] %v12699_v59  ;;  %v8735_v33 = vpop.eup %8734  ;;  %14329 = vst [vmem:[#allocation24_spill] sm:$0xff] %v12708_v61  ;;  %v3841_v60 = vmul.f32 %v3801_v45, %v12699_v59  ;;  %v3807_v24 = vld [vmem:[%s14033_s4 + $0x120] sm:$0xff] }
 0x960   : > { %6622 = vadd.xlane.f32.xlu1 %v6621_v55  ;;  %v3833_v55 = vmul.f32 %v3793_v5, %v12649_v48  ;;  %v3860_v5 = vadd.f32 %v3859_v22, %v12576_v58  ;;  %v3837_v58 = vmul.f32 %v3797_v37, %v12683_v52  ;;  %v12719_v22 = vmul.f32 0.6931472, %v8729_v29  ;;  %14330 = vst [vmem:[#allocation26_spill] sm:$0xff] %v12721_v1  ;;  %v8737_v41 = vpop.eup %8736 }
 0x961   : > { %v12731_v37 = vmul.f32 0.6931472, %v8733_v31  ;;  %v3920_v29 = vsel %vm3912_vm1, %v3835_v56, 0.0  ;;  %v3891_v31 = vsel %vm3851_vm0, %v3838_v9, 0.0  ;;  %v3804_v56 = vld [vmem:[%s14033_s4 + $0x108] sm:$0xff] }
 0x962   : > { %6619 = vadd.xlane.f32.xlu0 %v6618_v44  ;;  %v3802_v44 = vld [vmem:[%s14033_s4 + $0xf8] sm:$0xff]  ;;  %v3889_v27 = vsel %vm3851_vm0, %v3833_v55, 0.0  ;;  %v6600_v55 = vsel %vm3221_vm15, %v12537_v6, 0.0  ;;  %v3876_v45 = vsel %vm3851_vm0, %v3837_v58, 0.0  ;;  %v3839_v6 = vmul.f32 %v3799_v16, %v12719_v22 }
 0x963   : > { %v3842_v8 = vmul.f32 %v3802_v44, %v12692_v26  ;;  %14331 = vst [vmem:[#allocation30_spill] sm:$0xff] %v12731_v37  ;;  %v8739_v44 = vpop.eup %8738  ;;  %v3840_v26 = vmul.f32 %v3800_v57, %v12708_v61  ;;  %v12753_v59 = vmul.f32 0.6931472, %v8737_v41  ;;  %v3890_v57 = vadd.f32 %v3889_v27, %v12665_v23 }
 0x964   : > { %5616 = vadd.xlane.f32.xlu1 %v5615_v32  ;;  %v12735_v32 = vmul.f32 0.6931472, %v8735_v33  ;;  %v5627_v33 = vsel %vm2116_vm12, %v12515_v40, 0.0  ;;  %v8741_v9 = vpop.eup %8740  ;;  %v3803_v40 = vld [vmem:[%s14033_s4 + $0x100] sm:$0xff]  ;;  %v3847_v58 = vmul.f32 %v3807_v24, %v12731_v37  ;;  %v3863_v16 = vsel %vm3851_vm0, %v3841_v60, 0.0 }
 0x965   : > { %v3878_v61 = vsel %vm3851_vm0, %v3842_v8, 0.0  ;;  %v8743_v41 = vpop.eup %8742  ;;  %v6624_v27 = vsel %vm2116_vm12, %v12557_v28, 0.0  ;;  %v3892_v23 = vadd.f32 %v3891_v31, %v3890_v57  ;;  %v3877_v8 = vadd.f32 %v3876_v45, %v12676_v46  ;;  %v12783_v31 = vpop.permute.xlu1 %6486  ;;  %v3805_v45 = vld [vmem:[%s14033_s4 + $0x110] sm:$0xf] }
 0x966   : > { %5604 = vadd.xlane.f32.xlu0 %v5603_v20  ;;  %14332 = vst [vmem:[#allocation28_spill] sm:$0xff] %v12735_v32  ;;  %v3862_v20 = vadd.f32 %v3861_v3, %v3860_v5  ;;  %v3846_v5 = vmul.f32 %v3806_v10, %v12721_v1  ;;  %v3921_v3 = vadd.f32 %v3920_v29, %v12667_v49  ;;  %v3922_v49 = vsel %vm3912_vm1, %v3840_v26, 0.0  ;;  %v3808_v29 = vld [vmem:[%s14033_s4 + $0x128] sm:$0xff] }
 0x967   : > { %v3844_v10 = vmul.f32 %v3804_v56, %v12735_v32  ;;  %v6612_v24 = vsel %vm2116_vm12, %v12548_v0, 0.0  ;;  %v3906_v60 = vsel %vm3851_vm0, %v3839_v6, 0.0  ;;  %v12781_v28 = vmul.f32 0.6931472, %v8741_v9  ;;  %v3809_v9 = vld [vmem:[%s14033_s4 + $0x130] sm:$0xff] }
 0x968   : > { %6601 = vadd.xlane.f32.xlu1 %v6600_v55  ;;  %v12763_v55 = vpop.permute.xlu0 %6484  ;;  %v3865_v56 = vsel %vm3851_vm0, %v3846_v5, 0.0  ;;  %v3879_v46 = vadd.f32 %v3878_v61, %v3877_v8  ;;  %v3864_v26 = vadd.f32 %v3863_v16, %v3862_v20  ;;  %v3880_v0 = vsel %vm3851_vm0, %v3847_v58, 0.0 }
 0x969   : > { %14334 = vst [vmem:[#allocation33_spill] sm:$0xff] %v12781_v28  ;;  %v12789_v57 = vmul.f32 0.6931472, %v8743_v41  ;;  %v6636_v61 = vsel %vm2116_vm12, %v12582_v38, 0.0  ;;  %v3923_v16 = vadd.f32 %v3922_v49, %v3921_v3  ;;  %v3907_v8 = vadd.f32 %v3906_v60, %v3905_v15 }
 0x96a   : > { %5628 = vadd.xlane.f32.xlu0 %v5627_v33  ;;  %v12767_v33 = vmul.f32 0.6931472, %v8739_v44  ;;  %v3843_v44 = vmul.f32 %v3803_v40, %v12753_v59  ;;  %v3908_v40 = vsel %vm3851_vm0, %v3844_v10, 0.0  ;;  %v6633_v58 = vsel %vm2116_vm12, %v12566_v19, 0.0 }
 0x96b   : > { %v3845_v10 = vmul.f32 %v3805_v45, %v12781_v28  ;;  %v3909_v37 = vadd.f32 %v3908_v40, %v3907_v8  ;;  %v3849_v38 = vmul.f32 %v3809_v9, %v12789_v57  ;;  %v5630_v19 = vsel %vm2116_vm12, %v12617_v54, 0.0 }
 0x96c   : > { %14333 = vst [vmem:[#allocation32_spill] sm:$0xff] %v12767_v33  ;;  %6625 = vadd.xlane.f32.xlu1 %v6624_v27  ;;  %v8745_v27 = vpop.eup %8744  ;;  %v3848_v5 = vmul.f32 %v3808_v29, %v12767_v33  ;;  %v3893_v41 = vsel %vm3851_vm0, %v3843_v44, 0.0  ;;  %v3881_v29 = vadd.f32 %v3880_v0, %v3879_v46  ;;  %v5618_v45 = vsel %vm3221_vm15, %v12598_v34, 0.0 }
 0x96d   : > { %v12802_v32 = vmul.f32 0.6931472, %v8745_v27  ;;  %v3910_v27 = vsel %vm3851_vm0, %v3849_v38, 0.0  ;;  %v6627_v34 = vsel %vm2116_vm12, %v12654_v14, 0.0 }
 0x96e   : > { %6613 = vadd.xlane.f32.xlu0 %v6612_v24  ;;  %v3866_v24 = vadd.f32 %v3865_v56, %v3864_v26  ;;  %v3895_v49 = vsel %vm3851_vm0, %v3848_v5, 0.0  ;;  %v3894_v56 = vadd.f32 %v3893_v41, %v3892_v23  ;;  %v3810_v26 = vld [vmem:[%s14033_s4 + $0x138] sm:$0xf] }
 0x96f   : > { %v5518_v6 = vpop.xlane.xlu0 %5517  ;;  %14335 = vst [vmem:[#allocation29_spill] sm:$0xff] %v12802_v32 }
 0x970   : > { %v5636_v20 = vmul.f32 0.14285715, %v5518_v6  ;;  %6637 = vadd.xlane.f32.xlu1 %v6636_v61  ;;  %v3928_v46 = vsel %vm3851_vm0, %v3866_v24, 0.0  ;;  %v3929_v6 = vsel %vm3851_vm0, %v3881_v29, 0.0  ;;  %v3896_v23 = vadd.f32 %v3895_v49, %v3894_v56 }
 0x971   : > { %v5521_v1 = vpop.xlane.xlu1 %5520  ;;  %v3850_v61 = vmul.f32 %v3810_v26, %v12802_v32  ;;  %v3930_v24 = vadd.f32 %v3929_v6, %v3928_v46 }
 0x972   : > { %v5676_v33 = vmax.f32 %v5636_v20, 1e-06  ;;  %6634 = vadd.xlane.f32.xlu0 %v6633_v58  ;;  %v5637_v3 = vmul.f32 0.14285715, %v5521_v1  ;;  %v3924_v1 = vsel %vm3912_vm1, %v3845_v10, 0.0  ;;  %v6615_v58 = vsel %vm3221_vm15, %v12632_v42, 0.0 }
 0x973   : > { %v5533_v15 = vpop.xlane.xlu0 %5532  ;;  %v3911_v10 = vadd.f32 %v3910_v27, %v3909_v37  ;;  %v6639_v37 = vsel %vm2116_vm12, %v12685_v39, 0.0  ;;  %v6630_v39 = vsel %vm3221_vm15, %v12742_v50, 0.0  ;;  %v6645_v50 = vsel %vm3221_vm15, %v12783_v31, 0.0 }
 0x974   : > { %v5716_v60 = vmin.f32 %v5676_v33, 1000000.0  ;;  %v5641_v44 = vmul.f32 0.14285715, %v5533_v15  ;;  %v5677_v0 = vmax.f32 %v5637_v3, 1e-06  ;;  %5631 = vadd.xlane.f32.xlu1 %v5630_v19  ;;  %v3925_v3 = vadd.f32 %v3924_v1, %v3923_v16 }
 0x975   : > { %v5524_v33 = vpop.xlane.xlu1 %5523  ;;  %v3931_v15 = vsel %vm3851_vm0, %v3896_v23, 0.0  ;;  %v3933_v16 = vsel %vm3851_vm0, %v3911_v10, 0.0 }
 0x976   : > { %8746 = vlog2.f32 %v5716_v60  ;;  %v5681_v54 = vmax.f32 %v5641_v44, 1e-06  ;;  %5619 = vadd.xlane.f32.xlu0 %v5618_v45  ;;  %v5717_v40 = vmin.f32 %v5677_v0, 1000000.0  ;;  %v5638_v5 = vmul.f32 0.14285715, %v5524_v33 }
 0x977   : > { %v5536_v9 = vpop.xlane.xlu0 %5535  ;;  %v3926_v60 = vsel %vm3912_vm1, %v3850_v61, 0.0  ;;  %v5633_v44 = vsel %vm3221_vm15, %v12715_v51, 0.0  ;;  %v3932_v46 = vadd.f32 %v3931_v15, %v3930_v24  ;;  %v6642_v51 = vsel %vm2116_vm12, %v12763_v55, 0.0 }
 0x978   : > { %v5721_v20 = vmin.f32 %v5681_v54, 1000000.0  ;;  %v5642_v8 = vmul.f32 0.14285715, %v5536_v9  ;;  %8748 = vlog2.f32 %v5717_v40  ;;  %v5678_v41 = vmax.f32 %v5638_v5, 1e-06  ;;  %6628 = vadd.xlane.f32.xlu1 %v6627_v34 }
 0x979   : > { %v5548_v38 = vpop.xlane.xlu1 %5547  ;;  %v3927_v1 = vadd.f32 %v3926_v60, %v3925_v3  ;;  %v3934_v40 = vadd.f32 %v3933_v16, %v3932_v46 }
 0x97a   : > { %8750 = vlog2.f32 %v5721_v20  ;;  %v5682_v29 = vmax.f32 %v5642_v8, 1e-06  ;;  %6616 = vadd.xlane.f32.xlu0 %v6615_v58  ;;  %v5718_v49 = vmin.f32 %v5678_v41, 1000000.0  ;;  %v5646_v19 = vmul.f32 0.14285715, %v5548_v38 }
 0x97b   : > { %v5539_v14 = vpop.xlane.xlu0 %5538  ;;  %v3935_v20 = vsel %vm3912_vm1, %v3927_v1, 0.0  ;;  %v7554_v38 = vld [vmem:[%s14033_s4 + $0x280] sm:$0xff] }
 0x97c   : > { %v5722_v42 = vmin.f32 %v5682_v29, 1000000.0  ;;  %v5643_v56 = vmul.f32 0.14285715, %v5539_v14  ;;  %8752 = vlog2.f32 %v5718_v49  ;;  %v5686_v26 = vmax.f32 %v5646_v19, 1e-06  ;;  %5634 = vadd.xlane.f32.xlu1 %v5633_v44 }
 0x97d   : > { %v6530_v0 = vpop.xlane.xlu1 %6529  ;;  %v3936_v29 = vadd.f32 %v3935_v20, %v3934_v40  ;;  %v7559_v49 = vld [vmem:[%s14033_s4 + $0x2a8] sm:$0xff] }
 0x97e   : > { %8754 = vlog2.f32 %v5722_v42  ;;  %v5683_v45 = vmax.f32 %v5643_v56, 1e-06  ;;  %6640 = vadd.xlane.f32.xlu0 %v6639_v37  ;;  %v5726_v6 = vmin.f32 %v5686_v26, 1000000.0  ;;  %v6648_v54 = vmul.f32 0.14285715, %v6530_v0 }
 0x97f   : > { %v5551_v33 = vpop.xlane.xlu0 %5550  ;;  %v7555_v37 = vld [vmem:[%s14033_s4 + $0x288] sm:$0xff] }
 0x980   : > { %v5723_v23 = vmin.f32 %v5683_v45, 1000000.0  ;;  %v5647_v27 = vmul.f32 0.14285715, %v5551_v33  ;;  %8756 = vlog2.f32 %v5726_v6  ;;  %v6688_v5 = vmax.f32 %v6648_v54, 1e-06  ;;  %6643 = vadd.xlane.f32.xlu1 %v6642_v51 }
 0x981   : > { %v6545_v61 = vpop.xlane.xlu1 %6544  ;;  %v3937_v45 = vrot.slane %v3936_v29, 4 }
 0x982   : > { %8758 = vlog2.f32 %v5723_v23  ;;  %v5687_v9 = vmax.f32 %v5647_v27, 1e-06  ;;  %6631 = vadd.xlane.f32.xlu0 %v6630_v39  ;;  %v6728_v8 = vmin.f32 %v6688_v5, 1000000.0  ;;  %v6653_v24 = vmul.f32 0.14285715, %v6545_v61 }
 0x983   : > { %v8747_v34 = vpop.eup %8746  ;;  %v6533_v58 = vpop.xlane.xlu0 %6532  ;;  %v7556_v27 = vld [vmem:[%s14033_s4 + $0x290] sm:$0xff] }
 0x984   : > { %v12834_v55 = vmul.f32 0.6931472, %v8747_v34  ;;  %v5727_v41 = vmin.f32 %v5687_v9, 1000000.0  ;;  %v6649_v10 = vmul.f32 0.14285715, %v6533_v58  ;;  %8760 = vlog2.f32 %v6728_v8 }
 0x985   : > { %v6693_v3 = vmax.f32 %v6653_v24, 1e-06  ;;  %v8749_v15 = vpop.eup %8748  ;;  %v5527_v14 = vpop.xlane.xlu1 %5526  ;;  %v7560_v39 = vld [vmem:[%s14033_s4 + $0x2b0] sm:$0xff] }
 0x986   : > { %8762 = vlog2.f32 %v5727_v41  ;;  %v6689_v19 = vmax.f32 %v6649_v10, 1e-06  ;;  %6646 = vadd.xlane.f32.xlu0 %v6645_v50  ;;  %v12844_v44 = vmul.f32 0.6931472, %v8749_v15  ;;  %v5639_v31 = vmul.f32 0.14285715, %v5527_v14 }
 0x987   : > { %v8751_v60 = vpop.eup %8750  ;;  %v6733_v42 = vmin.f32 %v6693_v3, 1000000.0  ;;  %v6548_v56 = vpop.xlane.xlu0 %6547  ;;  %v5877_v46 = vmul.f32 %v7554_v38, %v12834_v55  ;;  %v14336_v24 = vld [vmem:[#allocation76_spill] sm:$0xff]  ;;  %v12869_v10 = vadd.f32 %v3937_v45, %v3936_v29 }
 0x988   : > { %v12850_v26 = vmul.f32 0.6931472, %v8751_v60  ;;  %v6729_v16 = vmin.f32 %v6689_v19, 1000000.0  ;;  %v5679_v0 = vmax.f32 %v5639_v31, 1e-06  ;;  %v5878_v23 = vmul.f32 %v7555_v37, %v12844_v44 }
 0x989   : > { %8764 = vlog2.f32 %v6733_v42  ;;  %v8753_v1 = vpop.eup %8752  ;;  %v6654_v54 = vmul.f32 0.14285715, %v6548_v56  ;;  %v5554_v33 = vpop.xlane.xlu1 %5553  ;;  %v5917_v61 = vsel %vm3851_vm0, %v5877_v46, 0.0  ;;  %v7021_v58 = vsel %vm7020_vm2, %v12378_v7, %v14336_v24  ;;  %v7564_v3 = vld [vmem:[%s14033_s4 + $0x2d0] sm:$0xff]  ;;  %v7561_v29 = vld [vmem:[%s14033_s4 + $0x2b8] sm:$0xff] }
 0x98a   : > { %v5882_v6 = vmul.f32 %v7559_v49, %v12850_v26  ;;  %8766 = vlog2.f32 %v6729_v16  ;;  %v12857_v40 = vmul.f32 0.6931472, %v8753_v1  ;;  %v5719_v5 = vmin.f32 %v5679_v0, 1000000.0 }
 0x98b   : > { %v8755_v51 = vpop.eup %8754  ;;  %v5542_v9 = vpop.xlane.xlu0 %5541  ;;  %v6694_v8 = vmax.f32 %v6654_v54, 1e-06  ;;  %v5648_v49 = vmul.f32 0.14285715, %v5554_v33  ;;  %v5932_v60 = vsel %vm3851_vm0, %v5878_v23, 0.0  ;;  %v7062_v54 = vsel %vm7061_vm3, %v7021_v58, %v12834_v55  ;;  %v7594_v58 = vld [vmem:[%s14033_s4 + $0x3c0] sm:$0xff] }
 0x98c   : > { %v5918_v34 = vsel %vm3851_vm0, %v5882_v6, 0.0  ;;  %v12864_v20 = vmul.f32 0.6931472, %v8755_v51  ;;  %8768 = vlog2.f32 %v5719_v5  ;;  %v5879_v7 = vmul.f32 %v7556_v27, %v12857_v40  ;;  %v7565_v51 = vld [vmem:[%s14033_s4 + $0x2d8] sm:$0xff] }
 0x98d   : > { %v5919_v41 = vadd.f32 %v5918_v34, %v5917_v61  ;;  %v8757_v50 = vpop.eup %8756  ;;  %v6734_v15 = vmin.f32 %v6694_v8, 1000000.0  ;;  %v5566_v19 = vpop.xlane.xlu1 %5565  ;;  %v5644_v31 = vmul.f32 0.14285715, %v5542_v9  ;;  %v5688_v16 = vmax.f32 %v5648_v49, 1e-06 }
 0x98e   : > { %v5883_v38 = vmul.f32 %v7560_v39, %v12864_v20  ;;  %v12877_v42 = vmul.f32 0.6931472, %v8757_v50  ;;  %v5652_v27 = vmul.f32 0.14285715, %v5566_v19  ;;  %v5947_v9 = vsel %vm3851_vm0, %v5879_v7, 0.0 }
 0x98f   : > { %v8759_v14 = vpop.eup %8758  ;;  %v5563_v56 = vpop.xlane.xlu0 %5562  ;;  %8770 = vlog2.f32 %v6734_v15  ;;  %v5684_v1 = vmax.f32 %v5644_v31, 1e-06  ;;  %v5728_v23 = vmin.f32 %v5688_v16, 1000000.0 }
 0x990   : > { %v5933_v46 = vsel %vm3851_vm0, %v5883_v38, 0.0  ;;  %v12883_v37 = vmul.f32 0.6931472, %v8759_v14  ;;  %v5887_v0 = vmul.f32 %v7564_v3, %v12877_v42  ;;  %v14337_v3 = vld [vmem:[#allocation79_spill] sm:$0xff]  ;;  %v14338_v14 = vld [vmem:[#allocation78_spill] sm:$0xff] }
 0x991   : > { %v5934_v45 = vadd.f32 %v5933_v46, %v5932_v60  ;;  %v8761_v6 = vpop.eup %8760  ;;  %v6551_v39 = vpop.xlane.xlu1 %6550  ;;  %v5724_v8 = vmin.f32 %v5684_v1, 1000000.0  ;;  %8772 = vlog2.f32 %v5728_v23  ;;  %v7022_v15 = vsel %vm7020_vm2, %v12345_v30, %v14337_v3  ;;  %v7595_v23 = vld [vmem:[%s14033_s4 + $0x3c8] sm:$0xff] }
 0x992   : > { %v5884_v33 = vmul.f32 %v7561_v29, %v12883_v37  ;;  %v5920_v61 = vsel %vm3851_vm0, %v5887_v0, 0.0  ;;  %v6769_v34 = vmul.f32 0.6931472, %v8761_v6  ;;  %v7026_v60 = vsel %vm7020_vm2, %v12362_v4, %v14338_v14  ;;  %v7599_v29 = vld [vmem:[%s14033_s4 + $0x3e8] sm:$0xff]  ;;  %v14340_v14 = vld [vmem:[#allocation81_spill] sm:$0xff] }
 0x993   : > { %v8763_v5 = vpop.eup %8762  ;;  %v6536_v24 = vpop.xlane.xlu0 %6535  ;;  %v12894_v50 = vadd.f32 %v5920_v61, %v5919_v41  ;;  %8774 = vlog2.f32 %v5724_v8  ;;  %v5692_v31 = vmax.f32 %v5652_v27, 1e-06  ;;  %v5651_v30 = vmul.f32 0.14285715, %v5563_v56 }
 0x994   : > { %v5948_v55 = vsel %vm3851_vm0, %v5884_v33, 0.0  ;;  %v12900_v38 = vmul.f32 0.6931472, %v8763_v5  ;;  %v7103_v19 = vsel %vm7102_vm4, %v7062_v54, %v6769_v34  ;;  %v7063_v0 = vsel %vm7061_vm3, %v7022_v15, %v12844_v44 }
 0x995   : > { %v12905_v49 = vadd.f32 %v5948_v55, %v5947_v9  ;;  %7143 = vst.msk [vmem:[%s9152_s12] sm:$0xff] %vm3851_vm0, %v7103_v19  ;;  %v6563_v46 = vpop.xlane.xlu1 %6562  ;;  %v6889_v1 = vmul.f32 %v7594_v58, %v6769_v34  ;;  %v6655_v54 = vmul.f32 0.14285715, %v6551_v39  ;;  %v7067_v33 = vsel %vm7061_vm3, %v7026_v60, %v12850_v26  ;;  %v14339_v34 = vld [vmem:[#allocation77_spill] sm:$0xff] }
 0x996   : > { %v8765_v41 = vpop.eup %8764  ;;  %v5888_v7 = vmul.f32 %v7565_v51, %v12900_v38  ;;  %v5732_v27 = vmin.f32 %v5692_v31, 1000000.0  ;;  %v5691_v61 = vmax.f32 %v5651_v30, 1e-06  ;;  %v12931_v26 = vsel %vm7020_vm2, %v12384_v43, %v14339_v34  ;;  %v14341_v30 = vld [vmem:[#allocation82_spill] sm:$0xff] }
 0x997   : > { %v8767_v16 = vpop.eup %8766  ;;  %v6779_v6 = vmul.f32 0.6931472, %v8765_v41  ;;  %v6560_v4 = vpop.xlane.xlu0 %6559  ;;  %v6695_v55 = vmax.f32 %v6655_v54, 1e-06  ;;  %v12943_v43 = vsel %vm7020_vm2, %v12395_v47, %v14340_v14  ;;  %v7600_v47 = vld [vmem:[%s14033_s4 + $0x3f0] sm:$0xff] }
 0x998   : > { %v5935_v51 = vsel %vm3851_vm0, %v5888_v7, 0.0  ;;  %v6771_v56 = vmul.f32 0.6931472, %v8767_v16  ;;  %8776 = vlog2.f32 %v5732_v27  ;;  %v5731_v19 = vmin.f32 %v5691_v61, 1000000.0 }
 0x999   : > { %v12925_v5 = vadd.f32 %v5935_v51, %v5934_v45  ;;  %v6894_v44 = vmul.f32 %v7599_v29, %v6779_v6  ;;  %v7108_v9 = vsel %vm7102_vm4, %v7067_v33, %v6779_v6  ;;  %v8769_v39 = vpop.eup %8768  ;;  %v5545_v58 = vpop.xlane.xlu1 %5544  ;;  %v6929_v45 = vsel %vm3851_vm0, %v6889_v1, 0.0 }
 0x99a   : > { %7148 = vst.msk [vmem:[%s9152_s12 + $0x28] sm:$0xff] %vm3851_vm0, %v7108_v9  ;;  %v7104_v8 = vsel %vm7102_vm4, %v7063_v0, %v6771_v56  ;;  %v6890_v15 = vmul.f32 %v7595_v23, %v6771_v56  ;;  %v6735_v7 = vmin.f32 %v6695_v55, 1000000.0  ;;  %v6650_v29 = vmul.f32 0.14285715, %v6536_v24  ;;  %v7557_v0 = vld [vmem:[%s14033_s4 + $0x298] sm:$0xff] }
 0x99b   : > { %v6930_v3 = vsel %vm3851_vm0, %v6894_v44, 0.0  ;;  %7144 = vst.msk [vmem:[%s9152_s12 + $0x8] sm:$0xff] %vm3851_vm0, %v7104_v8  ;;  %v5530_v41 = vpop.xlane.xlu0 %5529  ;;  %v7027_v16 = vsel %vm7020_vm2, %v12412_v35, %v14341_v30  ;;  %v12953_v1 = vmul.f32 0.6931472, %v8769_v39  ;;  %8778 = vlog2.f32 %v5731_v19  ;;  %v7562_v19 = vld [vmem:[%s14033_s4 + $0x2c0] sm:$0xff] }
 0x99c   : > { %v12945_v60 = vadd.f32 %v6930_v3, %v6929_v45  ;;  %v8771_v31 = vpop.eup %8770  ;;  %v6659_v6 = vmul.f32 0.14285715, %v6563_v46  ;;  %8780 = vlog2.f32 %v6735_v7  ;;  %v6690_v24 = vmax.f32 %v6650_v29, 1e-06  ;;  %v7566_v46 = vld [vmem:[%s14033_s4 + $0x2e0] sm:$0xff] }
 0x99d   : > { %v6781_v54 = vmul.f32 0.6931472, %v8771_v31  ;;  %v6658_v33 = vmul.f32 0.14285715, %v6560_v4  ;;  %v5569_v51 = vpop.xlane.xlu1 %5568  ;;  %v7068_v35 = vsel %vm7061_vm3, %v7027_v16, %v12864_v20  ;;  %v6944_v23 = vsel %vm3851_vm0, %v6890_v15, 0.0 }
 0x99e   : > { %v6699_v56 = vmax.f32 %v6659_v6, 1e-06  ;;  %v5645_v27 = vmul.f32 0.14285715, %v5545_v58  ;;  %v6730_v39 = vmin.f32 %v6690_v24, 1000000.0  ;;  %v8773_v8 = vpop.eup %8772  ;;  %v5880_v4 = vmul.f32 %v7557_v0, %v12953_v1 }
 0x99f   : > { %v5557_v44 = vpop.xlane.xlu0 %5556  ;;  %v6895_v9 = vmul.f32 %v7600_v47, %v6781_v54  ;;  %v7109_v61 = vsel %vm7102_vm4, %v7068_v35, %v6781_v54  ;;  %v6698_v34 = vmax.f32 %v6658_v33, 1e-06  ;;  %v5640_v45 = vmul.f32 0.14285715, %v5530_v41  ;;  %v14342_v41 = vld [vmem:[#allocation86_spill] sm:$0xff]  ;;  %v14343_v54 = vld [vmem:[#allocation87_spill] sm:$0xff] }
 0x9a0   : > { %7149 = vst.msk [vmem:[%s9152_s12 + $0x30] sm:$0xff] %vm3851_vm0, %v7109_v61  ;;  %v6739_v20 = vmin.f32 %v6699_v56, 1000000.0  ;;  %v5685_v55 = vmax.f32 %v5645_v27, 1e-06  ;;  %v8775_v3 = vpop.eup %8774  ;;  %8782 = vlog2.f32 %v6730_v39  ;;  %v7032_v0 = vsel %vm7020_vm2, %v12430_v53, %v14342_v41 }
 0x9a1   : > { %v6945_v58 = vsel %vm3851_vm0, %v6895_v9, 0.0  ;;  %v12969_v15 = vmul.f32 0.6931472, %v8773_v8  ;;  %v6738_v14 = vmin.f32 %v6698_v34, 1000000.0  ;;  %v5581_v7 = vpop.xlane.xlu1 %5580  ;;  %v7031_v24 = vsel %vm7020_vm2, %v12474_v36, %v14343_v54  ;;  %v7570_v36 = vld [vmem:[%s14033_s4 + $0x300] sm:$0xff] }
 0x9a2   : > { %v12974_v29 = vadd.f32 %v6945_v58, %v6944_v23  ;;  %v12976_v31 = vmul.f32 0.6931472, %v8775_v3  ;;  %8784 = vlog2.f32 %v6739_v20  ;;  %v5725_v30 = vmin.f32 %v5685_v55, 1000000.0 }
 0x9a3   : > { %v5578_v16 = vpop.xlane.xlu0 %5577  ;;  %v5889_v47 = vmul.f32 %v7566_v46, %v12969_v15  ;;  %8786 = vlog2.f32 %v6738_v14  ;;  %v5680_v6 = vmax.f32 %v5640_v45, 1e-06  ;;  %v5653_v35 = vmul.f32 0.14285715, %v5569_v51 }
 0x9a4   : > { %v5885_v33 = vmul.f32 %v7562_v19, %v12976_v31  ;;  %8788 = vlog2.f32 %v5725_v30  ;;  %v5962_v23 = vsel %vm3851_vm0, %v5880_v4, 0.0  ;;  %v5649_v9 = vmul.f32 0.14285715, %v5557_v44  ;;  %v7601_v30 = vld [vmem:[%s14033_s4 + $0x3f8] sm:$0xff] }
 0x9a5   : > { %v5950_v56 = vsel %vm3851_vm0, %v5889_v47, 0.0  ;;  %v5720_v27 = vmin.f32 %v5680_v6, 1000000.0  ;;  %v6554_v61 = vpop.xlane.xlu1 %6553  ;;  %v8777_v53 = vpop.eup %8776  ;;  %v5693_v34 = vmax.f32 %v5653_v35, 1e-06  ;;  %v13004_v19 = vsel %vm7061_vm3, %v7031_v24, %v12877_v42 }
 0x9a6   : > { %v12989_v46 = vadd.f32 %v5950_v56, %v12905_v49  ;;  %v5963_v39 = vsel %vm3851_vm0, %v5885_v33, 0.0  ;;  %v5657_v8 = vmul.f32 0.14285715, %v5581_v7  ;;  %v12997_v4 = vmul.f32 0.6931472, %v8777_v53  ;;  %v7569_v7 = vld [vmem:[%s14033_s4 + $0x2f8] sm:$0xff] }
 0x9a7   : > { %v6539_v51 = vpop.xlane.xlu0 %6538  ;;  %v12995_v20 = vadd.f32 %v5963_v39, %v5962_v23  ;;  %8790 = vlog2.f32 %v5720_v27  ;;  %v5689_v44 = vmax.f32 %v5649_v9, 1e-06  ;;  %v7064_v49 = vsel %vm7061_vm3, %v12931_v26, %v12857_v40 }
 0x9a8   : > { %v5733_v55 = vmin.f32 %v5693_v34, 1000000.0  ;;  %v5697_v45 = vmax.f32 %v5657_v8, 1e-06  ;;  %v5656_v3 = vmul.f32 0.14285715, %v5578_v16  ;;  %v8779_v58 = vpop.eup %8778  ;;  %v5893_v14 = vmul.f32 %v7570_v36, %v12997_v4 }
 0x9a9   : > { %v5729_v41 = vmin.f32 %v5689_v44, 1000000.0  ;;  %v6656_v40 = vmul.f32 0.14285715, %v6554_v61  ;;  %v6575_v26 = vpop.xlane.xlu1 %6574  ;;  %v8781_v47 = vpop.eup %8780  ;;  %v13013_v16 = vmul.f32 0.6931472, %v8779_v58  ;;  %v7069_v23 = vsel %vm7061_vm3, %v12943_v43, %v12883_v37 }
 0x9aa   : > { %8792 = vlog2.f32 %v5733_v55  ;;  %v5737_v6 = vmin.f32 %v5697_v45, 1000000.0  ;;  %v5696_v42 = vmax.f32 %v5656_v3, 1e-06  ;;  %v5937_v24 = vsel %vm3851_vm0, %v5893_v14, 0.0  ;;  %v7596_v37 = vld [vmem:[%s14033_s4 + $0x3d0] sm:$0xff] }
 0x9ab   : > { %v6566_v54 = vpop.xlane.xlu0 %6565  ;;  %v6783_v33 = vmul.f32 0.6931472, %v8781_v47  ;;  %8794 = vlog2.f32 %v5729_v41  ;;  %v6696_v35 = vmax.f32 %v6656_v40, 1e-06  ;;  %v13020_v56 = vadd.f32 %v5937_v24, %v12925_v5 }
 0x9ac   : > { %v5892_v27 = vmul.f32 %v7569_v7, %v13013_v16  ;;  %8796 = vlog2.f32 %v5737_v6  ;;  %v5736_v53 = vmin.f32 %v5696_v42, 1000000.0  ;;  %v7073_v8 = vsel %vm7061_vm3, %v7032_v0, %v12900_v38  ;;  %v7605_v38 = vld [vmem:[%s14033_s4 + $0x418] sm:$0xff]  ;;  %v7604_v0 = vld [vmem:[%s14033_s4 + $0x410] sm:$0xff]  ;;  %v7563_v6 = vld [vmem:[%s14033_s4 + $0x2c8] sm:$0xf] }
 0x9ad   : > { %v6896_v9 = vmul.f32 %v7601_v30, %v6783_v33  ;;  %v7110_v61 = vsel %vm7102_vm4, %v7069_v23, %v6783_v33  ;;  %v6736_v39 = vmin.f32 %v6696_v35, 1000000.0  ;;  %v5560_v36 = vpop.xlane.xlu1 %5559  ;;  %v8783_v34 = vpop.eup %8782  ;;  %v6651_v5 = vmul.f32 0.14285715, %v6539_v51 }
 0x9ae   : > { %v5922_v44 = vsel %vm3851_vm0, %v5892_v27, 0.0  ;;  %7150 = vst.msk [vmem:[%s9152_s12 + $0x38] sm:$0xff] %vm3851_vm0, %v7110_v61  ;;  %v6663_v43 = vmul.f32 0.14285715, %v6575_v26  ;;  %v6773_v14 = vmul.f32 0.6931472, %v8783_v34  ;;  %8798 = vlog2.f32 %v5736_v53 }
 0x9af   : > { %v6578_v55 = vpop.xlane.xlu0 %6577  ;;  %v8785_v45 = vpop.eup %8784  ;;  %v13033_v3 = vadd.f32 %v5922_v44, %v12894_v50  ;;  %v6960_v58 = vsel %vm3851_vm0, %v6896_v9, 0.0  ;;  %8800 = vlog2.f32 %v6736_v39  ;;  %v6691_v30 = vmax.f32 %v6651_v5, 1e-06 }
 0x9b0   : > { %v8787_v51 = vpop.eup %8786  ;;  %v6791_v7 = vmul.f32 0.6931472, %v8785_v45  ;;  %v6703_v50 = vmax.f32 %v6663_v43, 1e-06  ;;  %v6891_v40 = vmul.f32 %v7596_v37, %v6773_v14  ;;  %v7105_v26 = vsel %vm7102_vm4, %v7064_v49, %v6773_v14  ;;  %v7558_v37 = vld [vmem:[%s14033_s4 + $0x2a0] sm:$0xf] }
 0x9b1   : > { %v8789_v41 = vpop.eup %8788  ;;  %v6789_v47 = vmul.f32 0.6931472, %v8787_v51  ;;  %v6660_v42 = vmul.f32 0.14285715, %v6566_v54  ;;  %v5584_v24 = vpop.xlane.xlu1 %5583  ;;  %7145 = vst.msk [vmem:[%s9152_s12 + $0x10] sm:$0xff] %vm3851_vm0, %v7105_v26  ;;  %v3939_v5 = vrot.slane %v12869_v10, 2 }
 0x9b2   : > { %v6900_v33 = vmul.f32 %v7605_v38, %v6791_v7  ;;  %v7114_v35 = vsel %vm7102_vm4, %v7073_v8, %v6791_v7  ;;  %v13049_v23 = vmul.f32 0.6931472, %v8789_v41  ;;  %v6731_v27 = vmin.f32 %v6691_v30, 1000000.0  ;;  %v7571_v30 = vld [vmem:[%s14033_s4 + $0x308] sm:$0xff] }
 0x9b3   : > { %v13051_v9 = vpop.xlane.xlu0 %5571  ;;  %v6959_v49 = vsel %vm3851_vm0, %v6891_v40, 0.0  ;;  %7154 = vst.msk [vmem:[%s9152_s12 + $0x58] sm:$0xff] %vm3851_vm0, %v7114_v35  ;;  %v6899_v61 = vmul.f32 %v7604_v0, %v6789_v47  ;;  %v7113_v54 = vsel %vm7102_vm4, %v13004_v19, %v6789_v47  ;;  %v6743_v53 = vmin.f32 %v6703_v50, 1000000.0  ;;  %v7567_v50 = vld [vmem:[%s14033_s4 + $0x2e8] sm:$0xff] }
 0x9b4   : > { %v8791_v39 = vpop.eup %8790  ;;  %v13058_v34 = vadd.f32 %v6960_v58, %v6959_v49  ;;  %v6947_v44 = vsel %vm3851_vm0, %v6900_v33, 0.0  ;;  %7153 = vst.msk [vmem:[%s9152_s12 + $0x50] sm:$0xff] %vm3851_vm0, %v7113_v54  ;;  %v5886_v8 = vmul.f32 %v7563_v6, %v13049_v23  ;;  %8802 = vlog2.f32 %v6731_v27  ;;  %v7575_v35 = vld [vmem:[%s14033_s4 + $0x328] sm:$0xff] }
 0x9b5   : > { %v13069_v43 = vadd.f32 %v6947_v44, %v12974_v29  ;;  %v6932_v19 = vsel %vm3851_vm0, %v6899_v61, 0.0  ;;  %v13072_v45 = vmul.f32 0.6931472, %v8791_v39  ;;  %v13074_v58 = vpop.xlane.xlu1 %5595  ;;  %8804 = vlog2.f32 %v6743_v53 }
 0x9b6   : > { %v13077_v14 = vadd.f32 %v6932_v19, %v12945_v60  ;;  %v6700_v38 = vmax.f32 %v6660_v42, 1e-06  ;;  %v5978_v7 = vsel %vm3912_vm1, %v5886_v8, 0.0  ;;  %v5650_v41 = vmul.f32 0.14285715, %v5560_v36  ;;  %v14344_v36 = vld [vmem:[#allocation83_spill] sm:$0xff] }
 0x9b7   : > { %v13079_v0 = vpop.xlane.xlu0 %5592  ;;  %v8793_v51 = vpop.eup %8792  ;;  %v5881_v29 = vmul.f32 %v7558_v37, %v13072_v45  ;;  %v6664_v47 = vmul.f32 0.14285715, %v6578_v55  ;;  %v13098_v61 = vadd.f32 %v3939_v5, %v12869_v10  ;;  %v7024_v54 = vsel %vm7020_vm2, %v12360_v17, %v14344_v36  ;;  %v14345_v10 = vld [vmem:[#allocation85_spill] sm:$0xff] }
 0x9b8   : > { %v8795_v60 = vpop.eup %8794  ;;  %v13089_v40 = vmul.f32 0.6931472, %v8793_v51  ;;  %v6740_v26 = vmin.f32 %v6700_v38, 1000000.0  ;;  %v5690_v27 = vmax.f32 %v5650_v41, 1e-06  ;;  %v7029_v5 = vsel %vm7020_vm2, %v12438_v63, %v14345_v10 }
 0x9b9   : > { %v8797_v6 = vpop.eup %8796  ;;  %v5977_v42 = vsel %vm3912_vm1, %v5881_v29, 0.0  ;;  %v13092_v33 = vmul.f32 0.6931472, %v8795_v60  ;;  %v6557_v49 = vpop.xlane.xlu1 %6556  ;;  %v5658_v19 = vmul.f32 0.14285715, %v5584_v24 }
 0x9ba   : > { %v13103_v53 = vadd.f32 %v5978_v7, %v5977_v42  ;;  %v5894_v55 = vmul.f32 %v7571_v30, %v13089_v40  ;;  %v13106_v39 = vmul.f32 0.6931472, %v8797_v6  ;;  %8806 = vlog2.f32 %v6740_v26  ;;  %v7574_v7 = vld [vmem:[%s14033_s4 + $0x320] sm:$0xff] }
 0x9bb   : > { %v13108_v44 = vpop.xlane.xlu0 %6541  ;;  %v5890_v8 = vmul.f32 %v7567_v50, %v13092_v33  ;;  %v5730_v37 = vmin.f32 %v5690_v27, 1000000.0  ;;  %v8799_v38 = vpop.eup %8798  ;;  %v6704_v29 = vmax.f32 %v6664_v47, 1e-06  ;;  %v7602_v47 = vld [vmem:[%s14033_s4 + $0x400] sm:$0xff] }
 0x9bc   : > { %v5952_v17 = vsel %vm3851_vm0, %v5894_v55, 0.0  ;;  %v5898_v51 = vmul.f32 %v7575_v35, %v13106_v39  ;;  %v8801_v30 = vpop.eup %8800  ;;  %v13123_v41 = vmul.f32 0.6931472, %v8799_v38  ;;  %v7070_v35 = vsel %vm7061_vm3, %v7029_v5, %v12976_v31  ;;  %v14346_v55 = vld [vmem:[#allocation80_spill] sm:$0xff]  ;;  %v14349_v5 = vld [vmem:[#allocation17_spill] sm:$0xff] }
 0x9bd   : > { %v13120_v50 = vadd.f32 %v5952_v17, %v12989_v46  ;;  %v5965_v24 = vsel %vm3851_vm0, %v5890_v8, 0.0  ;;  %8808 = vlog2.f32 %v5730_v37  ;;  %v6581_v60 = vpop.xlane.xlu1 %6580  ;;  %v6785_v6 = vmul.f32 0.6931472, %v8801_v30  ;;  %v14347_v37 = vld [vmem:[#allocation84_spill] sm:$0xff]  ;;  %v14351_v30 = vld [vmem:[#allocation90_spill] sm:$0xff] }
 0x9be   : > { %v13126_v63 = vadd.f32 %v5965_v24, %v12995_v20  ;;  %v5939_v26 = vsel %vm3851_vm0, %v5898_v51, 0.0  ;;  %v6744_v42 = vmin.f32 %v6704_v29, 1000000.0  ;;  %v5897_v20 = vmul.f32 %v7574_v7, %v13123_v41  ;;  %v14348_v31 = vld [vmem:[#allocation88_spill] sm:$0xff]  ;;  %v14350_v29 = vld [vmem:[#allocation89_spill] sm:$0xff]  ;;  %v14352_v24 = vld [vmem:[#allocation19_spill] sm:$0xff] }
 0x9bf   : > { %v13132_v46 = vpop.xlane.xlu0 %6568  ;;  %v13137_v27 = vadd.f32 %v5939_v26, %v13020_v56  ;;  %v5698_v36 = vmax.f32 %v5658_v19, 1e-06  ;;  %v13143_v8 = vsel %vm7020_vm2, %v12424_v21, %v14346_v55  ;;  %v13148_v38 = vsel %vm7020_vm2, %v12397_v18, %v14347_v37  ;;  %v14355_v55 = vld [vmem:[#allocation16_spill] sm:$0xff] }
 0x9c0   : > { %v7111_v10 = vsel %vm7102_vm4, %v7070_v35, %v6785_v6  ;;  %8810 = vlog2.f32 %v6744_v42  ;;  %v7033_v56 = vsel %vm7020_vm2, %v14349_v5, %v14348_v31  ;;  %v5924_v17 = vsel %vm3851_vm0, %v5897_v20, 0.0  ;;  %v14353_v42 = vld [vmem:[#allocation91_spill] sm:$0xff] }
 0x9c1   : > { %v6897_v19 = vmul.f32 %v7602_v47, %v6785_v6  ;;  %7151 = vst.msk [vmem:[%s9152_s12 + $0x40] sm:$0xff] %vm3851_vm0, %v7111_v10  ;;  %v5738_v51 = vmin.f32 %v5698_v36, 1000000.0  ;;  %v6593_v21 = vpop.xlane.xlu1 %6592  ;;  %v8803_v7 = vpop.eup %8802  ;;  %v13160_v18 = vsel %vm7020_vm2, %v12534_v25, %v14350_v29  ;;  %v13165_v26 = vsel %vm7020_vm2, %v14352_v24, %v14351_v30  ;;  %v7597_v6 = vld [vmem:[%s14033_s4 + $0x3d8] sm:$0xff] }
 0x9c2   : > { %v13170_v35 = vsel %vm7020_vm2, %v12570_v2, %v14353_v42  ;;  %v13173_v47 = vadd.f32 %v5924_v17, %v13033_v3  ;;  %v8805_v25 = vpop.eup %8804  ;;  %v14354_v36 = vld [vmem:[#allocation92_spill] sm:$0xff]  ;;  %v6775_v10 = vmul.f32 0.6931472, %v8803_v7  ;;  %v6657_v3 = vmul.f32 0.14285715, %v6557_v49 }
 0x9c3   : > { %v13178_v20 = vpop.xlane.xlu0 %6589  ;;  %v7036_v37 = vsel %vm7020_vm2, %v14355_v55, %v14354_v36  ;;  %v7609_v2 = vld [vmem:[%s14033_s4 + $0x438] sm:$0xff]  ;;  %8812 = vlog2.f32 %v5738_v51  ;;  %v7065_v31 = vsel %vm7061_vm3, %v7024_v54, %v12953_v1  ;;  %v6799_v17 = vmul.f32 0.6931472, %v8805_v25 }
 0x9c4   : > { %v7077_v5 = vsel %vm7061_vm3, %v7036_v37, %v13013_v16  ;;  %v13191_v29 = vmul.f32 0.14285715, %v13051_v9  ;;  %v6975_v30 = vsel %vm3851_vm0, %v6897_v19, 0.0  ;;  %v6892_v7 = vmul.f32 %v7597_v6, %v6775_v10  ;;  %v14356_v49 = vld [vmem:[#allocation96_spill] sm:$0xff]  ;;  %v14357_v51 = vld [vmem:[#allocation93_spill] sm:$0xff] }
 0x9c5   : > { %v7106_v24 = vsel %vm7102_vm4, %v7065_v31, %v6775_v10  ;;  %v6697_v42 = vmax.f32 %v6657_v3, 1e-06  ;;  %v13195_v36 = vpop.xlane.xlu1 %5586  ;;  %v13200_v1 = vsel %vm7020_vm2, %v12603_v12, %v14356_v49  ;;  %v6904_v16 = vmul.f32 %v7609_v2, %v6799_v17  ;;  %v7606_v2 = vld [vmem:[%s14033_s4 + $0x420] sm:$0xff] }
 0x9c6   : > { %7146 = vst.msk [vmem:[%s9152_s12 + $0x18] sm:$0xff] %vm3851_vm0, %v7106_v24  ;;  %v7118_v54 = vsel %vm7102_vm4, %v7077_v5, %v6799_v17  ;;  %v13206_v9 = vmul.f32 0.14285715, %v13074_v58  ;;  %v13213_v6 = vsel %vm7020_vm2, %v12523_v11, %v14357_v51  ;;  %v6974_v25 = vsel %vm3851_vm0, %v6892_v7, 0.0 }
 0x9c7   : > { %v13208_v19 = vpop.xlane.xlu0 %5574  ;;  %7158 = vst.msk [vmem:[%s9152_s12 + $0x78] sm:$0xff] %vm3851_vm0, %v7118_v54  ;;  %v6737_v12 = vmin.f32 %v6697_v42, 1000000.0  ;;  %v6652_v55 = vmul.f32 0.14285715, %v13108_v44  ;;  %v8807_v37 = vpop.eup %8806  ;;  %v13219_v10 = vadd.f32 %v6975_v30, %v6974_v25  ;;  %v6934_v58 = vsel %vm3851_vm0, %v6904_v16, 0.0 }
 0x9c8   : > { %v5694_v3 = vmax.f32 %v13191_v29, 1e-06  ;;  %v6665_v11 = vmul.f32 0.14285715, %v6581_v60  ;;  %v13227_v31 = vadd.f32 %v6934_v58, %v13077_v14  ;;  %v6793_v5 = vmul.f32 0.6931472, %v8807_v37 }
 0x9c9   : > { %v7568_v44 = vld [vmem:[%s14033_s4 + $0x2f0] sm:$0xf]  ;;  %8814 = vlog2.f32 %v6737_v12  ;;  %v6692_v17 = vmax.f32 %v6652_v55, 1e-06  ;;  %v13232_v30 = vpop.xlane.xlu1 %5607  ;;  %v7074_v24 = vsel %vm7061_vm3, %v7033_v56, %v12969_v15  ;;  %v6661_v60 = vmul.f32 0.14285715, %v13132_v46 }
 0x9ca   : > { %v8809_v7 = vpop.eup %8808  ;;  %v6705_v42 = vmax.f32 %v6665_v11, 1e-06  ;;  %v6669_v49 = vmul.f32 0.14285715, %v6593_v21  ;;  %v6901_v16 = vmul.f32 %v7606_v2, %v6793_v5  ;;  %v7115_v54 = vsel %vm7102_vm4, %v7074_v24, %v6793_v5  ;;  %v14358_v12 = vld [vmem:[#allocation94_spill] sm:$0xff] }
 0x9cb   : > { %v13237_v14 = vpop.xlane.xlu0 %5598  ;;  %v13240_v51 = vmul.f32 0.6931472, %v8809_v7  ;;  %v6732_v25 = vmin.f32 %v6692_v17, 1000000.0  ;;  %v13245_v55 = vsel %vm7020_vm2, %v12622_v62, %v14358_v12  ;;  %7155 = vst.msk [vmem:[%s9152_s12 + $0x60] sm:$0xff] %vm3851_vm0, %v7115_v54  ;;  %v7610_v2 = vld [vmem:[%s14033_s4 + $0x440] sm:$0xff] }
 0x9cc   : > { %v6745_v15 = vmin.f32 %v6705_v42, 1000000.0  ;;  %v6701_v56 = vmax.f32 %v6661_v60, 1e-06  ;;  %v6709_v37 = vmax.f32 %v6669_v49, 1e-06 }
 0x9cd   : > { %v8811_v46 = vpop.eup %8810  ;;  %v6962_v21 = vsel %vm3851_vm0, %v6901_v16, 0.0  ;;  %v5891_v58 = vmul.f32 %v7568_v44, %v13240_v51  ;;  %v5661_v11 = vmul.f32 0.14285715, %v13079_v0  ;;  %8816 = vlog2.f32 %v6732_v25  ;;  %v13255_v5 = vpop.xlane.xlu1 %6571  ;;  %v7576_v25 = vld [vmem:[%s14033_s4 + $0x330] sm:$0xff] }
 0x9ce   : > { %v13258_v62 = vadd.f32 %v6962_v21, %v13058_v34  ;;  %v6801_v17 = vmul.f32 0.6931472, %v8811_v46  ;;  %8818 = vlog2.f32 %v6745_v15  ;;  %v6741_v7 = vmin.f32 %v6701_v56, 1000000.0  ;;  %v14359_v15 = vld [vmem:[#allocation97_spill] sm:$0xff] }
 0x9cf   : > { %v13260_v24 = vpop.xlane.xlu0 %5610  ;;  %v7078_v44 = vsel %vm7061_vm3, %v13170_v35, %v12997_v4  ;;  %v5980_v42 = vsel %vm3912_vm1, %v5891_v58, 0.0  ;;  %v6749_v60 = vmin.f32 %v6709_v37, 1000000.0  ;;  %v6668_v0 = vmul.f32 0.14285715, %v13178_v20 }
 0x9d0   : > { %v8813_v49 = vpop.eup %8812  ;;  %v13268_v16 = vadd.f32 %v5980_v42, %v13103_v53  ;;  %v6905_v34 = vmul.f32 %v7610_v2, %v6801_v17  ;;  %v7119_v54 = vsel %vm7102_vm4, %v7078_v44, %v6801_v17  ;;  %8820 = vlog2.f32 %v6741_v7  ;;  %v14360_v7 = vld [vmem:[#allocation98_spill] sm:$0xff]  ;;  %v14361_v44 = vld [vmem:[#allocation95_spill] sm:$0xff] }
 0x9d1   : > { %7159 = vst.msk [vmem:[%s9152_s12 + $0x80] sm:$0xff] %vm3851_vm0, %v7119_v54  ;;  %v13276_v4 = vmul.f32 0.6931472, %v8813_v49  ;;  %v5702_v35 = vmax.f32 %v13206_v9, 1e-06  ;;  %8822 = vlog2.f32 %v6749_v60  ;;  %v6596_v12 = vpop.xlane.xlu1 %6595  ;;  %v13282_v53 = vsel %vm7020_vm2, %v12590_v13, %v14359_v15  ;;  %v14362_v42 = vld [vmem:[#allocation23_spill] sm:$0xff] }
 0x9d2   : > { %v6708_v20 = vmax.f32 %v6668_v0, 1e-06  ;;  %v6949_v56 = vsel %vm3851_vm0, %v6905_v34, 0.0  ;;  %v5701_v37 = vmax.f32 %v5661_v11, 1e-06  ;;  %v13296_v13 = vsel %vm7020_vm2, %v12649_v48, %v14360_v7  ;;  %v14364_v60 = vld [vmem:[#allocation18_spill] sm:$0xff] }
 0x9d3   : > { %v5659_v46 = vmul.f32 0.14285715, %v13195_v36  ;;  %v13286_v21 = vpop.xlane.xlu0 %6583  ;;  %v13289_v58 = vadd.f32 %v6949_v56, %v13069_v43  ;;  %v5899_v9 = vmul.f32 %v7576_v25, %v13276_v4  ;;  %v5655_v17 = vmul.f32 0.14285715, %v13208_v19  ;;  %v14363_v36 = vld [vmem:[#allocation100_spill] sm:$0xff]  ;;  %v14365_v49 = vld [vmem:[#allocation99_spill] sm:$0xff] }
 0x9d4   : > { %v6748_v2 = vmin.f32 %v6708_v20, 1000000.0  ;;  %v7042_v11 = vsel %vm7020_vm2, %v14362_v42, %v14361_v44  ;;  %v13304_v0 = vsel %vm7020_vm2, %v14364_v60, %v14363_v36  ;;  %v5734_v43 = vmin.f32 %v5694_v3, 1000000.0  ;;  %v14366_v34 = vld [vmem:[#allocation22_spill] sm:$0xff]  ;;  %v14367_v54 = vld [vmem:[#allocation101_spill] sm:$0xff] }
 0x9d5   : > { %v13311_v19 = vsel %vm7020_vm2, %v14366_v34, %v14365_v49  ;;  %v13316_v48 = vsel %vm7020_vm2, %v12683_v52, %v14367_v54  ;;  %v5954_v25 = vsel %vm3851_vm0, %v5899_v9, 0.0  ;;  %v7603_v20 = vld [vmem:[%s14033_s4 + $0x408] sm:$0xf]  ;;  %v13322_v15 = vpop.xlane.xlu1 %6607  ;;  %v5742_v56 = vmin.f32 %v5702_v35, 1000000.0  ;;  %v14369_v36 = vld [vmem:[#allocation25_spill] sm:$0xff] }
 0x9d6   : > { %8824 = vlog2.f32 %v6748_v2  ;;  %v8815_v29 = vpop.eup %8814  ;;  %v13325_v3 = vadd.f32 %v5954_v25, %v13120_v50  ;;  %v5699_v7 = vmax.f32 %v5659_v46, 1e-06  ;;  %v5666_v44 = vmul.f32 0.14285715, %v13232_v30  ;;  %v14368_v52 = vld [vmem:[#allocation102_spill] sm:$0xff]  ;;  %v14370_v34 = vld [vmem:[#allocation105_spill] sm:$0xff] }
 0x9d7   : > { %v13328_v42 = vpop.xlane.xlu0 %6604  ;;  %v13333_v9 = vsel %vm7020_vm2, %v14369_v36, %v14368_v52  ;;  %v5741_v60 = vmin.f32 %v5701_v37, 1000000.0  ;;  %v6787_v2 = vmul.f32 0.6931472, %v8815_v29  ;;  %v5695_v49 = vmax.f32 %v5655_v17, 1e-06 }
 0x9d8   : > { %v13338_v50 = vsel %vm7020_vm2, %v12719_v22, %v14370_v34  ;;  %v14371_v35 = vld [vmem:[#allocation103_spill] sm:$0xff]  ;;  %v14372_v46 = vld [vmem:[#allocation21_spill] sm:$0xff]  ;;  %v7071_v54 = vsel %vm7061_vm3, %v13148_v38, %v13049_v23  ;;  %8826 = vlog2.f32 %v5734_v43  ;;  %v7066_v37 = vsel %vm7061_vm3, %v13143_v8, %v13072_v45 }
 0x9d9   : > { %v13343_v30 = vsel %vm7020_vm2, %v14372_v46, %v14371_v35  ;;  %v7079_v17 = vsel %vm7061_vm3, %v13213_v6, %v13089_v40  ;;  %v6898_v22 = vmul.f32 %v7603_v20, %v6787_v2  ;;  %v7112_v25 = vsel %vm7102_vm4, %v7071_v54, %v6787_v2  ;;  %v13355_v29 = vpop.xlane.xlu1 %5601  ;;  %v7598_v23 = vld [vmem:[%s14033_s4 + $0x3e0] sm:$0xf]  ;;  %v7607_v35 = vld [vmem:[%s14033_s4 + $0x428] sm:$0xff] }
 0x9da   : > { %v8817_v52 = vpop.eup %8816  ;;  %v7075_v36 = vsel %vm7061_vm3, %v13165_v26, %v13092_v33  ;;  %8828 = vlog2.f32 %v5742_v56  ;;  %7152 = vst.msk [vmem:[%s9152_s12 + $0x48] sm:$0xf] %vm3912_vm1, %v7112_v25  ;;  %v5739_v45 = vmin.f32 %v5699_v7, 1000000.0  ;;  %v5706_v8 = vmax.f32 %v5666_v44, 1e-06 }
 0x9db   : > { %v13365_v40 = vpop.xlane.xlu0 %5589  ;;  %v8819_v38 = vpop.eup %8818  ;;  %8830 = vlog2.f32 %v5741_v60  ;;  %v6990_v6 = vsel %vm3912_vm1, %v6898_v22, 0.0  ;;  %v6777_v43 = vmul.f32 0.6931472, %v8817_v52  ;;  %v7611_v33 = vld [vmem:[%s14033_s4 + $0x448] sm:$0xff]  ;;  %v5735_v26 = vmin.f32 %v5695_v49, 1000000.0 }
 0x9dc   : > { %v7083_v20 = vsel %vm7061_vm3, %v7042_v11, %v13106_v39  ;;  %v6803_v56 = vmul.f32 0.6931472, %v8819_v38  ;;  %v5663_v7 = vmul.f32 0.14285715, %v13237_v14  ;;  %v6662_v44 = vmul.f32 0.14285715, %v13255_v5 }
 0x9dd   : > { %v8821_v2 = vpop.eup %8820  ;;  %v6893_v60 = vmul.f32 %v7598_v23, %v6777_v43  ;;  %v7107_v34 = vsel %vm7102_vm4, %v7066_v37, %v6777_v43  ;;  %v5667_v46 = vmul.f32 0.14285715, %v13260_v24  ;;  %v6670_v49 = vmul.f32 0.14285715, %v6596_v12  ;;  %v13380_v54 = vpop.xlane.xlu1 %5622  ;;  %v7615_v37 = vld [vmem:[%s14033_s4 + $0x468] sm:$0xff] }
 0x9de   : > { %v8823_v39 = vpop.eup %8822  ;;  %7147 = vst.msk [vmem:[%s9152_s12 + $0x20] sm:$0xf] %vm3912_vm1, %v7107_v34  ;;  %v6906_v14 = vmul.f32 %v7611_v33, %v6803_v56  ;;  %v7120_v5 = vsel %vm7102_vm4, %v7079_v17, %v6803_v56  ;;  %v6795_v11 = vmul.f32 0.6931472, %v8821_v2  ;;  %v5703_v22 = vmax.f32 %v5663_v7, 1e-06 }
 0x9df   : > { %v13388_v25 = vpop.xlane.xlu0 %5613  ;;  %v6989_v24 = vsel %vm3912_vm1, %v6893_v60, 0.0  ;;  %7160 = vst.msk [vmem:[%s9152_s12 + $0x88] sm:$0xff] %vm3851_vm0, %v7120_v5  ;;  %v6811_v12 = vmul.f32 0.6931472, %v8823_v39  ;;  %8832 = vlog2.f32 %v5739_v45  ;;  %v6702_v52 = vmax.f32 %v6662_v44, 1e-06 }
 0x9e0   : > { %v13393_v23 = vadd.f32 %v6990_v6, %v6989_v24  ;;  %v6964_v17 = vsel %vm3851_vm0, %v6906_v14, 0.0  ;;  %v6902_v38 = vmul.f32 %v7607_v35, %v6795_v11  ;;  %v7116_v43 = vsel %vm7102_vm4, %v7075_v36, %v6795_v11 }
 0x9e1   : > { %v13398_v33 = vadd.f32 %v6964_v17, %v13258_v62  ;;  %7156 = vst.msk [vmem:[%s9152_s12 + $0x68] sm:$0xff] %vm3851_vm0, %v7116_v43  ;;  %v6910_v56 = vmul.f32 %v7615_v37, %v6811_v12  ;;  %v7124_v7 = vsel %vm7102_vm4, %v7083_v20, %v6811_v12  ;;  %v5746_v2 = vmin.f32 %v5706_v8, 1000000.0  ;;  %v13403_v60 = vpop.xlane.xlu1 %6586  ;;  %v7614_v62 = vld [vmem:[%s14033_s4 + $0x460] sm:$0xff] }
 0x9e2   : > { %v7082_v6 = vsel %vm7061_vm3, %v13245_v55, %v13123_v41  ;;  %v6977_v44 = vsel %vm3851_vm0, %v6902_v38, 0.0  ;;  %7164 = vst.msk [vmem:[%s9152_s12 + $0xa8] sm:$0xff] %vm3851_vm0, %v7124_v7  ;;  %v6742_v36 = vmin.f32 %v6702_v52, 1000000.0  ;;  %v5707_v34 = vmax.f32 %v5667_v46, 1e-06 }
 0x9e3   : > { %v8825_v45 = vpop.eup %8824  ;;  %v13415_v8 = vadd.f32 %v6977_v44, %v13219_v10  ;;  %v6951_v20 = vsel %vm3851_vm0, %v6910_v56, 0.0  ;;  %8834 = vlog2.f32 %v5735_v26  ;;  %v13418_v39 = vpop.xlane.xlu0 %5625  ;;  %v5743_v55 = vmin.f32 %v5703_v22, 1000000.0  ;;  %v14373_v52 = vld [vmem:[#allocation104_spill] sm:$0xff] }
 0x9e4   : > { %v6809_v35 = vmul.f32 0.6931472, %v8825_v45  ;;  %v13421_v41 = vadd.f32 %v6951_v20, %v13289_v58  ;;  %8836 = vlog2.f32 %v6742_v36  ;;  %v6710_v14 = vmax.f32 %v6670_v49, 1e-06  ;;  %v14374_v49 = vld [vmem:[#allocation27_spill] sm:$0xff]  ;;  %v14375_v45 = vld [vmem:[#allocation108_spill] sm:$0xff] }
 0x9e5   : > { %v8827_v5 = vpop.eup %8826  ;;  %v6666_v37 = vmul.f32 0.14285715, %v13286_v21  ;;  %v6674_v10 = vmul.f32 0.14285715, %v13322_v15  ;;  %v13426_v24 = vpop.xlane.xlu1 %6610  ;;  %8838 = vlog2.f32 %v5746_v2  ;;  %v5747_v26 = vmin.f32 %v5707_v34, 1000000.0 }
 0x9e6   : > { %v6909_v11 = vmul.f32 %v7614_v62, %v6809_v35  ;;  %v7123_v46 = vsel %vm7102_vm4, %v7082_v6, %v6809_v35  ;;  %v6750_v12 = vmin.f32 %v6710_v14, 1000000.0  ;;  %v6673_v58 = vmul.f32 0.14285715, %v13328_v42  ;;  %v14376_v6 = vld [vmem:[#allocation24_spill] sm:$0xff] }
 0x9e7   : > { %7163 = vst.msk [vmem:[%s9152_s12 + $0xa0] sm:$0xff] %vm3851_vm0, %v7123_v46  ;;  %v8829_v22 = vpop.eup %8828  ;;  %v13434_v17 = vsel %vm7020_vm2, %v14374_v49, %v14373_v52  ;;  %v6706_v21 = vmax.f32 %v6666_v37, 1e-06  ;;  %v6714_v43 = vmax.f32 %v6674_v10, 1e-06  ;;  %v13443_v42 = vsel %vm7020_vm2, %v14376_v6, %v14375_v45  ;;  %v7572_v44 = vld [vmem:[%s14033_s4 + $0x310] sm:$0xff]  ;;  %v13448_v34 = vpop.xlane.xlu0 %6598 }
 0x9e8   : > { %v6936_v38 = vsel %vm3851_vm0, %v6909_v11, 0.0  ;;  %v8831_v15 = vpop.eup %8830  ;;  %v5793_v56 = vmul.f32 0.6931472, %v8827_v5  ;;  %8840 = vlog2.f32 %v6750_v12  ;;  %v6713_v2 = vmax.f32 %v6673_v58, 1e-06  ;;  %v14377_v20 = vld [vmem:[#allocation116_spill] sm:$0xff] }
 0x9e9   : > { %v13438_v7 = vadd.f32 %v6936_v38, %v13227_v31  ;;  %8842 = vlog2.f32 %v5743_v55  ;;  %v6746_v62 = vmin.f32 %v6706_v21, 1000000.0  ;;  %v6754_v36 = vmin.f32 %v6714_v43, 1000000.0  ;;  %v14378_v5 = vld [vmem:[#allocation107_spill] sm:$0xff]  ;;  %v13457_v10 = vpop.xlane.xlu1 %6622  ;;  %v14379_v12 = vld [vmem:[#allocation106_spill] sm:$0xff] }
 0x9ea   : > { %v4989_v35 = vrot.slane %v14377_v20, 4  ;;  %8844 = vlog2.f32 %v5747_v26  ;;  %v6753_v31 = vmin.f32 %v6713_v2, 1000000.0  ;;  %v5664_v14 = vmul.f32 0.14285715, %v13355_v29  ;;  %v14380_v58 = vld [vmem:[#allocation20_spill] sm:$0xff] }
 0x9eb   : > { %v13455_v11 = vsel %vm7020_vm2, %v12753_v59, %v14378_v5  ;;  %v5809_v46 = vmul.f32 0.6931472, %v8829_v22  ;;  %v5807_v37 = vmul.f32 0.6931472, %v8831_v15  ;;  %8846 = vlog2.f32 %v6746_v62  ;;  %v14381_v26 = vld [vmem:[#allocation109_spill] sm:$0xff]  ;;  %v14382_v49 = vld [vmem:[#allocation28_spill] sm:$0xff] }
 0x9ec   : > { %v8833_v55 = vpop.eup %8832  ;;  %v13462_v52 = vsel %vm7020_vm2, %v14380_v58, %v14379_v12  ;;  %v13467_v29 = vsel %vm7020_vm2, %v14382_v49, %v14381_v26  ;;  %v5895_v38 = vmul.f32 %v7572_v44, %v5793_v56  ;;  %v7580_v59 = vld [vmem:[%s14033_s4 + $0x350] sm:$0xff]  ;;  %v7579_v22 = vld [vmem:[%s14033_s4 + $0x348] sm:$0xff]  ;;  %8848 = vlog2.f32 %v6754_v36  ;;  %v14387_v44 = vld [vmem:[#allocation113_spill] sm:$0xff] }
 0x9ed   : > { %v14383_v21 = vld [vmem:[#allocation111_spill] sm:$0xff]  ;;  %v14384_v43 = vld [vmem:[#allocation30_spill] sm:$0xff]  ;;  %v14385_v2 = vld [vmem:[#allocation112_spill] sm:$0xff]  ;;  %v13488_v62 = vsel %vm7020_vm2, %v12789_v57, %v14387_v44  ;;  %8850 = vlog2.f32 %v6753_v31  ;;  %v7076_v36 = vsel %vm7061_vm3, %v13160_v18, %v13240_v51  ;;  %v5704_v5 = vmax.f32 %v5664_v14, 1e-06 }
 0x9ee   : > { %v13478_v15 = vsel %vm7020_vm2, %v14384_v43, %v14383_v21  ;;  %v14386_v45 = vld [vmem:[#allocation26_spill] sm:$0xff]  ;;  %v5671_v12 = vmul.f32 0.14285715, %v13380_v54  ;;  %v13495_v58 = vadd.f32 %v4989_v35, %v14377_v20  ;;  %v5903_v26 = vmul.f32 %v7580_v59, %v5809_v46  ;;  %v7608_v21 = vld [vmem:[%s14033_s4 + $0x430] sm:$0xf]  ;;  %v13502_v43 = vpop.xlane.xlu0 %6619 }
 0x9ef   : > { %v13483_v6 = vsel %vm7020_vm2, %v14386_v45, %v14385_v2  ;;  %v5902_v49 = vmul.f32 %v7579_v22, %v5807_v37  ;;  %v5660_v57 = vmul.f32 0.14285715, %v13365_v40  ;;  %v6667_v31 = vmul.f32 0.14285715, %v13403_v60  ;;  %v13516_v22 = vpop.xlane.xlu1 %5616 }
 0x9f0   : > { %v8835_v2 = vpop.eup %8834  ;;  %v7084_v18 = vsel %vm7061_vm3, %v13296_v13, %v13276_v4  ;;  %v13508_v51 = vsel %vm3851_vm0, %v5895_v38, 0.0  ;;  %v13510_v54 = vmul.f32 0.6931472, %v8833_v55  ;;  %v5711_v20 = vmax.f32 %v5671_v12, 1e-06 }
 0x9f1   : > { %v8837_v35 = vpop.eup %8836  ;;  %v7080_v14 = vsel %vm7061_vm3, %v13200_v1, %v5793_v56  ;;  %v5668_v40 = vmul.f32 0.14285715, %v13388_v25  ;;  %v6707_v60 = vmax.f32 %v6667_v31, 1e-06  ;;  %v5672_v59 = vmul.f32 0.14285715, %v13418_v39 }
 0x9f2   : > { %v7088_v4 = vsel %vm7061_vm3, %v13316_v48, %v5809_v46  ;;  %v6797_v13 = vmul.f32 0.6931472, %v8837_v35  ;;  %v5744_v38 = vmin.f32 %v5704_v5, 1000000.0  ;;  %v5751_v55 = vmin.f32 %v5711_v20, 1000000.0  ;;  %v8839_v45 = vpop.eup %8838  ;;  %v13540_v20 = vpop.xlane.xlu0 %5604 }
 0x9f3   : > { %v13521_v44 = vsel %vm3851_vm0, %v5903_v26, 0.0  ;;  %v13524_v1 = vsel %vm3851_vm0, %v5902_v49, 0.0  ;;  %v7087_v25 = vsel %vm7061_vm3, %v13333_v9, %v5807_v37  ;;  %v7577_v39 = vld [vmem:[%s14033_s4 + $0x338] sm:$0xff]  ;;  %v5700_v56 = vmax.f32 %v5660_v57, 1e-06 }
 0x9f4   : > { %v7573_v48 = vld [vmem:[%s14033_s4 + $0x318] sm:$0xf]  ;;  %v13534_v46 = vmul.f32 0.6931472, %v8835_v2  ;;  %v6903_v5 = vmul.f32 %v7608_v21, %v6797_v13  ;;  %v7117_v12 = vsel %vm7102_vm4, %v7076_v36, %v6797_v13  ;;  %v6747_v26 = vmin.f32 %v6707_v60, 1000000.0  ;;  %v13552_v13 = vpop.xlane.xlu1 %6601 }
 0x9f5   : > { %v8841_v49 = vpop.eup %8840  ;;  %7157 = vst.msk [vmem:[%s9152_s12 + $0x70] sm:$0xf] %vm3912_vm1, %v7117_v12  ;;  %8852 = vlog2.f32 %v5751_v55  ;;  %v5708_v9 = vmax.f32 %v5668_v40, 1e-06  ;;  %v5712_v37 = vmax.f32 %v5672_v59, 1e-06  ;;  %v5900_v35 = vmul.f32 %v7577_v39, %v13510_v54 }
 0x9f6   : > { %v6675_v31 = vmul.f32 0.14285715, %v13426_v24  ;;  %v8843_v57 = vpop.eup %8842  ;;  %v13543_v32 = vmul.f32 0.6931472, %v8839_v45  ;;  %v6992_v21 = vsel %vm3912_vm1, %v6903_v5, 0.0  ;;  %v7616_v36 = vld [vmem:[%s14033_s4 + $0x470] sm:$0xff]  ;;  %8854 = vlog2.f32 %v5744_v38 }
 0x9f7   : > { %v8845_v2 = vpop.eup %8844  ;;  %v13550_v40 = vadd.f32 %v6992_v21, %v13393_v23  ;;  %v6813_v60 = vmul.f32 0.6931472, %v8841_v49  ;;  %v5740_v24 = vmin.f32 %v5700_v56, 1000000.0  ;;  %v5752_v59 = vmin.f32 %v5712_v37, 1000000.0 }
 0x9f8   : > { %v8847_v55 = vpop.eup %8846  ;;  %v5896_v45 = vmul.f32 %v7573_v48, %v13534_v46  ;;  %8856 = vlog2.f32 %v6747_v26  ;;  %v6715_v39 = vmax.f32 %v6675_v31, 1e-06  ;;  %v6671_v5 = vmul.f32 0.14285715, %v13448_v34  ;;  %v7584_v38 = vld [vmem:[%s14033_s4 + $0x370] sm:$0xff] }
 0x9f9   : > { %14388 = vst [vmem:[#allocation34_spill] sm:$0xff] %v13550_v40  ;;  %v8849_v12 = vpop.eup %8848  ;;  %v6911_v23 = vmul.f32 %v7616_v36, %v6813_v60  ;;  %v7125_v49 = vsel %vm7102_vm4, %v7084_v18, %v6813_v60  ;;  %v6805_v56 = vmul.f32 0.6931472, %v8847_v55  ;;  %v5748_v37 = vmin.f32 %v5708_v9, 1000000.0  ;;  %v13566_v18 = vpop.xlane.xlu0 %5628 }
 0x9fa   : > { %v8851_v21 = vpop.eup %8850  ;;  %7165 = vst.msk [vmem:[%s9152_s12 + $0xb0] sm:$0xff] %vm3851_vm0, %v7125_v49  ;;  %v6821_v40 = vmul.f32 0.6931472, %v8849_v12  ;;  %8858 = vlog2.f32 %v5752_v59  ;;  %v6755_v48 = vmin.f32 %v6715_v39, 1000000.0  ;;  %v5907_v59 = vmul.f32 %v7584_v38, %v13543_v32  ;;  %v14390_v39 = vld [vmem:[#allocation32_spill] sm:$0xff] }
 0x9fb   : > { %v6711_v26 = vmax.f32 %v6671_v5, 1e-06  ;;  %v6966_v34 = vsel %vm3851_vm0, %v6911_v23, 0.0  ;;  %v7121_v31 = vsel %vm7102_vm4, %v7080_v14, %v6805_v56  ;;  %v13564_v28 = vmul.f32 0.6931472, %v8851_v21  ;;  %v7581_v14 = vld [vmem:[%s14033_s4 + $0x358] sm:$0xff] }
 0x9fc   : > { %8860 = vlog2.f32 %v5740_v24  ;;  %v5811_v36 = vmul.f32 0.6931472, %v8843_v57  ;;  %v13569_v9 = vadd.f32 %v6966_v34, %v13398_v33  ;;  %7161 = vst.msk [vmem:[%s9152_s12 + $0x90] sm:$0xff] %vm3851_vm0, %v7121_v31  ;;  %v7129_v60 = vsel %vm7102_vm4, %v7088_v4, %v6821_v40  ;;  %v13582_v33 = vpop.xlane.xlu1 %6625  ;;  %v14389_v24 = vld [vmem:[#allocation114_spill] sm:$0xff]  ;;  %v7585_v5 = vld [vmem:[%s14033_s4 + $0x378] sm:$0xff] }
 0x9fd   : > { %8862 = vlog2.f32 %v6755_v48  ;;  %v5819_v55 = vmul.f32 0.6931472, %v8845_v2  ;;  %7169 = vst.msk [vmem:[%s9152_s12 + $0xd0] sm:$0xff] %vm3851_vm0, %v7129_v60  ;;  %v7128_v57 = vsel %vm7102_vm4, %v7087_v25, %v13564_v28  ;;  %v13587_v4 = vsel %vm7020_vm2, %v14390_v39, %v14389_v24  ;;  %v7612_v48 = vld [vmem:[%s14033_s4 + $0x450] sm:$0xff] }
 0x9fe   : > { %8864 = vlog2.f32 %v5748_v37  ;;  %7168 = vst.msk [vmem:[%s9152_s12 + $0xc8] sm:$0xff] %vm3851_vm0, %v7128_v57  ;;  %v6751_v2 = vmin.f32 %v6711_v26, 1000000.0  ;;  %v6679_v12 = vmul.f32 0.14285715, %v13457_v10  ;;  %v4991_v38 = vrot.slane %v13495_v58, 2 }
 0x9ff   : > { %v5968_v25 = vadd.f32 %v13508_v51, %v13126_v63  ;;  %v5942_v23 = vadd.f32 %v13521_v44, %v13137_v27  ;;  %v5927_v49 = vadd.f32 %v13524_v1, %v13173_v47  ;;  %v5969_v37 = vsel %vm3851_vm0, %v5900_v35, 0.0  ;;  %v7620_v44 = vld [vmem:[%s14033_s4 + $0x490] sm:$0xff]  ;;  %v7589_v1 = vld [vmem:[%s14033_s4 + $0x398] sm:$0xff]  ;;  %v13620_v35 = vpop.xlane.xlu0 %6613 }
 0xa00   : > { %v5904_v21 = vmul.f32 %v7581_v14, %v5811_v36  ;;  %8866 = vlog2.f32 %v6751_v2  ;;  %v6719_v10 = vmax.f32 %v6679_v12, 1e-06  ;;  %v6678_v26 = vmul.f32 0.14285715, %v13502_v43  ;;  %v13635_v24 = vpop.xlane.xlu1 %6637 }
 0xa01   : > { %v13610_v63 = vsel %vm7061_vm3, %v13311_v19, %v13510_v54  ;;  %v5982_v27 = vsel %vm3912_vm1, %v5896_v45, 0.0  ;;  %v5928_v47 = vsel %vm3851_vm0, %v5907_v59, 0.0  ;;  %v5908_v51 = vmul.f32 %v7585_v5, %v5819_v55 }
 0xa02   : > { %v8853_v43 = vpop.eup %8852  ;;  %v7081_v19 = vsel %vm7061_vm3, %v13282_v53, %v13534_v46  ;;  %v6759_v54 = vmin.f32 %v6719_v10, 1000000.0  ;;  %v6718_v45 = vmax.f32 %v6678_v26, 1e-06  ;;  %v5669_v34 = vmul.f32 0.14285715, %v13516_v22 }
 0xa03   : > { %v8855_v31 = vpop.eup %8854  ;;  %v13626_v60 = vadd.f32 %v5969_v37, %v5968_v25  ;;  %v13631_v59 = vsel %vm7061_vm3, %v13434_v17, %v13543_v32  ;;  %v6907_v14 = vmul.f32 %v7612_v48, %v6805_v56  ;;  %v13633_v57 = vmul.f32 0.6931472, %v8853_v43  ;;  %v7619_v56 = vld [vmem:[%s14033_s4 + $0x488] sm:$0xff]  ;;  %v6635_v48 = vpop.xlane.xlu0 %6634 }
 0xa04   : > { %v13638_v39 = vadd.f32 %v5982_v27, %v13268_v16  ;;  %v5956_v53 = vsel %vm3851_vm0, %v5904_v21, 0.0  ;;  %8868 = vlog2.f32 %v6759_v54  ;;  %v6758_v22 = vmin.f32 %v6718_v45, 1000000.0 }
 0xa05   : > { %v8857_v46 = vpop.eup %8856  ;;  %v5929_v5 = vadd.f32 %v5928_v47, %v5927_v49  ;;  %v5943_v2 = vsel %vm3851_vm0, %v5908_v51, 0.0  ;;  %v6915_v12 = vmul.f32 %v7620_v44, %v6821_v40  ;;  %v5912_v32 = vmul.f32 %v7589_v1, %v13633_v57 }
 0xa06   : > { %v7089_v17 = vsel %vm7061_vm3, %v13343_v30, %v5811_v36  ;;  %v13648_v16 = vmul.f32 0.6931472, %v8857_v46  ;;  %8870 = vlog2.f32 %v6758_v22  ;;  %v5709_v25 = vmax.f32 %v5669_v34, 1e-06  ;;  %v7590_v30 = vld [vmem:[%s14033_s4 + $0x3a0] sm:$0xff] }
 0xa07   : > { %v8859_v37 = vpop.eup %8858  ;;  %v13651_v49 = vadd.f32 %v5956_v53, %v13325_v3  ;;  %v13655_v40 = vsel %vm7061_vm3, %v13462_v52, %v5819_v55  ;;  %v6979_v21 = vsel %vm3851_vm0, %v6907_v14, 0.0  ;;  %v5665_v36 = vmul.f32 0.14285715, %v13540_v20 }
 0xa08   : > { %v5944_v26 = vadd.f32 %v5943_v2, %v5942_v23  ;;  %v5930_v27 = vsel %vm3851_vm0, %v5912_v32, 0.0  ;;  %v7122_v3 = vsel %vm7102_vm4, %v7081_v19, %v13648_v16  ;;  %v13665_v47 = vmul.f32 0.6931472, %v8859_v37  ;;  %v5632_v23 = vpop.xlane.xlu1 %5631  ;;  %v7578_v2 = vld [vmem:[%s14033_s4 + $0x340] sm:$0xf] }
 0xa09   : > { %v8861_v10 = vpop.eup %8860  ;;  %v6953_v55 = vsel %vm3851_vm0, %v6915_v12, 0.0  ;;  %v13669_v51 = vmul.f32 %v7619_v56, %v13564_v28  ;;  %7162 = vst.msk [vmem:[%s9152_s12 + $0x98] sm:$0xf] %vm3912_vm1, %v7122_v3  ;;  %v6672_v20 = vmul.f32 0.14285715, %v13552_v13  ;;  %v13676_v43 = vadd.f32 %v6979_v21, %v13415_v8  ;;  %v7582_v8 = vld [vmem:[%s14033_s4 + $0x360] sm:$0xff]  ;;  %v5620_v56 = vpop.xlane.xlu0 %5619 }
 0xa0a   : > { %v8863_v52 = vpop.eup %8862  ;;  %v5673_v44 = vmul.f32 0.14285715, %v13566_v18  ;;  %v13678_v19 = vmul.f32 0.6931472, %v8855_v31  ;;  %v5913_v54 = vmul.f32 %v7590_v30, %v13665_v47  ;;  %v5749_v45 = vmin.f32 %v5709_v25, 1000000.0 }
 0xa0b   : > { %v8865_v1 = vpop.eup %8864  ;;  %v13681_v34 = vmul.f32 0.6931472, %v8861_v10  ;;  %v5931_v28 = vadd.f32 %v5930_v27, %v5929_v5  ;;  %v13683_v14 = vmul.f32 0.6931472, %v8863_v52  ;;  %v5705_v53 = vmax.f32 %v5665_v36, 1e-06 }
 0xa0c   : > { %v13686_v13 = vadd.f32 %v6953_v55, %v13421_v41  ;;  %v5945_v18 = vsel %vm3851_vm0, %v5913_v54, 0.0  ;;  %v6712_v31 = vmax.f32 %v6672_v20, 1e-06  ;;  %v5713_v22 = vmax.f32 %v5673_v44, 1e-06  ;;  %v6629_v27 = vpop.xlane.xlu1 %6628 }
 0xa0d   : > { %v8867_v46 = vpop.eup %8866  ;;  %v13695_v5 = vmul.f32 0.6931472, %v8865_v1  ;;  %v5946_v12 = vadd.f32 %v5945_v18, %v5944_v26  ;;  %v7130_v41 = vsel %vm7102_vm4, %v7089_v17, %v13683_v14  ;;  %v6680_v32 = vmul.f32 0.14285715, %v13582_v33  ;;  %v7586_v33 = vld [vmem:[%s14033_s4 + $0x380] sm:$0xff] }
 0xa0e   : > { %7170 = vst.msk [vmem:[%s9152_s12 + $0xd8] sm:$0xff] %vm3851_vm0, %v7130_v41  ;;  %v13702_v25 = vmul.f32 0.6931472, %v8867_v46  ;;  %8872 = vlog2.f32 %v5749_v45  ;;  %v6752_v37 = vmin.f32 %v6712_v31, 1000000.0  ;;  %v5992_v30 = vsel %vm3851_vm0, %v5931_v28, 0.0  ;;  %v6617_v31 = vpop.xlane.xlu0 %6616 }
 0xa0f   : > { %v5753_v21 = vmin.f32 %v5713_v22, 1000000.0  ;;  %v5993_v36 = vsel %vm3851_vm0, %v5946_v12, 0.0  ;;  %v6720_v10 = vmax.f32 %v6680_v32, 1e-06  ;;  %v5905_v17 = vmul.f32 %v7582_v8, %v13678_v19 }
 0xa10   : > { %v6676_v26 = vmul.f32 0.14285715, %v13620_v35  ;;  %v13711_v3 = vadd.f32 %v5993_v36, %v5992_v30  ;;  %v7126_v52 = vsel %vm7102_vm4, %v13610_v63, %v13702_v25  ;;  %v5745_v55 = vmin.f32 %v5705_v53, 1000000.0  ;;  %v5635_v41 = vpop.xlane.xlu1 %5634 }
 0xa11   : > { %v8869_v20 = vpop.eup %8868  ;;  %7166 = vst.msk [vmem:[%s9152_s12 + $0xb8] sm:$0xff] %vm3851_vm0, %v7126_v52  ;;  %8874 = vlog2.f32 %v6752_v37  ;;  %v6760_v44 = vmin.f32 %v6720_v10, 1000000.0  ;;  %v6684_v1 = vmul.f32 0.14285715, %v13635_v24  ;;  %v5901_v54 = vmul.f32 %v7578_v2, %v13681_v34 }
 0xa12   : > { %v6716_v35 = vmax.f32 %v6676_v26, 1e-06  ;;  %v13720_v45 = vmul.f32 0.6931472, %v8869_v20  ;;  %8876 = vlog2.f32 %v5753_v21  ;;  %v6683_v28 = vmul.f32 0.14285715, %v6635_v48 }
 0xa13   : > { %v8871_v8 = vpop.eup %8870  ;;  %v5909_v18 = vmul.f32 %v7586_v33, %v13695_v5  ;;  %8878 = vlog2.f32 %v6760_v44  ;;  %v6724_v53 = vmax.f32 %v6684_v1, 1e-06  ;;  %v5674_v2 = vmul.f32 0.14285715, %v5632_v23  ;;  %v6641_v33 = vpop.xlane.xlu0 %6640 }
 0xa14   : > { %v6756_v63 = vmin.f32 %v6716_v35, 1000000.0  ;;  %v7134_v22 = vsel %vm7102_vm4, %v13655_v40, %v13720_v45  ;;  %v13726_v46 = vmul.f32 0.6931472, %v8871_v8  ;;  %8880 = vlog2.f32 %v5745_v55  ;;  %v7621_v40 = vld [vmem:[%s14033_s4 + $0x498] sm:$0xff] }
 0xa15   : > { %v6723_v24 = vmax.f32 %v6683_v28, 1e-06  ;;  %7174 = vst.msk [vmem:[%s9152_s12 + $0xf8] sm:$0xff] %vm3851_vm0, %v7134_v22  ;;  %v6764_v48 = vmin.f32 %v6724_v53, 1000000.0  ;;  %v6938_v32 = vsel %vm3851_vm0, %v13669_v51, 0.0  ;;  %v13742_v23 = vsel %vm7061_vm3, %v13338_v50, %v13678_v19 }
 0xa16   : > { %8882 = vlog2.f32 %v6756_v63  ;;  %v5670_v12 = vmul.f32 0.14285715, %v5620_v56  ;;  %v5971_v37 = vsel %vm3851_vm0, %v5905_v17, 0.0  ;;  %v7133_v21 = vsel %vm7102_vm4, %v13631_v59, %v13726_v46  ;;  %v7587_v28 = vld [vmem:[%s14033_s4 + $0x388] sm:$0xff] }
 0xa17   : > { %v6763_v30 = vmin.f32 %v6723_v24, 1000000.0  ;;  %v5984_v56 = vsel %vm3912_vm1, %v5901_v54, 0.0  ;;  %7173 = vst.msk [vmem:[%s9152_s12 + $0xf0] sm:$0xff] %vm3851_vm0, %v7133_v21  ;;  %8884 = vlog2.f32 %v6764_v48  ;;  %v5714_v51 = vmax.f32 %v5674_v2, 1e-06  ;;  %v6632_v2 = vpop.xlane.xlu0 %6631 }
 0xa18   : > { %v5958_v36 = vsel %vm3851_vm0, %v5909_v18, 0.0  ;;  %v5710_v10 = vmax.f32 %v5670_v12, 1e-06  ;;  %v6681_v26 = vmul.f32 0.14285715, %v6629_v27  ;;  %v13749_v17 = vadd.f32 %v6938_v32, %v13438_v7 }
 0xa19   : > { %8886 = vlog2.f32 %v6763_v30  ;;  %v13752_v59 = vadd.f32 %v5971_v37, %v13626_v60  ;;  %v7086_v50 = vsel %vm7061_vm3, %v13304_v0, %v13681_v34  ;;  %v6916_v19 = vmul.f32 %v7621_v40, %v13683_v14  ;;  %v6644_v14 = vpop.xlane.xlu1 %6643 }
 0xa1a   : > { %v13761_v52 = vsel %vm7061_vm3, %v13483_v6, %v13633_v57  ;;  %v5754_v55 = vmin.f32 %v5714_v51, 1000000.0  ;;  %v5750_v27 = vmin.f32 %v5710_v10, 1000000.0  ;;  %v6721_v20 = vmax.f32 %v6681_v26, 1e-06 }
 0xa1b   : > { %v8873_v7 = vpop.eup %8872  ;;  %v13764_v44 = vadd.f32 %v5984_v56, %v13638_v39  ;;  %v5959_v60 = vadd.f32 %v5958_v36, %v13651_v49  ;;  %v7094_v0 = vsel %vm7061_vm3, %v13455_v11, %v13695_v5  ;;  %v6677_v34 = vmul.f32 0.14285715, %v6617_v31  ;;  %v7617_v57 = vld [vmem:[%s14033_s4 + $0x478] sm:$0xff]  ;;  %v7624_v49 = vld [vmem:[%s14033_s4 + $0x4b0] sm:$0xff] }
 0xa1c   : > { %v13773_v6 = vsel %vm7061_vm3, %v13478_v15, %v13665_v47  ;;  %v7625_v39 = vld [vmem:[%s14033_s4 + $0x4b8] sm:$0xff]  ;;  %8888 = vlog2.f32 %v5754_v55  ;;  %v6761_v11 = vmin.f32 %v6721_v20, 1000000.0  ;;  %v5675_v5 = vmul.f32 0.14285715, %v5635_v41  ;;  %v7591_v15 = vld [vmem:[%s14033_s4 + $0x3a8] sm:$0xff] }
 0xa1d   : > { %v6968_v35 = vsel %vm3851_vm0, %v6916_v19, 0.0  ;;  %8890 = vlog2.f32 %v5750_v27  ;;  %v6717_v47 = vmax.f32 %v6677_v34, 1e-06  ;;  %v6685_v1 = vmul.f32 0.14285715, %v6641_v33 }
 0xa1e   : > { %v8875_v54 = vpop.eup %8874  ;;  %v13791_v8 = vmul.f32 0.6931472, %v8873_v7  ;;  %8892 = vlog2.f32 %v6761_v11  ;;  %v5715_v18 = vmax.f32 %v5675_v5, 1e-06  ;;  %v6686_v63 = vmul.f32 0.14285715, %v6644_v14 }
 0xa1f   : > { %v8877_v53 = vpop.eup %8876  ;;  %v6920_v31 = vmul.f32 %v7625_v39, %v13720_v45  ;;  %v13794_v22 = vmul.f32 0.6931472, %v8875_v54  ;;  %v6757_v24 = vmin.f32 %v6717_v47, 1000000.0  ;;  %v6725_v48 = vmax.f32 %v6685_v1, 1e-06 }
 0xa20   : > { %v8879_v12 = vpop.eup %8878  ;;  %v6919_v41 = vmul.f32 %v7624_v49, %v13726_v46  ;;  %v13797_v32 = vmul.f32 0.6931472, %v8877_v53  ;;  %v5755_v37 = vmin.f32 %v5715_v18, 1000000.0  ;;  %v6726_v40 = vmax.f32 %v6686_v63, 1e-06  ;;  %v6647_v49 = vpop.xlane.xlu0 %6646 }
 0xa21   : > { %v8881_v21 = vpop.eup %8880  ;;  %v6912_v30 = vmul.f32 %v7617_v57, %v13702_v25  ;;  %v7127_v56 = vsel %vm7102_vm4, %v7086_v50, %v13794_v22  ;;  %v13802_v45 = vmul.f32 0.6931472, %v8879_v12  ;;  %8894 = vlog2.f32 %v6757_v24  ;;  %v7630_v39 = vld [vmem:[%s14033_s4 + $0x4e0] sm:$0xff]  ;;  %v7592_v24 = vld [vmem:[%s14033_s4 + $0x3b0] sm:$0xff] }
 0xa22   : > { %v13805_v36 = vadd.f32 %v6968_v35, %v13569_v9  ;;  %7167 = vst.msk [vmem:[%s9152_s12 + $0xc0] sm:$0xf] %vm3912_vm1, %v7127_v56  ;;  %v5914_v46 = vmul.f32 %v7591_v15, %v13797_v32  ;;  %8896 = vlog2.f32 %v5755_v37  ;;  %v6765_v10 = vmin.f32 %v6725_v48, 1000000.0  ;;  %v7629_v35 = vld [vmem:[%s14033_s4 + $0x4d8] sm:$0xff] }
 0xa23   : > { %v8883_v51 = vpop.eup %8882  ;;  %v6955_v26 = vsel %vm3851_vm0, %v6920_v31, 0.0  ;;  %v5910_v25 = vmul.f32 %v7587_v28, %v13791_v8  ;;  %v7135_v50 = vsel %vm7102_vm4, %v7094_v0, %v13802_v45  ;;  %v6940_v9 = vsel %vm3851_vm0, %v6919_v41, 0.0  ;;  %v7583_v0 = vld [vmem:[%s14033_s4 + $0x368] sm:$0xf] }
 0xa24   : > { %v13814_v19 = vmul.f32 0.6931472, %v8883_v51  ;;  %v8885_v33 = vpop.eup %8884  ;;  %v5960_v55 = vsel %vm3851_vm0, %v5914_v46, 0.0  ;;  %7175 = vst.msk [vmem:[%s9152_s12 + $0x100] sm:$0xff] %vm3851_vm0, %v7135_v50  ;;  %8898 = vlog2.f32 %v6765_v10  ;;  %v6766_v27 = vmin.f32 %v6726_v40, 1000000.0 }
 0xa25   : > { %v13821_v7 = vsel %vm3851_vm0, %v6912_v30, 0.0  ;;  %v5815_v34 = vmul.f32 0.6931472, %v8881_v21  ;;  %v5961_v14 = vadd.f32 %v5960_v55, %v5959_v60  ;;  %v6956_v11 = vadd.f32 %v6955_v26, %v13686_v13  ;;  %v7626_v40 = vld [vmem:[%s14033_s4 + $0x4c0] sm:$0xff] }
 0xa26   : > { %v8887_v20 = vpop.eup %8886  ;;  %v7131_v57 = vsel %vm7102_vm4, %v13742_v23, %v13814_v19  ;;  %v6841_v5 = vmul.f32 0.6931472, %v8885_v33  ;;  %8900 = vlog2.f32 %v6766_v27  ;;  %v6941_v15 = vadd.f32 %v6940_v9, %v13749_v17 }
 0xa27   : > { %7171 = vst.msk [vmem:[%s9152_s12 + $0xe0] sm:$0xff] %vm3851_vm0, %v7131_v57  ;;  %v6839_v60 = vmul.f32 0.6931472, %v8887_v20  ;;  %v5973_v23 = vsel %vm3851_vm0, %v5910_v25, 0.0  ;;  %v5995_v47 = vsel %vm3851_vm0, %v5961_v14, 0.0  ;;  %v5906_v53 = vmul.f32 %v7583_v0, %v5815_v34  ;;  %v7627_v20 = vld [vmem:[%s14033_s4 + $0x4c8] sm:$0xff] }
 0xa28   : > { %v6682_v1 = vmul.f32 0.14285715, %v6632_v2  ;;  %v5996_v13 = vadd.f32 %v5995_v47, %v13711_v3  ;;  %v6925_v54 = vmul.f32 %v7630_v39, %v6841_v5  ;;  %v7139_v28 = vsel %vm7102_vm4, %v13773_v6, %v6841_v5 }
 0xa29   : > { %v6687_v18 = vmul.f32 0.14285715, %v6647_v49  ;;  %v8889_v63 = vpop.eup %8888  ;;  %7179 = vst.msk [vmem:[%s9152_s12 + $0x120] sm:$0xff] %vm3851_vm0, %v7139_v28  ;;  %v6924_v31 = vmul.f32 %v7629_v35, %v6839_v60  ;;  %v7138_v17 = vsel %vm7102_vm4, %v13761_v52, %v6839_v60  ;;  %v5974_v3 = vadd.f32 %v5973_v23, %v13752_v59  ;;  %v7588_v52 = vld [vmem:[%s14033_s4 + $0x390] sm:$0xf]  ;;  %v7631_v28 = vld [vmem:[%s14033_s4 + $0x4e8] sm:$0xff] }
 0xa2a   : > { %v6722_v48 = vmax.f32 %v6682_v1, 1e-06  ;;  %v8891_v2 = vpop.eup %8890  ;;  %v7095_v6 = vsel %vm7061_vm3, %v13467_v29, %v13791_v8  ;;  %v6957_v12 = vsel %vm3851_vm0, %v6925_v54, 0.0  ;;  %7178 = vst.msk [vmem:[%s9152_s12 + $0x118] sm:$0xff] %vm3851_vm0, %v7138_v17  ;;  %v13858_v41 = vmul.f32 0.6931472, %v8889_v63 }
 0xa2b   : > { %v8893_v37 = vpop.eup %8892  ;;  %v6958_v59 = vadd.f32 %v6957_v12, %v6956_v11  ;;  %v6942_v21 = vsel %vm3851_vm0, %v6924_v31, 0.0  ;;  %v13867_v30 = vmul.f32 0.6931472, %v8891_v2  ;;  %v7622_v8 = vld [vmem:[%s14033_s4 + $0x4a0] sm:$0xff]  ;;  %v6727_v10 = vmax.f32 %v6687_v18, 1e-06 }
 0xa2c   : > { %v6762_v29 = vmin.f32 %v6722_v48, 1000000.0  ;;  %v6943_v56 = vadd.f32 %v6942_v21, %v6941_v15  ;;  %v5915_v51 = vmul.f32 %v7592_v24, %v13858_v41  ;;  %v6835_v46 = vmul.f32 0.6931472, %v8893_v37 }
 0xa2d   : > { %v5986_v26 = vsel %vm3912_vm1, %v5906_v53, 0.0  ;;  %v7005_v25 = vsel %vm3851_vm0, %v6958_v59, 0.0  ;;  %v5911_v50 = vmul.f32 %v7588_v52, %v13867_v30  ;;  %v6921_v9 = vmul.f32 %v7626_v40, %v13802_v45  ;;  %v7593_v45 = vld [vmem:[%s14033_s4 + $0x3b8] sm:$0xf] }
 0xa2e   : > { %8902 = vlog2.f32 %v6762_v29  ;;  %v8895_v33 = vpop.eup %8894  ;;  %v7004_v55 = vsel %vm3851_vm0, %v6943_v56, 0.0  ;;  %v5975_v27 = vsel %vm3851_vm0, %v5915_v51, 0.0  ;;  %v7136_v0 = vsel %vm7102_vm4, %v7095_v6, %v6835_v46  ;;  %v7632_v6 = vld [vmem:[%s14033_s4 + $0x4f0] sm:$0xff] }
 0xa2f   : > { %v8897_v14 = vpop.eup %8896  ;;  %v6917_v57 = vmul.f32 %v7622_v8, %v13814_v19  ;;  %v7006_v39 = vadd.f32 %v7005_v25, %v7004_v55  ;;  %v5976_v49 = vadd.f32 %v5975_v27, %v5974_v3  ;;  %7176 = vst.msk [vmem:[%s9152_s12 + $0x108] sm:$0xff] %vm3851_vm0, %v7136_v0  ;;  %v6827_v11 = vmul.f32 0.6931472, %v8895_v33  ;;  %v14391_v27 = vld [vmem:[#allocation110_spill] sm:$0xff] }
 0xa30   : > { %v7091_v5 = vsel %vm7061_vm3, %v13443_v42, %v5815_v34  ;;  %v5988_v35 = vsel %vm3912_vm1, %v5911_v50, 0.0  ;;  %v13892_v60 = vmul.f32 0.6931472, %v8897_v14  ;;  %v6767_v15 = vmin.f32 %v6727_v10, 1000000.0 }
 0xa31   : > { %v8899_v23 = vpop.eup %8898  ;;  %v5987_v19 = vadd.f32 %v5986_v26, %v13764_v44  ;;  %v5997_v47 = vsel %vm3851_vm0, %v5976_v49, 0.0  ;;  %v6922_v1 = vmul.f32 %v7627_v20, %v6835_v46  ;;  %v7132_v54 = vsel %vm7102_vm4, %v7091_v5, %v6827_v11  ;;  %v7613_v44 = vld [vmem:[%s14033_s4 + $0x458] sm:$0xf] }
 0xa32   : > { %v6970_v18 = vsel %vm3851_vm0, %v6921_v9, 0.0  ;;  %v5998_v42 = vadd.f32 %v5997_v47, %v5996_v13  ;;  %7172 = vst.msk [vmem:[%s9152_s12 + $0xe8] sm:$0xf] %vm3912_vm1, %v7132_v54  ;;  %v5916_v34 = vmul.f32 %v7593_v45, %v13892_v60  ;;  %v6843_v63 = vmul.f32 0.6931472, %v8899_v23  ;;  %v14392_v20 = vld [vmem:[#allocation33_spill] sm:$0xff] }
 0xa33   : > { %v8901_v53 = vpop.eup %8900  ;;  %v7099_v31 = vsel %vm7061_vm3, %v13587_v4, %v13797_v32  ;;  %v6983_v17 = vsel %vm3851_vm0, %v6917_v57, 0.0  ;;  %v5989_v24 = vadd.f32 %v5988_v35, %v5987_v19  ;;  %8904 = vlog2.f32 %v6767_v15  ;;  %v7628_v9 = vld [vmem:[%s14033_s4 + $0x4d0] sm:$0xf]  ;;  %v14393_v23 = vld [vmem:[#allocation34_spill] sm:$0xff] }
 0xa34   : > { %v6982_v13 = vadd.f32 %v13821_v7, %v13676_v43  ;;  %v5990_v48 = vsel %vm3912_vm1, %v5916_v34, 0.0  ;;  %v6926_v2 = vmul.f32 %v7631_v28, %v6843_v63  ;;  %v7140_v3 = vsel %vm7102_vm4, %v7099_v31, %v6843_v63  ;;  %v7618_v7 = vld [vmem:[%s14033_s4 + $0x480] sm:$0xf]  ;;  %v14394_v63 = vld [vmem:[#allocation115_spill] sm:$0xff] }
 0xa35   : > { %v6971_v12 = vadd.f32 %v6970_v18, %v13805_v36  ;;  %v6985_v4 = vsel %vm3851_vm0, %v6922_v1, 0.0  ;;  %v5991_v32 = vadd.f32 %v5990_v48, %v5989_v24  ;;  %7180 = vst.msk [vmem:[%s9152_s12 + $0x128] sm:$0xff] %vm3851_vm0, %v7140_v3  ;;  %v6845_v52 = vmul.f32 0.6931472, %v8901_v53  ;;  %v7633_v18 = vld [vmem:[%s14033_s4 + $0x4f8] sm:$0xf] }
 0xa36   : > { %v6908_v43 = vmul.f32 %v7613_v44, %v13648_v16  ;;  %v6984_v37 = vadd.f32 %v6983_v17, %v6982_v13  ;;  %v7100_v40 = vsel %vm7061_vm3, %v13488_v62, %v13858_v41  ;;  %v6972_v36 = vsel %vm3851_vm0, %v6926_v2, 0.0  ;;  %v7623_v16 = vld [vmem:[%s14033_s4 + $0x4a8] sm:$0xf]  ;;  %v14395_v53 = vld [vmem:[#allocation29_spill] sm:$0xff] }
 0xa37   : > { %v5999_v59 = vsel %vm3912_vm1, %v5991_v32, 0.0  ;;  %v6973_v21 = vadd.f32 %v6972_v36, %v6971_v12  ;;  %v6927_v29 = vmul.f32 %v7632_v6, %v6845_v52  ;;  %v7141_v8 = vsel %vm7102_vm4, %v7100_v40, %v6845_v52 }
 0xa38   : > { %v6986_v56 = vadd.f32 %v6985_v4, %v6984_v37  ;;  %v6000_v51 = vadd.f32 %v5999_v59, %v5998_v42  ;;  %7181 = vst.msk [vmem:[%s9152_s12 + $0x130] sm:$0xff] %vm3851_vm0, %v7141_v8  ;;  %v4992_v62 = vadd.f32 %v4991_v38, %v13495_v58  ;;  %v6913_v41 = vmul.f32 %v7618_v7, %v13794_v22 }
 0xa39   : > { %v7007_v46 = vsel %vm3851_vm0, %v6973_v21, 0.0  ;;  %v6987_v10 = vsel %vm3851_vm0, %v6927_v29, 0.0  ;;  %v3941_v55 = vrot.slane %v13098_v61, 1  ;;  %v7055_v58 = vsel %vm7020_vm2, %v14392_v20, %v14391_v27 }
 0xa3a   : > { %v6001_v25 = vrot.slane %v6000_v51, 4  ;;  %v7008_v50 = vadd.f32 %v7007_v46, %v7006_v39  ;;  %v6988_v33 = vadd.f32 %v6987_v10, %v6986_v56  ;;  %v6994_v38 = vsel %vm3912_vm1, %v6908_v43, 0.0 }
 0xa3b   : > { %v8903_v26 = vpop.eup %8902  ;;  %v6918_v22 = vmul.f32 %v7623_v16, %v6827_v11  ;;  %v7096_v14 = vsel %vm7061_vm3, %v7055_v58, %v13867_v30  ;;  %v4993_v39 = vrot.slane %v4992_v62, 1  ;;  %v6996_v45 = vsel %vm3912_vm1, %v6913_v41, 0.0  ;;  %v3207_v30 = vld [vmem:[%s14034_s5] sm:$0x1] }
 0xa3c   : > { %v6837_v0 = vmul.f32 0.6931472, %v8903_v26  ;;  %v7009_v57 = vsel %vm3851_vm0, %v6988_v33, 0.0  ;;  %v6002_v49 = vadd.f32 %v6001_v25, %v6000_v51  ;;  %v6995_v19 = vadd.f32 %v6994_v38, %v14393_v23 }
 0xa3d   : > { %v7010_v5 = vadd.f32 %v7009_v57, %v7008_v50  ;;  %v3942_v11 = vadd.f32 %v3941_v55, %v13098_v61  ;;  %v6998_v1 = vsel %vm3912_vm1, %v6918_v22, 0.0  ;;  %v4994_v42 = vadd.f32 %v4993_v39, %v4992_v62 }
 0xa3e   : > { %v6923_v35 = vmul.f32 %v7628_v9, %v6837_v0  ;;  %v7137_v15 = vsel %vm7102_vm4, %v7096_v14, %v6837_v0  ;;  %v6003_v47 = vrot.slane %v6002_v49, 2  ;;  %v6997_v28 = vadd.f32 %v6996_v45, %v6995_v19 }
 0xa3f   : > { %7177 = vst.msk [vmem:[%s9152_s12 + $0x110] sm:$0xf] %vm3912_vm1, %v7137_v15  ;;  %v7060_v61 = vsel %vm7020_vm2, %v14395_v53, %v14394_v63  ;;  %v3943_v13 = vadd.f32 %v3942_v11, %v3207_v30 }
 0xa40   : > { %v8905_v54 = vpop.eup %8904  ;;  %v6004_v34 = vadd.f32 %v6003_v47, %v6002_v49  ;;  %v7000_v44 = vsel %vm3912_vm1, %v6923_v35, 0.0  ;;  %v6999_v17 = vadd.f32 %v6998_v1, %v6997_v28  ;;  %v7101_v24 = vsel %vm7061_vm3, %v7060_v61, %v13892_v60 }
 0xa41   : > { %v6847_v31 = vmul.f32 0.6931472, %v8905_v54  ;;  %v4995_v12 = vadd.f32 %v4994_v42, %v3943_v13 }
 0xa42   : > { %v6005_v48 = vrot.slane %v6004_v34, 1  ;;  %v7001_v6 = vadd.f32 %v7000_v44, %v6999_v17 }
 0xa43   : > { %v6928_v2 = vmul.f32 %v7633_v18, %v6847_v31  ;;  %v7142_v3 = vsel %vm7102_vm4, %v7101_v24, %v6847_v31 }
 0xa44   : > { %7182 = vst.msk [vmem:[%s9152_s12 + $0x138] sm:$0xf] %vm3912_vm1, %v7142_v3  ;;  %v6006_v4 = vadd.f32 %v6005_v48, %v6004_v34 }
 0xa45   : > { %v7002_v32 = vsel %vm3912_vm1, %v6928_v2, 0.0 }
 0xa46   : > { %v7003_v52 = vadd.f32 %v7002_v32, %v7001_v6  ;;  %v6007_v43 = vadd.f32 %v6006_v4, %v4995_v12 }
 0xa48   : > { %v7011_v7 = vsel %vm3912_vm1, %v7003_v52, 0.0 }
 0xa49   : > { %v7012_v37 = vadd.f32 %v7011_v7, %v7010_v5 }
 0xa4b   : > { %v7013_v40 = vrot.slane %v7012_v37, 4 }
 0xa4d   : > { %v7014_v36 = vadd.f32 %v7013_v40, %v7012_v37 }
 0xa4f   : > { %v7015_v60 = vrot.slane %v7014_v36, 2 }
 0xa51   : > { %v7016_v59 = vadd.f32 %v7015_v60, %v7014_v36 }
 0xa53   : > { %v7017_v21 = vrot.slane %v7016_v59, 1 }
 0xa55   : > { %v7018_v29 = vadd.f32 %v7017_v21, %v7016_v59 }
 0xa57   : > { %v7019_v8 = vadd.f32 %v7018_v29, %v6007_v43 }
 0xa59   : > { %v7184_v56 = vsel %vm7183_vm5, %v7019_v8, -inf }
 0xa5a   : > { %7185 = vmax.xlane.f32.xlu1 %v7184_v56 }
 0xae3   : > { %v7186_v16 = vpop.xlane.xlu1 %7185 }
 0xae4   : > { %8263 = vpush %v7186_v16 }
 0xb15   : > { %s8264_s12 = spop %8263 }
 0xb16   : > { %v7188_v51 = vstv %s8264_s12 }
 0xb17   : > { %v7189_v62 = vsub.f32 %v7019_v8, %v7188_v51 }
 0xb19   : > { %v7190_v41 = vmul.f32 1.442695, %v7189_v62 }
 0xb1b   : > { %8906 = vpow2.f32 %v7190_v41 }
 0xb28   : > { %v8907_v46 = vpop.eup %8906 }
 0xb29   : > { %v7192_v10 = vsel %vm7183_vm5, %v8907_v46, 0.0 }
 0xb2a   : > { %7193 = vadd.xlane.f32.xlu0 %v7192_v10 }
 0xbb3   : > { %v7194_v26 = vpop.xlane.xlu0 %7193 }
 0xbb4   : > { %8265 = vpush %v7194_v26 }
 0xbe5   : > { %s8266_s17 = spop %8265 }
 0xbe6   : > { %v7196_v25 = vstv %s8266_s17 }
 0xbe7   : > { %8908 = vlog2.f32 %v7196_v25 }
 0xbf4   : > { %v8909_v50 = vpop.eup %8908 }
 0xbf5   : > { %v7198_v33 = vmul.f32 0.6931472, %v8909_v50 }
 0xbf7   : > { %8267 = vpush %v7198_v33 }
 0xc28   : > { %s8268_s26 = spop %8267 }
 0xc29   : > { %s7200_s29 = sadd.f32 %s8268_s26, %s8264_s12 }
 0xc2b   : > { %v7201_v9 = vstv %s7200_s29 }
 0xc2c   : > { %v7202_v55 = vsub.f32 %v7019_v8, %v7201_v9 }
 0xc2e   : > { %7203 = vst.msk [vmem:[%s9166_s24] sm:$0x1] %vm7183_vm5, %v7202_v55 }
 0xc2f PF: > { %s7634_s27 = sshll.u32 %s8990_s28, 4  ;;  %s7222_s18 = sshll.u32 %s9166_s24, 4  ;;  %s7223_s18 = int_to_ptr.vmem [resolvable:$true] %s7222_s18 }
 0xc30   : > { %s7220_s11 = scalar_lea.hbm %s14035_s6, %s7634_s27  ;;  %s14396_s15 = sand.u32 1, %s8978_s25  }
 0xc31   : > { %s7205_s19 = scalar_lea.sflag [#allocation4], %s14396_s15  ;;  %s8910_s21 = scalar_lea.vmem %s7223_s18, 16 }
 0xc32   : > { %p8911_p2 = scmp.ne.s32.totalorder %s7223_s18, %s8910_s21  ;;  %s9034_s14 = smov [#allocation3]  }
 0xc33   : > { %s8914_s22 = sshll.u32 %s9034_s14, 4  ;;  %s8915_s22 = int_to_ptr.vmem [resolvable:$false] %s8914_s22 }
 0xc34   : > { %p8912_p4 = pnand %p8911_p2, %p9124_p3  ;;  %s8916_s20 = scalar_lea.vmem %s8915_s22, 32 }
 0xc35   : > { %p8917_p6 = scmp.lt.s32.totalorder %s7223_s18, %s8915_s22  ;;  %p8918_p7 = scmp.lt.s32.totalorder %s8916_s20, %s8910_s21 }
 0xc36   : > { %p8913_p5 = pneg %p8912_p4 }
 0xc37   : > { %p8919_p8 = por %p8918_p7, %p8917_p6 }
 0xc39   : > { %p8920_p10 = pnand %p8919_p8, %p8913_p5 }
 0xc3b   : > { %8923 = shalt.err (!%p8920_p10)
}
 0xc3c   : > { %s8924_s28 = scalar_lea.hbm %s7220_s11, 16  ;;  %s8928_s23 = scalar_lea.hbm %s14035_s6, 32 }
 0xc3d   : > { %p8925_p11 = scmp.ne.s32.totalorder %s7220_s11, %s8924_s28  ;;  %p8929_p0 = scmp.lt.s32.totalorder %s7220_s11, %s14035_s6 }
 0xc3e   : > { %p8930_p1 = scmp.lt.s32.totalorder %s8928_s23, %s8924_s28 }
 0xc3f   : > { %p8926_p12 = pnand %p8925_p11, %p9124_p3 }
 0xc40   : > { %p8931_p2 = por %p8930_p1, %p8929_p0 }
 0xc41   : > { %p8927_p13 = pneg %p8926_p12 }
 0xc43   : > { %p8932_p4 = pnand %p8931_p2, %p8927_p13 }
 0xc45   : > { %8935 = shalt.err (!%p8932_p4)
}
 0xc46   : > { %8269 = dma.vmem_to_hbm [thread:$0]  (%p9124_p3), %s7223_s18, 16, %s7220_s11, %s7205_s19  }
 0xc47 PF: > { %s14397_s17 = sld [smem:[#allocation6_spill]]  ;;  %p8275_p5 = scmp.ge.s32.totalorder %s9002_s8, 2 }
 0xc49   : > { %p8272_p6 = pnand %p8275_p5, %p9134_p9 }
 0xc4b   : > { %p8273_p7 = pneg %p8272_p6 }
 0xc4d   : > { %s7237_s29 = sand.u32 1, %s14397_s17  }
 0xc4e   : > { %s7238_s27 = scalar_lea.sflag [#allocation4], %s7237_s29 }
 0xc4f   : > { %8969 = dma.done.wait (%p8273_p7), %s7238_s27, 16  }
 0xc50   : > { %8971 = vsyncadd (%p8273_p7), %s7238_s27, 4294967280  ;;  %s21_s8 = sadd.s32 1, %s9002_s8   ;;  %s14399_s30 = sld [smem:[#allocation7_spill]] }
 0xc51   : > { %p18_p8 = scmp.ge.s32.totalorder %s21_s8, 10   ;;  %s14400_s26 = sld [smem:[#allocation13_spill]] }
 0xc52   : > { %s14401_s27 = sld [smem:[#allocation8_spill]]  ;;  %s14405_s24 = smov %s8978_s25 }
 0xc53   : > { %s14402_s28 = sld [smem:[#allocation9_spill]] }
 0xc54   : > { %s14403_s29 = sld [smem:[#allocation10_spill]] }
 0xc55   : > { %s14404_s13 = sld [smem:[#allocation11_spill]] }
 0xc56   : > { %s14406_s25 = smov %s14399_s30 }
 0xc57   :  { %20 = sbr.rel (!%p18_p8) target bundleno = 5 (0x5), region = 127 }
 0xc5b   : > { %s14407_s30 = smov %s14404_s13 }
 0xc5c   :  { %7250 = vsyncpa [#allocation4], 1 }
 0xc5d   :  { %7252 = vsyncpa [#allocation4 + $0x1], 1 }

</bundles_post_ra>
